<compile_context>
chip_gen: v7x
topology: tpu7x:2x2x1
jax: 0.10.0
libtpu: 0.0.40
codegen_flags: <defaults>
</compile_context>

<pallas_src>
import math
from functools import partial

import numpy as np
import jax
import jax.numpy as jnp
from jax.experimental import pallas as pl
from jax.experimental.pallas import tpu as pltpu

TILE_M = 512                        # cap on the row tile of the generic matmul kernel
_VMEM_LIMIT = 48 * 1024 * 1024      # fits v7x's 64 MiB/TC; v5e/v6e (128 MiB) have headroom


def _cdiv(a, b):
    return -(-a // b)


def _round_up(a, b):
    return _cdiv(a, b) * b


def _cparams():
    return pltpu.CompilerParams(dimension_semantics=("parallel",),
                                vmem_limit_bytes=_VMEM_LIMIT)


def _bf16(x):
    return x if x.dtype == jnp.bfloat16 else x.astype(jnp.bfloat16)


# ----------------------------------------------------------------------------
# Pallas kernel 1: fused multi-input matmul
#   y = act( sum_i x_i @ w_i + bias )
# Covers: patch-embed, fused encoder projections, down1..3, conv_f1..4 (split-weight
# replacement of cat+1x1 conv), Up.conv_1, head (4-way split weight).
# bf16 operands on the MXU, f32 accumulation held in vregs, single store per block.
# ----------------------------------------------------------------------------
def _mmn_kernel(*refs, n, act):
    x_refs = refs[:n]
    w_refs = refs[n:2 * n]
    b_ref = refs[2 * n]
    o_ref = refs[2 * n + 1]
    acc = jnp.dot(x_refs[0][...], w_refs[0][...], preferred_element_type=jnp.float32)
    for i in range(1, n):
        acc = acc + jnp.dot(x_refs[i][...], w_refs[i][...],
                            preferred_element_type=jnp.float32)
    y = acc + b_ref[...]
    if act == "relu":
        y = jnp.maximum(y, 0.0)
    elif act == "sigmoid":
        y = jax.nn.sigmoid(y)
    o_ref[...] = y.astype(o_ref.dtype)


def mm_multi(xs, ws, bias, act="none", col_blocks=None, out_dtype=jnp.bfloat16):
    """y = act(sum_i xs[i][:, cb_i*K_i:(cb_i+1)*K_i] @ ws[i] + bias).

    col_blocks lets a caller consume one 384-wide column block of a wider array
    (e.g. the fused encoder output) without materializing a slice in HBM.
    """
    n = len(xs)
    M = xs[0].shape[0]
    N = ws[0].shape[1]
    if col_blocks is None:
        col_blocks = [0] * n
    # keep the M grid at >= 2 steps so both v7x TensorCores get work and block i-1
    # writeback hides under block i; cap the tile at TILE_M for VMEM headroom.
    tile_m = min(TILE_M, min(M, max(8, _round_up(_cdiv(M, 2), 8))))
    grid = (_cdiv(M, tile_m),)

    in_specs = []
    for i in range(n):
        K_i = ws[i].shape[0]
        in_specs.append(pl.BlockSpec((tile_m, K_i),
                                     lambda m, _cb=col_blocks[i]: (m, _cb)))
    for i in range(n):
        in_specs.append(pl.BlockSpec(ws[i].shape, lambda m: (0, 0)))
    in_specs.append(pl.BlockSpec((1, N), lambda m: (0, 0)))

    return pl.pallas_call(
        partial(_mmn_kernel, n=n, act=act),
        out_shape=jax.ShapeDtypeStruct((M, N), out_dtype),
        grid=grid,
        in_specs=in_specs,
        out_specs=pl.BlockSpec((tile_m, N), lambda m: (m, 0)),
        compiler_params=_cparams(),
    )(*[_bf16(x) for x in xs], *[_bf16(w) for w in ws],
      bias.astype(jnp.float32).reshape(1, N))


# ----------------------------------------------------------------------------
# Pallas kernel 2: 3x3 conv (pad=1) + folded BN + ReLU, one grid step per batch element.
# The padded image is flattened row-major with width padded to a multiple of 8; three
# column-shifted copies are pre-materialized so every tap slice starts on an 8-row
# boundary, and the 9 taps are accumulated in vregs (no im2col, single output store).
# ----------------------------------------------------------------------------
def _conv3x3_kernel(x_ref, w_ref, b_ref, o_ref, *, Wp, Mo):
    acc = jnp.dot(x_ref[0, 0, 0:Mo, :], w_ref[0], preferred_element_type=jnp.float32)
    for t in range(1, 9):
        di, dj = t // 3, t % 3
        off = di * Wp                       # Wp % 8 == 0  ->  aligned slice start
        acc = acc + jnp.dot(x_ref[0, dj, off:off + Mo, :], w_ref[t],
                            preferred_element_type=jnp.float32)
    o_ref[0] = jnp.maximum(acc + b_ref[...], 0.0).astype(o_ref.dtype)


def conv3x3_bn_relu(x_t, B, H, W, w9, b):
    """x_t: (B*H*W, Cin) pixel-major; w9: (9, Cin, Cout) BN-folded bf16; b: (Cout,) f32."""
    Cin = x_t.shape[1]
    Cout = w9.shape[2]
    Wp = _round_up(W + 2, 8)                # padded width, 8-sublane aligned
    Mo = H * Wp                             # output rows per image (multiple of 8)
    R = (H + 2) * Wp                        # rows of the padded flat image (multiple of 8)
    # TODO(synk): halo padding is still a jnp.pad pass in HBM (an in-kernel halo would need
    # per-row DMAs); it and the post-kernel strip are now bf16 so the traffic is halved.
    xp = jnp.pad(_bf16(x_t).reshape(B, H, W, Cin),
                 ((0, 0), (1, 1), (1, Wp - W - 1), (0, 0)))
    flat = jnp.pad(xp.reshape(B, R, Cin), ((0, 0), (0, 8), (0, 0)))
    x3 = jnp.stack([flat[:, d:d + R, :] for d in range(3)], axis=1)   # (B, 3, R, Cin)
    out = pl.pallas_call(
        partial(_conv3x3_kernel, Wp=Wp, Mo=Mo),
        out_shape=jax.ShapeDtypeStruct((B, Mo, Cout), jnp.bfloat16),
        grid=(B,),                          # B >= 2 keeps both v7x TensorCores busy
        in_specs=[
            pl.BlockSpec((1, 3, R, Cin), lambda i: (i, 0, 0, 0)),
            pl.BlockSpec((9, Cin, Cout), lambda i: (0, 0, 0)),
            pl.BlockSpec((1, Cout), lambda i: (0, 0)),
        ],
        out_specs=pl.BlockSpec((1, Mo, Cout), lambda i: (i, 0, 0)),
        compiler_params=_cparams(),
    )(x3, _bf16(w9), b.astype(jnp.float32).reshape(1, Cout))
    # strip the padded-width columns (bf16), back to pixel-major tokens
    return out.reshape(B, H, Wp, Cout)[:, :, :W, :].reshape(B * H * W, Cout)


# ----------------------------------------------------------------------------
# Pallas kernel 3: fused SCF block, one grid step per batch element.
# Height/width adaptive pools are tiny bf16 pooling + broadcast matmuls (f32 accumulate),
# the channel pool is an f32 lane reduction, and the 1x1 conv + sigmoid epilogue is a
# bf16 MXU matmul.  Output stays token-major (B, N, L), bf16.
# ----------------------------------------------------------------------------
def _scf_kernel(x_ref, rr_ref, rc_ref, er_ref, ec_ref, w_ref, b_ref, o_ref):
    x = x_ref[0]                                                          # (N, L) bf16
    row_mean = jnp.dot(rr_ref[...], x, preferred_element_type=jnp.float32)    # (H, L)
    col_mean = jnp.dot(rc_ref[...], x, preferred_element_type=jnp.float32)    # (W, L)
    b_row = jnp.dot(er_ref[...], row_mean.astype(jnp.bfloat16),
                    preferred_element_type=jnp.float32)                  # row_mean[n % W]
    b_col = jnp.dot(ec_ref[...], col_mean.astype(jnp.bfloat16),
                    preferred_element_type=jnp.float32)                  # col_mean[n // W]
    chan = jnp.mean(x.astype(jnp.float32), axis=1, keepdims=True)        # (N, 1)
    pre = b_col * b_row + chan              # == ((ap_w @ ap_h).T + ap_c) token-major
    y = jnp.dot(pre.astype(jnp.bfloat16), w_ref[...],
                preferred_element_type=jnp.float32) + b_ref[...]
    o_ref[0] = jax.nn.sigmoid(y).astype(o_ref.dtype)


def scf(x_bnl, H, W, w_io, bias):
    """SCF.forward, token-major: (B, N, L) tokens -> (B, N, L) sigmoid gate (bf16)."""
    B, N, L = x_bnl.shape
    # The PyTorch broadcast (ap_w @ ap_h).transpose(-2,-1) + ap_c only lines up on a
    # square token grid (as used by Net).
    assert H == W and N == H * W
    n = np.arange(N)
    i_idx, j_idx = n // W, n % W
    rr = np.zeros((H, N), np.float32); rr[i_idx, n] = 1.0 / W
    rc = np.zeros((W, N), np.float32); rc[j_idx, n] = 1.0 / H
    er = np.zeros((N, H), np.float32); er[n, j_idx] = 1.0
    ec = np.zeros((N, W), np.float32); ec[n, i_idx] = 1.0
    return pl.pallas_call(
        _scf_kernel,
        out_shape=jax.ShapeDtypeStruct((B, N, L), jnp.bfloat16),
        grid=(B,),
        in_specs=[
            pl.BlockSpec((1, N, L), lambda i: (i, 0, 0)),
            pl.BlockSpec((H, N), lambda i: (0, 0)),
            pl.BlockSpec((W, N), lambda i: (0, 0)),
            pl.BlockSpec((N, H), lambda i: (0, 0)),
            pl.BlockSpec((N, W), lambda i: (0, 0)),
            pl.BlockSpec((L, L), lambda i: (0, 0)),
            pl.BlockSpec((1, L), lambda i: (0, 0)),
        ],
        out_specs=pl.BlockSpec((1, N, L), lambda i: (i, 0, 0)),
        compiler_params=_cparams(),
    )(_bf16(x_bnl), jnp.asarray(rr, jnp.bfloat16), jnp.asarray(rc, jnp.bfloat16),
      jnp.asarray(er, jnp.bfloat16), jnp.asarray(ec, jnp.bfloat16),
      _bf16(w_io), bias.astype(jnp.float32).reshape(1, L))


# ----------------------------------------------------------------------------
# Pallas kernel 4: pixel-resampling matmul  out[b] = K @ x[b], channels on the lane axis.
# ----------------------------------------------------------------------------
def _pixmm_kernel(k_ref, x_ref, o_ref):
    o_ref[0] = jnp.dot(k_ref[...], x_ref[0],
                       preferred_element_type=jnp.float32).astype(o_ref.dtype)


def pix_resample(x_bnc, K):
    B, Nin, C = x_bnc.shape
    Nout = K.shape[0]
    return pl.pallas_call(
        _pixmm_kernel,
        out_shape=jax.ShapeDtypeStruct((B, Nout, C), jnp.bfloat16),
        grid=(B,),
        in_specs=[
            pl.BlockSpec((Nout, Nin), lambda i: (0, 0)),
            pl.BlockSpec((1, Nin, C), lambda i: (i, 0, 0)),
        ],
        out_specs=pl.BlockSpec((1, Nout, C), lambda i: (i, 0, 0)),
        compiler_params=_cparams(),
    )(jnp.asarray(K, jnp.bfloat16), _bf16(x_bnc))


def _bilinear_matrix(in_size, out_size):
    # torch F.interpolate(mode="bilinear", align_corners=False) 1-D weights.
    o = np.arange(out_size, dtype=np.float64)
    src = np.maximum((o + 0.5) * (in_size / out_size) - 0.5, 0.0)
    i0 = np.minimum(np.floor(src).astype(np.int64), in_size - 1)
    i1 = np.minimum(i0 + 1, in_size - 1)
    w1 = src - i0
    R = np.zeros((out_size, in_size), np.float32)
    R[np.arange(out_size), i0] += (1.0 - w1).astype(np.float32)
    R[np.arange(out_size), i1] += w1.astype(np.float32)
    return R


def _down_up_matrix(H, W, hd, wd):
    # M = Ku @ Kd for (down to (hd,wd)) followed by (up to (H,W)), built via the separable
    # kron(A_h, A_w) factorisation; (N, N) with N = H*W (<= 256 tokens for this Net).
    a_h = _bilinear_matrix(hd, H) @ _bilinear_matrix(H, hd)      # (H, H)
    a_w = _bilinear_matrix(wd, W) @ _bilinear_matrix(W, wd)      # (W, W)
    return np.kron(a_h, a_w).astype(np.float32)                  # (N, N)


# ----------------------------------------------------------------------------
# Up.forward (num_conv == 2), pixel-major end-to-end.
# img_size == (H, W) == current size, so the final same-size bilinear resize
# (align_corners=False) is an exact identity and is skipped.
# ----------------------------------------------------------------------------
def up_forward(f_t, up, B, H, W, num_upsample_layer):
    y = conv3x3_bn_relu(f_t, B, H, W, up["w0"], up["b0"])            # (B*H*W, 256) bf16
    z = mm_multi([y], [up["w1"]], up["b1"])                          # (B*H*W, 384) bf16
    if num_upsample_layer == 2:
        # conv_1 is a 1x1 conv (pure channel matmul), so "downsample -> conv_1 -> upsample"
        # equals "conv_1 -> (Ku @ Kd) resample" exactly (Ku rows sum to 1 so the bias
        # broadcasts unchanged); one fused (N,N) resample matmul replaces two kron passes.
        hd = wd = W // 2                                             # F.interpolate(size=W//2)
        M = _down_up_matrix(H, W, hd, wd)
        z = pix_resample(z.reshape(B, H * W, 384), M).reshape(B * H * W, 384)
    return z


# ----------------------------------------------------------------------------
# Net.forward
# ----------------------------------------------------------------------------
def net_forward(x, p):
    B, C, Hin, Win = x.shape
    H, W = Hin // 16, Win // 16
    N = H * W

    # TODO(synk): the DeiT-S transformer encoder (`deit_s`) is not part of the given source;
    # it is replaced by a deterministic 16x16 patch-embed plus one fused 1x1 projection
    # producing the four out_* tensors and the patch_56r tokens that Net.forward consumes.
    xb = _bf16(x)
    patches = xb.reshape(B, C, H, 16, W, 16).transpose(0, 2, 4, 1, 3, 5)
    patches = patches.reshape(B * N, C * 256)
    patch_t = mm_multi([patches], [p["pe_w"]], p["pe_b"])            # (B*N, 384) bf16 tokens
    enc_out = mm_multi([patch_t], [p["enc_w"]], p["enc_b"])          # (B*N, 1536) = [7r|14r|28r|56r]
    patch_56r = patch_t.reshape(B, N, 384)

    # ---------------- decoder (faithful to Net.forward, token-major throughout) ----------------
    s1 = scf(patch_56r, H, W, p["isca0_w"], p["isca0_b"])            # (B, N, 384)
    # Original code's raw reshape (B, N, 384) -> NCHW (B, 384, H, W) is channel-mixing;
    # converting that fake-NCHW view to pixel-major needs exactly one small transpose.
    fake_t = jnp.transpose(patch_56r.reshape(B, 384, N), (0, 2, 1)).reshape(B * N, 384)
    patch_28r = mm_multi([fake_t], [p["down1_w"]], p["down1_b"])     # (B*N, 384) pixel-major
    s2 = scf(patch_28r.reshape(B, N, 384), H, W, p["isca1_w"], p["isca1_b"])
    patch_14r = mm_multi([patch_28r], [p["down2_w"]], p["down2_b"])
    s3 = scf(patch_14r.reshape(B, N, 384), H, W, p["isca2_w"], p["isca2_b"])
    patch_7r = mm_multi([patch_14r], [p["down3_w"]], p["down3_b"])
    s4 = scf(patch_7r.reshape(B, N, 384), H, W, p["isca3_w"], p["isca3_b"])

    # conv_f{1..4}(cat(out_k, s_k)) == out_k @ Wa + s_k @ Wb + b  (no concat materialized;
    # out_k is read directly from its 384-wide column block of the fused encoder output)
    s1f, s2f, s3f, s4f = (s.reshape(B * N, 384) for s in (s1, s2, s3, s4))
    f1 = mm_multi([enc_out, s4f], [p["cf1_wa"], p["cf1_wb"]], p["cf1_b"], col_blocks=[0, 0])
    f2 = mm_multi([enc_out, s3f], [p["cf2_wa"], p["cf2_wb"]], p["cf2_b"], col_blocks=[1, 0])
    f3 = mm_multi([enc_out, s2f], [p["cf3_wa"], p["cf3_wb"]], p["cf3_b"], col_blocks=[2, 0])
    f4 = mm_multi([enc_out, s1f], [p["cf4_wa"], p["cf4_wb"]], p["cf4_b"], col_blocks=[3, 0])

    x1 = up_forward(f1, p["up7"], B, H, W, num_upsample_layer=1)
    x2 = up_forward(f2, p["up14"], B, H, W, num_upsample_layer=1)
    x3 = up_forward(f3, p["up28"], B, H, W, num_upsample_layer=1)
    x4 = up_forward(f4, p["up56"], B, H, W, num_upsample_layer=2)

    # head(cat([x1..x4], channel)) as a 4-way split-weight matmul (no 1536-channel concat)
    head_ws = [p["head_w"][i * 384:(i + 1) * 384] for i in range(4)]
    out_local_t = mm_multi([x1, x2, x3, x4], head_ws, p["head_b"], out_dtype=jnp.float32)
    out_local = out_local_t.reshape(B, H, W, 256).transpose(0, 3, 1, 2)

    # classifier: avgpool(out_7r.reshape(B, 512, -1)) uses NCHW element ordering of out_7r.
    # Kept in plain XLA: (B x 512) @ (512 x num_classes) is below lane/sublane tile size.
    assert (384 * N) % 512 == 0
    out7_nchw = jnp.transpose(enc_out[:, 0:384].reshape(B, N, 384), (0, 2, 1)).astype(jnp.float32)
    pooled = jnp.mean(out7_nchw.reshape(B, 512, -1), axis=-1)        # (B, 512)
    out_cls = pooled @ p["cls_w"] + p["cls_b"]                       # (B, num_classes)
    return out_local, out_cls


# ----------------------------------------------------------------------------
# Deterministic parameter construction (shapes from Net.__init__); MXU weights are
# pre-cast to bf16 once here, biases stay f32.
# NOTE: Net.reshape_14 is never used in forward, so it is not materialized.
# ----------------------------------------------------------------------------
def init_params(key, num_classes=10):
    keys = iter(jax.random.split(key, 64))

    def lin(shape, std=0.02):
        return (jax.random.normal(next(keys), shape, jnp.float32) * std).astype(jnp.bfloat16)

    p = {}
    p["pe_w"], p["pe_b"] = lin((3 * 256, 384)), jnp.zeros((384,), jnp.float32)
    # fused encoder projection stubs (out_7r | out_14r | out_28r | out_56r)
    p["enc_w"], p["enc_b"] = lin((384, 4 * 384)), jnp.zeros((4 * 384,), jnp.float32)
    for i in range(4):
        p[f"isca{i}_w"], p[f"isca{i}_b"] = lin((384, 384)), jnp.zeros((384,), jnp.float32)
    for name in ("down1", "down2", "down3"):
        p[f"{name}_w"], p[f"{name}_b"] = lin((384, 384)), jnp.zeros((384,), jnp.float32)
    for i in range(1, 5):
        p[f"cf{i}_wa"] = lin((384, 384))      # columns [0:384]  of conv_f weight (out_* part)
        p[f"cf{i}_wb"] = lin((384, 384))      # columns [384:768] (SCF gate part)
        p[f"cf{i}_b"] = jnp.zeros((384,), jnp.float32)

    def up_params():
        d = {}
        w0 = jax.random.normal(next(keys), (9, 384, 256), jnp.float32) * math.sqrt(2.0 / (9 * 256))
        b0 = jnp.zeros((256,), jnp.float32)
        # TODO(synk): BatchNorm2d(256) runs in inference mode with fresh statistics
        # (gamma=1, beta=0, mean=0, var=1, eps=1e-5); it is folded into the conv weight
        # and bias here so the kernel epilogue is a pure bias + ReLU.
        gamma = jnp.ones((256,), jnp.float32)
        beta = jnp.zeros((256,), jnp.float32)
        rmean = jnp.zeros((256,), jnp.float32)
        rvar = jnp.ones((256,), jnp.float32)
        scale = gamma / jnp.sqrt(rvar + 1e-5)
        shift = beta - rmean * scale
        d["w0"] = (w0 * scale[None, None, :]).astype(jnp.bfloat16)
        d["b0"] = b0 * scale + shift
        d["w1"], d["b1"] = lin((256, 384)), jnp.zeros((384,), jnp.float32)
        return d

    p["up7"], p["up14"], p["up28"], p["up56"] = (up_params(), up_params(),
                                                 up_params(), up_params())
    p["head_w"], p["head_b"] = lin((4 * 384, 256)), jnp.zeros((256,), jnp.float32)
    p["cls_w"] = jax.random.normal(next(keys), (512, num_classes), jnp.float32) * 0.02
    p["cls_b"] = jnp.zeros((num_classes,), jnp.float32)
    return p


if __name__ == "__main__":
    key = jax.random.PRNGKey(0)
    kx, kp = jax.random.split(key)
    B, Cin = 2, 3
    Hin = Win = 64                        # -> 4x4 token grid (N=16), divisible-by-16 image
    x = jax.random.normal(kx, (B, Cin, Hin, Win), jnp.float32)
    params = init_params(kp, num_classes=10)

    out_local, out_cls = jax.jit(net_forward)(x, params)
    jax.block_until_ready((out_local, out_cls))

    assert out_local.shape == (B, 256, Hin // 16, Win // 16)
    assert out_cls.shape == (B, 10)
    assert out_local.dtype == jnp.float32 and out_cls.dtype == jnp.float32
    print("KERNEL_OK")
</pallas_src>

<mosaic_0001>
module attributes {stable_mosaic.version = 11 : i64} {
  func.func @_mmn_kernel(%arg0: i32, %arg1: memref<16x768xbf16, #tpu.memory_space<vmem>>, %arg2: memref<768x384xbf16, #tpu.memory_space<vmem>>, %arg3: memref<1x384xf32, #tpu.memory_space<vmem>>, %arg4: memref<16x384xbf16, #tpu.memory_space<vmem>>) attributes {dimension_semantics = [#tpu.dimension_semantics<parallel>], iteration_bounds = array<i64: 2>, scalar_prefetch = 0 : i64, scratch_operands = 0 : i64, tpu.core_type = #tpu.core_type<tc>, window_params = [{transform_indices = @transform_0, window_bounds = array<i64: 16, 768>}, {pipeline_mode = #tpu.pipeline_mode<synchronous>, transform_indices = @transform_1, window_bounds = array<i64: 768, 384>}, {pipeline_mode = #tpu.pipeline_mode<synchronous>, transform_indices = @transform_2, window_bounds = array<i64: 1, 384>}, {transform_indices = @transform_3, window_bounds = array<i64: 16, 384>}]} {
    %c0 = arith.constant 0 : index
    %c0_0 = arith.constant 0 : index
    %0 = vector.load %arg1[%c0, %c0_0] : memref<16x768xbf16, #tpu.memory_space<vmem>>, vector<16x768xbf16>
    %c0_1 = arith.constant 0 : index
    %c0_2 = arith.constant 0 : index
    %1 = vector.load %arg2[%c0_1, %c0_2] : memref<768x384xbf16, #tpu.memory_space<vmem>>, vector<768x384xbf16>
    %cst = arith.constant dense<0.000000e+00> : vector<16x384xf32>
    %2 = tpu.matmul %0, %1, %cst {dimension_numbers = #tpu.dot_dimension_numbers<[1], [0], [0], [1], [0, 0, 1, 1], [], []>} : vector<16x768xbf16>, vector<768x384xbf16>, vector<16x384xf32> -> vector<16x384xf32>
    %c0_3 = arith.constant 0 : index
    %c0_4 = arith.constant 0 : index
    %3 = vector.load %arg3[%c0_3, %c0_4] : memref<1x384xf32, #tpu.memory_space<vmem>>, vector<1x384xf32>
    %4 = vector.broadcast %3 : vector<1x384xf32> to vector<16x384xf32>
    %5 = arith.addf %2, %4 : vector<16x384xf32>
    %6 = arith.truncf %5 : vector<16x384xf32> to vector<16x384xbf16>
    %c0_5 = arith.constant 0 : index
    %c0_6 = arith.constant 0 : index
    %7 = vector.load %arg4[%c0_5, %c0_6] : memref<16x384xbf16, #tpu.memory_space<vmem>>, vector<16x384xbf16>
    tpu.vector_store %arg4[%c0_5, %c0_6], %6 {strides = array<i32>} : memref<16x384xbf16, #tpu.memory_space<vmem>>, vector<16x384xbf16>,
    return
  }
  func.func @transform_0(%arg0: i32) -> (i32, i32) {
    %c0_i32 = arith.constant 0 : i32
    %c0_i32_0 = arith.constant 0 : i32
    return %arg0, %c0_i32 : i32, i32
  }
  func.func @transform_1(%arg0: i32) -> (i32, i32) {
    %c0_i32 = arith.constant 0 : i32
    %c0_i32_0 = arith.constant 0 : i32
    %c0_i32_1 = arith.constant 0 : i32
    return %c0_i32, %c0_i32_0 : i32, i32
  }
  func.func @transform_2(%arg0: i32) -> (i32, i32) {
    %c0_i32 = arith.constant 0 : i32
    %c0_i32_0 = arith.constant 0 : i32
    %c0_i32_1 = arith.constant 0 : i32
    return %c0_i32, %c0_i32_0 : i32, i32
  }
  func.func @transform_3(%arg0: i32) -> (i32, i32) {
    %c0_i32 = arith.constant 0 : i32
    %c0_i32_0 = arith.constant 0 : i32
    return %arg0, %c0_i32 : i32, i32
  }
}

module attributes {stable_mosaic.version = 11 : i64} {
  func.func @_scf_kernel(%arg0: i32, %arg1: memref<1x16x384xbf16, #tpu.memory_space<vmem>>, %arg2: memref<4x16xbf16, #tpu.memory_space<vmem>>, %arg3: memref<4x16xbf16, #tpu.memory_space<vmem>>, %arg4: memref<16x4xbf16, #tpu.memory_space<vmem>>, %arg5: memref<16x4xbf16, #tpu.memory_space<vmem>>, %arg6: memref<384x384xbf16, #tpu.memory_space<vmem>>, %arg7: memref<1x384xf32, #tpu.memory_space<vmem>>, %arg8: memref<1x16x384xbf16, #tpu.memory_space<vmem>>) attributes {dimension_semantics = [#tpu.dimension_semantics<parallel>], iteration_bounds = array<i64: 2>, scalar_prefetch = 0 : i64, scratch_operands = 0 : i64, tpu.core_type = #tpu.core_type<tc>, window_params = [{transform_indices = @transform_0, window_bounds = array<i64: 1, 16, 384>}, {pipeline_mode = #tpu.pipeline_mode<synchronous>, transform_indices = @transform_1, window_bounds = array<i64: 4, 16>}, {pipeline_mode = #tpu.pipeline_mode<synchronous>, transform_indices = @transform_2, window_bounds = array<i64: 4, 16>}, {pipeline_mode = #tpu.pipeline_mode<synchronous>, transform_indices = @transform_3, window_bounds = array<i64: 16, 4>}, {pipeline_mode = #tpu.pipeline_mode<synchronous>, transform_indices = @transform_4, window_bounds = array<i64: 16, 4>}, {pipeline_mode = #tpu.pipeline_mode<synchronous>, transform_indices = @transform_5, window_bounds = array<i64: 384, 384>}, {pipeline_mode = #tpu.pipeline_mode<synchronous>, transform_indices = @transform_6, window_bounds = array<i64: 1, 384>}, {transform_indices = @transform_7, window_bounds = array<i64: 1, 16, 384>}]} {
    %c0 = arith.constant 0 : index
    %c0_0 = arith.constant 0 : index
    %c0_1 = arith.constant 0 : index
    %0 = vector.load %arg1[%c0, %c0_0, %c0_1] : memref<1x16x384xbf16, #tpu.memory_space<vmem>>, vector<1x16x384xbf16>
    %1 = vector.shape_cast %0 : vector<1x16x384xbf16> to vector<16x384xbf16>
    %c0_2 = arith.constant 0 : index
    %c0_3 = arith.constant 0 : index
    %2 = vector.load %arg2[%c0_2, %c0_3] : memref<4x16xbf16, #tpu.memory_space<vmem>>, vector<4x16xbf16>
    %cst = arith.constant dense<0.000000e+00> : vector<4x384xf32>
    %3 = tpu.matmul %2, %1, %cst {dimension_numbers = #tpu.dot_dimension_numbers<[1], [0], [0], [1], [0, 0, 1, 1], [], []>} : vector<4x16xbf16>, vector<16x384xbf16>, vector<4x384xf32> -> vector<4x384xf32>
    %c0_4 = arith.constant 0 : index
    %c0_5 = arith.constant 0 : index
    %4 = vector.load %arg3[%c0_4, %c0_5] : memref<4x16xbf16, #tpu.memory_space<vmem>>, vector<4x16xbf16>
    %cst_6 = arith.constant dense<0.000000e+00> : vector<4x384xf32>
    %5 = tpu.matmul %4, %1, %cst_6 {dimension_numbers = #tpu.dot_dimension_numbers<[1], [0], [0], [1], [0, 0, 1, 1], [], []>} : vector<4x16xbf16>, vector<16x384xbf16>, vector<4x384xf32> -> vector<4x384xf32>
    %c0_7 = arith.constant 0 : index
    %c0_8 = arith.constant 0 : index
    %6 = vector.load %arg4[%c0_7, %c0_8] : memref<16x4xbf16, #tpu.memory_space<vmem>>, vector<16x4xbf16>
    %7 = arith.truncf %3 : vector<4x384xf32> to vector<4x384xbf16>
    %cst_9 = arith.constant dense<0.000000e+00> : vector<16x384xf32>
    %8 = tpu.matmul %6, %7, %cst_9 {dimension_numbers = #tpu.dot_dimension_numbers<[1], [0], [0], [1], [0, 0, 1, 1], [], []>} : vector<16x4xbf16>, vector<4x384xbf16>, vector<16x384xf32> -> vector<16x384xf32>
    %c0_10 = arith.constant 0 : index
    %c0_11 = arith.constant 0 : index
    %9 = vector.load %arg5[%c0_10, %c0_11] : memref<16x4xbf16, #tpu.memory_space<vmem>>, vector<16x4xbf16>
    %10 = arith.truncf %5 : vector<4x384xf32> to vector<4x384xbf16>
    %cst_12 = arith.constant dense<0.000000e+00> : vector<16x384xf32>
    %11 = tpu.matmul %9, %10, %cst_12 {dimension_numbers = #tpu.dot_dimension_numbers<[1], [0], [0], [1], [0, 0, 1, 1], [], []>} : vector<16x4xbf16>, vector<4x384xbf16>, vector<16x384xf32> -> vector<16x384xf32>
    %12 = arith.extf %1 : vector<16x384xbf16> to vector<16x384xf32>
    %cst_13 = arith.constant dense<0.000000e+00> : vector<16xf32>
    %13 = vector.multi_reduction <add>, %12, %cst_13 [1] : vector<16x384xf32> to vector<16xf32>
    %14 = vector.shape_cast %13 : vector<16xf32> to vector<16x1xf32>
    %cst_14 = arith.constant 3.840000e+02 : f32
    %15 = vector.broadcast %cst_14 : f32 to vector<16x1xf32>
    %16 = arith.divf %14, %15 : vector<16x1xf32>
    %17 = arith.mulf %11, %8 : vector<16x384xf32>
    %18 = vector.broadcast %16 : vector<16x1xf32> to vector<16x384xf32>
    %19 = arith.addf %17, %18 : vector<16x384xf32>
    %20 = arith.truncf %19 : vector<16x384xf32> to vector<16x384xbf16>
    %c0_15 = arith.constant 0 : index
    %c0_16 = arith.constant 0 : index
    %21 = vector.load %arg6[%c0_15, %c0_16] : memref<384x384xbf16, #tpu.memory_space<vmem>>, vector<384x384xbf16>
    %cst_17 = arith.constant dense<0.000000e+00> : vector<16x384xf32>
    %22 = tpu.matmul %20, %21, %cst_17 {dimension_numbers = #tpu.dot_dimension_numbers<[1], [0], [0], [1], [0, 0, 1, 1], [], []>} : vector<16x384xbf16>, vector<384x384xbf16>, vector<16x384xf32> -> vector<16x384xf32>
    %c0_18 = arith.constant 0 : index
    %c0_19 = arith.constant 0 : index
    %23 = vector.load %arg7[%c0_18, %c0_19] : memref<1x384xf32, #tpu.memory_space<vmem>>, vector<1x384xf32>
    %24 = vector.broadcast %23 : vector<1x384xf32> to vector<16x384xf32>
    %25 = arith.addf %22, %24 : vector<16x384xf32>
    %26 = arith.negf %25 : vector<16x384xf32>
    %27 = math.exp %26 : vector<16x384xf32>
    %cst_20 = arith.constant 1.000000e+00 : f32
    %28 = vector.broadcast %cst_20 : f32 to vector<16x384xf32>
    %29 = arith.addf %28, %27 : vector<16x384xf32>
    %30 = arith.divf %28, %29 : vector<16x384xf32>
    %31 = arith.truncf %30 : vector<16x384xf32> to vector<16x384xbf16>
    %c0_21 = arith.constant 0 : index
    %c0_22 = arith.constant 0 : index
    %c0_23 = arith.constant 0 : index
    %32 = vector.load %arg8[%c0_21, %c0_22, %c0_23] : memref<1x16x384xbf16, #tpu.memory_space<vmem>>, vector<1x16x384xbf16>
    %33 = vector.shape_cast %32 : vector<1x16x384xbf16> to vector<16x384xbf16>
    %34 = vector.shape_cast %31 : vector<16x384xbf16> to vector<1x16x384xbf16>
    tpu.vector_store %arg8[%c0_21, %c0_22, %c0_23], %34 {strides = array<i32>} : memref<1x16x384xbf16, #tpu.memory_space<vmem>>, vector<1x16x384xbf16>,
    return
  }
  func.func @transform_0(%arg0: i32) -> (i32, i32, i32) {
    %c0_i32 = arith.constant 0 : i32
    %c0_i32_0 = arith.constant 0 : i32
    %c0_i32_1 = arith.constant 0 : i32
    return %arg0, %c0_i32, %c0_i32_0 : i32, i32, i32
  }
  func.func @transform_1(%arg0: i32) -> (i32, i32) {
    %c0_i32 = arith.constant 0 : i32
    %c0_i32_0 = arith.constant 0 : i32
    %c0_i32_1 = arith.constant 0 : i32
    return %c0_i32, %c0_i32_0 : i32, i32
  }
  func.func @transform_2(%arg0: i32) -> (i32, i32) {
    %c0_i32 = arith.constant 0 : i32
    %c0_i32_0 = arith.constant 0 : i32
    %c0_i32_1 = arith.constant 0 : i32
    return %c0_i32, %c0_i32_0 : i32, i32
  }
  func.func @transform_3(%arg0: i32) -> (i32, i32) {
    %c0_i32 = arith.constant 0 : i32
    %c0_i32_0 = arith.constant 0 : i32
    %c0_i32_1 = arith.constant 0 : i32
    return %c0_i32, %c0_i32_0 : i32, i32
  }
  func.func @transform_4(%arg0: i32) -> (i32, i32) {
    %c0_i32 = arith.constant 0 : i32
    %c0_i32_0 = arith.constant 0 : i32
    %c0_i32_1 = arith.constant 0 : i32
    return %c0_i32, %c0_i32_0 : i32, i32
  }
  func.func @transform_5(%arg0: i32) -> (i32, i32) {
    %c0_i32 = arith.constant 0 : i32
    %c0_i32_0 = arith.constant 0 : i32
    %c0_i32_1 = arith.constant 0 : i32
    return %c0_i32, %c0_i32_0 : i32, i32
  }
  func.func @transform_6(%arg0: i32) -> (i32, i32) {
    %c0_i32 = arith.constant 0 : i32
    %c0_i32_0 = arith.constant 0 : i32
    %c0_i32_1 = arith.constant 0 : i32
    return %c0_i32, %c0_i32_0 : i32, i32
  }
  func.func @transform_7(%arg0: i32) -> (i32, i32, i32) {
    %c0_i32 = arith.constant 0 : i32
    %c0_i32_0 = arith.constant 0 : i32
    %c0_i32_1 = arith.constant 0 : i32
    return %arg0, %c0_i32, %c0_i32_0 : i32, i32, i32
  }
}

module attributes {stable_mosaic.version = 11 : i64} {
  func.func @_mmn_kernel(%arg0: i32, %arg1: memref<16x384xbf16, #tpu.memory_space<vmem>>, %arg2: memref<384x1536xbf16, #tpu.memory_space<vmem>>, %arg3: memref<1x1536xf32, #tpu.memory_space<vmem>>, %arg4: memref<16x1536xbf16, #tpu.memory_space<vmem>>) attributes {dimension_semantics = [#tpu.dimension_semantics<parallel>], iteration_bounds = array<i64: 2>, scalar_prefetch = 0 : i64, scratch_operands = 0 : i64, tpu.core_type = #tpu.core_type<tc>, window_params = [{transform_indices = @transform_0, window_bounds = array<i64: 16, 384>}, {pipeline_mode = #tpu.pipeline_mode<synchronous>, transform_indices = @transform_1, window_bounds = array<i64: 384, 1536>}, {pipeline_mode = #tpu.pipeline_mode<synchronous>, transform_indices = @transform_2, window_bounds = array<i64: 1, 1536>}, {transform_indices = @transform_3, window_bounds = array<i64: 16, 1536>}]} {
    %c0 = arith.constant 0 : index
    %c0_0 = arith.constant 0 : index
    %0 = vector.load %arg1[%c0, %c0_0] : memref<16x384xbf16, #tpu.memory_space<vmem>>, vector<16x384xbf16>
    %c0_1 = arith.constant 0 : index
    %c0_2 = arith.constant 0 : index
    %1 = vector.load %arg2[%c0_1, %c0_2] : memref<384x1536xbf16, #tpu.memory_space<vmem>>, vector<384x1536xbf16>
    %cst = arith.constant dense<0.000000e+00> : vector<16x1536xf32>
    %2 = tpu.matmul %0, %1, %cst {dimension_numbers = #tpu.dot_dimension_numbers<[1], [0], [0], [1], [0, 0, 1, 1], [], []>} : vector<16x384xbf16>, vector<384x1536xbf16>, vector<16x1536xf32> -> vector<16x1536xf32>
    %c0_3 = arith.constant 0 : index
    %c0_4 = arith.constant 0 : index
    %3 = vector.load %arg3[%c0_3, %c0_4] : memref<1x1536xf32, #tpu.memory_space<vmem>>, vector<1x1536xf32>
    %4 = vector.broadcast %3 : vector<1x1536xf32> to vector<16x1536xf32>
    %5 = arith.addf %2, %4 : vector<16x1536xf32>
    %6 = arith.truncf %5 : vector<16x1536xf32> to vector<16x1536xbf16>
    %c0_5 = arith.constant 0 : index
    %c0_6 = arith.constant 0 : index
    %7 = vector.load %arg4[%c0_5, %c0_6] : memref<16x1536xbf16, #tpu.memory_space<vmem>>, vector<16x1536xbf16>
    tpu.vector_store %arg4[%c0_5, %c0_6], %6 {strides = array<i32>} : memref<16x1536xbf16, #tpu.memory_space<vmem>>, vector<16x1536xbf16>,
    return
  }
  func.func @transform_0(%arg0: i32) -> (i32, i32) {
    %c0_i32 = arith.constant 0 : i32
    %c0_i32_0 = arith.constant 0 : i32
    return %arg0, %c0_i32 : i32, i32
  }
  func.func @transform_1(%arg0: i32) -> (i32, i32) {
    %c0_i32 = arith.constant 0 : i32
    %c0_i32_0 = arith.constant 0 : i32
    %c0_i32_1 = arith.constant 0 : i32
    return %c0_i32, %c0_i32_0 : i32, i32
  }
  func.func @transform_2(%arg0: i32) -> (i32, i32) {
    %c0_i32 = arith.constant 0 : i32
    %c0_i32_0 = arith.constant 0 : i32
    %c0_i32_1 = arith.constant 0 : i32
    return %c0_i32, %c0_i32_0 : i32, i32
  }
  func.func @transform_3(%arg0: i32) -> (i32, i32) {
    %c0_i32 = arith.constant 0 : i32
    %c0_i32_0 = arith.constant 0 : i32
    return %arg0, %c0_i32 : i32, i32
  }
}

module attributes {stable_mosaic.version = 11 : i64} {
  func.func @_mmn_kernel(%arg0: i32, %arg1: memref<16x384xbf16, #tpu.memory_space<vmem>>, %arg2: memref<16x384xbf16, #tpu.memory_space<vmem>>, %arg3: memref<384x384xbf16, #tpu.memory_space<vmem>>, %arg4: memref<384x384xbf16, #tpu.memory_space<vmem>>, %arg5: memref<1x384xf32, #tpu.memory_space<vmem>>, %arg6: memref<16x384xbf16, #tpu.memory_space<vmem>>) attributes {dimension_semantics = [#tpu.dimension_semantics<parallel>], iteration_bounds = array<i64: 2>, scalar_prefetch = 0 : i64, scratch_operands = 0 : i64, tpu.core_type = #tpu.core_type<tc>, window_params = [{transform_indices = @transform_0, window_bounds = array<i64: 16, 384>}, {transform_indices = @transform_1, window_bounds = array<i64: 16, 384>}, {pipeline_mode = #tpu.pipeline_mode<synchronous>, transform_indices = @transform_2, window_bounds = array<i64: 384, 384>}, {pipeline_mode = #tpu.pipeline_mode<synchronous>, transform_indices = @transform_3, window_bounds = array<i64: 384, 384>}, {pipeline_mode = #tpu.pipeline_mode<synchronous>, transform_indices = @transform_4, window_bounds = array<i64: 1, 384>}, {transform_indices = @transform_5, window_bounds = array<i64: 16, 384>}]} {
    %c0 = arith.constant 0 : index
    %c0_0 = arith.constant 0 : index
    %0 = vector.load %arg1[%c0, %c0_0] : memref<16x384xbf16, #tpu.memory_space<vmem>>, vector<16x384xbf16>
    %c0_1 = arith.constant 0 : index
    %c0_2 = arith.constant 0 : index
    %1 = vector.load %arg3[%c0_1, %c0_2] : memref<384x384xbf16, #tpu.memory_space<vmem>>, vector<384x384xbf16>
    %cst = arith.constant dense<0.000000e+00> : vector<16x384xf32>
    %2 = tpu.matmul %0, %1, %cst {dimension_numbers = #tpu.dot_dimension_numbers<[1], [0], [0], [1], [0, 0, 1, 1], [], []>} : vector<16x384xbf16>, vector<384x384xbf16>, vector<16x384xf32> -> vector<16x384xf32>
    %c0_3 = arith.constant 0 : index
    %c0_4 = arith.constant 0 : index
    %3 = vector.load %arg2[%c0_3, %c0_4] : memref<16x384xbf16, #tpu.memory_space<vmem>>, vector<16x384xbf16>
    %c0_5 = arith.constant 0 : index
    %c0_6 = arith.constant 0 : index
    %4 = vector.load %arg4[%c0_5, %c0_6] : memref<384x384xbf16, #tpu.memory_space<vmem>>, vector<384x384xbf16>
    %cst_7 = arith.constant dense<0.000000e+00> : vector<16x384xf32>
    %5 = tpu.matmul %3, %4, %cst_7 {dimension_numbers = #tpu.dot_dimension_numbers<[1], [0], [0], [1], [0, 0, 1, 1], [], []>} : vector<16x384xbf16>, vector<384x384xbf16>, vector<16x384xf32> -> vector<16x384xf32>
    %6 = arith.addf %2, %5 : vector<16x384xf32>
    %c0_8 = arith.constant 0 : index
    %c0_9 = arith.constant 0 : index
    %7 = vector.load %arg5[%c0_8, %c0_9] : memref<1x384xf32, #tpu.memory_space<vmem>>, vector<1x384xf32>
    %8 = vector.broadcast %7 : vector<1x384xf32> to vector<16x384xf32>
    %9 = arith.addf %6, %8 : vector<16x384xf32>
    %10 = arith.truncf %9 : vector<16x384xf32> to vector<16x384xbf16>
    %c0_10 = arith.constant 0 : index
    %c0_11 = arith.constant 0 : index
    %11 = vector.load %arg6[%c0_10, %c0_11] : memref<16x384xbf16, #tpu.memory_space<vmem>>, vector<16x384xbf16>
    tpu.vector_store %arg6[%c0_10, %c0_11], %10 {strides = array<i32>} : memref<16x384xbf16, #tpu.memory_space<vmem>>, vector<16x384xbf16>,
    return
  }
  func.func @transform_0(%arg0: i32) -> (i32, i32) {
    %c3_i32 = arith.constant 3 : i32
    %c0_i32 = arith.constant 0 : i32
    return %arg0, %c3_i32 : i32, i32
  }
  func.func @transform_1(%arg0: i32) -> (i32, i32) {
    %c0_i32 = arith.constant 0 : i32
    %c0_i32_0 = arith.constant 0 : i32
    return %arg0, %c0_i32 : i32, i32
  }
  func.func @transform_2(%arg0: i32) -> (i32, i32) {
    %c0_i32 = arith.constant 0 : i32
    %c0_i32_0 = arith.constant 0 : i32
    %c0_i32_1 = arith.constant 0 : i32
    return %c0_i32, %c0_i32_0 : i32, i32
  }
  func.func @transform_3(%arg0: i32) -> (i32, i32) {
    %c0_i32 = arith.constant 0 : i32
    %c0_i32_0 = arith.constant 0 : i32
    %c0_i32_1 = arith.constant 0 : i32
    return %c0_i32, %c0_i32_0 : i32, i32
  }
  func.func @transform_4(%arg0: i32) -> (i32, i32) {
    %c0_i32 = arith.constant 0 : i32
    %c0_i32_0 = arith.constant 0 : i32
    %c0_i32_1 = arith.constant 0 : i32
    return %c0_i32, %c0_i32_0 : i32, i32
  }
  func.func @transform_5(%arg0: i32) -> (i32, i32) {
    %c0_i32 = arith.constant 0 : i32
    %c0_i32_0 = arith.constant 0 : i32
    return %arg0, %c0_i32 : i32, i32
  }
}

module attributes {stable_mosaic.version = 11 : i64} {
  func.func @_conv3x3_kernel(%arg0: i32, %arg1: memref<1x3x48x384xbf16, #tpu.memory_space<vmem>>, %arg2: memref<9x384x256xbf16, #tpu.memory_space<vmem>>, %arg3: memref<1x256xf32, #tpu.memory_space<vmem>>, %arg4: memref<1x32x256xbf16, #tpu.memory_space<vmem>>) attributes {dimension_semantics = [#tpu.dimension_semantics<parallel>], iteration_bounds = array<i64: 2>, scalar_prefetch = 0 : i64, scratch_operands = 0 : i64, tpu.core_type = #tpu.core_type<tc>, window_params = [{transform_indices = @transform_0, window_bounds = array<i64: 1, 3, 48, 384>}, {pipeline_mode = #tpu.pipeline_mode<synchronous>, transform_indices = @transform_1, window_bounds = array<i64: 9, 384, 256>}, {pipeline_mode = #tpu.pipeline_mode<synchronous>, transform_indices = @transform_2, window_bounds = array<i64: 1, 256>}, {transform_indices = @transform_3, window_bounds = array<i64: 1, 32, 256>}]} {
    %c0 = arith.constant 0 : index
    %c0_0 = arith.constant 0 : index
    %c0_1 = arith.constant 0 : index
    %c0_2 = arith.constant 0 : index
    %0 = vector.load %arg1[%c0, %c0_0, %c0_1, %c0_2] : memref<1x3x48x384xbf16, #tpu.memory_space<vmem>>, vector<1x1x32x384xbf16>
    %1 = vector.shape_cast %0 : vector<1x1x32x384xbf16> to vector<32x384xbf16>
    %c0_3 = arith.constant 0 : index
    %c0_4 = arith.constant 0 : index
    %c0_5 = arith.constant 0 : index
    %2 = vector.load %arg2[%c0_3, %c0_4, %c0_5] : memref<9x384x256xbf16, #tpu.memory_space<vmem>>, vector<1x384x256xbf16>
    %3 = vector.shape_cast %2 : vector<1x384x256xbf16> to vector<384x256xbf16>
    %cst = arith.constant dense<0.000000e+00> : vector<32x256xf32>
    %4 = tpu.matmul %1, %3, %cst {dimension_numbers = #tpu.dot_dimension_numbers<[1], [0], [0], [1], [0, 0, 1, 1], [], []>} : vector<32x384xbf16>, vector<384x256xbf16>, vector<32x256xf32> -> vector<32x256xf32>
    %c0_6 = arith.constant 0 : index
    %c1 = arith.constant 1 : index
    %c0_7 = arith.constant 0 : index
    %c0_8 = arith.constant 0 : index
    %5 = vector.load %arg1[%c0_6, %c1, %c0_7, %c0_8] : memref<1x3x48x384xbf16, #tpu.memory_space<vmem>>, vector<1x1x32x384xbf16>
    %6 = vector.shape_cast %5 : vector<1x1x32x384xbf16> to vector<32x384xbf16>
    %c1_9 = arith.constant 1 : index
    %c0_10 = arith.constant 0 : index
    %c0_11 = arith.constant 0 : index
    %7 = vector.load %arg2[%c1_9, %c0_10, %c0_11] : memref<9x384x256xbf16, #tpu.memory_space<vmem>>, vector<1x384x256xbf16>
    %8 = vector.shape_cast %7 : vector<1x384x256xbf16> to vector<384x256xbf16>
    %cst_12 = arith.constant dense<0.000000e+00> : vector<32x256xf32>
    %9 = tpu.matmul %6, %8, %cst_12 {dimension_numbers = #tpu.dot_dimension_numbers<[1], [0], [0], [1], [0, 0, 1, 1], [], []>} : vector<32x384xbf16>, vector<384x256xbf16>, vector<32x256xf32> -> vector<32x256xf32>
    %10 = arith.addf %4, %9 : vector<32x256xf32>
    %c0_13 = arith.constant 0 : index
    %c2 = arith.constant 2 : index
    %c0_14 = arith.constant 0 : index
    %c0_15 = arith.constant 0 : index
    %11 = vector.load %arg1[%c0_13, %c2, %c0_14, %c0_15] : memref<1x3x48x384xbf16, #tpu.memory_space<vmem>>, vector<1x1x32x384xbf16>
    %12 = vector.shape_cast %11 : vector<1x1x32x384xbf16> to vector<32x384xbf16>
    %c2_16 = arith.constant 2 : index
    %c0_17 = arith.constant 0 : index
    %c0_18 = arith.constant 0 : index
    %13 = vector.load %arg2[%c2_16, %c0_17, %c0_18] : memref<9x384x256xbf16, #tpu.memory_space<vmem>>, vector<1x384x256xbf16>
    %14 = vector.shape_cast %13 : vector<1x384x256xbf16> to vector<384x256xbf16>
    %cst_19 = arith.constant dense<0.000000e+00> : vector<32x256xf32>
    %15 = tpu.matmul %12, %14, %cst_19 {dimension_numbers = #tpu.dot_dimension_numbers<[1], [0], [0], [1], [0, 0, 1, 1], [], []>} : vector<32x384xbf16>, vector<384x256xbf16>, vector<32x256xf32> -> vector<32x256xf32>
    %16 = arith.addf %10, %15 : vector<32x256xf32>
    %c0_20 = arith.constant 0 : index
    %c0_21 = arith.constant 0 : index
    %c8 = arith.constant 8 : index
    %c0_22 = arith.constant 0 : index
    %17 = vector.load %arg1[%c0_20, %c0_21, %c8, %c0_22] : memref<1x3x48x384xbf16, #tpu.memory_space<vmem>>, vector<1x1x32x384xbf16>
    %18 = vector.shape_cast %17 : vector<1x1x32x384xbf16> to vector<32x384xbf16>
    %c3 = arith.constant 3 : index
    %c0_23 = arith.constant 0 : index
    %c0_24 = arith.constant 0 : index
    %19 = vector.load %arg2[%c3, %c0_23, %c0_24] : memref<9x384x256xbf16, #tpu.memory_space<vmem>>, vector<1x384x256xbf16>
    %20 = vector.shape_cast %19 : vector<1x384x256xbf16> to vector<384x256xbf16>
    %cst_25 = arith.constant dense<0.000000e+00> : vector<32x256xf32>
    %21 = tpu.matmul %18, %20, %cst_25 {dimension_numbers = #tpu.dot_dimension_numbers<[1], [0], [0], [1], [0, 0, 1, 1], [], []>} : vector<32x384xbf16>, vector<384x256xbf16>, vector<32x256xf32> -> vector<32x256xf32>
    %22 = arith.addf %16, %21 : vector<32x256xf32>
    %c0_26 = arith.constant 0 : index
    %c1_27 = arith.constant 1 : index
    %c8_28 = arith.constant 8 : index
    %c0_29 = arith.constant 0 : index
    %23 = vector.load %arg1[%c0_26, %c1_27, %c8_28, %c0_29] : memref<1x3x48x384xbf16, #tpu.memory_space<vmem>>, vector<1x1x32x384xbf16>
    %24 = vector.shape_cast %23 : vector<1x1x32x384xbf16> to vector<32x384xbf16>
    %c4 = arith.constant 4 : index
    %c0_30 = arith.constant 0 : index
    %c0_31 = arith.constant 0 : index
    %25 = vector.load %arg2[%c4, %c0_30, %c0_31] : memref<9x384x256xbf16, #tpu.memory_space<vmem>>, vector<1x384x256xbf16>
    %26 = vector.shape_cast %25 : vector<1x384x256xbf16> to vector<384x256xbf16>
    %cst_32 = arith.constant dense<0.000000e+00> : vector<32x256xf32>
    %27 = tpu.matmul %24, %26, %cst_32 {dimension_numbers = #tpu.dot_dimension_numbers<[1], [0], [0], [1], [0, 0, 1, 1], [], []>} : vector<32x384xbf16>, vector<384x256xbf16>, vector<32x256xf32> -> vector<32x256xf32>
    %28 = arith.addf %22, %27 : vector<32x256xf32>
    %c0_33 = arith.constant 0 : index
    %c2_34 = arith.constant 2 : index
    %c8_35 = arith.constant 8 : index
    %c0_36 = arith.constant 0 : index
    %29 = vector.load %arg1[%c0_33, %c2_34, %c8_35, %c0_36] : memref<1x3x48x384xbf16, #tpu.memory_space<vmem>>, vector<1x1x32x384xbf16>
    %30 = vector.shape_cast %29 : vector<1x1x32x384xbf16> to vector<32x384xbf16>
    %c5 = arith.constant 5 : index
    %c0_37 = arith.constant 0 : index
    %c0_38 = arith.constant 0 : index
    %31 = vector.load %arg2[%c5, %c0_37, %c0_38] : memref<9x384x256xbf16, #tpu.memory_space<vmem>>, vector<1x384x256xbf16>
    %32 = vector.shape_cast %31 : vector<1x384x256xbf16> to vector<384x256xbf16>
    %cst_39 = arith.constant dense<0.000000e+00> : vector<32x256xf32>
    %33 = tpu.matmul %30, %32, %cst_39 {dimension_numbers = #tpu.dot_dimension_numbers<[1], [0], [0], [1], [0, 0, 1, 1], [], []>} : vector<32x384xbf16>, vector<384x256xbf16>, vector<32x256xf32> -> vector<32x256xf32>
    %34 = arith.addf %28, %33 : vector<32x256xf32>
    %c0_40 = arith.constant 0 : index
    %c0_41 = arith.constant 0 : index
    %c16 = arith.constant 16 : index
    %c0_42 = arith.constant 0 : index
    %35 = vector.load %arg1[%c0_40, %c0_41, %c16, %c0_42] : memref<1x3x48x384xbf16, #tpu.memory_space<vmem>>, vector<1x1x32x384xbf16>
    %36 = vector.shape_cast %35 : vector<1x1x32x384xbf16> to vector<32x384xbf16>
    %c6 = arith.constant 6 : index
    %c0_43 = arith.constant 0 : index
    %c0_44 = arith.constant 0 : index
    %37 = vector.load %arg2[%c6, %c0_43, %c0_44] : memref<9x384x256xbf16, #tpu.memory_space<vmem>>, vector<1x384x256xbf16>
    %38 = vector.shape_cast %37 : vector<1x384x256xbf16> to vector<384x256xbf16>
    %cst_45 = arith.constant dense<0.000000e+00> : vector<32x256xf32>
    %39 = tpu.matmul %36, %38, %cst_45 {dimension_numbers = #tpu.dot_dimension_numbers<[1], [0], [0], [1], [0, 0, 1, 1], [], []>} : vector<32x384xbf16>, vector<384x256xbf16>, vector<32x256xf32> -> vector<32x256xf32>
    %40 = arith.addf %34, %39 : vector<32x256xf32>
    %c0_46 = arith.constant 0 : index
    %c1_47 = arith.constant 1 : index
    %c16_48 = arith.constant 16 : index
    %c0_49 = arith.constant 0 : index
    %41 = vector.load %arg1[%c0_46, %c1_47, %c16_48, %c0_49] : memref<1x3x48x384xbf16, #tpu.memory_space<vmem>>, vector<1x1x32x384xbf16>
    %42 = vector.shape_cast %41 : vector<1x1x32x384xbf16> to vector<32x384xbf16>
    %c7 = arith.constant 7 : index
    %c0_50 = arith.constant 0 : index
    %c0_51 = arith.constant 0 : index
    %43 = vector.load %arg2[%c7, %c0_50, %c0_51] : memref<9x384x256xbf16, #tpu.memory_space<vmem>>, vector<1x384x256xbf16>
    %44 = vector.shape_cast %43 : vector<1x384x256xbf16> to vector<384x256xbf16>
    %cst_52 = arith.constant dense<0.000000e+00> : vector<32x256xf32>
    %45 = tpu.matmul %42, %44, %cst_52 {dimension_numbers = #tpu.dot_dimension_numbers<[1], [0], [0], [1], [0, 0, 1, 1], [], []>} : vector<32x384xbf16>, vector<384x256xbf16>, vector<32x256xf32> -> vector<32x256xf32>
    %46 = arith.addf %40, %45 : vector<32x256xf32>
    %c0_53 = arith.constant 0 : index
    %c2_54 = arith.constant 2 : index
    %c16_55 = arith.constant 16 : index
    %c0_56 = arith.constant 0 : index
    %47 = vector.load %arg1[%c0_53, %c2_54, %c16_55, %c0_56] : memref<1x3x48x384xbf16, #tpu.memory_space<vmem>>, vector<1x1x32x384xbf16>
    %48 = vector.shape_cast %47 : vector<1x1x32x384xbf16> to vector<32x384xbf16>
    %c8_57 = arith.constant 8 : index
    %c0_58 = arith.constant 0 : index
    %c0_59 = arith.constant 0 : index
    %49 = vector.load %arg2[%c8_57, %c0_58, %c0_59] : memref<9x384x256xbf16, #tpu.memory_space<vmem>>, vector<1x384x256xbf16>
    %50 = vector.shape_cast %49 : vector<1x384x256xbf16> to vector<384x256xbf16>
    %cst_60 = arith.constant dense<0.000000e+00> : vector<32x256xf32>
    %51 = tpu.matmul %48, %50, %cst_60 {dimension_numbers = #tpu.dot_dimension_numbers<[1], [0], [0], [1], [0, 0, 1, 1], [], []>} : vector<32x384xbf16>, vector<384x256xbf16>, vector<32x256xf32> -> vector<32x256xf32>
    %52 = arith.addf %46, %51 : vector<32x256xf32>
    %c0_61 = arith.constant 0 : index
    %c0_62 = arith.constant 0 : index
    %53 = vector.load %arg3[%c0_61, %c0_62] : memref<1x256xf32, #tpu.memory_space<vmem>>, vector<1x256xf32>
    %54 = vector.broadcast %53 : vector<1x256xf32> to vector<32x256xf32>
    %55 = arith.addf %52, %54 : vector<32x256xf32>
    %cst_63 = arith.constant 0.000000e+00 : f32
    %56 = vector.broadcast %cst_63 : f32 to vector<32x256xf32>
    %57 = arith.maximumf %55, %56 : vector<32x256xf32>
    %58 = arith.truncf %57 : vector<32x256xf32> to vector<32x256xbf16>
    %c0_64 = arith.constant 0 : index
    %c0_65 = arith.constant 0 : index
    %c0_66 = arith.constant 0 : index
    %59 = vector.load %arg4[%c0_64, %c0_65, %c0_66] : memref<1x32x256xbf16, #tpu.memory_space<vmem>>, vector<1x32x256xbf16>
    %60 = vector.shape_cast %59 : vector<1x32x256xbf16> to vector<32x256xbf16>
    %61 = vector.shape_cast %58 : vector<32x256xbf16> to vector<1x32x256xbf16>
    tpu.vector_store %arg4[%c0_64, %c0_65, %c0_66], %61 {strides = array<i32>} : memref<1x32x256xbf16, #tpu.memory_space<vmem>>, vector<1x32x256xbf16>,
    return
  }
  func.func @transform_0(%arg0: i32) -> (i32, i32, i32, i32) {
    %c0_i32 = arith.constant 0 : i32
    %c0_i32_0 = arith.constant 0 : i32
    %c0_i32_1 = arith.constant 0 : i32
    %c0_i32_2 = arith.constant 0 : i32
    return %arg0, %c0_i32, %c0_i32_0, %c0_i32_1 : i32, i32, i32, i32
  }
  func.func @transform_1(%arg0: i32) -> (i32, i32, i32) {
    %c0_i32 = arith.constant 0 : i32
    %c0_i32_0 = arith.constant 0 : i32
    %c0_i32_1 = arith.constant 0 : i32
    %c0_i32_2 = arith.constant 0 : i32
    return %c0_i32, %c0_i32_0, %c0_i32_1 : i32, i32, i32
  }
  func.func @transform_2(%arg0: i32) -> (i32, i32) {
    %c0_i32 = arith.constant 0 : i32
    %c0_i32_0 = arith.constant 0 : i32
    %c0_i32_1 = arith.constant 0 : i32
    return %c0_i32, %c0_i32_0 : i32, i32
  }
  func.func @transform_3(%arg0: i32) -> (i32, i32, i32) {
    %c0_i32 = arith.constant 0 : i32
    %c0_i32_0 = arith.constant 0 : i32
    %c0_i32_1 = arith.constant 0 : i32
    return %arg0, %c0_i32, %c0_i32_0 : i32, i32, i32
  }
}

module attributes {stable_mosaic.version = 11 : i64} {
  func.func @_pixmm_kernel(%arg0: i32, %arg1: memref<16x16xbf16, #tpu.memory_space<vmem>>, %arg2: memref<1x16x384xbf16, #tpu.memory_space<vmem>>, %arg3: memref<1x16x384xbf16, #tpu.memory_space<vmem>>) attributes {dimension_semantics = [#tpu.dimension_semantics<parallel>], iteration_bounds = array<i64: 2>, scalar_prefetch = 0 : i64, scratch_operands = 0 : i64, tpu.core_type = #tpu.core_type<tc>, window_params = [{pipeline_mode = #tpu.pipeline_mode<synchronous>, transform_indices = @transform_0, window_bounds = array<i64: 16, 16>}, {transform_indices = @transform_1, window_bounds = array<i64: 1, 16, 384>}, {transform_indices = @transform_2, window_bounds = array<i64: 1, 16, 384>}]} {
    %c0 = arith.constant 0 : index
    %c0_0 = arith.constant 0 : index
    %0 = vector.load %arg1[%c0, %c0_0] : memref<16x16xbf16, #tpu.memory_space<vmem>>, vector<16x16xbf16>
    %c0_1 = arith.constant 0 : index
    %c0_2 = arith.constant 0 : index
    %c0_3 = arith.constant 0 : index
    %1 = vector.load %arg2[%c0_1, %c0_2, %c0_3] : memref<1x16x384xbf16, #tpu.memory_space<vmem>>, vector<1x16x384xbf16>
    %2 = vector.shape_cast %1 : vector<1x16x384xbf16> to vector<16x384xbf16>
    %cst = arith.constant dense<0.000000e+00> : vector<16x384xf32>
    %3 = tpu.matmul %0, %2, %cst {dimension_numbers = #tpu.dot_dimension_numbers<[1], [0], [0], [1], [0, 0, 1, 1], [], []>} : vector<16x16xbf16>, vector<16x384xbf16>, vector<16x384xf32> -> vector<16x384xf32>
    %4 = arith.truncf %3 : vector<16x384xf32> to vector<16x384xbf16>
    %c0_4 = arith.constant 0 : index
    %c0_5 = arith.constant 0 : index
    %c0_6 = arith.constant 0 : index
    %5 = vector.load %arg3[%c0_4, %c0_5, %c0_6] : memref<1x16x384xbf16, #tpu.memory_space<vmem>>, vector<1x16x384xbf16>
    %6 = vector.shape_cast %5 : vector<1x16x384xbf16> to vector<16x384xbf16>
    %7 = vector.shape_cast %4 : vector<16x384xbf16> to vector<1x16x384xbf16>
    tpu.vector_store %arg3[%c0_4, %c0_5, %c0_6], %7 {strides = array<i32>} : memref<1x16x384xbf16, #tpu.memory_space<vmem>>, vector<1x16x384xbf16>,
    return
  }
  func.func @transform_0(%arg0: i32) -> (i32, i32) {
    %c0_i32 = arith.constant 0 : i32
    %c0_i32_0 = arith.constant 0 : i32
    %c0_i32_1 = arith.constant 0 : i32
    return %c0_i32, %c0_i32_0 : i32, i32
  }
  func.func @transform_1(%arg0: i32) -> (i32, i32, i32) {
    %c0_i32 = arith.constant 0 : i32
    %c0_i32_0 = arith.constant 0 : i32
    %c0_i32_1 = arith.constant 0 : i32
    return %arg0, %c0_i32, %c0_i32_0 : i32, i32, i32
  }
  func.func @transform_2(%arg0: i32) -> (i32, i32, i32) {
    %c0_i32 = arith.constant 0 : i32
    %c0_i32_0 = arith.constant 0 : i32
    %c0_i32_1 = arith.constant 0 : i32
    return %arg0, %c0_i32, %c0_i32_0 : i32, i32, i32
  }
}

module attributes {stable_mosaic.version = 11 : i64} {
  func.func @_mmn_kernel(%arg0: i32, %arg1: memref<16x256xbf16, #tpu.memory_space<vmem>>, %arg2: memref<256x384xbf16, #tpu.memory_space<vmem>>, %arg3: memref<1x384xf32, #tpu.memory_space<vmem>>, %arg4: memref<16x384xbf16, #tpu.memory_space<vmem>>) attributes {dimension_semantics = [#tpu.dimension_semantics<parallel>], iteration_bounds = array<i64: 2>, scalar_prefetch = 0 : i64, scratch_operands = 0 : i64, tpu.core_type = #tpu.core_type<tc>, window_params = [{transform_indices = @transform_0, window_bounds = array<i64: 16, 256>}, {pipeline_mode = #tpu.pipeline_mode<synchronous>, transform_indices = @transform_1, window_bounds = array<i64: 256, 384>}, {pipeline_mode = #tpu.pipeline_mode<synchronous>, transform_indices = @transform_2, window_bounds = array<i64: 1, 384>}, {transform_indices = @transform_3, window_bounds = array<i64: 16, 384>}]} {
    %c0 = arith.constant 0 : index
    %c0_0 = arith.constant 0 : index
    %0 = vector.load %arg1[%c0, %c0_0] : memref<16x256xbf16, #tpu.memory_space<vmem>>, vector<16x256xbf16>
    %c0_1 = arith.constant 0 : index
    %c0_2 = arith.constant 0 : index
    %1 = vector.load %arg2[%c0_1, %c0_2] : memref<256x384xbf16, #tpu.memory_space<vmem>>, vector<256x384xbf16>
    %cst = arith.constant dense<0.000000e+00> : vector<16x384xf32>
    %2 = tpu.matmul %0, %1, %cst {dimension_numbers = #tpu.dot_dimension_numbers<[1], [0], [0], [1], [0, 0, 1, 1], [], []>} : vector<16x256xbf16>, vector<256x384xbf16>, vector<16x384xf32> -> vector<16x384xf32>
    %c0_3 = arith.constant 0 : index
    %c0_4 = arith.constant 0 : index
    %3 = vector.load %arg3[%c0_3, %c0_4] : memref<1x384xf32, #tpu.memory_space<vmem>>, vector<1x384xf32>
    %4 = vector.broadcast %3 : vector<1x384xf32> to vector<16x384xf32>
    %5 = arith.addf %2, %4 : vector<16x384xf32>
    %6 = arith.truncf %5 : vector<16x384xf32> to vector<16x384xbf16>
    %c0_5 = arith.constant 0 : index
    %c0_6 = arith.constant 0 : index
    %7 = vector.load %arg4[%c0_5, %c0_6] : memref<16x384xbf16, #tpu.memory_space<vmem>>, vector<16x384xbf16>
    tpu.vector_store %arg4[%c0_5, %c0_6], %6 {strides = array<i32>} : memref<16x384xbf16, #tpu.memory_space<vmem>>, vector<16x384xbf16>,
    return
  }
  func.func @transform_0(%arg0: i32) -> (i32, i32) {
    %c0_i32 = arith.constant 0 : i32
    %c0_i32_0 = arith.constant 0 : i32
    return %arg0, %c0_i32 : i32, i32
  }
  func.func @transform_1(%arg0: i32) -> (i32, i32) {
    %c0_i32 = arith.constant 0 : i32
    %c0_i32_0 = arith.constant 0 : i32
    %c0_i32_1 = arith.constant 0 : i32
    return %c0_i32, %c0_i32_0 : i32, i32
  }
  func.func @transform_2(%arg0: i32) -> (i32, i32) {
    %c0_i32 = arith.constant 0 : i32
    %c0_i32_0 = arith.constant 0 : i32
    %c0_i32_1 = arith.constant 0 : i32
    return %c0_i32, %c0_i32_0 : i32, i32
  }
  func.func @transform_3(%arg0: i32) -> (i32, i32) {
    %c0_i32 = arith.constant 0 : i32
    %c0_i32_0 = arith.constant 0 : i32
    return %arg0, %c0_i32 : i32, i32
  }
}

module attributes {stable_mosaic.version = 11 : i64} {
  func.func @_mmn_kernel(%arg0: i32, %arg1: memref<16x384xbf16, #tpu.memory_space<vmem>>, %arg2: memref<384x384xbf16, #tpu.memory_space<vmem>>, %arg3: memref<1x384xf32, #tpu.memory_space<vmem>>, %arg4: memref<16x384xbf16, #tpu.memory_space<vmem>>) attributes {dimension_semantics = [#tpu.dimension_semantics<parallel>], iteration_bounds = array<i64: 2>, scalar_prefetch = 0 : i64, scratch_operands = 0 : i64, tpu.core_type = #tpu.core_type<tc>, window_params = [{transform_indices = @transform_0, window_bounds = array<i64: 16, 384>}, {pipeline_mode = #tpu.pipeline_mode<synchronous>, transform_indices = @transform_1, window_bounds = array<i64: 384, 384>}, {pipeline_mode = #tpu.pipeline_mode<synchronous>, transform_indices = @transform_2, window_bounds = array<i64: 1, 384>}, {transform_indices = @transform_3, window_bounds = array<i64: 16, 384>}]} {
    %c0 = arith.constant 0 : index
    %c0_0 = arith.constant 0 : index
    %0 = vector.load %arg1[%c0, %c0_0] : memref<16x384xbf16, #tpu.memory_space<vmem>>, vector<16x384xbf16>
    %c0_1 = arith.constant 0 : index
    %c0_2 = arith.constant 0 : index
    %1 = vector.load %arg2[%c0_1, %c0_2] : memref<384x384xbf16, #tpu.memory_space<vmem>>, vector<384x384xbf16>
    %cst = arith.constant dense<0.000000e+00> : vector<16x384xf32>
    %2 = tpu.matmul %0, %1, %cst {dimension_numbers = #tpu.dot_dimension_numbers<[1], [0], [0], [1], [0, 0, 1, 1], [], []>} : vector<16x384xbf16>, vector<384x384xbf16>, vector<16x384xf32> -> vector<16x384xf32>
    %c0_3 = arith.constant 0 : index
    %c0_4 = arith.constant 0 : index
    %3 = vector.load %arg3[%c0_3, %c0_4] : memref<1x384xf32, #tpu.memory_space<vmem>>, vector<1x384xf32>
    %4 = vector.broadcast %3 : vector<1x384xf32> to vector<16x384xf32>
    %5 = arith.addf %2, %4 : vector<16x384xf32>
    %6 = arith.truncf %5 : vector<16x384xf32> to vector<16x384xbf16>
    %c0_5 = arith.constant 0 : index
    %c0_6 = arith.constant 0 : index
    %7 = vector.load %arg4[%c0_5, %c0_6] : memref<16x384xbf16, #tpu.memory_space<vmem>>, vector<16x384xbf16>
    tpu.vector_store %arg4[%c0_5, %c0_6], %6 {strides = array<i32>} : memref<16x384xbf16, #tpu.memory_space<vmem>>, vector<16x384xbf16>,
    return
  }
  func.func @transform_0(%arg0: i32) -> (i32, i32) {
    %c0_i32 = arith.constant 0 : i32
    %c0_i32_0 = arith.constant 0 : i32
    return %arg0, %c0_i32 : i32, i32
  }
  func.func @transform_1(%arg0: i32) -> (i32, i32) {
    %c0_i32 = arith.constant 0 : i32
    %c0_i32_0 = arith.constant 0 : i32
    %c0_i32_1 = arith.constant 0 : i32
    return %c0_i32, %c0_i32_0 : i32, i32
  }
  func.func @transform_2(%arg0: i32) -> (i32, i32) {
    %c0_i32 = arith.constant 0 : i32
    %c0_i32_0 = arith.constant 0 : i32
    %c0_i32_1 = arith.constant 0 : i32
    return %c0_i32, %c0_i32_0 : i32, i32
  }
  func.func @transform_3(%arg0: i32) -> (i32, i32) {
    %c0_i32 = arith.constant 0 : i32
    %c0_i32_0 = arith.constant 0 : i32
    return %arg0, %c0_i32 : i32, i32
  }
}

module attributes {stable_mosaic.version = 11 : i64} {
  func.func @_mmn_kernel(%arg0: i32, %arg1: memref<16x384xbf16, #tpu.memory_space<vmem>>, %arg2: memref<16x384xbf16, #tpu.memory_space<vmem>>, %arg3: memref<384x384xbf16, #tpu.memory_space<vmem>>, %arg4: memref<384x384xbf16, #tpu.memory_space<vmem>>, %arg5: memref<1x384xf32, #tpu.memory_space<vmem>>, %arg6: memref<16x384xbf16, #tpu.memory_space<vmem>>) attributes {dimension_semantics = [#tpu.dimension_semantics<parallel>], iteration_bounds = array<i64: 2>, scalar_prefetch = 0 : i64, scratch_operands = 0 : i64, tpu.core_type = #tpu.core_type<tc>, window_params = [{transform_indices = @transform_0, window_bounds = array<i64: 16, 384>}, {transform_indices = @transform_1, window_bounds = array<i64: 16, 384>}, {pipeline_mode = #tpu.pipeline_mode<synchronous>, transform_indices = @transform_2, window_bounds = array<i64: 384, 384>}, {pipeline_mode = #tpu.pipeline_mode<synchronous>, transform_indices = @transform_3, window_bounds = array<i64: 384, 384>}, {pipeline_mode = #tpu.pipeline_mode<synchronous>, transform_indices = @transform_4, window_bounds = array<i64: 1, 384>}, {transform_indices = @transform_5, window_bounds = array<i64: 16, 384>}]} {
    %c0 = arith.constant 0 : index
    %c0_0 = arith.constant 0 : index
    %0 = vector.load %arg1[%c0, %c0_0] : memref<16x384xbf16, #tpu.memory_space<vmem>>, vector<16x384xbf16>
    %c0_1 = arith.constant 0 : index
    %c0_2 = arith.constant 0 : index
    %1 = vector.load %arg3[%c0_1, %c0_2] : memref<384x384xbf16, #tpu.memory_space<vmem>>, vector<384x384xbf16>
    %cst = arith.constant dense<0.000000e+00> : vector<16x384xf32>
    %2 = tpu.matmul %0, %1, %cst {dimension_numbers = #tpu.dot_dimension_numbers<[1], [0], [0], [1], [0, 0, 1, 1], [], []>} : vector<16x384xbf16>, vector<384x384xbf16>, vector<16x384xf32> -> vector<16x384xf32>
    %c0_3 = arith.constant 0 : index
    %c0_4 = arith.constant 0 : index
    %3 = vector.load %arg2[%c0_3, %c0_4] : memref<16x384xbf16, #tpu.memory_space<vmem>>, vector<16x384xbf16>
    %c0_5 = arith.constant 0 : index
    %c0_6 = arith.constant 0 : index
    %4 = vector.load %arg4[%c0_5, %c0_6] : memref<384x384xbf16, #tpu.memory_space<vmem>>, vector<384x384xbf16>
    %cst_7 = arith.constant dense<0.000000e+00> : vector<16x384xf32>
    %5 = tpu.matmul %3, %4, %cst_7 {dimension_numbers = #tpu.dot_dimension_numbers<[1], [0], [0], [1], [0, 0, 1, 1], [], []>} : vector<16x384xbf16>, vector<384x384xbf16>, vector<16x384xf32> -> vector<16x384xf32>
    %6 = arith.addf %2, %5 : vector<16x384xf32>
    %c0_8 = arith.constant 0 : index
    %c0_9 = arith.constant 0 : index
    %7 = vector.load %arg5[%c0_8, %c0_9] : memref<1x384xf32, #tpu.memory_space<vmem>>, vector<1x384xf32>
    %8 = vector.broadcast %7 : vector<1x384xf32> to vector<16x384xf32>
    %9 = arith.addf %6, %8 : vector<16x384xf32>
    %10 = arith.truncf %9 : vector<16x384xf32> to vector<16x384xbf16>
    %c0_10 = arith.constant 0 : index
    %c0_11 = arith.constant 0 : index
    %11 = vector.load %arg6[%c0_10, %c0_11] : memref<16x384xbf16, #tpu.memory_space<vmem>>, vector<16x384xbf16>
    tpu.vector_store %arg6[%c0_10, %c0_11], %10 {strides = array<i32>} : memref<16x384xbf16, #tpu.memory_space<vmem>>, vector<16x384xbf16>,
    return
  }
  func.func @transform_0(%arg0: i32) -> (i32, i32) {
    %c1_i32 = arith.constant 1 : i32
    %c0_i32 = arith.constant 0 : i32
    return %arg0, %c1_i32 : i32, i32
  }
  func.func @transform_1(%arg0: i32) -> (i32, i32) {
    %c0_i32 = arith.constant 0 : i32
    %c0_i32_0 = arith.constant 0 : i32
    return %arg0, %c0_i32 : i32, i32
  }
  func.func @transform_2(%arg0: i32) -> (i32, i32) {
    %c0_i32 = arith.constant 0 : i32
    %c0_i32_0 = arith.constant 0 : i32
    %c0_i32_1 = arith.constant 0 : i32
    return %c0_i32, %c0_i32_0 : i32, i32
  }
  func.func @transform_3(%arg0: i32) -> (i32, i32) {
    %c0_i32 = arith.constant 0 : i32
    %c0_i32_0 = arith.constant 0 : i32
    %c0_i32_1 = arith.constant 0 : i32
    return %c0_i32, %c0_i32_0 : i32, i32
  }
  func.func @transform_4(%arg0: i32) -> (i32, i32) {
    %c0_i32 = arith.constant 0 : i32
    %c0_i32_0 = arith.constant 0 : i32
    %c0_i32_1 = arith.constant 0 : i32
    return %c0_i32, %c0_i32_0 : i32, i32
  }
  func.func @transform_5(%arg0: i32) -> (i32, i32) {
    %c0_i32 = arith.constant 0 : i32
    %c0_i32_0 = arith.constant 0 : i32
    return %arg0, %c0_i32 : i32, i32
  }
}

module attributes {stable_mosaic.version = 11 : i64} {
  func.func @_mmn_kernel(%arg0: i32, %arg1: memref<16x384xbf16, #tpu.memory_space<vmem>>, %arg2: memref<16x384xbf16, #tpu.memory_space<vmem>>, %arg3: memref<384x384xbf16, #tpu.memory_space<vmem>>, %arg4: memref<384x384xbf16, #tpu.memory_space<vmem>>, %arg5: memref<1x384xf32, #tpu.memory_space<vmem>>, %arg6: memref<16x384xbf16, #tpu.memory_space<vmem>>) attributes {dimension_semantics = [#tpu.dimension_semantics<parallel>], iteration_bounds = array<i64: 2>, scalar_prefetch = 0 : i64, scratch_operands = 0 : i64, tpu.core_type = #tpu.core_type<tc>, window_params = [{transform_indices = @transform_0, window_bounds = array<i64: 16, 384>}, {transform_indices = @transform_1, window_bounds = array<i64: 16, 384>}, {pipeline_mode = #tpu.pipeline_mode<synchronous>, transform_indices = @transform_2, window_bounds = array<i64: 384, 384>}, {pipeline_mode = #tpu.pipeline_mode<synchronous>, transform_indices = @transform_3, window_bounds = array<i64: 384, 384>}, {pipeline_mode = #tpu.pipeline_mode<synchronous>, transform_indices = @transform_4, window_bounds = array<i64: 1, 384>}, {transform_indices = @transform_5, window_bounds = array<i64: 16, 384>}]} {
    %c0 = arith.constant 0 : index
    %c0_0 = arith.constant 0 : index
    %0 = vector.load %arg1[%c0, %c0_0] : memref<16x384xbf16, #tpu.memory_space<vmem>>, vector<16x384xbf16>
    %c0_1 = arith.constant 0 : index
    %c0_2 = arith.constant 0 : index
    %1 = vector.load %arg3[%c0_1, %c0_2] : memref<384x384xbf16, #tpu.memory_space<vmem>>, vector<384x384xbf16>
    %cst = arith.constant dense<0.000000e+00> : vector<16x384xf32>
    %2 = tpu.matmul %0, %1, %cst {dimension_numbers = #tpu.dot_dimension_numbers<[1], [0], [0], [1], [0, 0, 1, 1], [], []>} : vector<16x384xbf16>, vector<384x384xbf16>, vector<16x384xf32> -> vector<16x384xf32>
    %c0_3 = arith.constant 0 : index
    %c0_4 = arith.constant 0 : index
    %3 = vector.load %arg2[%c0_3, %c0_4] : memref<16x384xbf16, #tpu.memory_space<vmem>>, vector<16x384xbf16>
    %c0_5 = arith.constant 0 : index
    %c0_6 = arith.constant 0 : index
    %4 = vector.load %arg4[%c0_5, %c0_6] : memref<384x384xbf16, #tpu.memory_space<vmem>>, vector<384x384xbf16>
    %cst_7 = arith.constant dense<0.000000e+00> : vector<16x384xf32>
    %5 = tpu.matmul %3, %4, %cst_7 {dimension_numbers = #tpu.dot_dimension_numbers<[1], [0], [0], [1], [0, 0, 1, 1], [], []>} : vector<16x384xbf16>, vector<384x384xbf16>, vector<16x384xf32> -> vector<16x384xf32>
    %6 = arith.addf %2, %5 : vector<16x384xf32>
    %c0_8 = arith.constant 0 : index
    %c0_9 = arith.constant 0 : index
    %7 = vector.load %arg5[%c0_8, %c0_9] : memref<1x384xf32, #tpu.memory_space<vmem>>, vector<1x384xf32>
    %8 = vector.broadcast %7 : vector<1x384xf32> to vector<16x384xf32>
    %9 = arith.addf %6, %8 : vector<16x384xf32>
    %10 = arith.truncf %9 : vector<16x384xf32> to vector<16x384xbf16>
    %c0_10 = arith.constant 0 : index
    %c0_11 = arith.constant 0 : index
    %11 = vector.load %arg6[%c0_10, %c0_11] : memref<16x384xbf16, #tpu.memory_space<vmem>>, vector<16x384xbf16>
    tpu.vector_store %arg6[%c0_10, %c0_11], %10 {strides = array<i32>} : memref<16x384xbf16, #tpu.memory_space<vmem>>, vector<16x384xbf16>,
    return
  }
  func.func @transform_0(%arg0: i32) -> (i32, i32) {
    %c2_i32 = arith.constant 2 : i32
    %c0_i32 = arith.constant 0 : i32
    return %arg0, %c2_i32 : i32, i32
  }
  func.func @transform_1(%arg0: i32) -> (i32, i32) {
    %c0_i32 = arith.constant 0 : i32
    %c0_i32_0 = arith.constant 0 : i32
    return %arg0, %c0_i32 : i32, i32
  }
  func.func @transform_2(%arg0: i32) -> (i32, i32) {
    %c0_i32 = arith.constant 0 : i32
    %c0_i32_0 = arith.constant 0 : i32
    %c0_i32_1 = arith.constant 0 : i32
    return %c0_i32, %c0_i32_0 : i32, i32
  }
  func.func @transform_3(%arg0: i32) -> (i32, i32) {
    %c0_i32 = arith.constant 0 : i32
    %c0_i32_0 = arith.constant 0 : i32
    %c0_i32_1 = arith.constant 0 : i32
    return %c0_i32, %c0_i32_0 : i32, i32
  }
  func.func @transform_4(%arg0: i32) -> (i32, i32) {
    %c0_i32 = arith.constant 0 : i32
    %c0_i32_0 = arith.constant 0 : i32
    %c0_i32_1 = arith.constant 0 : i32
    return %c0_i32, %c0_i32_0 : i32, i32
  }
  func.func @transform_5(%arg0: i32) -> (i32, i32) {
    %c0_i32 = arith.constant 0 : i32
    %c0_i32_0 = arith.constant 0 : i32
    return %arg0, %c0_i32 : i32, i32
  }
}

module attributes {stable_mosaic.version = 11 : i64} {
  func.func @_mmn_kernel(%arg0: i32, %arg1: memref<16x384xbf16, #tpu.memory_space<vmem>>, %arg2: memref<16x384xbf16, #tpu.memory_space<vmem>>, %arg3: memref<384x384xbf16, #tpu.memory_space<vmem>>, %arg4: memref<384x384xbf16, #tpu.memory_space<vmem>>, %arg5: memref<1x384xf32, #tpu.memory_space<vmem>>, %arg6: memref<16x384xbf16, #tpu.memory_space<vmem>>) attributes {dimension_semantics = [#tpu.dimension_semantics<parallel>], iteration_bounds = array<i64: 2>, scalar_prefetch = 0 : i64, scratch_operands = 0 : i64, tpu.core_type = #tpu.core_type<tc>, window_params = [{transform_indices = @transform_0, window_bounds = array<i64: 16, 384>}, {transform_indices = @transform_1, window_bounds = array<i64: 16, 384>}, {pipeline_mode = #tpu.pipeline_mode<synchronous>, transform_indices = @transform_2, window_bounds = array<i64: 384, 384>}, {pipeline_mode = #tpu.pipeline_mode<synchronous>, transform_indices = @transform_3, window_bounds = array<i64: 384, 384>}, {pipeline_mode = #tpu.pipeline_mode<synchronous>, transform_indices = @transform_4, window_bounds = array<i64: 1, 384>}, {transform_indices = @transform_5, window_bounds = array<i64: 16, 384>}]} {
    %c0 = arith.constant 0 : index
    %c0_0 = arith.constant 0 : index
    %0 = vector.load %arg1[%c0, %c0_0] : memref<16x384xbf16, #tpu.memory_space<vmem>>, vector<16x384xbf16>
    %c0_1 = arith.constant 0 : index
    %c0_2 = arith.constant 0 : index
    %1 = vector.load %arg3[%c0_1, %c0_2] : memref<384x384xbf16, #tpu.memory_space<vmem>>, vector<384x384xbf16>
    %cst = arith.constant dense<0.000000e+00> : vector<16x384xf32>
    %2 = tpu.matmul %0, %1, %cst {dimension_numbers = #tpu.dot_dimension_numbers<[1], [0], [0], [1], [0, 0, 1, 1], [], []>} : vector<16x384xbf16>, vector<384x384xbf16>, vector<16x384xf32> -> vector<16x384xf32>
    %c0_3 = arith.constant 0 : index
    %c0_4 = arith.constant 0 : index
    %3 = vector.load %arg2[%c0_3, %c0_4] : memref<16x384xbf16, #tpu.memory_space<vmem>>, vector<16x384xbf16>
    %c0_5 = arith.constant 0 : index
    %c0_6 = arith.constant 0 : index
    %4 = vector.load %arg4[%c0_5, %c0_6] : memref<384x384xbf16, #tpu.memory_space<vmem>>, vector<384x384xbf16>
    %cst_7 = arith.constant dense<0.000000e+00> : vector<16x384xf32>
    %5 = tpu.matmul %3, %4, %cst_7 {dimension_numbers = #tpu.dot_dimension_numbers<[1], [0], [0], [1], [0, 0, 1, 1], [], []>} : vector<16x384xbf16>, vector<384x384xbf16>, vector<16x384xf32> -> vector<16x384xf32>
    %6 = arith.addf %2, %5 : vector<16x384xf32>
    %c0_8 = arith.constant 0 : index
    %c0_9 = arith.constant 0 : index
    %7 = vector.load %arg5[%c0_8, %c0_9] : memref<1x384xf32, #tpu.memory_space<vmem>>, vector<1x384xf32>
    %8 = vector.broadcast %7 : vector<1x384xf32> to vector<16x384xf32>
    %9 = arith.addf %6, %8 : vector<16x384xf32>
    %10 = arith.truncf %9 : vector<16x384xf32> to vector<16x384xbf16>
    %c0_10 = arith.constant 0 : index
    %c0_11 = arith.constant 0 : index
    %11 = vector.load %arg6[%c0_10, %c0_11] : memref<16x384xbf16, #tpu.memory_space<vmem>>, vector<16x384xbf16>
    tpu.vector_store %arg6[%c0_10, %c0_11], %10 {strides = array<i32>} : memref<16x384xbf16, #tpu.memory_space<vmem>>, vector<16x384xbf16>,
    return
  }
  func.func @transform_0(%arg0: i32) -> (i32, i32) {
    %c0_i32 = arith.constant 0 : i32
    %c0_i32_0 = arith.constant 0 : i32
    return %arg0, %c0_i32 : i32, i32
  }
  func.func @transform_1(%arg0: i32) -> (i32, i32) {
    %c0_i32 = arith.constant 0 : i32
    %c0_i32_0 = arith.constant 0 : i32
    return %arg0, %c0_i32 : i32, i32
  }
  func.func @transform_2(%arg0: i32) -> (i32, i32) {
    %c0_i32 = arith.constant 0 : i32
    %c0_i32_0 = arith.constant 0 : i32
    %c0_i32_1 = arith.constant 0 : i32
    return %c0_i32, %c0_i32_0 : i32, i32
  }
  func.func @transform_3(%arg0: i32) -> (i32, i32) {
    %c0_i32 = arith.constant 0 : i32
    %c0_i32_0 = arith.constant 0 : i32
    %c0_i32_1 = arith.constant 0 : i32
    return %c0_i32, %c0_i32_0 : i32, i32
  }
  func.func @transform_4(%arg0: i32) -> (i32, i32) {
    %c0_i32 = arith.constant 0 : i32
    %c0_i32_0 = arith.constant 0 : i32
    %c0_i32_1 = arith.constant 0 : i32
    return %c0_i32, %c0_i32_0 : i32, i32
  }
  func.func @transform_5(%arg0: i32) -> (i32, i32) {
    %c0_i32 = arith.constant 0 : i32
    %c0_i32_0 = arith.constant 0 : i32
    return %arg0, %c0_i32 : i32, i32
  }
}

module attributes {stable_mosaic.version = 11 : i64} {
  func.func @_mmn_kernel(%arg0: i32, %arg1: memref<16x384xbf16, #tpu.memory_space<vmem>>, %arg2: memref<16x384xbf16, #tpu.memory_space<vmem>>, %arg3: memref<16x384xbf16, #tpu.memory_space<vmem>>, %arg4: memref<16x384xbf16, #tpu.memory_space<vmem>>, %arg5: memref<384x256xbf16, #tpu.memory_space<vmem>>, %arg6: memref<384x256xbf16, #tpu.memory_space<vmem>>, %arg7: memref<384x256xbf16, #tpu.memory_space<vmem>>, %arg8: memref<384x256xbf16, #tpu.memory_space<vmem>>, %arg9: memref<1x256xf32, #tpu.memory_space<vmem>>, %arg10: memref<16x256xf32, #tpu.memory_space<vmem>>) attributes {dimension_semantics = [#tpu.dimension_semantics<parallel>], iteration_bounds = array<i64: 2>, scalar_prefetch = 0 : i64, scratch_operands = 0 : i64, tpu.core_type = #tpu.core_type<tc>, window_params = [{transform_indices = @transform_0, window_bounds = array<i64: 16, 384>}, {transform_indices = @transform_1, window_bounds = array<i64: 16, 384>}, {transform_indices = @transform_2, window_bounds = array<i64: 16, 384>}, {transform_indices = @transform_3, window_bounds = array<i64: 16, 384>}, {pipeline_mode = #tpu.pipeline_mode<synchronous>, transform_indices = @transform_4, window_bounds = array<i64: 384, 256>}, {pipeline_mode = #tpu.pipeline_mode<synchronous>, transform_indices = @transform_5, window_bounds = array<i64: 384, 256>}, {pipeline_mode = #tpu.pipeline_mode<synchronous>, transform_indices = @transform_6, window_bounds = array<i64: 384, 256>}, {pipeline_mode = #tpu.pipeline_mode<synchronous>, transform_indices = @transform_7, window_bounds = array<i64: 384, 256>}, {pipeline_mode = #tpu.pipeline_mode<synchronous>, transform_indices = @transform_8, window_bounds = array<i64: 1, 256>}, {transform_indices = @transform_9, window_bounds = array<i64: 16, 256>}]} {
    %c0 = arith.constant 0 : index
    %c0_0 = arith.constant 0 : index
    %0 = vector.load %arg1[%c0, %c0_0] : memref<16x384xbf16, #tpu.memory_space<vmem>>, vector<16x384xbf16>
    %c0_1 = arith.constant 0 : index
    %c0_2 = arith.constant 0 : index
    %1 = vector.load %arg5[%c0_1, %c0_2] : memref<384x256xbf16, #tpu.memory_space<vmem>>, vector<384x256xbf16>
    %cst = arith.constant dense<0.000000e+00> : vector<16x256xf32>
    %2 = tpu.matmul %0, %1, %cst {dimension_numbers = #tpu.dot_dimension_numbers<[1], [0], [0], [1], [0, 0, 1, 1], [], []>} : vector<16x384xbf16>, vector<384x256xbf16>, vector<16x256xf32> -> vector<16x256xf32>
    %c0_3 = arith.constant 0 : index
    %c0_4 = arith.constant 0 : index
    %3 = vector.load %arg2[%c0_3, %c0_4] : memref<16x384xbf16, #tpu.memory_space<vmem>>, vector<16x384xbf16>
    %c0_5 = arith.constant 0 : index
    %c0_6 = arith.constant 0 : index
    %4 = vector.load %arg6[%c0_5, %c0_6] : memref<384x256xbf16, #tpu.memory_space<vmem>>, vector<384x256xbf16>
    %cst_7 = arith.constant dense<0.000000e+00> : vector<16x256xf32>
    %5 = tpu.matmul %3, %4, %cst_7 {dimension_numbers = #tpu.dot_dimension_numbers<[1], [0], [0], [1], [0, 0, 1, 1], [], []>} : vector<16x384xbf16>, vector<384x256xbf16>, vector<16x256xf32> -> vector<16x256xf32>
    %6 = arith.addf %2, %5 : vector<16x256xf32>
    %c0_8 = arith.constant 0 : index
    %c0_9 = arith.constant 0 : index
    %7 = vector.load %arg3[%c0_8, %c0_9] : memref<16x384xbf16, #tpu.memory_space<vmem>>, vector<16x384xbf16>
    %c0_10 = arith.constant 0 : index
    %c0_11 = arith.constant 0 : index
    %8 = vector.load %arg7[%c0_10, %c0_11] : memref<384x256xbf16, #tpu.memory_space<vmem>>, vector<384x256xbf16>
    %cst_12 = arith.constant dense<0.000000e+00> : vector<16x256xf32>
    %9 = tpu.matmul %7, %8, %cst_12 {dimension_numbers = #tpu.dot_dimension_numbers<[1], [0], [0], [1], [0, 0, 1, 1], [], []>} : vector<16x384xbf16>, vector<384x256xbf16>, vector<16x256xf32> -> vector<16x256xf32>
    %10 = arith.addf %6, %9 : vector<16x256xf32>
    %c0_13 = arith.constant 0 : index
    %c0_14 = arith.constant 0 : index
    %11 = vector.load %arg4[%c0_13, %c0_14] : memref<16x384xbf16, #tpu.memory_space<vmem>>, vector<16x384xbf16>
    %c0_15 = arith.constant 0 : index
    %c0_16 = arith.constant 0 : index
    %12 = vector.load %arg8[%c0_15, %c0_16] : memref<384x256xbf16, #tpu.memory_space<vmem>>, vector<384x256xbf16>
    %cst_17 = arith.constant dense<0.000000e+00> : vector<16x256xf32>
    %13 = tpu.matmul %11, %12, %cst_17 {dimension_numbers = #tpu.dot_dimension_numbers<[1], [0], [0], [1], [0, 0, 1, 1], [], []>} : vector<16x384xbf16>, vector<384x256xbf16>, vector<16x256xf32> -> vector<16x256xf32>
    %14 = arith.addf %10, %13 : vector<16x256xf32>
    %c0_18 = arith.constant 0 : index
    %c0_19 = arith.constant 0 : index
    %15 = vector.load %arg9[%c0_18, %c0_19] : memref<1x256xf32, #tpu.memory_space<vmem>>, vector<1x256xf32>
    %16 = vector.broadcast %15 : vector<1x256xf32> to vector<16x256xf32>
    %17 = arith.addf %14, %16 : vector<16x256xf32>
    %c0_20 = arith.constant 0 : index
    %c0_21 = arith.constant 0 : index
    %18 = vector.load %arg10[%c0_20, %c0_21] : memref<16x256xf32, #tpu.memory_space<vmem>>, vector<16x256xf32>
    tpu.vector_store %arg10[%c0_20, %c0_21], %17 {strides = array<i32>} : memref<16x256xf32, #tpu.memory_space<vmem>>, vector<16x256xf32>,
    return
  }
  func.func @transform_0(%arg0: i32) -> (i32, i32) {
    %c0_i32 = arith.constant 0 : i32
    %c0_i32_0 = arith.constant 0 : i32
    return %arg0, %c0_i32 : i32, i32
  }
  func.func @transform_1(%arg0: i32) -> (i32, i32) {
    %c0_i32 = arith.constant 0 : i32
    %c0_i32_0 = arith.constant 0 : i32
    return %arg0, %c0_i32 : i32, i32
  }
  func.func @transform_2(%arg0: i32) -> (i32, i32) {
    %c0_i32 = arith.constant 0 : i32
    %c0_i32_0 = arith.constant 0 : i32
    return %arg0, %c0_i32 : i32, i32
  }
  func.func @transform_3(%arg0: i32) -> (i32, i32) {
    %c0_i32 = arith.constant 0 : i32
    %c0_i32_0 = arith.constant 0 : i32
    return %arg0, %c0_i32 : i32, i32
  }
  func.func @transform_4(%arg0: i32) -> (i32, i32) {
    %c0_i32 = arith.constant 0 : i32
    %c0_i32_0 = arith.constant 0 : i32
    %c0_i32_1 = arith.constant 0 : i32
    return %c0_i32, %c0_i32_0 : i32, i32
  }
  func.func @transform_5(%arg0: i32) -> (i32, i32) {
    %c0_i32 = arith.constant 0 : i32
    %c0_i32_0 = arith.constant 0 : i32
    %c0_i32_1 = arith.constant 0 : i32
    return %c0_i32, %c0_i32_0 : i32, i32
  }
  func.func @transform_6(%arg0: i32) -> (i32, i32) {
    %c0_i32 = arith.constant 0 : i32
    %c0_i32_0 = arith.constant 0 : i32
    %c0_i32_1 = arith.constant 0 : i32
    return %c0_i32, %c0_i32_0 : i32, i32
  }
  func.func @transform_7(%arg0: i32) -> (i32, i32) {
    %c0_i32 = arith.constant 0 : i32
    %c0_i32_0 = arith.constant 0 : i32
    %c0_i32_1 = arith.constant 0 : i32
    return %c0_i32, %c0_i32_0 : i32, i32
  }
  func.func @transform_8(%arg0: i32) -> (i32, i32) {
    %c0_i32 = arith.constant 0 : i32
    %c0_i32_0 = arith.constant 0 : i32
    %c0_i32_1 = arith.constant 0 : i32
    return %c0_i32, %c0_i32_0 : i32, i32
  }
  func.func @transform_9(%arg0: i32) -> (i32, i32) {
    %c0_i32 = arith.constant 0 : i32
    %c0_i32_0 = arith.constant 0 : i32
    return %arg0, %c0_i32 : i32, i32
  }
}

</mosaic_0001>

<bundles_post_ra>
// kernel: net_forward.23
= control target key start
LH: loop header
LB: loop body
LE: loop exit
PB: predicated region body
PF: predicated region fallthrough
CT: control target
= control target key end

     0   :  { %s2013_s12 = smov 0   ;;  %s2495_s0 = inlined_call_operand.vmem [shape: bf16[32,768], index: 0, kind: input, shape index: {}]   ;;  %s2496_s1 = inlined_call_operand.vmem [shape: bf16[768,384], index: 1, kind: input, shape index: {}]   ;;  %s2497_s2 = inlined_call_operand.vmem [shape: f32[1,384], index: 2, kind: input, shape index: {}]   ;;  %s2498_s3 = inlined_call_operand.vmem [shape: bf16[32,384], index: 3, kind: output, shape index: {}]  }
   0x1 LB: > { %s1527_s13 = sadd.s32 4294967295, %s1991_s12   ;;  %p1531_p0 = scmp.ge.s32.totalorder %s1991_s12, 1  ;;  %s1991_s12 = sphi %s2013_s12, %s13_s12  }
   0x2   : > { %p139_p1 = scmp.lt.s32.totalorder %s1991_s12, 3 }
   0x4   : > { %p140_p2 = pnand %p1531_p0, %p139_p1 }
   0x5   : > { %v1784_v0 = vld [vmem:[%s2496_s1 + $0x4] ss:$12 sps:$4 sm:$0xff] (!%p140_p2)   ;;  %v1788_v2 = vld [vmem:[%s2496_s1] ss:$12 sps:$4 sm:$0xff] (!%p140_p2)   ;;  %v1790_v4 = vld [vmem:[%s2496_s1 + $0x1c] ss:$12 sps:$4 sm:$0xff] (!%p140_p2)  }
   0x6   : > { %143 = sbr.rel (%p140_p2) target bundleno = 388 (0x184), region = 32  ;;  %v1786_v1 = vld [vmem:[%s2496_s1 + $0x184] ss:$12 sps:$4 sm:$0xff] (!%p140_p2)   ;;  %1193 = vmatprep.subr.bf16.mxu1 (!%p140_p2), %v1784_v0  ;;  %v1789_v3 = vld [vmem:[%s2496_s1 + $0x180] ss:$12 sps:$4 sm:$0xff] (!%p140_p2)   ;;  %s1532_s24 = sshll.u32 (!%p140_p2), %s1527_s13, 1 }
   0x7   : > { %1236 = vmatprep.subr.bf16.mxu0 (!%p140_p2), %v1786_v1  ;;  %1194 = vmatpush1.bf16.msra.mxu1 (!%p140_p2), %v1788_v2  ;;  %v1792_v5 = vld [vmem:[%s2496_s1 + $0x19c] ss:$12 sps:$4 sm:$0xff] (!%p140_p2)   ;;  %v1794_v6 = vld [vmem:[%s2496_s1 + $0x18] ss:$12 sps:$4 sm:$0xff] (!%p140_p2)   ;;  %v1796_v8 = vld [vmem:[%s2496_s1 + $0x34] ss:$12 sps:$4 sm:$0xff] (!%p140_p2)  }
   0x8   : > { %1237 = vmatpush1.bf16.msra.mxu0 (!%p140_p2), %v1789_v3  ;;  %1195 = vmatprep.subr.bf16.mxu1 (!%p140_p2), %v1790_v4  ;;  %v1795_v7 = vld [vmem:[%s2496_s1 + $0x198] ss:$12 sps:$4 sm:$0xff] (!%p140_p2)   ;;  %v1798_v9 = vld [vmem:[%s2496_s1 + $0x1b4] ss:$12 sps:$4 sm:$0xff] (!%p140_p2)   ;;  %v1800_v10 = vld [vmem:[%s2496_s1 + $0x30] ss:$12 sps:$4 sm:$0xff] (!%p140_p2)  }
   0x9   : > { %1238 = vmatprep.subr.bf16.mxu0 (!%p140_p2), %v1792_v5  ;;  %v1801_v11 = vld [vmem:[%s2496_s1 + $0x1b0] ss:$12 sps:$4 sm:$0xff] (!%p140_p2)   ;;  %v1802_v12 = vld [vmem:[%s2496_s1 + $0x4c] ss:$12 sps:$4 sm:$0xff] (!%p140_p2)   ;;  %v1806_v14 = vld [vmem:[%s2496_s1 + $0x48] ss:$12 sps:$4 sm:$0xff] (!%p140_p2)  }
   0xa   : > { %v1804_v13 = vld [vmem:[%s2496_s1 + $0x1cc] ss:$12 sps:$4 sm:$0xff] (!%p140_p2)   ;;  %v1807_v15 = vld [vmem:[%s2496_s1 + $0x1c8] ss:$12 sps:$4 sm:$0xff] (!%p140_p2)   ;;  %v1808_v16 = vld [vmem:[%s2496_s1 + $0x64] ss:$12 sps:$4 sm:$0xff] (!%p140_p2)  }
   0xb   : > { %1196 = vmatpush1.bf16.msra.mxu1 (!%p140_p2), %v1794_v6  ;;  %v1810_v17 = vld [vmem:[%s2496_s1 + $0x1e4] ss:$12 sps:$4 sm:$0xff] (!%p140_p2)   ;;  %v1812_v18 = vld [vmem:[%s2496_s1 + $0x60] ss:$12 sps:$4 sm:$0xff] (!%p140_p2)   ;;  %v1814_v20 = vld [vmem:[%s2496_s1 + $0x7c] ss:$12 sps:$4 sm:$0xff] (!%p140_p2)  }
   0xc   : > { %1239 = vmatpush1.bf16.msra.mxu0 (!%p140_p2), %v1795_v7  ;;  %1197 = vmatprep.subr.bf16.mxu1 (!%p140_p2), %v1796_v8  ;;  %v1813_v19 = vld [vmem:[%s2496_s1 + $0x1e0] ss:$12 sps:$4 sm:$0xff] (!%p140_p2)   ;;  %v1816_v21 = vld [vmem:[%s2496_s1 + $0x1fc] ss:$12 sps:$4 sm:$0xff] (!%p140_p2)   ;;  %v1818_v22 = vld [vmem:[%s2496_s1 + $0x78] ss:$12 sps:$4 sm:$0xff] (!%p140_p2)  }
   0xd   : > { %1240 = vmatprep.subr.bf16.mxu0 %v1798_v9  ;;  %v1819_v23 = vld [vmem:[%s2496_s1 + $0x1f8] ss:$12 sps:$4 sm:$0xff]   ;;  %v1820_v24 = vld [vmem:[%s2496_s1 + $0x94] ss:$12 sps:$4 sm:$0xff]   ;;  %v1824_v26 = vld [vmem:[%s2496_s1 + $0x90] ss:$12 sps:$4 sm:$0xff]  }
   0xe   : > { %v1822_v25 = vld [vmem:[%s2496_s1 + $0x214] ss:$12 sps:$4 sm:$0xff]   ;;  %v1825_v27 = vld [vmem:[%s2496_s1 + $0x210] ss:$12 sps:$4 sm:$0xff]   ;;  %v1826_v28 = vld [vmem:[%s2496_s1 + $0xac] ss:$12 sps:$4 sm:$0xff]  }
   0xf   : > { %1198 = vmatpush1.bf16.msra.mxu1 %v1800_v10  ;;  %v1828_v29 = vld [vmem:[%s2496_s1 + $0x22c] ss:$12 sps:$4 sm:$0xff]   ;;  %v1830_v30 = vld [vmem:[%s2496_s1 + $0xa8] ss:$12 sps:$4 sm:$0xff]   ;;  %v1832_v32 = vld [vmem:[%s2496_s1 + $0xc4] ss:$12 sps:$4 sm:$0xff]  }
  0x10   : > { %1241 = vmatpush1.bf16.msra.mxu0 %v1801_v11  ;;  %1199 = vmatprep.subr.bf16.mxu1 %v1802_v12  ;;  %v1831_v31 = vld [vmem:[%s2496_s1 + $0x228] ss:$12 sps:$4 sm:$0xff]   ;;  %p166_p3 = scmp.lt.s32.totalorder %s1532_s24, 3  ;;  %v1834_v33 = vld [vmem:[%s2496_s1 + $0x244] ss:$12 sps:$4 sm:$0xff]  }
  0x11   : > { %1242 = vmatprep.subr.bf16.mxu0 %v1804_v13  ;;  %v1836_v34 = vld [vmem:[%s2496_s1 + $0xc0] ss:$12 sps:$4 sm:$0xff]   ;;  %v1838_v36 = vld [vmem:[%s2496_s1 + $0xdc] ss:$12 sps:$4 sm:$0xff]   ;;  %v1842_v38 = vld [vmem:[%s2496_s1 + $0xd8] ss:$12 sps:$4 sm:$0xff]  }
  0x12   : > { %v1837_v35 = vld [vmem:[%s2496_s1 + $0x240] ss:$12 sps:$4 sm:$0xff]   ;;  %s2500_s24 = smov (!%p166_p3, %s1532_s24), 3  ;;  %v1840_v37 = vld [vmem:[%s2496_s1 + $0x25c] ss:$12 sps:$4 sm:$0xff]  }
  0x13   : > { %1200 = vmatpush1.bf16.msra.mxu1 %v1806_v14  ;;  %v1843_v39 = vld [vmem:[%s2496_s1 + $0x258] ss:$12 sps:$4 sm:$0xff]   ;;  %v1844_v40 = vld [vmem:[%s2496_s1 + $0xf4] ss:$12 sps:$4 sm:$0xff]   ;;  %s1774_s21 = smul.u32 24, %s2500_s24 }
  0x14   : > { %1243 = vmatpush1.bf16.msra.mxu0 %v1807_v15  ;;  %1201 = vmatprep.subr.bf16.mxu1 %v1808_v16  ;;  %v1846_v41 = vld [vmem:[%s2496_s1 + $0x274] ss:$12 sps:$4 sm:$0xff]   ;;  %v1848_v42 = vld [vmem:[%s2496_s1 + $0xf0] ss:$12 sps:$4 sm:$0xff]   ;;  %v1850_v44 = vld [vmem:[%s2496_s1 + $0x10c] ss:$12 sps:$4 sm:$0xff]  }
  0x15   : > { %1244 = vmatprep.subr.bf16.mxu0 %v1810_v17  ;;  %v1849_v43 = vld [vmem:[%s2496_s1 + $0x270] ss:$12 sps:$4 sm:$0xff]   ;;  %s2164_s13 = scalar_lea.vmem %s2495_s0, %s1774_s21  ;;  %v1852_v45 = vld [vmem:[%s2496_s1 + $0x28c] ss:$12 sps:$4 sm:$0xff]   ;;  %v1854_v46 = vld [vmem:[%s2496_s1 + $0x108] ss:$12 sps:$4 sm:$0xff]  }
  0x16   : > { %v1855_v47 = vld [vmem:[%s2496_s1 + $0x288] ss:$12 sps:$4 sm:$0xff]   ;;  %v1856_v48 = vld [vmem:[%s2496_s1 + $0x124] ss:$12 sps:$4 sm:$0xff]   ;;  %v1860_v52 = vld [vmem:[%s2496_s1 + $0x120] ss:$12 sps:$4 sm:$0xff]  }
  0x17   : > { %1202 = vmatpush1.bf16.msra.mxu1 %v1812_v18  ;;  %v1882_v49 = vld [vmem:[%s2164_s13 + $0x4] ss:$24 sps:$4 sm:$0xff]   ;;  %v1861_v53 = vld [vmem:[%s2496_s1 + $0x2a0] ss:$12 sps:$4 sm:$0xff]   ;;  %v1878_v0 = vld [vmem:[%s2496_s1 + $0x168] ss:$12 sps:$4 sm:$0xff]  }
  0x18   : > { %1245 = vmatpush1.bf16.msra.mxu0 %v1813_v19  ;;  %1203 = vmatprep.subr.bf16.mxu1 %v1814_v20  ;;  %v1858_v50 = vld [vmem:[%s2496_s1 + $0x2a4] ss:$12 sps:$4 sm:$0xff]   ;;  %v1862_v54 = vld [vmem:[%s2496_s1 + $0x13c] ss:$12 sps:$4 sm:$0xff]   ;;  %v1868_v58 = vld [vmem:[%s2496_s1 + $0x154] ss:$12 sps:$4 sm:$0xff]  }
  0x19   : > { %1246 = vmatprep.subr.bf16.mxu0 %v1816_v21  ;;  %v2183_v51 = vld [vmem:[%s2164_s13 + $0xc] ss:$24 sps:$4 sm:$0xff]   ;;  %1225 = vmatprep.mubr.bf16.mxu1 %v1882_v49  ;;  %v1864_v55 = vld [vmem:[%s2496_s1 + $0x2bc] ss:$12 sps:$4 sm:$0xff]   ;;  %v1870_v59 = vld [vmem:[%s2496_s1 + $0x2d4] ss:$12 sps:$4 sm:$0xff]  }
  0x1a   : > { %1268 = vmatprep.mubr.bf16.mxu0 %v2183_v51  ;;  %v1866_v56 = vld [vmem:[%s2496_s1 + $0x138] ss:$12 sps:$4 sm:$0xff]   ;;  %v1872_v60 = vld [vmem:[%s2496_s1 + $0x150] ss:$12 sps:$4 sm:$0xff]   ;;  %v1879_v1 = vld [vmem:[%s2496_s1 + $0x2e8] ss:$12 sps:$4 sm:$0xff]  }
  0x1b   : > { %1204 = vmatpush1.bf16.msra.mxu1 %v1818_v22  ;;  %v1867_v57 = vld [vmem:[%s2496_s1 + $0x2b8] ss:$12 sps:$4 sm:$0xff]   ;;  %v1873_v61 = vld [vmem:[%s2496_s1 + $0x2d0] ss:$12 sps:$4 sm:$0xff]   ;;  %v2235_v4 = vld [vmem:[%s2164_s13 + $0x8] ss:$24 sps:$4 sm:$0xff]  }
  0x1c   : > { %1247 = vmatpush1.bf16.msra.mxu0 %v1819_v23  ;;  %1205 = vmatprep.subr.bf16.mxu1 %v1820_v24  ;;  %v1874_v62 = vld [vmem:[%s2496_s1 + $0x16c] ss:$12 sps:$4 sm:$0xff]   ;;  %v1888_v2 = vld [vmem:[%s2496_s1 + $0x304] ss:$12 sps:$4 sm:$0xff]   ;;  %v1889_v5 = vld [vmem:[%s2496_s1 + $0xc8] ss:$12 sps:$4 sm:$0xff]  }
  0x1d   : > { %1248 = vmatprep.subr.bf16.mxu0 %v1822_v25  ;;  %v1876_v63 = vld [vmem:[%s2496_s1 + $0x2ec] ss:$12 sps:$4 sm:$0xff]   ;;  %v1890_v7 = vld [vmem:[%s2496_s1 + $0x8] ss:$12 sps:$4 sm:$0xff]   ;;  %v1896_v14 = vld [vmem:[%s2496_s1 + $0x330] ss:$12 sps:$4 sm:$0xff]  }
  0x1e   : > { %v2232_v3 = vld [vmem:[%s2164_s13] ss:$24 sps:$4 sm:$0xff]   ;;  %v1893_v8 = vld [vmem:[%s2496_s1 + $0x31c] ss:$12 sps:$4 sm:$0xff]   ;;  %v1908_v20 = vld [vmem:[%s2496_s1 + $0x364] ss:$12 sps:$4 sm:$0xff]  }
  0x1f   : > { %1206 = vmatpush1.bf16.msra.mxu1 %v1824_v26  ;;  %v1886_v6 = vld [vmem:[%s2496_s1 + $0x300] ss:$12 sps:$4 sm:$0xff]   ;;  %v1891_v10 = vld [vmem:[%s2496_s1 + $0x318] ss:$12 sps:$4 sm:$0xff]   ;;  %v1904_v17 = vld [vmem:[%s2496_s1 + $0x110] ss:$12 sps:$4 sm:$0xff]  }
  0x20   : > { %1249 = vmatpush1.bf16.msra.mxu0 %v1825_v27  ;;  %1207 = vmatprep.subr.bf16.mxu1 %v1826_v28  ;;  %v1894_v9 = vld [vmem:[%s2496_s1 + $0xe0] ss:$12 sps:$4 sm:$0xff]   ;;  %v1899_v13 = vld [vmem:[%s2496_s1 + $0xf8] ss:$12 sps:$4 sm:$0xff]   ;;  %v1901_v18 = vld [vmem:[%s2496_s1 + $0x348] ss:$12 sps:$4 sm:$0xff]  }
  0x21   : > { %1250 = vmatprep.subr.bf16.mxu0 %v1828_v29  ;;  %v1895_v11 = vld [vmem:[%s2496_s1 + $0x20] ss:$12 sps:$4 sm:$0xff]   ;;  %v1900_v15 = vld [vmem:[%s2496_s1 + $0x38] ss:$12 sps:$4 sm:$0xff]   ;;  %v1905_v19 = vld [vmem:[%s2496_s1 + $0x50] ss:$12 sps:$4 sm:$0xff]  }
  0x22   : > { %v1898_v12 = vld [vmem:[%s2496_s1 + $0x334] ss:$12 sps:$4 sm:$0xff]   ;;  %v1903_v16 = vld [vmem:[%s2496_s1 + $0x34c] ss:$12 sps:$4 sm:$0xff]   ;;  %v1913_v24 = vld [vmem:[%s2496_s1 + $0x37c] ss:$12 sps:$4 sm:$0xff]  }
  0x23   : > { %1208 = vmatpush1.bf16.msra.mxu1 %v1830_v30  ;;  %v1909_v21 = vld [vmem:[%s2496_s1 + $0x128] ss:$12 sps:$4 sm:$0xff]   ;;  %v1906_v22 = vld [vmem:[%s2496_s1 + $0x360] ss:$12 sps:$4 sm:$0xff]   ;;  %v1911_v26 = vld [vmem:[%s2496_s1 + $0x378] ss:$12 sps:$4 sm:$0xff]  }
  0x24   : > { %1251 = vmatpush1.bf16.msra.mxu0 %v1831_v31  ;;  %1209 = vmatprep.subr.bf16.mxu1 %v1832_v32  ;;  %v1910_v23 = vld [vmem:[%s2496_s1 + $0x68] ss:$12 sps:$4 sm:$0xff]   ;;  %v1914_v25 = vld [vmem:[%s2496_s1 + $0x140] ss:$12 sps:$4 sm:$0xff]   ;;  %v1919_v29 = vld [vmem:[%s2496_s1 + $0x158] ss:$12 sps:$4 sm:$0xff]  }
  0x25   : > { %1252 = vmatprep.subr.bf16.mxu0 %v1834_v33  ;;  %v1915_v27 = vld [vmem:[%s2496_s1 + $0x80] ss:$12 sps:$4 sm:$0xff]   ;;  %v1916_v30 = vld [vmem:[%s2496_s1 + $0x390] ss:$12 sps:$4 sm:$0xff]   ;;  %v1920_v31 = vld [vmem:[%s2496_s1 + $0x98] ss:$12 sps:$4 sm:$0xff]  }
  0x26   : > { %v1918_v28 = vld [vmem:[%s2496_s1 + $0x394] ss:$12 sps:$4 sm:$0xff]   ;;  %v1923_v32 = vld [vmem:[%s2496_s1 + $0x3ac] ss:$12 sps:$4 sm:$0xff]   ;;  %v1924_v33 = vld [vmem:[%s2496_s1 + $0x170] ss:$12 sps:$4 sm:$0xff]  }
  0x27   : > { %1210 = vmatpush1.bf16.msra.mxu1 %v1836_v34  ;;  %v1921_v34 = vld [vmem:[%s2496_s1 + $0x3a8] ss:$12 sps:$4 sm:$0xff]   ;;  %s1775_s14 = smul.u32 12, %s2500_s24 }
  0x28   : > { %1253 = vmatpush1.bf16.msra.mxu0 %v1837_v35  ;;  %1211 = vmatprep.subr.bf16.mxu1 %v1838_v36  ;;  %v1925_v35 = vld [vmem:[%s2496_s1 + $0xb0] ss:$12 sps:$4 sm:$0xff]  }
  0x29   : > { %1254 = vmatprep.subr.bf16.mxu0 %v1840_v37  ;;  %v1928_v36 = vld [vmem:[%s2496_s1 + $0x3c4] ss:$12 sps:$4 sm:$0xff]   ;;  %v1929_v37 = vld [vmem:[%s2496_s1 + $0x248] ss:$12 sps:$4 sm:$0xff]   ;;  %s177_s17 = scalar_lea.vmem %s2498_s3, %s1775_s14 }
  0x2b   : > { %1212 = vmatpush1.bf16.msra.mxu1 %v1842_v38  ;;  %v1926_v38 = vld [vmem:[%s2496_s1 + $0x3c0] ss:$12 sps:$4 sm:$0xff]  }
  0x2c   : > { %1255 = vmatpush1.bf16.msra.mxu0 %v1843_v39  ;;  %1213 = vmatprep.subr.bf16.mxu1 %v1844_v40  ;;  %v1930_v39 = vld [vmem:[%s2496_s1 + $0x188] ss:$12 sps:$4 sm:$0xff]  }
  0x2d   : > { %1256 = vmatprep.subr.bf16.mxu0 %v1846_v41  ;;  %v1933_v40 = vld [vmem:[%s2496_s1 + $0x3dc] ss:$12 sps:$4 sm:$0xff]   ;;  %v1934_v41 = vld [vmem:[%s2496_s1 + $0x260] ss:$12 sps:$4 sm:$0xff]  }
  0x2f   : > { %1214 = vmatpush1.bf16.msra.mxu1 %v1848_v42  ;;  %v1931_v42 = vld [vmem:[%s2496_s1 + $0x3d8] ss:$12 sps:$4 sm:$0xff]  }
  0x30   : > { %1257 = vmatpush1.bf16.msra.mxu0 %v1849_v43  ;;  %1215 = vmatprep.subr.bf16.mxu1 %v1850_v44  ;;  %v1935_v43 = vld [vmem:[%s2496_s1 + $0x1a0] ss:$12 sps:$4 sm:$0xff]  }
  0x31   : > { %1258 = vmatprep.subr.bf16.mxu0 %v1852_v45  ;;  %v2358_v44 = vld [vmem:[%s2164_s13 + $0x14] ss:$24 sps:$4 sm:$0xff]  }
  0x32   : > { %v1938_v45 = vld [vmem:[%s2496_s1 + $0x3f4] ss:$12 sps:$4 sm:$0xff]  }
  0x33   : > { %1216 = vmatpush1.bf16.msra.mxu1 %v1854_v46  ;;  %v1939_v46 = vld [vmem:[%s2496_s1 + $0x278] ss:$12 sps:$4 sm:$0xff]  }
  0x34   : > { %1259 = vmatpush1.bf16.msra.mxu0 %v1855_v47  ;;  %1217 = vmatprep.subr.bf16.mxu1 %v1856_v48  ;;  %v1936_v47 = vld [vmem:[%s2496_s1 + $0x3f0] ss:$12 sps:$4 sm:$0xff]   ;;  %v1940_v48 = vld [vmem:[%s2496_s1 + $0x1b8] ss:$12 sps:$4 sm:$0xff]  }
  0x35   : > { %1260 = vmatprep.subr.bf16.mxu0 %v1858_v50  ;;  %v1944_v50 = vld [vmem:[%s2496_s1 + $0x290] ss:$12 sps:$4 sm:$0xff]  }
  0x37   : > { %1218 = vmatpush1.bf16.msra.mxu1 %v1860_v52  ;;  %v1945_v52 = vld [vmem:[%s2496_s1 + $0x1d0] ss:$12 sps:$4 sm:$0xff]  }
  0x38   : > { %1261 = vmatpush1.bf16.msra.mxu0 %v1861_v53  ;;  %1219 = vmatprep.subr.bf16.mxu1 %v1862_v54  ;;  %v1948_v53 = vld [vmem:[%s2496_s1 + $0x424] ss:$12 sps:$4 sm:$0xff]   ;;  %v1949_v54 = vld [vmem:[%s2496_s1 + $0x2a8] ss:$12 sps:$4 sm:$0xff]  }
  0x39   : > { %1262 = vmatprep.subr.bf16.mxu0 %v1864_v55  ;;  %v1946_v55 = vld [vmem:[%s2496_s1 + $0x420] ss:$12 sps:$4 sm:$0xff]  }
  0x3b   : > { %1220 = vmatpush1.bf16.msra.mxu1 %v1866_v56  ;;  %v1950_v56 = vld [vmem:[%s2496_s1 + $0x1e8] ss:$12 sps:$4 sm:$0xff]  }
  0x3c   : > { %1263 = vmatpush1.bf16.msra.mxu0 %v1867_v57  ;;  %1221 = vmatprep.subr.bf16.mxu1 %v1868_v58  ;;  %v1953_v57 = vld [vmem:[%s2496_s1 + $0x43c] ss:$12 sps:$4 sm:$0xff]   ;;  %v1954_v58 = vld [vmem:[%s2496_s1 + $0x2c0] ss:$12 sps:$4 sm:$0xff]  }
  0x3d   : > { %1264 = vmatprep.subr.bf16.mxu0 %v1870_v59  ;;  %v1951_v59 = vld [vmem:[%s2496_s1 + $0x438] ss:$12 sps:$4 sm:$0xff]  }
  0x3f   : > { %1222 = vmatpush1.bf16.msra.mxu1 %v1872_v60  ;;  %v1955_v60 = vld [vmem:[%s2496_s1 + $0x200] ss:$12 sps:$4 sm:$0xff]  }
  0x40   : > { %1265 = vmatpush1.bf16.msra.mxu0 %v1873_v61  ;;  %1223 = vmatprep.subr.bf16.mxu1 %v1874_v62  ;;  %v1958_v61 = vld [vmem:[%s2496_s1 + $0x454] ss:$12 sps:$4 sm:$0xff]   ;;  %v1959_v62 = vld [vmem:[%s2496_s1 + $0x2d8] ss:$12 sps:$4 sm:$0xff]  }
  0x41   : > { %1266 = vmatprep.subr.bf16.mxu0 %v1876_v63  ;;  %v1956_v63 = vld [vmem:[%s2496_s1 + $0x450] ss:$12 sps:$4 sm:$0xff]  }
  0x43   : > { %1224 = vmatpush1.bf16.msra.mxu1 %v1878_v0  ;;  %v1960_v0 = vld [vmem:[%s2496_s1 + $0x218] ss:$12 sps:$4 sm:$0xff]  }
  0x44   : > { %1267 = vmatpush1.bf16.msra.mxu0 %v1879_v1  ;;  %1696 = vmatprep.subr.bf16.mxu1 %v1889_v5  ;;  %v1963_v1 = vld [vmem:[%s2496_s1 + $0x46c] ss:$12 sps:$4 sm:$0xff]   ;;  %v1965_v5 = vld [vmem:[%s2496_s1 + $0x230] ss:$12 sps:$4 sm:$0xff]  }
  0x45   : > { %1279 = vmatprep.subr.bf16.mxu0 %v1888_v2  ;;  %v1964_v2 = vld [vmem:[%s2496_s1 + $0x2f0] ss:$12 sps:$4 sm:$0xff]  }
  0x46   : > { %1226 = vmatmul.mubr.bf16.vlgmr.msra.gmra.mrb[0].mxu1 %v2232_v3 }
  0x47   : > { %1269 = vmatmul.mubr.bf16.vlgmr.msra.gmra.mrb[0].mxu0 %v2235_v4  ;;  %1697 = vmatpush3.bf16.msra.mxu1 %v1890_v7  ;;  %v1966_v7 = vld [vmem:[%s2164_s13 + $0x10] ss:$24 sps:$4 sm:$0xff]  }
  0x48   : > { %1280 = vmatpush1.bf16.msra.mxu0 %v1886_v6  ;;  %1698 = vmatprep.subr.bf16.mxu1 %v1894_v9  ;;  %v1969_v6 = vld [vmem:[%s2496_s1 + $0x3c8] ss:$12 sps:$4 sm:$0xff]   ;;  %v1971_v9 = vld [vmem:[%s2496_s1 + $0x3e0] ss:$12 sps:$4 sm:$0xff]  }
  0x49   : > { %1281 = vmatprep.subr.bf16.mxu0 %v1893_v8  ;;  %1354 = vmatprep.mubr.bf16.mxu1 %v1882_v49  ;;  %v1943_v49 = vld [vmem:[%s2496_s1 + $0x40c] ss:$12 sps:$4 sm:$0xff]   ;;  %v1970_v8 = vld [vmem:[%s2496_s1 + $0x308] ss:$12 sps:$4 sm:$0xff]  }
  0x4a   : > { %1311 = vmatprep.mubr.bf16.mxu0 %v2358_v44 }
  0x4b   : > { %1699 = vmatpush3.bf16.msra.mxu1 %v1895_v11  ;;  %v1973_v11 = vld [vmem:[%s2496_s1 + $0x3f8] ss:$12 sps:$4 sm:$0xff]  }
  0x4c   : > { %1282 = vmatpush1.bf16.msra.mxu0 %v1891_v10  ;;  %1700 = vmatprep.subr.bf16.mxu1 %v1899_v13  ;;  %v1972_v10 = vld [vmem:[%s2496_s1 + $0x320] ss:$12 sps:$4 sm:$0xff]   ;;  %v1976_v13 = vld [vmem:[%s2496_s1 + $0x350] ss:$12 sps:$4 sm:$0xff]  }
  0x4d   : > { %1283 = vmatprep.subr.bf16.mxu0 %v1898_v12  ;;  %v1974_v12 = vld [vmem:[%s2496_s1 + $0x338] ss:$12 sps:$4 sm:$0xff]  }
  0x4f   : > { %1701 = vmatpush3.bf16.msra.mxu1 %v1900_v15  ;;  %v1978_v15 = vld [vmem:[%s2496_s1 + $0x368] ss:$12 sps:$4 sm:$0xff]  }
  0x50   : > { %1284 = vmatpush1.bf16.msra.mxu0 %v1896_v14  ;;  %1702 = vmatprep.subr.bf16.mxu1 %v1904_v17  ;;  %v1977_v14 = vld [vmem:[%s2496_s1 + $0x428] ss:$12 sps:$4 sm:$0xff]   ;;  %v1980_v17 = vld [vmem:[%s2496_s1 + $0x380] ss:$12 sps:$4 sm:$0xff]  }
  0x51   : > { %1285 = vmatprep.subr.bf16.mxu0 %v1903_v16  ;;  %v1979_v16 = vld [vmem:[%s2496_s1 + $0x440] ss:$12 sps:$4 sm:$0xff]  }
  0x53   : > { %1703 = vmatpush3.bf16.msra.mxu1 %v1905_v19  ;;  %v1982_v19 = vld [vmem:[%s2496_s1 + $0x398] ss:$12 sps:$4 sm:$0xff]  }
  0x54   : > { %1286 = vmatpush1.bf16.msra.mxu0 %v1901_v18  ;;  %1704 = vmatprep.subr.bf16.mxu1 %v1909_v21  ;;  %v1981_v18 = vld [vmem:[%s2496_s1 + $0x458] ss:$12 sps:$4 sm:$0xff]   ;;  %v1984_v21 = vld [vmem:[%s2496_s1 + $0x3b0] ss:$12 sps:$4 sm:$0xff]  }
  0x55   : > { %1287 = vmatprep.subr.bf16.mxu0 %v1908_v20  ;;  %v1983_v20 = vld [vmem:[%s2496_s1 + $0x470] ss:$12 sps:$4 sm:$0xff]  }
  0x57   : > { %1705 = vmatpush3.bf16.msra.mxu1 %v1910_v23 }
  0x58   : > { %1288 = vmatpush1.bf16.msra.mxu0 %v1906_v22  ;;  %1706 = vmatprep.subr.bf16.mxu1 %v1914_v25 }
  0x59   : > { %1289 = vmatprep.subr.bf16.mxu0 %v1913_v24 }
  0x5b   : > { %1707 = vmatpush3.bf16.msra.mxu1 %v1915_v27 }
  0x5c   : > { %1290 = vmatpush1.bf16.msra.mxu0 %v1911_v26  ;;  %1708 = vmatprep.subr.bf16.mxu1 %v1919_v29 }
  0x5d   : > { %1291 = vmatprep.subr.bf16.mxu0 %v1918_v28 }
  0x5f   : > { %1709 = vmatpush3.bf16.msra.mxu1 %v1920_v31 }
  0x60   : > { %1292 = vmatpush1.bf16.msra.mxu0 %v1916_v30  ;;  %1710 = vmatprep.subr.bf16.mxu1 %v1924_v33 }
  0x61   : > { %1293 = vmatprep.subr.bf16.mxu0 %v1923_v32  ;;  %v380_v32 = vlaneseq }
  0x63   : > { %1711 = vmatpush3.bf16.msra.mxu1 %v1925_v35  ;;  %v381_v33 = vshrl.u32 %v380_v32, 7  ;;  %v378_v35 = vld [vmem:[%s2497_s2] sm:$0x7] }
  0x64   : > { %1294 = vmatpush1.bf16.msra.mxu0 %v1921_v34  ;;  %1718 = vmatprep.subr.bf16.mxu1 %v1929_v37 }
  0x65   : > { %1295 = vmatprep.subr.bf16.mxu0 %v1928_v36  ;;  %v382_v34 = vsub.s32 0, %v381_v33  ;;  %v386_v36 = vsub.s32 1, %v381_v33  ;;  %v390_v37 = vsub.s32 2, %v381_v33 }
  0x66   : > { %1355 = vmatmul.mubr.bf16.vlgmr.msra.gmra.mrb[4].mxu1 %v2232_v3  ;;  %v1961_v3 = vld [vmem:[%s2496_s1 + $0x468] ss:$12 sps:$4 sm:$0xff]  }
  0x67   : > { %1719 = vmatpush3.bf16.msra.mxu1 %v1930_v39  ;;  %1395 = vmatprep.mubr.bf16.mxu1 %v2183_v51  ;;  %v1941_v51 = vld [vmem:[%s2496_s1 + $0x408] ss:$12 sps:$4 sm:$0xff]   ;;  %v387_v39 = vrot.slane %v378_v35, %v386_v36 }
  0x68   : > { %1296 = vmatpush1.bf16.msra.mxu0 %v1926_v38  ;;  %1720 = vmatprep.subr.bf16.mxu1 %v1934_v41  ;;  %v383_v38 = vrot.slane %v378_v35, %v382_v34 }
  0x69   : > { %1297 = vmatprep.subr.bf16.mxu0 %v1933_v40  ;;  %v391_v40 = vrot.slane %v378_v35, %v390_v37 }
  0x6b   : > { %1721 = vmatpush3.bf16.msra.mxu1 %v1935_v43 }
  0x6c   : > { %1298 = vmatpush1.bf16.msra.mxu0 %v1931_v42  ;;  %1722 = vmatprep.subr.bf16.mxu1 %v1939_v46 }
  0x6d   : > { %1299 = vmatprep.subr.bf16.mxu0 %v1938_v45 }
  0x6f   : > { %1723 = vmatpush3.bf16.msra.mxu1 %v1940_v48 }
  0x70   : > { %1300 = vmatpush1.bf16.msra.mxu0 %v1936_v47  ;;  %1724 = vmatprep.subr.bf16.mxu1 %v1944_v50 }
  0x71   : > { %1301 = vmatprep.subr.bf16.mxu0 %v1943_v49 }
  0x73   : > { %1725 = vmatpush3.bf16.msra.mxu1 %v1945_v52 }
  0x74   : > { %1302 = vmatpush1.bf16.msra.mxu0 %v1941_v51  ;;  %1726 = vmatprep.subr.bf16.mxu1 %v1949_v54 }
  0x75   : > { %1303 = vmatprep.subr.bf16.mxu0 %v1948_v53 }
  0x77   : > { %1727 = vmatpush3.bf16.msra.mxu1 %v1950_v56 }
  0x78   : > { %1304 = vmatpush1.bf16.msra.mxu0 %v1946_v55  ;;  %1728 = vmatprep.subr.bf16.mxu1 %v1954_v58 }
  0x79   : > { %1305 = vmatprep.subr.bf16.mxu0 %v1953_v57 }
  0x7b   : > { %1729 = vmatpush3.bf16.msra.mxu1 %v1955_v60 }
  0x7c   : > { %1306 = vmatpush1.bf16.msra.mxu0 %v1951_v59  ;;  %1730 = vmatprep.subr.bf16.mxu1 %v1959_v62 }
  0x7d   : > { %1307 = vmatprep.subr.bf16.mxu0 %v1958_v61 }
  0x7f   : > { %1731 = vmatpush3.bf16.msra.mxu1 %v1960_v0 }
  0x80   : > { %1308 = vmatpush1.bf16.msra.mxu0 %v1956_v63  ;;  %1732 = vmatprep.subr.bf16.mxu1 %v1964_v2 }
  0x81   : > { %1309 = vmatprep.subr.bf16.mxu0 %v1963_v1 }
  0x83   : > { %1733 = vmatpush3.bf16.msra.mxu1 %v1965_v5 }
  0x84   : > { %1310 = vmatpush1.bf16.msra.mxu0 %v1961_v3  ;;  %1740 = vmatprep.subr.bf16.mxu1 %v1969_v6 }
  0x86   : > { %1396 = vmatmul.mubr.bf16.vlgmr.msra.gmra.mrb[8].mxu1 %v2235_v4  ;;  %v1975_v4 = vld [vmem:[%s2496_s1 + $0x410] ss:$12 sps:$4 sm:$0xff]  }
  0x87   : > { %1312 = vmatmul.mubr.bf16.vlgmr.msra.gmra.mrb[0].mxu0 %v1966_v7  ;;  %1741 = vmatpush3.bf16.msra.mxu1 %v1970_v8 }
  0x88   : > { %1436 = vmatprep.mubr.bf16.mxu1 %v2358_v44  ;;  %1742 = vmatprep.subr.bf16.mxu1 %v1971_v9 }
  0x8b   : > { %1743 = vmatpush3.bf16.msra.mxu1 %v1972_v10 }
  0x8c   : > { %1744 = vmatprep.subr.bf16.mxu1 %v1973_v11 }
  0x8f   : > { %1745 = vmatpush3.bf16.msra.mxu1 %v1974_v12 }
  0x90   : > { %1746 = vmatprep.subr.bf16.mxu1 %v1975_v4 }
  0x93   : > { %1747 = vmatpush3.bf16.msra.mxu1 %v1976_v13 }
  0x94   : > { %1748 = vmatprep.subr.bf16.mxu1 %v1977_v14 }
  0x97   : > { %1749 = vmatpush3.bf16.msra.mxu1 %v1978_v15 }
  0x98   : > { %1750 = vmatprep.subr.bf16.mxu1 %v1979_v16 }
  0x9b   : > { %1751 = vmatpush3.bf16.msra.mxu1 %v1980_v17 }
  0x9c   : > { %1752 = vmatprep.subr.bf16.mxu1 %v1981_v18 }
  0x9f   : > { %1753 = vmatpush3.bf16.msra.mxu1 %v1982_v19 }
  0xa0   : > { %1754 = vmatprep.subr.bf16.mxu1 %v1983_v20 }
  0xa3   : > { %1755 = vmatpush3.bf16.msra.mxu1 %v1984_v21 }
  0xa6   : > { %1437 = vmatmul.mubr.bf16.vlgmr.msra.gmra.mrb[12].mxu1 %v1966_v7 }
 0x119   : > { %v1227_v22 = vpop.f32.mrb[0].mxu1 }
 0x11a   : > { %v1229_v23 = vpop.f32.mrb[1].mxu1  ;;  %v1228_v41 = vadd.f32 %v1227_v22, %v383_v38 }
 0x11b   : > { %v1231_v24 = vpop.f32.mrb[2].mxu1  ;;  %v1230_v42 = vadd.f32 %v1229_v23, %v387_v39 }
 0x11c   : > { %v1233_v25 = vpop.f32.mrb[3].mxu1  ;;  %v1232_v45 = vadd.f32 %v1231_v24, %v383_v38 }
 0x11d   : > { %v1234_v49 = vadd.f32 %v1233_v25, %v387_v39 }
 0x139   : > { %v1712_v26 = vpop.f32.mrb[4].mxu1 }
 0x13a   : > { %v1713_v27 = vpop.f32.mrb[5].mxu1 }
 0x13b   : > { %v1714_v28 = vadd.f32 %v1713_v27, %v1712_v26  ;;  %v1715_v29 = vpop.f32.mrb[6].mxu1 }
 0x13c   : > { %v1716_v30 = vpop.f32.mrb[7].mxu1 }
 0x13d   : > { %v1717_v31 = vadd.f32 %v1716_v30, %v1715_v29  ;;  %v1357_v50 = vadd.f32 %v1714_v28, %v391_v40 }
 0x13f   : > { %v1360_v55 = vadd.f32 %v1717_v31, %v391_v40 }
 0x159   : > { %v1734_v44 = vpop.f32.mrb[8].mxu1 }
 0x15a   : > { %v1313_v43 = vpop.f32.mrb[0].mxu0  ;;  %v1735_v48 = vpop.f32.mrb[9].mxu1 }
 0x15b   : > { %v1763_v46 = vadd.f32 %v1313_v43, %v1228_v41  ;;  %v1315_v47 = vpop.f32.mrb[1].mxu0  ;;  %v1736_v52 = vadd.f32 %v1735_v48, %v1734_v44  ;;  %v1737_v54 = vpop.f32.mrb[10].mxu1 }
 0x15c   : > { %v1765_v51 = vadd.f32 %v1315_v47, %v1230_v42  ;;  %v1317_v53 = vpop.f32.mrb[2].mxu0  ;;  %v1738_v58 = vpop.f32.mrb[11].mxu1 }
 0x15d   : > { %v1767_v56 = vadd.f32 %v1317_v53, %v1232_v45  ;;  %v1319_v57 = vpop.f32.mrb[3].mxu0  ;;  %v1398_v60 = vadd.f32 %v1736_v52, %v1357_v50  ;;  %v1739_v62 = vadd.f32 %v1738_v58, %v1737_v54 }
 0x15e   : > { %v1692_v59 = vpack.c.bf16 %v1765_v51, %v1763_v46  ;;  %v1769_v61 = vadd.f32 %v1319_v57, %v1234_v49 }
 0x15f   : > { %v1401_v0 = vadd.f32 %v1739_v62, %v1360_v55 }
 0x160   : > { %1465 = vst [vmem:[%s177_s17] sm:$0xff] %v1692_v59  ;;  %v1694_v63 = vpack.c.bf16 %v1769_v61, %v1767_v56 }
 0x162   : > { %1467 = vst [vmem:[%s177_s17 + $0xc] sm:$0xff] %v1694_v63 }
 0x179   : > { %v1756_v1 = vpop.f32.mrb[12].mxu1 }
 0x17a   : > { %v1757_v2 = vpop.f32.mrb[13].mxu1 }
 0x17b   : > { %v1758_v3 = vadd.f32 %v1757_v2, %v1756_v1  ;;  %v1759_v5 = vpop.f32.mrb[14].mxu1 }
 0x17c   : > { %v1760_v6 = vpop.f32.mrb[15].mxu1 }
 0x17d   : > { %v1439_v7 = vadd.f32 %v1758_v3, %v1398_v60  ;;  %v1761_v8 = vadd.f32 %v1760_v6, %v1759_v5 }
 0x17f   : > { %v1693_v9 = vpack.c.bf16 %v1439_v7, %v1439_v7  ;;  %v1442_v10 = vadd.f32 %v1761_v8, %v1401_v0 }
 0x181   : > { %1466 = vst [vmem:[%s177_s17 + $0x8] sm:$0xf] %v1693_v9  ;;  %v1695_v11 = vpack.c.bf16 %v1442_v10, %v1442_v10 }
 0x183   : > { %1468 = vst [vmem:[%s177_s17 + $0x14] sm:$0xf] %v1695_v11 }
 0x184 PF: > { %s13_s12 = sadd.s32 1, %s1991_s12  }
 0x185   : > { %p10_p4 = scmp.ge.s32.totalorder %s13_s12, 4  }
 0x187   :  { %12 = sbr.rel (!%p10_p4) target bundleno = 1 (0x1), region = 62 }

// kernel: net_forward.25
= control target key start
LH: loop header
LB: loop body
LE: loop exit
PB: predicated region body
PF: predicated region fallthrough
CT: control target
= control target key end

     0   :  { %s1886_s24 = smov 0   ;;  %s2182_s0 = inlined_call_operand.vmem [shape: bf16[2,16,384], index: 0, kind: input, shape index: {}]   ;;  %s2183_s1 = inlined_call_operand.vmem [shape: bf16[4,16], index: 1, kind: input, shape index: {}]   ;;  %s2184_s2 = inlined_call_operand.vmem [shape: bf16[4,16], index: 2, kind: input, shape index: {}]   ;;  %s2185_s3 = inlined_call_operand.vmem [shape: bf16[16,4], index: 3, kind: input, shape index: {}]   ;;  %s2186_s4 = inlined_call_operand.vmem [shape: bf16[16,4], index: 4, kind: input, shape index: {}]   ;;  %s2187_s5 = inlined_call_operand.vmem [shape: bf16[384,384], index: 5, kind: input, shape index: {}]   ;;  %s2188_s6 = inlined_call_operand.vmem [shape: f32[1,384], index: 6, kind: input, shape index: {}]   ;;  %s2189_s7 = inlined_call_operand.vmem [shape: bf16[2,16,384], index: 7, kind: output, shape index: {}]  }
   0x1 LB: > { %s1497_s25 = sadd.s32 4294967295, %s1841_s24   ;;  %p1501_p0 = scmp.ge.s32.totalorder %s1841_s24, 1  ;;  %s1841_s24 = sphi %s1886_s24, %s17_s24  }
   0x2   : > { %p237_p1 = scmp.lt.s32.totalorder %s1841_s24, 3 }
   0x4   : > { %p238_p2 = pnand %p1501_p0, %p237_p1 }
   0x5   : > { %p269_p3 = scmp.lt.s32.totalorder (!%p238_p2), %s1497_s25, 1  ;;  %v1843_v0 = vmov (!%p238_p2), 0   ;;  %v284_v7 = vld [vmem:[%s2183_s1] sm:$0x3] (!%p238_p2)  ;;  %vm301_vm0 = vcmask (!%p238_p2), 130048   ;;  %v1844_v9 = vmov (!%p238_p2), 0.0  }
   0x6   : > { %241 = sbr.rel (%p238_p2) target bundleno = 761 (0x2f9), region = 48  ;;  %337 = vmatprep.mubr.bf16.mxu1 (!%p238_p2), %v1843_v0  ;;  %527 = vmatprep.mubr.bf16.mxu0 (!%p238_p2), %v1843_v0  ;;  %vm1845_vm1 = vmmov (!%p238_p2), 0   ;;  %v386_v10 = vld [vmem:[%s2184_s2] sm:$0x3] (!%p238_p2)  ;;  %vm485_vm2 = vcmask (!%p238_p2), 1041408   ;;  %vm481_vm3 = vcmask (!%p238_p2), 31744  }
   0x7   : > { %v1713_v28 = vld [vmem:[%s2185_s3] sm:$0xff] (!%p238_p2)   ;;  %v1720_v45 = vld [vmem:[%s2187_s5 + $0x1c] ss:$12 sps:$4 sm:$0xff] (!%p238_p2)   ;;  %v1726_v58 = vld [vmem:[%s2187_s5 + $0x4c] ss:$12 sps:$4 sm:$0xff] (!%p238_p2)  }
   0x8   : > { %v1717_v40 = vld [vmem:[%s2187_s5 + $0x4] ss:$12 sps:$4 sm:$0xff] (!%p238_p2)   ;;  %v1715_v44 = vld [vmem:[%s2187_s5] ss:$12 sps:$4 sm:$0xff] (!%p238_p2)   ;;  %v1742_v50 = vld [vmem:[%s2187_s5 + $0xc8] ss:$12 sps:$4 sm:$0xff] (!%p238_p2)  }
   0x9   : > { %v1714_v43 = vld [vmem:[%s2186_s4] sm:$0xff] (!%p238_p2)   ;;  %v1743_v55 = vld [vmem:[%s2187_s5 + $0x8] ss:$12 sps:$4 sm:$0xff] (!%p238_p2)   ;;  %v1721_v56 = vld [vmem:[%s2187_s5 + $0x30] ss:$12 sps:$4 sm:$0xff] (!%p238_p2)  }
   0xa   : > { %v1718_v49 = vld [vmem:[%s2187_s5 + $0x18] ss:$12 sps:$4 sm:$0xff] (!%p238_p2)   ;;  %v1723_v52 = vld [vmem:[%s2187_s5 + $0x34] ss:$12 sps:$4 sm:$0xff] (!%p238_p2)  }
   0xb   : > { %v1747_v57 = vld [vmem:[%s2187_s5 + $0xe0] ss:$12 sps:$4 sm:$0xff] (!%p238_p2)   ;;  %v1724_v60 = vld [vmem:[%s2187_s5 + $0x48] ss:$12 sps:$4 sm:$0xff] (!%p238_p2)   ;;  %v1752_v61 = vld [vmem:[%s2187_s5 + $0xf8] ss:$12 sps:$4 sm:$0xff] (!%p238_p2)  }
   0xc   : > { %v1748_v59 = vld [vmem:[%s2187_s5 + $0x20] ss:$12 sps:$4 sm:$0xff] (!%p238_p2)   ;;  %v1729_v62 = vld [vmem:[%s2187_s5 + $0x64] ss:$12 sps:$4 sm:$0xff] (!%p238_p2)  }
   0xd   : > { %s2191_s25 = smov (!%p269_p3, %s1497_s25), 1  ;;  %v1753_v63 = vld [vmem:[%s2187_s5 + $0x38] ss:$12 sps:$4 sm:$0xff]  }
   0xe   : > { %s1698_s26 = smul.u32 24, %s2191_s25 }
  0x10   : > { %s273_s29 = scalar_lea.vmem %s2182_s0, %s1698_s26  ;;  %s278_s23 = scalar_lea.vmem %s2189_s7, %s1698_s26 }
  0x11   : > { %v280_v1 = vld [vmem:[%s273_s29] sm:$0xff]  ;;  %v282_v2 = vld [vmem:[%s273_s29 + $0xc] sm:$0xff]  ;;  %v281_v3 = vld [vmem:[%s273_s29 + $0x8] sm:$0xf] }
  0x12   : > { %v1505_v4 = vcombine.high %v280_v1, %v282_v2  ;;  %v1504_v5 = vcombine.low %v280_v1, %v282_v2  ;;  %v283_v6 = vld [vmem:[%s273_s29 + $0x14] sm:$0xf]  ;;  %v685_v11 = vunpack.c.l.bf16 %v280_v1  ;;  %v686_v12 = vunpack.c.h.bf16 %v280_v1  ;;  %v1727_v1 = vld [vmem:[%s2187_s5 + $0x60] ss:$12 sps:$4 sm:$0xff]  }
  0x13   : > { %v1506_v8 = vcombine.low %v281_v3, %v283_v6  ;;  %v687_v13 = vunpack.c.l.bf16 %v281_v3  ;;  %v688_v14 = vunpack.c.l.bf16 %v282_v2  ;;  %v689_v15 = vunpack.c.h.bf16 %v282_v2  ;;  %v1757_v2 = vld [vmem:[%s2187_s5 + $0x110] ss:$12 sps:$4 sm:$0xff]  }
  0x14   : > { %305 = vmatprep.subr.bf16.mxu1 %v1505_v4  ;;  %v691_v16 = vadd.f32 %v686_v12, %v685_v11  ;;  %v690_v17 = vunpack.c.l.bf16 %v283_v6  ;;  %v1732_v3 = vld [vmem:[%s2187_s5 + $0x7c] ss:$12 sps:$4 sm:$0xff]   ;;  %v1735_v6 = vld [vmem:[%s2187_s5 + $0x94] ss:$12 sps:$4 sm:$0xff]   ;;  %v1741_v11 = vld [vmem:[%s2187_s5 + $0xc4] ss:$12 sps:$4 sm:$0xff]  }
  0x15   : > { %306 = vmatpush1.bf16.msra.mxu1 %v1504_v5  ;;  %v695_v18 = vadd.f32 %v689_v15, %v688_v14  ;;  %v1739_v12 = vld [vmem:[%s2187_s5 + $0xc0] ss:$12 sps:$4 sm:$0xff]   ;;  %v1744_v14 = vld [vmem:[%s2187_s5 + $0xd8] ss:$12 sps:$4 sm:$0xff]  }
  0x16   : > { %1646 = vmatprep.subr.bf16.mxu1 %v1844_v9  ;;  %v692_v19 = vadd.f32 %v691_v16, %v687_v13  ;;  %v1746_v13 = vld [vmem:[%s2187_s5 + $0xdc] ss:$12 sps:$4 sm:$0xff]   ;;  %v1751_v15 = vld [vmem:[%s2187_s5 + $0xf4] ss:$12 sps:$4 sm:$0xff]  }
  0x17   : > { %v696_v20 = vadd.f32 %v695_v18, %v690_v17  ;;  %v1749_v16 = vld [vmem:[%s2187_s5 + $0xf0] ss:$12 sps:$4 sm:$0xff]   ;;  %v1756_v17 = vld [vmem:[%s2187_s5 + $0x10c] ss:$12 sps:$4 sm:$0xff]   ;;  %v1754_v18 = vld [vmem:[%s2187_s5 + $0x108] ss:$12 sps:$4 sm:$0xff]  }
  0x18   : > { %1507 = vmatmul.mubr.msk.bf16.vlgmr.msra.gmra.mrb[0].mxu1 %vm301_vm0, %v284_v7  ;;  %693 = vadd.xlane.f32.xlu0 %v692_v19  ;;  %v1759_v19 = vld [vmem:[%s2187_s5 + $0x120] ss:$12 sps:$4 sm:$0xff]  }
  0x19   : > { %1647 = vmatpush3.bf16.msra.mxu1 %v1506_v8  ;;  %1648 = vmatprep.mubr.msk.bf16.mxu1 %vm1845_vm1, %v1844_v9 }
  0x1a   : > { %390 = vmatprep.subr.bf16.mxu1 %v1505_v4  ;;  %v1758_v4 = vld [vmem:[%s2187_s5 + $0x50] ss:$12 sps:$4 sm:$0xff]  }
  0x1c   : > { %697 = vadd.xlane.f32.xlu0 %v696_v20  ;;  %v1761_v20 = vld [vmem:[%s2187_s5 + $0x124] ss:$12 sps:$4 sm:$0xff]  }
  0x20   : > { %1649 = vmatmul.mubr.msk.bf16.vlgmr.msra.gmra.mrb[4].mxu1 %vm301_vm0, %v284_v7  ;;  %v1733_v7 = vld [vmem:[%s2187_s5 + $0x90] ss:$12 sps:$4 sm:$0xff]  }
  0x21   : > { %391 = vmatpush1.bf16.msra.mxu1 %v1504_v5  ;;  %422 = vmatprep.mubr.bf16.mxu1 %v1843_v0  ;;  %v1730_v5 = vld [vmem:[%s2187_s5 + $0x78] ss:$12 sps:$4 sm:$0xff]  }
  0x22   : > { %1652 = vmatprep.subr.bf16.mxu1 %v1844_v9 }
  0x28   : > { %1509 = vmatmul.mubr.msk.bf16.vlgmr.msra.gmra.mrb[8].mxu1 %vm301_vm0, %v386_v10 }
  0x29   : > { %1653 = vmatpush3.bf16.msra.mxu1 %v1506_v8  ;;  %1654 = vmatprep.mubr.msk.bf16.mxu1 %vm1845_vm1, %v1844_v9  ;;  %v1738_v8 = vld [vmem:[%s2187_s5 + $0xac] ss:$12 sps:$4 sm:$0xff]  }
  0x2a   : > { %1658 = vmatprep.subr.bf16.mxu1 %v1844_v9 }
  0x30   : > { %1655 = vmatmul.mubr.msk.bf16.vlgmr.msra.gmra.mrb[12].mxu1 %vm301_vm0, %v386_v10  ;;  %v1736_v10 = vld [vmem:[%s2187_s5 + $0xa8] ss:$12 sps:$4 sm:$0xff]  }
  0x31   : > { %1660 = vmatprep.mubr.msk.bf16.mxu1 %vm1845_vm1, %v1844_v9 }
  0xeb   : > { %v339_v21 = vpop.f32.mrb[0].mxu1 }
  0xec   : > { %v473_v22 = vpack.c.bf16 %v339_v21, %v339_v21  ;;  %v341_v23 = vpop.f32.mrb[1].mxu1  ;;  %v1762_v21 = vld [vmem:[%s2187_s5 + $0x128] ss:$12 sps:$4 sm:$0xff]  }
  0xed   : > { %v474_v24 = vpack.c.bf16 %v341_v23, %v341_v23  ;;  %v343_v25 = vpop.f32.mrb[2].mxu1  ;;  %v1764_v23 = vld [vmem:[%s2187_s5 + $0x138] ss:$12 sps:$4 sm:$0xff]  }
  0xee   : > { %v344_v26 = vpop.f32.mrb[3].mxu1  ;;  %v487_v27 = vsel %vm485_vm2, %v473_v22, 0  ;;  %v1763_v22 = vld [vmem:[%s2187_s5 + $0x68] ss:$12 sps:$4 sm:$0xff]   ;;  %v1767_v25 = vld [vmem:[%s2187_s5 + $0x140] ss:$12 sps:$4 sm:$0xff]  }
  0xef   : > { %1512 = vmatprep.subr.msk.bf16.mxu0 %vm485_vm2, %v474_v24  ;;  %v1766_v24 = vld [vmem:[%s2187_s5 + $0x13c] ss:$12 sps:$4 sm:$0xff]   ;;  %v1768_v26 = vld [vmem:[%s2187_s5 + $0x80] ss:$12 sps:$4 sm:$0xff]  }
  0xf0   : > { %496 = vmatpush1.bf16.msra.mxu0 %v487_v27  ;;  %v1771_v27 = vld [vmem:[%s2187_s5 + $0x154] ss:$12 sps:$4 sm:$0xff]  }
  0xf3   : > { %v380_v29 = vpop.f32.mrb[4].mxu1  ;;  %1513 = vmatmul.mubr.msk.bf16.vlgmr.msra.gmra.mrb[0].mxu0 %vm481_vm3, %v1713_v28 }
  0xf4   : > { %v475_v30 = vpack.c.bf16 %v380_v29, %v380_v29  ;;  %v1650_v31 = vpop.f32.mrb[5].mxu1  ;;  %633 = vmatprep.mubr.bf16.mxu0 %v1843_v0  ;;  %v1769_v29 = vld [vmem:[%s2187_s5 + $0x150] ss:$12 sps:$4 sm:$0xff]  }
  0xf5   : > { %v383_v32 = vpop.f32.mrb[6].mxu1  ;;  %v1776_v31 = vld [vmem:[%s2187_s5 + $0x16c] ss:$12 sps:$4 sm:$0xff]  }
  0xf6   : > { %v493_v33 = vsel %vm485_vm2, %v475_v30, 0  ;;  %v1651_v34 = vpop.f32.mrb[7].mxu1  ;;  %v1773_v30 = vld [vmem:[%s2187_s5 + $0x98] ss:$12 sps:$4 sm:$0xff]   ;;  %v1777_v32 = vld [vmem:[%s2187_s5 + $0x170] ss:$12 sps:$4 sm:$0xff]  }
  0xf7   : > { %1659 = vmatpush3.bf16.msra.mxu1 %v493_v33  ;;  %v1774_v33 = vld [vmem:[%s2187_s5 + $0x168] ss:$12 sps:$4 sm:$0xff]   ;;  %v1778_v34 = vld [vmem:[%s2187_s5 + $0xb0] ss:$12 sps:$4 sm:$0xff]  }
  0xf8   : > { %1664 = vmatprep.subr.bf16.mxu1 %v1844_v9 }
  0xfa   : > { %1661 = vmatmul.mubr.msk.bf16.vlgmr.msra.gmra.mrb[16].mxu1 %vm481_vm3, %v1713_v28  ;;  %v1772_v28 = vld [vmem:[%s2187_s5 + $0x158] ss:$12 sps:$4 sm:$0xff]  }
  0xfb   : > { %v424_v35 = vpop.f32.mrb[8].mxu1  ;;  %1666 = vmatprep.mubr.msk.bf16.mxu1 %vm1845_vm1, %v1844_v9 }
  0xfc   : > { %v581_v36 = vpack.c.bf16 %v424_v35, %v424_v35  ;;  %v426_v37 = vpop.f32.mrb[9].mxu1  ;;  %v1781_v35 = vld [vmem:[%s2187_s5 + $0x184] ss:$12 sps:$4 sm:$0xff]  }
  0xfd   : > { %v582_v38 = vpack.c.bf16 %v426_v37, %v426_v37  ;;  %v428_v39 = vpop.f32.mrb[10].mxu1 }
  0xfe   : > { %v593_v41 = vsel %vm485_vm2, %v581_v36, 0  ;;  %v429_v42 = vpop.f32.mrb[11].mxu1 }
  0xff   : > { %1516 = vmatprep.subr.msk.bf16.mxu0 %vm485_vm2, %v582_v38 }
 0x100   : > { %602 = vmatpush1.bf16.msra.mxu0 %v593_v41  ;;  %v694_v41 = vpop.xlane.xlu0 %693 }
 0x101   : > { %1214 = vmatprep.subr.bf16.mxu0 %v1717_v40 }
 0x103   : > { %v465_v46 = vpop.f32.mrb[12].mxu1  ;;  %1517 = vmatmul.mubr.msk.bf16.vlgmr.msra.gmra.mrb[4].mxu0 %vm481_vm3, %v1714_v43 }
 0x104   : > { %v583_v47 = vpack.c.bf16 %v465_v46, %v465_v46  ;;  %v1656_v48 = vpop.f32.mrb[13].mxu1  ;;  %1215 = vmatpush1.bf16.msra.mxu0 %v1715_v44 }
 0x105   : > { %v468_v51 = vpop.f32.mrb[14].mxu1  ;;  %1216 = vmatprep.subr.bf16.mxu0 %v1720_v45  ;;  %v698_v45 = vpop.xlane.xlu0 %697 }
 0x106   : > { %v599_v53 = vsel %vm485_vm2, %v583_v47, 0  ;;  %v1657_v54 = vpop.f32.mrb[15].mxu1  ;;  %v700_v47 = vmul.f32 0.0026041667, %v694_v41 }
 0x107   : > { %1665 = vmatpush3.bf16.msra.mxu1 %v599_v53 }
 0x108   : > { %1217 = vmatpush1.bf16.msra.mxu0 %v1718_v49  ;;  %1615 = vmatprep.subr.bf16.mxu1 %v1742_v50  ;;  %v701_v50 = vmul.f32 0.0026041667, %v698_v45 }
 0x109   : > { %1218 = vmatprep.subr.bf16.mxu0 %v1723_v52 }
 0x10a   : > { %1667 = vmatmul.mubr.msk.bf16.vlgmr.msra.gmra.mrb[20].mxu1 %vm481_vm3, %v1714_v43 }
 0x10b   : > { %1616 = vmatpush3.bf16.msra.mxu1 %v1743_v55 }
 0x10c   : > { %1219 = vmatpush1.bf16.msra.mxu0 %v1721_v56  ;;  %1617 = vmatprep.subr.bf16.mxu1 %v1747_v57 }
 0x10d   : > { %1220 = vmatprep.subr.bf16.mxu0 %v1726_v58 }
 0x10f   : > { %1618 = vmatpush3.bf16.msra.mxu1 %v1748_v59 }
 0x110   : > { %1221 = vmatpush1.bf16.msra.mxu0 %v1724_v60  ;;  %1619 = vmatprep.subr.bf16.mxu1 %v1752_v61 }
 0x111   : > { %1222 = vmatprep.subr.bf16.mxu0 %v1729_v62 }
 0x113   : > { %1620 = vmatpush3.bf16.msra.mxu1 %v1753_v63 }
 0x114   : > { %1223 = vmatpush1.bf16.msra.mxu0 %v1727_v1  ;;  %1621 = vmatprep.subr.bf16.mxu1 %v1757_v2  ;;  %v1779_v2 = vld [vmem:[%s2187_s5 + $0x180] ss:$12 sps:$4 sm:$0xff]  }
 0x115   : > { %1224 = vmatprep.subr.bf16.mxu0 %v1732_v3  ;;  %v1782_v3 = vld [vmem:[%s2187_s5 + $0x188] ss:$12 sps:$4 sm:$0xff]  }
 0x117   : > { %1622 = vmatpush3.bf16.msra.mxu1 %v1758_v4 }
 0x118   : > { %1225 = vmatpush1.bf16.msra.mxu0 %v1730_v5  ;;  %1623 = vmatprep.subr.bf16.mxu1 %v1762_v21  ;;  %v1785_v5 = vld [vmem:[%s2187_s5 + $0x19c] ss:$12 sps:$4 sm:$0xff]  }
 0x119   : > { %1226 = vmatprep.subr.bf16.mxu0 %v1735_v6  ;;  %v1798_v21 = vld [vmem:[%s2187_s5 + $0x1e8] ss:$12 sps:$4 sm:$0xff]  }
 0x11b   : > { %1624 = vmatpush3.bf16.msra.mxu1 %v1763_v22  ;;  %v1801_v22 = vld [vmem:[%s2187_s5 + $0x1fc] ss:$12 sps:$4 sm:$0xff]  }
 0x11c   : > { %1227 = vmatpush1.bf16.msra.mxu0 %v1733_v7  ;;  %1625 = vmatprep.subr.bf16.mxu1 %v1767_v25  ;;  %v1805_v25 = vld [vmem:[%s2187_s5 + $0x214] ss:$12 sps:$4 sm:$0xff]  }
 0x11d   : > { %1228 = vmatprep.subr.bf16.mxu0 %v1738_v8 }
 0x11f   : > { %1626 = vmatpush3.bf16.msra.mxu1 %v1768_v26  ;;  %v1803_v26 = vld [vmem:[%s2187_s5 + $0x210] ss:$12 sps:$4 sm:$0xff]  }
 0x120   : > { %1229 = vmatpush1.bf16.msra.mxu0 %v1736_v10  ;;  %1627 = vmatprep.subr.bf16.mxu1 %v1772_v28  ;;  %v1809_v28 = vld [vmem:[%s2187_s5 + $0x22c] ss:$12 sps:$4 sm:$0xff]  }
 0x121   : > { %1230 = vmatprep.subr.bf16.mxu0 %v1741_v11  ;;  %v1783_v11 = vld [vmem:[%s2187_s5 + $0x198] ss:$12 sps:$4 sm:$0xff]  }
 0x123   : > { %1628 = vmatpush3.bf16.msra.mxu1 %v1773_v30  ;;  %v1810_v30 = vld [vmem:[%s2187_s5 + $0x230] ss:$12 sps:$4 sm:$0xff]  }
 0x124   : > { %1231 = vmatpush1.bf16.msra.mxu0 %v1739_v12  ;;  %1629 = vmatprep.subr.bf16.mxu1 %v1777_v32  ;;  %v1786_v12 = vld [vmem:[%s2187_s5 + $0x1a0] ss:$12 sps:$4 sm:$0xff]  }
 0x125   : > { %1232 = vmatprep.subr.bf16.mxu0 %v1746_v13  ;;  %v1789_v13 = vld [vmem:[%s2187_s5 + $0x1b4] ss:$12 sps:$4 sm:$0xff]  }
 0x127   : > { %1630 = vmatpush3.bf16.msra.mxu1 %v1778_v34 }
 0x128   : > { %1233 = vmatpush1.bf16.msra.mxu0 %v1744_v14  ;;  %1670 = vmatprep.subr.bf16.mxu1 %v1844_v9 }
 0x129   : > { %1234 = vmatprep.subr.bf16.mxu0 %v1751_v15  ;;  %v1787_v15 = vld [vmem:[%s2187_s5 + $0x1b0] ss:$12 sps:$4 sm:$0xff]  }
 0x12c   : > { %1235 = vmatpush1.bf16.msra.mxu0 %v1749_v16  ;;  %v1790_v16 = vld [vmem:[%s2187_s5 + $0x1b8] ss:$12 sps:$4 sm:$0xff]  }
 0x12d   : > { %1236 = vmatprep.subr.bf16.mxu0 %v1756_v17  ;;  %v1791_v17 = vld [vmem:[%s2187_s5 + $0x1c8] ss:$12 sps:$4 sm:$0xff]  }
 0x130   : > { %1237 = vmatpush1.bf16.msra.mxu0 %v1754_v18  ;;  %v1794_v18 = vld [vmem:[%s2187_s5 + $0x1d0] ss:$12 sps:$4 sm:$0xff]  }
 0x131   : > { %1238 = vmatprep.subr.bf16.mxu0 %v1761_v20  ;;  %v1795_v20 = vld [vmem:[%s2187_s5 + $0x1e0] ss:$12 sps:$4 sm:$0xff]  }
 0x134   : > { %1239 = vmatpush1.bf16.msra.mxu0 %v1759_v19  ;;  %v1797_v19 = vld [vmem:[%s2187_s5 + $0x1e4] ss:$12 sps:$4 sm:$0xff]  }
 0x135   : > { %1240 = vmatprep.subr.bf16.mxu0 %v1766_v24  ;;  %v1802_v24 = vld [vmem:[%s2187_s5 + $0x200] ss:$12 sps:$4 sm:$0xff]  }
 0x138   : > { %1241 = vmatpush1.bf16.msra.mxu0 %v1764_v23  ;;  %v1799_v23 = vld [vmem:[%s2187_s5 + $0x1f8] ss:$12 sps:$4 sm:$0xff]  }
 0x139   : > { %1242 = vmatprep.subr.bf16.mxu0 %v1771_v27  ;;  %v1806_v27 = vld [vmem:[%s2187_s5 + $0x218] ss:$12 sps:$4 sm:$0xff]  }
 0x13c   : > { %1243 = vmatpush1.bf16.msra.mxu0 %v1769_v29  ;;  %v1807_v29 = vld [vmem:[%s2187_s5 + $0x228] ss:$12 sps:$4 sm:$0xff]  }
 0x13d   : > { %1244 = vmatprep.subr.bf16.mxu0 %v1776_v31 }
 0x140   : > { %1245 = vmatpush1.bf16.msra.mxu0 %v1774_v33 }
 0x141   : > { %1257 = vmatprep.subr.bf16.mxu0 %v1781_v35 }
 0x1c6   : > { %v529_v36 = vpop.f32.mrb[0].mxu0 }
 0x1c7   : > { %v531_v37 = vpop.f32.mrb[1].mxu0 }
 0x1c8   : > { %v533_v38 = vpop.f32.mrb[2].mxu0 }
 0x1c9   : > { %v535_v39 = vpop.f32.mrb[3].mxu0 }
 0x1cd   : > { %v572_v40 = vpop.f32.mrb[16].mxu1 }
 0x1ce   : > { %v1662_v42 = vpop.f32.mrb[17].mxu1 }
 0x1cf   : > { %v575_v43 = vpop.f32.mrb[18].mxu1 }
 0x1d0   : > { %v1663_v44 = vpop.f32.mrb[19].mxu1 }
 0x1d6   : > { %v635_v46 = vpop.f32.mrb[4].mxu0 }
 0x1d7   : > { %v702_v48 = vmul.f32 %v635_v46, %v529_v36  ;;  %v637_v49 = vpop.f32.mrb[5].mxu0 }
 0x1d8   : > { %v703_v51 = vmul.f32 %v637_v49, %v531_v37  ;;  %v639_v52 = vpop.f32.mrb[6].mxu0  ;;  %v815_v37 = vlaneseq }
 0x1d9   : > { %v705_v53 = vmul.f32 %v639_v52, %v533_v38  ;;  %v641_v54 = vpop.f32.mrb[7].mxu0  ;;  %v708_v56 = vadd.f32 %v702_v48, %v700_v47 }
 0x1da   : > { %v706_v55 = vmul.f32 %v641_v54, %v535_v39  ;;  %v709_v58 = vadd.f32 %v703_v51, %v700_v47  ;;  %v816_v38 = vshrl.u32 %v815_v37, 7 }
 0x1db   : > { %v711_v57 = vadd.f32 %v705_v53, %v701_v50 }
 0x1dc   : > { %v712_v59 = vadd.f32 %v706_v55, %v701_v50  ;;  %v825_v39 = vsub.s32 2, %v816_v38  ;;  %v817_v41 = vsub.s32 0, %v816_v38  ;;  %v821_v42 = vsub.s32 1, %v816_v38 }
 0x1dd   : > { %v714_v60 = vpack.c.bf16 %v711_v57, %v708_v56  ;;  %v678_v61 = vpop.f32.mrb[20].mxu1 }
 0x1de   : > { %v704_v62 = vmul.f32 %v678_v61, %v572_v40  ;;  %v1668_v63 = vpop.f32.mrb[21].mxu1  ;;  %v715_v1 = vpack.c.bf16 %v712_v59, %v709_v58  ;;  %v813_v40 = vld [vmem:[%s2188_s6] sm:$0x7] }
 0x1df   : > { %v681_v4 = vpop.f32.mrb[22].mxu1  ;;  %v822_v44 = vrot.slane %v813_v40, %v821_v42 }
 0x1e0   : > { %v707_v6 = vmul.f32 %v681_v4, %v575_v43  ;;  %1246 = vmatprep.mubr.bf16.mxu0 %v715_v1  ;;  %1332 = vmatprep.mubr.bf16.mxu1 %v715_v1  ;;  %v1669_v7 = vpop.f32.mrb[23].mxu1  ;;  %v710_v8 = vadd.f32 %v704_v62, %v700_v47  ;;  %v818_v43 = vrot.slane %v813_v40, %v817_v41 }
 0x1e1   : > { %1247 = vmatmul.mubr.bf16.vlgmr.msra.gmra.mrb[8].mxu0 %v714_v60  ;;  %1333 = vmatmul.mubr.bf16.vlgmr.msra.gmra.mrb[24].mxu1 %v714_v60 }
 0x1e2   : > { %v713_v10 = vadd.f32 %v707_v6, %v701_v50  ;;  %1258 = vmatpush1.bf16.msra.mxu0 %v1779_v2  ;;  %1671 = vmatpush3.bf16.msra.mxu1 %v1782_v3 }
 0x1e3   : > { %1259 = vmatprep.subr.bf16.mxu0 %v1785_v5  ;;  %1672 = vmatprep.subr.bf16.mxu1 %v1844_v9 }
 0x1e4   : > { %v716_v14 = vpack.c.bf16 %v713_v10, %v710_v8  ;;  %1289 = vmatprep.mubr.bf16.mxu0 %v1843_v0  ;;  %1686 = vmatprep.mubr.msk.bf16.mxu1 %vm1845_vm1, %v1844_v9  ;;  %v1793_v0 = vld [vmem:[%s2187_s5 + $0x1cc] ss:$12 sps:$4 sm:$0xff]  }
 0x1e6   : > { %1260 = vmatpush1.bf16.msra.mxu0 %v1783_v11  ;;  %1673 = vmatpush3.bf16.msra.mxu1 %v1786_v12 }
 0x1e7   : > { %1261 = vmatprep.subr.bf16.mxu0 %v1789_v13  ;;  %1674 = vmatprep.subr.bf16.mxu1 %v1844_v9 }
 0x1ea   : > { %1262 = vmatpush1.bf16.msra.mxu0 %v1787_v15  ;;  %1675 = vmatpush3.bf16.msra.mxu1 %v1790_v16 }
 0x1eb   : > { %1263 = vmatprep.subr.bf16.mxu0 %v1793_v0  ;;  %1676 = vmatprep.subr.bf16.mxu1 %v1844_v9 }
 0x1ee   : > { %1264 = vmatpush1.bf16.msra.mxu0 %v1791_v17  ;;  %1677 = vmatpush3.bf16.msra.mxu1 %v1794_v18 }
 0x1ef   : > { %1265 = vmatprep.subr.bf16.mxu0 %v1797_v19  ;;  %1678 = vmatprep.subr.bf16.mxu1 %v1844_v9 }
 0x1f2   : > { %1266 = vmatpush1.bf16.msra.mxu0 %v1795_v20  ;;  %1679 = vmatpush3.bf16.msra.mxu1 %v1798_v21 }
 0x1f3   : > { %1267 = vmatprep.subr.bf16.mxu0 %v1801_v22  ;;  %1680 = vmatprep.subr.bf16.mxu1 %v1844_v9 }
 0x1f6   : > { %1268 = vmatpush1.bf16.msra.mxu0 %v1799_v23  ;;  %1681 = vmatpush3.bf16.msra.mxu1 %v1802_v24 }
 0x1f7   : > { %1269 = vmatprep.subr.bf16.mxu0 %v1805_v25  ;;  %1682 = vmatprep.subr.bf16.mxu1 %v1844_v9 }
 0x1fa   : > { %1270 = vmatpush1.bf16.msra.mxu0 %v1803_v26  ;;  %1683 = vmatpush3.bf16.msra.mxu1 %v1806_v27 }
 0x1fb   : > { %1271 = vmatprep.subr.bf16.mxu0 %v1809_v28  ;;  %1684 = vmatprep.subr.bf16.mxu1 %v1844_v9  ;;  %v826_v9 = vrot.slane %v813_v40, %v825_v39 }
 0x1fe   : > { %1272 = vmatpush1.bf16.msra.mxu0 %v1807_v29  ;;  %1685 = vmatpush3.bf16.msra.mxu1 %v1810_v30 }
 0x201   : > { %1290 = vmatmul.mubr.bf16.vlgmr.msra.gmra.mrb[8].mxu0 %v716_v14  ;;  %1687 = vmatmul.mubr.bf16.vlgmr.msra.gmra.mrb[28].mxu1 %v716_v14 }
 0x2b4   : > { %v1631_v31 = vpop.f32.mrb[24].mxu1 }
 0x2b5   : > { %v1632_v32 = vpop.f32.mrb[25].mxu1 }
 0x2b6   : > { %v1633_v33 = vadd.f32 %v1632_v32, %v1631_v31  ;;  %v1634_v34 = vpop.f32.mrb[26].mxu1 }
 0x2b7   : > { %v1635_v35 = vpop.f32.mrb[27].mxu1 }
 0x2b8   : > { %v1636_v36 = vadd.f32 %v1635_v35, %v1634_v34  ;;  %v1335_v45 = vadd.f32 %v1633_v33, %v826_v9 }
 0x2ba   : > { %v1338_v52 = vadd.f32 %v1636_v36, %v826_v9 }
 0x2d4   : > { %v1291_v46 = vpop.f32.mrb[8].mxu0  ;;  %v1375_v47 = vpop.f32.mrb[28].mxu1 }
 0x2d5   : > { %v1690_v48 = vadd.f32 %v1291_v46, %v818_v43  ;;  %v1376_v49 = vadd.f32 %v1375_v47, %v1335_v45  ;;  %v1293_v50 = vpop.f32.mrb[9].mxu0  ;;  %v1688_v51 = vpop.f32.mrb[29].mxu1 }
 0x2d6   : > { %v1691_v53 = vadd.f32 %v1293_v50, %v822_v44  ;;  %v1295_v54 = vpop.f32.mrb[10].mxu0  ;;  %v1378_v55 = vpop.f32.mrb[30].mxu1 }
 0x2d7   : > { %v1591_v56 = vmul.f32 -1.442695, %v1690_v48  ;;  %v1593_v57 = vmul.f32 -1.442695, %v1376_v49  ;;  %v1692_v58 = vadd.f32 %v1295_v54, %v818_v43  ;;  %v1379_v59 = vadd.f32 %v1378_v55, %v1338_v52  ;;  %v1297_v60 = vpop.f32.mrb[11].mxu0  ;;  %v1689_v61 = vpop.f32.mrb[31].mxu1 }
 0x2d8   : > { %v1592_v62 = vmul.f32 -1.442695, %v1691_v53  ;;  %v1693_v63 = vadd.f32 %v1297_v60, %v822_v44 }
 0x2d9   : > { %1811 = vpow2.f32 %v1591_v56  ;;  %v1594_v1 = vmul.f32 -1.442695, %v1692_v58  ;;  %v1596_v2 = vmul.f32 -1.442695, %v1379_v59 }
 0x2da   : > { %1813 = vpow2.f32 %v1593_v57  ;;  %v1595_v3 = vmul.f32 -1.442695, %v1693_v63 }
 0x2db   : > { %1815 = vpow2.f32 %v1592_v62 }
 0x2dc   : > { %1817 = vpow2.f32 %v1594_v1 }
 0x2dd   : > { %1819 = vpow2.f32 %v1596_v2 }
 0x2de   : > { %1821 = vpow2.f32 %v1595_v3 }
 0x2e3   : > { %v1812_v4 = vpop.eup %1811 }
 0x2e4   : > { %v1814_v5 = vpop.eup %1813  ;;  %v1400_v6 = vadd.f32 1.0, %v1812_v4 }
 0x2e5   : > { %v1816_v7 = vpop.eup %1815  ;;  %v1402_v8 = vadd.f32 1.0, %v1814_v5 }
 0x2e6   : > { %v1818_v10 = vpop.eup %1817  ;;  %1823 = vrcp.f32 %v1400_v6  ;;  %v1401_v11 = vadd.f32 1.0, %v1816_v7 }
 0x2e7   : > { %v1820_v12 = vpop.eup %1819  ;;  %1825 = vrcp.f32 %v1402_v8  ;;  %v1403_v13 = vadd.f32 1.0, %v1818_v10 }
 0x2e8   : > { %v1822_v14 = vpop.eup %1821  ;;  %1827 = vrcp.f32 %v1401_v11  ;;  %v1405_v15 = vadd.f32 1.0, %v1820_v12 }
 0x2e9   : > { %1829 = vrcp.f32 %v1403_v13  ;;  %v1404_v16 = vadd.f32 1.0, %v1822_v14 }
 0x2ea   : > { %1831 = vrcp.f32 %v1405_v15 }
 0x2eb   : > { %1833 = vrcp.f32 %v1404_v16 }
 0x2f0   : > { %v1824_v0 = vpop.eup %1823 }
 0x2f1   : > { %v1826_v17 = vpop.eup %1825 }
 0x2f2   : > { %v1828_v18 = vpop.eup %1827  ;;  %v1604_v19 = vpack.c.bf16 %v1826_v17, %v1826_v17 }
 0x2f3   : > { %v1830_v20 = vpop.eup %1829  ;;  %v1603_v21 = vpack.c.bf16 %v1828_v18, %v1824_v0 }
 0x2f4   : > { %v1832_v22 = vpop.eup %1831  ;;  %1439 = vst [vmem:[%s278_s23 + $0x8] sm:$0xf] %v1604_v19 }
 0x2f5   : > { %v1834_v23 = vpop.eup %1833  ;;  %1438 = vst [vmem:[%s278_s23] sm:$0xff] %v1603_v21  ;;  %v1606_v24 = vpack.c.bf16 %v1832_v22, %v1832_v22 }
 0x2f6   : > { %v1605_v25 = vpack.c.bf16 %v1834_v23, %v1830_v20 }
 0x2f7   : > { %1441 = vst [vmem:[%s278_s23 + $0x14] sm:$0xf] %v1606_v24 }
 0x2f8   : > { %1440 = vst [vmem:[%s278_s23 + $0xc] sm:$0xff] %v1605_v25 }
 0x2f9 PF: > { %s17_s24 = sadd.s32 1, %s1841_s24  }
 0x2fa   : > { %p14_p4 = scmp.ge.s32.totalorder %s17_s24, 4  }
 0x2fc   :  { %16 = sbr.rel (!%p14_p4) target bundleno = 1 (0x1), region = 78 }

// kernel: net_forward.35
= control target key start
LH: loop header
LB: loop body
LE: loop exit
PB: predicated region body
PF: predicated region fallthrough
CT: control target
= control target key end

     0   :  { %s2335_s18 = smov 0   ;;  %s2337_s19 = smov 0   ;;  %s2868_s0 = inlined_call_operand.vmem [shape: bf16[32,1536], index: 0, kind: input, shape index: {}]   ;;  %s2869_s1 = inlined_call_operand.vmem [shape: bf16[32,384], index: 1, kind: input, shape index: {}]   ;;  %s2870_s2 = inlined_call_operand.vmem [shape: bf16[384,384], index: 2, kind: input, shape index: {}]   ;;  %s2871_s3 = inlined_call_operand.vmem [shape: bf16[384,384], index: 3, kind: input, shape index: {}]   ;;  %s2872_s4 = inlined_call_operand.vmem [shape: f32[1,384], index: 4, kind: input, shape index: {}]   ;;  %s2873_s5 = inlined_call_operand.vmem [shape: bf16[32,384], index: 5, kind: output, shape index: {}]  }
   0x1   :  { %s2339_s20 = smov 0  }
   0x2 LB: > { %s1758_s21 = sadd.s32 4294967295, %s2300_s20   ;;  %s2352_s22 = sadd.s32 1, %s2300_s20   ;;  %s2300_s20 = sphi %s2339_s20, %s2876_s20   ;;  %s2296_s19 = sphi %s2337_s19, %s2875_s19   ;;  %s2292_s18 = sphi %s2335_s18, %s2874_s18  }
   0x3   : > { %s19_s23 = ssub.s32 %s2300_s20, %s2352_s22  ;;  %s22_s24 = sadd.s32 1, %s2296_s19 }
   0x4   : > { %p20_p0 = scmp.eq.s32.totalorder %s19_s23, 0  ;;  %p29_p1 = scmp.ne.s32.totalorder %s2296_s19, %s2292_s18 }
   0x5   : > { %p30_p2 = scmp.eq.s32.totalorder %s2300_s20, 0  ;;  %p1761_p4 = scmp.ge.s32.totalorder %s2300_s20, 2 }
   0x6   : > { %s2361_s25 = scalar_select %p20_p0, %s2296_s19, %s22_s24  }
   0x7   : > { %p31_p3 = por %p30_p2, %p29_p1  ;;  %179 = sbr.rel (%p1761_p4) target bundleno = 21 (0x15), region = 28 }
   0xe   : > { %182 = sbr.rel (!%p31_p3) target bundleno = 21 (0x15), region = 32  ;;  %s184_s26 = sand.u32 (%p31_p3), 1, %s2296_s19  }
   0xf   : > { %s1762_s27 = smul.u32 (%p31_p3), 96, %s2300_s20 }
  0x10   : > { %s2048_s28 = smul.u32 (%p31_p3), 24, %s184_s26 }
  0x11   : > { %s1703_s6 = scalar_lea.vmem (%p31_p3), %s2868_s0, %s1762_s27 }
  0x12   : > { %v1763_v0 = vld [vmem:[%s1703_s6 + $0x24] sm:$0xff] (%p31_p3)  ;;  %v1764_v1 = vld [vmem:[%s1703_s6 + $0x54] sm:$0xff] (%p31_p3)  ;;  %v1765_v2 = vld [vmem:[%s1703_s6 + $0x2c] sm:$0xf] (%p31_p3)  ;;  %s186_s7 = scalar_lea.vmem (%p31_p3), [#allocation2], %s2048_s28 }
  0x13   : > { %207 = vst [vmem:[%s186_s7] sm:$0xff] (%p31_p3), %v1763_v0  ;;  %209 = vst [vmem:[%s186_s7 + $0xc] sm:$0xff] (%p31_p3), %v1764_v1  ;;  %v1767_v3 = vld [vmem:[%s1703_s6 + $0x5c] sm:$0xf] (%p31_p3) }
  0x14   : > { %1766 = vst [vmem:[%s186_s7 + $0x8] sm:$0xf] (%p31_p3), %v1765_v2  ;;  %1768 = vst [vmem:[%s186_s7 + $0x14] sm:$0xf] (%p31_p3), %v1767_v3 }
  0x15 PF: > { %p1769_p5 = scmp.ge.s32.totalorder %s2300_s20, 1  ;;  %p235_p6 = scmp.lt.s32.totalorder %s2300_s20, 3 }
  0x17   : > { %p236_p7 = pnand %p1769_p5, %p235_p6 }
  0x18   : > { %v2078_v4 = vld [vmem:[%s2871_s3 + $0x4] ss:$12 sps:$4 sm:$0xff] (!%p236_p7)   ;;  %v2302_v6 = vmov (!%p236_p7), 0   ;;  %v2082_v7 = vld [vmem:[%s2871_s3] ss:$12 sps:$4 sm:$0xff] (!%p236_p7)   ;;  %s1770_s7 = sshll.u32 (!%p236_p7), %s1758_s21, 1 }
  0x19   : > { %239 = sbr.rel (%p236_p7) target bundleno = 407 (0x197), region = 62  ;;  %v2080_v5 = vld [vmem:[%s2871_s3 + $0x184] ss:$12 sps:$4 sm:$0xff] (!%p236_p7)   ;;  %967 = vmatprep.mubr.bf16.mxu1 (!%p236_p7), %v2302_v6  ;;  %892 = vmatprep.subr.bf16.mxu0 (!%p236_p7), %v2078_v4  ;;  %v2083_v8 = vld [vmem:[%s2871_s3 + $0x180] ss:$12 sps:$4 sm:$0xff] (!%p236_p7)   ;;  %p278_p8 = scmp.lt.s32.totalorder (!%p236_p7), %s1770_s7, 3 }
  0x1a   : > { %935 = vmatprep.subr.bf16.mxu1 (!%p236_p7), %v2080_v5  ;;  %v2084_v9 = vld [vmem:[%s2871_s3 + $0x1c] ss:$12 sps:$4 sm:$0xff] (!%p236_p7)   ;;  %893 = vmatpush1.bf16.msra.mxu0 (!%p236_p7), %v2082_v7  ;;  %v2088_v11 = vld [vmem:[%s2871_s3 + $0x18] ss:$12 sps:$4 sm:$0xff] (!%p236_p7)   ;;  %v2090_v13 = vld [vmem:[%s2871_s3 + $0x34] ss:$12 sps:$4 sm:$0xff] (!%p236_p7)  }
  0x1b   : > { %936 = vmatpush1.bf16.msra.mxu1 (!%p236_p7), %v2083_v8  ;;  %v2086_v10 = vld [vmem:[%s2871_s3 + $0x19c] ss:$12 sps:$4 sm:$0xff] (!%p236_p7)   ;;  %894 = vmatprep.subr.bf16.mxu0 (!%p236_p7), %v2084_v9  ;;  %v2089_v12 = vld [vmem:[%s2871_s3 + $0x198] ss:$12 sps:$4 sm:$0xff] (!%p236_p7)   ;;  %v2092_v14 = vld [vmem:[%s2871_s3 + $0x1b4] ss:$12 sps:$4 sm:$0xff] (!%p236_p7)  }
  0x1c   : > { %937 = vmatprep.subr.bf16.mxu1 (!%p236_p7), %v2086_v10  ;;  %v2094_v15 = vld [vmem:[%s2871_s3 + $0x30] ss:$12 sps:$4 sm:$0xff] (!%p236_p7)   ;;  %v2096_v17 = vld [vmem:[%s2871_s3 + $0x4c] ss:$12 sps:$4 sm:$0xff] (!%p236_p7)   ;;  %v2100_v19 = vld [vmem:[%s2871_s3 + $0x48] ss:$12 sps:$4 sm:$0xff] (!%p236_p7)  }
  0x1d   : > { %v2095_v16 = vld [vmem:[%s2871_s3 + $0x1b0] ss:$12 sps:$4 sm:$0xff] (!%p236_p7)   ;;  %v2098_v18 = vld [vmem:[%s2871_s3 + $0x1cc] ss:$12 sps:$4 sm:$0xff] (!%p236_p7)   ;;  %v2101_v20 = vld [vmem:[%s2871_s3 + $0x1c8] ss:$12 sps:$4 sm:$0xff] (!%p236_p7)  }
  0x1e   : > { %895 = vmatpush1.bf16.msra.mxu0 (!%p236_p7), %v2088_v11  ;;  %v2102_v21 = vld [vmem:[%s2871_s3 + $0x64] ss:$12 sps:$4 sm:$0xff] (!%p236_p7)   ;;  %v2106_v23 = vld [vmem:[%s2871_s3 + $0x60] ss:$12 sps:$4 sm:$0xff] (!%p236_p7)   ;;  %v2108_v25 = vld [vmem:[%s2871_s3 + $0x7c] ss:$12 sps:$4 sm:$0xff] (!%p236_p7)  }
  0x1f   : > { %938 = vmatpush1.bf16.msra.mxu1 (!%p236_p7), %v2089_v12  ;;  %896 = vmatprep.subr.bf16.mxu0 (!%p236_p7), %v2090_v13  ;;  %v2104_v22 = vld [vmem:[%s2871_s3 + $0x1e4] ss:$12 sps:$4 sm:$0xff] (!%p236_p7)   ;;  %v2107_v24 = vld [vmem:[%s2871_s3 + $0x1e0] ss:$12 sps:$4 sm:$0xff] (!%p236_p7)   ;;  %v2110_v26 = vld [vmem:[%s2871_s3 + $0x1fc] ss:$12 sps:$4 sm:$0xff] (!%p236_p7)  }
  0x20   : > { %939 = vmatprep.subr.bf16.mxu1 %v2092_v14  ;;  %s2878_s7 = smov (!%p278_p8, %s1770_s7), 3  ;;  %v2112_v27 = vld [vmem:[%s2871_s3 + $0x78] ss:$12 sps:$4 sm:$0xff]   ;;  %v2114_v29 = vld [vmem:[%s2871_s3 + $0x94] ss:$12 sps:$4 sm:$0xff]   ;;  %v2303_v12 = vmov 0.0  }
  0x21   : > { %s2050_s14 = smul.u32 12, %s2878_s7  ;;  %v2113_v28 = vld [vmem:[%s2871_s3 + $0x1f8] ss:$12 sps:$4 sm:$0xff]   ;;  %v2116_v30 = vld [vmem:[%s2871_s3 + $0x214] ss:$12 sps:$4 sm:$0xff]   ;;  %vm2304_vm0 = vmmov 0  }
  0x22   : > { %897 = vmatpush1.bf16.msra.mxu0 %v2094_v15  ;;  %v2118_v31 = vld [vmem:[%s2871_s3 + $0x90] ss:$12 sps:$4 sm:$0xff]   ;;  %v2120_v33 = vld [vmem:[%s2871_s3 + $0xac] ss:$12 sps:$4 sm:$0xff]   ;;  %v2124_v35 = vld [vmem:[%s2871_s3 + $0xa8] ss:$12 sps:$4 sm:$0xff]  }
  0x23   : > { %940 = vmatpush1.bf16.msra.mxu1 %v2095_v16  ;;  %898 = vmatprep.subr.bf16.mxu0 %v2096_v17  ;;  %s2460_s29 = scalar_lea.vmem %s2869_s1, %s2050_s14  ;;  %v2119_v32 = vld [vmem:[%s2871_s3 + $0x210] ss:$12 sps:$4 sm:$0xff]   ;;  %v2122_v34 = vld [vmem:[%s2871_s3 + $0x22c] ss:$12 sps:$4 sm:$0xff]   ;;  %v2125_v36 = vld [vmem:[%s2871_s3 + $0x228] ss:$12 sps:$4 sm:$0xff]   ;;  %s289_s26 = scalar_lea.vmem %s2873_s5, %s2050_s14 }
  0x24   : > { %941 = vmatprep.subr.bf16.mxu1 %v2098_v18  ;;  %v2126_v37 = vld [vmem:[%s2871_s3 + $0xc4] ss:$12 sps:$4 sm:$0xff]   ;;  %v2484_v38 = vld [vmem:[%s2460_s29 + $0x8] ss:$12 sps:$4 sm:$0xff]   ;;  %v2130_v40 = vld [vmem:[%s2871_s3 + $0xc0] ss:$12 sps:$4 sm:$0xff]  }
  0x25   : > { %v2129_v39 = vld [vmem:[%s2871_s3 + $0xc8] ss:$12 sps:$4 sm:$0xff]   ;;  %v2134_v43 = vld [vmem:[%s2871_s3 + $0xe0] ss:$12 sps:$4 sm:$0xff]   ;;  %v2135_v44 = vld [vmem:[%s2871_s3 + $0xd8] ss:$12 sps:$4 sm:$0xff]  }
  0x26   : > { %899 = vmatpush1.bf16.msra.mxu0 %v2100_v19  ;;  %v2131_v41 = vld [vmem:[%s2871_s3 + $0x8] ss:$12 sps:$4 sm:$0xff]   ;;  %v2136_v45 = vld [vmem:[%s2871_s3 + $0x20] ss:$12 sps:$4 sm:$0xff]   ;;  %v2139_v47 = vld [vmem:[%s2871_s3 + $0xf8] ss:$12 sps:$4 sm:$0xff]  }
  0x27   : > { %942 = vmatpush1.bf16.msra.mxu1 %v2101_v20  ;;  %900 = vmatprep.subr.bf16.mxu0 %v2102_v21  ;;  %v2132_v42 = vld [vmem:[%s2871_s3 + $0xdc] ss:$12 sps:$4 sm:$0xff]   ;;  %v2137_v46 = vld [vmem:[%s2871_s3 + $0xf4] ss:$12 sps:$4 sm:$0xff]   ;;  %v2141_v49 = vld [vmem:[%s2871_s3 + $0x38] ss:$12 sps:$4 sm:$0xff]  }
  0x28   : > { %943 = vmatprep.subr.bf16.mxu1 %v2104_v22  ;;  %v2140_v48 = vld [vmem:[%s2871_s3 + $0xf0] ss:$12 sps:$4 sm:$0xff]   ;;  %v2142_v50 = vld [vmem:[%s2871_s3 + $0x10c] ss:$12 sps:$4 sm:$0xff]   ;;  %v2145_v52 = vld [vmem:[%s2871_s3 + $0x108] ss:$12 sps:$4 sm:$0xff]  }
  0x29   : > { %v2144_v51 = vld [vmem:[%s2871_s3 + $0x110] ss:$12 sps:$4 sm:$0xff]   ;;  %v2149_v55 = vld [vmem:[%s2871_s3 + $0x128] ss:$12 sps:$4 sm:$0xff]   ;;  %v2150_v56 = vld [vmem:[%s2871_s3 + $0x120] ss:$12 sps:$4 sm:$0xff]  }
  0x2a   : > { %901 = vmatpush1.bf16.msra.mxu0 %v2106_v23  ;;  %v2146_v53 = vld [vmem:[%s2871_s3 + $0x50] ss:$12 sps:$4 sm:$0xff]   ;;  %v2151_v57 = vld [vmem:[%s2871_s3 + $0x68] ss:$12 sps:$4 sm:$0xff]   ;;  %v2154_v59 = vld [vmem:[%s2871_s3 + $0x140] ss:$12 sps:$4 sm:$0xff]  }
  0x2b   : > { %944 = vmatpush1.bf16.msra.mxu1 %v2107_v24  ;;  %902 = vmatprep.subr.bf16.mxu0 %v2108_v25  ;;  %v2147_v54 = vld [vmem:[%s2871_s3 + $0x124] ss:$12 sps:$4 sm:$0xff]   ;;  %v2152_v58 = vld [vmem:[%s2871_s3 + $0x13c] ss:$12 sps:$4 sm:$0xff]   ;;  %v2156_v62 = vld [vmem:[%s2871_s3 + $0x80] ss:$12 sps:$4 sm:$0xff]  }
  0x2c   : > { %945 = vmatprep.subr.bf16.mxu1 %v2110_v26  ;;  %v2169_v60 = vld [vmem:[%s2460_s29 + $0x4] ss:$12 sps:$4 sm:$0xff]   ;;  %v2157_v63 = vld [vmem:[%s2871_s3 + $0x154] ss:$12 sps:$4 sm:$0xff]   ;;  %v2162_v3 = vld [vmem:[%s2871_s3 + $0x16c] ss:$12 sps:$4 sm:$0xff]  }
  0x2d   : > { %v2155_v61 = vld [vmem:[%s2871_s3 + $0x138] ss:$12 sps:$4 sm:$0xff]   ;;  %v2160_v1 = vld [vmem:[%s2871_s3 + $0x150] ss:$12 sps:$4 sm:$0xff]   ;;  %924 = vmatprep.mubr.bf16.mxu0 %v2169_v60  ;;  %v2165_v5 = vld [vmem:[%s2871_s3 + $0x168] ss:$12 sps:$4 sm:$0xff]  }
  0x2e   : > { %903 = vmatpush1.bf16.msra.mxu0 %v2112_v27  ;;  %v2159_v0 = vld [vmem:[%s2871_s3 + $0x158] ss:$12 sps:$4 sm:$0xff]   ;;  %v2164_v4 = vld [vmem:[%s2871_s3 + $0x170] ss:$12 sps:$4 sm:$0xff]   ;;  %v2167_v9 = vld [vmem:[%s2460_s29] ss:$12 sps:$4 sm:$0xff]  }
  0x2f   : > { %946 = vmatpush1.bf16.msra.mxu1 %v2113_v28  ;;  %904 = vmatprep.subr.bf16.mxu0 %v2114_v29  ;;  %v2161_v2 = vld [vmem:[%s2871_s3 + $0x98] ss:$12 sps:$4 sm:$0xff]   ;;  %v2166_v7 = vld [vmem:[%s2871_s3 + $0xb0] ss:$12 sps:$4 sm:$0xff]   ;;  %v2170_v10 = vld [vmem:[%s2870_s2] ss:$12 sps:$4 sm:$0xff]  }
  0x30   : > { %947 = vmatprep.subr.bf16.mxu1 %v2116_v30  ;;  %v2172_v8 = vld [vmem:[%s2870_s2 + $0x4] ss:$12 sps:$4 sm:$0xff]   ;;  %v2173_v11 = vld [vmem:[%s2871_s3 + $0x188] ss:$12 sps:$4 sm:$0xff]   ;;  %v2177_v15 = vld [vmem:[%s2871_s3 + $0x1a0] ss:$12 sps:$4 sm:$0xff]  }
  0x31   : > { %v2176_v13 = vld [vmem:[%s2870_s2 + $0x1c] ss:$12 sps:$4 sm:$0xff]   ;;  %v2174_v14 = vld [vmem:[%s2870_s2 + $0x18] ss:$12 sps:$4 sm:$0xff]   ;;  %v2180_v16 = vld [vmem:[%s2870_s2 + $0x34] ss:$12 sps:$4 sm:$0xff]  }
  0x32   : > { %905 = vmatpush1.bf16.msra.mxu0 %v2118_v31  ;;  %v2178_v17 = vld [vmem:[%s2870_s2 + $0x30] ss:$12 sps:$4 sm:$0xff]   ;;  %v2181_v18 = vld [vmem:[%s2871_s3 + $0x1b8] ss:$12 sps:$4 sm:$0xff]   ;;  %v2182_v20 = vld [vmem:[%s2870_s2 + $0x48] ss:$12 sps:$4 sm:$0xff]  }
  0x33   : > { %948 = vmatpush1.bf16.msra.mxu1 %v2119_v32  ;;  %906 = vmatprep.subr.bf16.mxu0 %v2120_v33  ;;  %v2184_v19 = vld [vmem:[%s2870_s2 + $0x4c] ss:$12 sps:$4 sm:$0xff]   ;;  %v2185_v21 = vld [vmem:[%s2871_s3 + $0x1d0] ss:$12 sps:$4 sm:$0xff]   ;;  %v2189_v24 = vld [vmem:[%s2871_s3 + $0x1e8] ss:$12 sps:$4 sm:$0xff]  }
  0x34   : > { %949 = vmatprep.subr.bf16.mxu1 %v2122_v34  ;;  %v2188_v22 = vld [vmem:[%s2870_s2 + $0x64] ss:$12 sps:$4 sm:$0xff]   ;;  %v2186_v23 = vld [vmem:[%s2870_s2 + $0x60] ss:$12 sps:$4 sm:$0xff]   ;;  %v2192_v25 = vld [vmem:[%s2870_s2 + $0x7c] ss:$12 sps:$4 sm:$0xff]  }
  0x35   : > { %v2190_v26 = vld [vmem:[%s2870_s2 + $0x78] ss:$12 sps:$4 sm:$0xff]   ;;  %s242_s30 = sand.u32 1, %s2292_s18   ;;  %v2193_v27 = vld [vmem:[%s2871_s3 + $0x200] ss:$12 sps:$4 sm:$0xff]  }
  0x36   : > { %907 = vmatpush1.bf16.msra.mxu0 %v2124_v35  ;;  %v2196_v28 = vld [vmem:[%s2870_s2 + $0x94] ss:$12 sps:$4 sm:$0xff]   ;;  %s2049_s11 = smul.u32 24, %s242_s30  ;;  %v2194_v29 = vld [vmem:[%s2870_s2 + $0x90] ss:$12 sps:$4 sm:$0xff]  }
  0x37   : > { %950 = vmatpush1.bf16.msra.mxu1 %v2125_v36  ;;  %908 = vmatprep.subr.bf16.mxu0 %v2126_v37  ;;  %v2197_v30 = vld [vmem:[%s2871_s3 + $0x218] ss:$12 sps:$4 sm:$0xff]   ;;  %v2198_v32 = vld [vmem:[%s2870_s2 + $0xa8] ss:$12 sps:$4 sm:$0xff]   ;;  %v2201_v33 = vld [vmem:[%s2871_s3 + $0x230] ss:$12 sps:$4 sm:$0xff]  }
  0x38   : > { %1934 = vmatprep.subr.bf16.mxu1 %v2129_v39  ;;  %v2200_v31 = vld [vmem:[%s2870_s2 + $0xac] ss:$12 sps:$4 sm:$0xff]   ;;  %v2204_v34 = vld [vmem:[%s2870_s2 + $0xc4] ss:$12 sps:$4 sm:$0xff]   ;;  %v2205_v35 = vld [vmem:[%s2870_s2 + $0xc8] ss:$12 sps:$4 sm:$0xff]  }
  0x39   : > { %v2202_v36 = vld [vmem:[%s2870_s2 + $0xc0] ss:$12 sps:$4 sm:$0xff]   ;;  %v2206_v37 = vld [vmem:[%s2870_s2 + $0x8] ss:$12 sps:$4 sm:$0xff]   ;;  %s2677_s10 = scalar_lea.vmem [#allocation2], %s2049_s11 }
  0x3a   : > { %968 = vmatmul.mubr.bf16.vlgmr.msra.gmra.mrb[0].mxu1 %v2484_v38  ;;  %909 = vmatpush1.bf16.msra.mxu0 %v2130_v40  ;;  %v2209_v39 = vld [vmem:[%s2870_s2 + $0xdc] ss:$12 sps:$4 sm:$0xff]  }
  0x3b   : > { %1935 = vmatpush3.bf16.msra.mxu1 %v2131_v41  ;;  %910 = vmatprep.subr.bf16.mxu0 %v2132_v42  ;;  %v2244_v40 = vld [vmem:[%s2677_s10 + $0x4] ss:$12 sps:$4 sm:$0xff]   ;;  %v2210_v41 = vld [vmem:[%s2870_s2 + $0xe0] ss:$12 sps:$4 sm:$0xff]  }
  0x3c   : > { %1936 = vmatprep.subr.bf16.mxu1 %v2134_v43  ;;  %1010 = vmatprep.mubr.bf16.mxu1 %v2169_v60  ;;  %v2207_v42 = vld [vmem:[%s2870_s2 + $0xd8] ss:$12 sps:$4 sm:$0xff]   ;;  %v2211_v43 = vld [vmem:[%s2870_s2 + $0x20] ss:$12 sps:$4 sm:$0xff]  }
  0x3d   : > { %v2235_v60 = vld [vmem:[%s2870_s2 + $0x158] ss:$12 sps:$4 sm:$0xff]  }
  0x3e   : > { %911 = vmatpush1.bf16.msra.mxu0 %v2135_v44  ;;  %v2214_v44 = vld [vmem:[%s2870_s2 + $0xf4] ss:$12 sps:$4 sm:$0xff]  }
  0x3f   : > { %1937 = vmatpush3.bf16.msra.mxu1 %v2136_v45  ;;  %912 = vmatprep.subr.bf16.mxu0 %v2137_v46  ;;  %v2212_v45 = vld [vmem:[%s2870_s2 + $0xf0] ss:$12 sps:$4 sm:$0xff]   ;;  %v2216_v46 = vld [vmem:[%s2870_s2 + $0x38] ss:$12 sps:$4 sm:$0xff]  }
  0x40   : > { %1938 = vmatprep.subr.bf16.mxu1 %v2139_v47  ;;  %v2219_v47 = vld [vmem:[%s2870_s2 + $0x10c] ss:$12 sps:$4 sm:$0xff]  }
  0x42   : > { %913 = vmatpush1.bf16.msra.mxu0 %v2140_v48  ;;  %v2220_v48 = vld [vmem:[%s2870_s2 + $0x110] ss:$12 sps:$4 sm:$0xff]  }
  0x43   : > { %1939 = vmatpush3.bf16.msra.mxu1 %v2141_v49  ;;  %914 = vmatprep.subr.bf16.mxu0 %v2142_v50  ;;  %v2217_v49 = vld [vmem:[%s2870_s2 + $0x108] ss:$12 sps:$4 sm:$0xff]   ;;  %v2221_v50 = vld [vmem:[%s2870_s2 + $0x50] ss:$12 sps:$4 sm:$0xff]  }
  0x44   : > { %1940 = vmatprep.subr.bf16.mxu1 %v2144_v51  ;;  %v2224_v51 = vld [vmem:[%s2870_s2 + $0x124] ss:$12 sps:$4 sm:$0xff]  }
  0x46   : > { %915 = vmatpush1.bf16.msra.mxu0 %v2145_v52  ;;  %v2225_v52 = vld [vmem:[%s2870_s2 + $0x128] ss:$12 sps:$4 sm:$0xff]  }
  0x47   : > { %1941 = vmatpush3.bf16.msra.mxu1 %v2146_v53  ;;  %916 = vmatprep.subr.bf16.mxu0 %v2147_v54  ;;  %v2222_v53 = vld [vmem:[%s2870_s2 + $0x120] ss:$12 sps:$4 sm:$0xff]   ;;  %v2226_v54 = vld [vmem:[%s2870_s2 + $0x68] ss:$12 sps:$4 sm:$0xff]  }
  0x48   : > { %1942 = vmatprep.subr.bf16.mxu1 %v2149_v55  ;;  %v2229_v55 = vld [vmem:[%s2870_s2 + $0x13c] ss:$12 sps:$4 sm:$0xff]  }
  0x4a   : > { %917 = vmatpush1.bf16.msra.mxu0 %v2150_v56  ;;  %v2230_v56 = vld [vmem:[%s2870_s2 + $0x140] ss:$12 sps:$4 sm:$0xff]  }
  0x4b   : > { %1943 = vmatpush3.bf16.msra.mxu1 %v2151_v57  ;;  %918 = vmatprep.subr.bf16.mxu0 %v2152_v58  ;;  %v2227_v57 = vld [vmem:[%s2870_s2 + $0x138] ss:$12 sps:$4 sm:$0xff]   ;;  %v2231_v58 = vld [vmem:[%s2870_s2 + $0x80] ss:$12 sps:$4 sm:$0xff]  }
  0x4c   : > { %1944 = vmatprep.subr.bf16.mxu1 %v2154_v59  ;;  %v2234_v59 = vld [vmem:[%s2870_s2 + $0x154] ss:$12 sps:$4 sm:$0xff]  }
  0x4e   : > { %919 = vmatpush1.bf16.msra.mxu0 %v2155_v61  ;;  %v2232_v61 = vld [vmem:[%s2870_s2 + $0x150] ss:$12 sps:$4 sm:$0xff]  }
  0x4f   : > { %1945 = vmatpush3.bf16.msra.mxu1 %v2156_v62  ;;  %920 = vmatprep.subr.bf16.mxu0 %v2157_v63  ;;  %v2236_v62 = vld [vmem:[%s2870_s2 + $0x98] ss:$12 sps:$4 sm:$0xff]  }
  0x50   : > { %1946 = vmatprep.subr.bf16.mxu1 %v2159_v0  ;;  %v2239_v63 = vld [vmem:[%s2870_s2 + $0x16c] ss:$12 sps:$4 sm:$0xff]   ;;  %v2240_v0 = vld [vmem:[%s2870_s2 + $0x170] ss:$12 sps:$4 sm:$0xff]  }
  0x52   : > { %921 = vmatpush1.bf16.msra.mxu0 %v2160_v1  ;;  %v2237_v1 = vld [vmem:[%s2870_s2 + $0x168] ss:$12 sps:$4 sm:$0xff]  }
  0x53   : > { %1947 = vmatpush3.bf16.msra.mxu1 %v2161_v2  ;;  %922 = vmatprep.subr.bf16.mxu0 %v2162_v3  ;;  %v2241_v2 = vld [vmem:[%s2870_s2 + $0xb0] ss:$12 sps:$4 sm:$0xff]  }
  0x54   : > { %1948 = vmatprep.subr.bf16.mxu1 %v2164_v4  ;;  %v2247_v3 = vld [vmem:[%s2870_s2 + $0x184] ss:$12 sps:$4 sm:$0xff]  }
  0x55   : > { %v2242_v4 = vld [vmem:[%s2677_s10] ss:$12 sps:$4 sm:$0xff]  }
  0x56   : > { %923 = vmatpush1.bf16.msra.mxu0 %v2165_v5  ;;  %v2245_v5 = vld [vmem:[%s2870_s2 + $0x180] ss:$12 sps:$4 sm:$0xff]  }
  0x57   : > { %1949 = vmatpush3.bf16.msra.mxu1 %v2166_v7  ;;  %1460 = vmatprep.subr.bf16.mxu0 %v2172_v8  ;;  %v2248_v7 = vld [vmem:[%s2870_s2 + $0x188] ss:$12 sps:$4 sm:$0xff]  }
  0x58   : > { %1996 = vmatprep.subr.bf16.mxu1 %v2303_v12  ;;  %v2251_v8 = vld [vmem:[%s2870_s2 + $0x19c] ss:$12 sps:$4 sm:$0xff]  }
  0x59   : > { %925 = vmatmul.mubr.bf16.vlgmr.msra.gmra.mrb[0].mxu0 %v2167_v9 }
  0x5a   : > { %1011 = vmatmul.mubr.bf16.vlgmr.msra.gmra.mrb[4].mxu1 %v2167_v9  ;;  %1461 = vmatpush1.bf16.msra.mxu0 %v2170_v10  ;;  %v2249_v9 = vld [vmem:[%s2870_s2 + $0x198] ss:$12 sps:$4 sm:$0xff]   ;;  %v2252_v10 = vld [vmem:[%s2870_s2 + $0x1a0] ss:$12 sps:$4 sm:$0xff]  }
  0x5b   : > { %1997 = vmatpush3.bf16.msra.mxu1 %v2173_v11  ;;  %1462 = vmatprep.subr.bf16.mxu0 %v2176_v13  ;;  %v2255_v11 = vld [vmem:[%s2870_s2 + $0x1b4] ss:$12 sps:$4 sm:$0xff]   ;;  %v2253_v13 = vld [vmem:[%s2870_s2 + $0x1b0] ss:$12 sps:$4 sm:$0xff]  }
  0x5c   : > { %1998 = vmatprep.subr.bf16.mxu1 %v2303_v12  ;;  %2012 = vmatprep.mubr.msk.bf16.mxu1 %vm2304_vm0, %v2303_v12 }
  0x5d   : > { %1492 = vmatprep.mubr.bf16.mxu0 %v2244_v40 }
  0x5e   : > { %1463 = vmatpush1.bf16.msra.mxu0 %v2174_v14  ;;  %v2256_v14 = vld [vmem:[%s2870_s2 + $0x1b8] ss:$12 sps:$4 sm:$0xff]  }
  0x5f   : > { %1999 = vmatpush3.bf16.msra.mxu1 %v2177_v15  ;;  %1464 = vmatprep.subr.bf16.mxu0 %v2180_v16  ;;  %v2257_v15 = vld [vmem:[%s2870_s2 + $0x1c8] ss:$12 sps:$4 sm:$0xff]   ;;  %v2260_v16 = vld [vmem:[%s2870_s2 + $0x1d0] ss:$12 sps:$4 sm:$0xff]  }
  0x60   : > { %2000 = vmatprep.subr.bf16.mxu1 %v2303_v12 }
  0x62   : > { %1465 = vmatpush1.bf16.msra.mxu0 %v2178_v17  ;;  %v2263_v17 = vld [vmem:[%s2870_s2 + $0x1e4] ss:$12 sps:$4 sm:$0xff]  }
  0x63   : > { %2001 = vmatpush3.bf16.msra.mxu1 %v2181_v18  ;;  %1466 = vmatprep.subr.bf16.mxu0 %v2184_v19  ;;  %v2261_v18 = vld [vmem:[%s2870_s2 + $0x1e0] ss:$12 sps:$4 sm:$0xff]   ;;  %v2264_v19 = vld [vmem:[%s2870_s2 + $0x1e8] ss:$12 sps:$4 sm:$0xff]  }
  0x64   : > { %2002 = vmatprep.subr.bf16.mxu1 %v2303_v12 }
  0x66   : > { %1467 = vmatpush1.bf16.msra.mxu0 %v2182_v20  ;;  %v2267_v20 = vld [vmem:[%s2870_s2 + $0x1fc] ss:$12 sps:$4 sm:$0xff]  }
  0x67   : > { %2003 = vmatpush3.bf16.msra.mxu1 %v2185_v21  ;;  %1468 = vmatprep.subr.bf16.mxu0 %v2188_v22  ;;  %v2265_v21 = vld [vmem:[%s2870_s2 + $0x1f8] ss:$12 sps:$4 sm:$0xff]   ;;  %v2268_v22 = vld [vmem:[%s2870_s2 + $0x200] ss:$12 sps:$4 sm:$0xff]  }
  0x68   : > { %2004 = vmatprep.subr.bf16.mxu1 %v2303_v12 }
  0x6a   : > { %1469 = vmatpush1.bf16.msra.mxu0 %v2186_v23  ;;  %v2271_v23 = vld [vmem:[%s2870_s2 + $0x214] ss:$12 sps:$4 sm:$0xff]  }
  0x6b   : > { %2005 = vmatpush3.bf16.msra.mxu1 %v2189_v24  ;;  %1470 = vmatprep.subr.bf16.mxu0 %v2192_v25  ;;  %v2269_v24 = vld [vmem:[%s2870_s2 + $0x210] ss:$12 sps:$4 sm:$0xff]   ;;  %v2272_v25 = vld [vmem:[%s2870_s2 + $0x218] ss:$12 sps:$4 sm:$0xff]  }
  0x6c   : > { %2006 = vmatprep.subr.bf16.mxu1 %v2303_v12 }
  0x6e   : > { %1471 = vmatpush1.bf16.msra.mxu0 %v2190_v26  ;;  %v2275_v26 = vld [vmem:[%s2870_s2 + $0x22c] ss:$12 sps:$4 sm:$0xff]  }
  0x6f   : > { %2007 = vmatpush3.bf16.msra.mxu1 %v2193_v27  ;;  %1472 = vmatprep.subr.bf16.mxu0 %v2196_v28  ;;  %v2273_v27 = vld [vmem:[%s2870_s2 + $0x228] ss:$12 sps:$4 sm:$0xff]   ;;  %v2276_v28 = vld [vmem:[%s2870_s2 + $0x230] ss:$12 sps:$4 sm:$0xff]  }
  0x70   : > { %2008 = vmatprep.subr.bf16.mxu1 %v2303_v12 }
  0x72   : > { %1473 = vmatpush1.bf16.msra.mxu0 %v2194_v29  ;;  %v2277_v29 = vld [vmem:[%s2677_s10 + $0x8] ss:$12 sps:$4 sm:$0xff]  }
  0x73   : > { %2009 = vmatpush3.bf16.msra.mxu1 %v2197_v30  ;;  %1474 = vmatprep.subr.bf16.mxu0 %v2200_v31 }
  0x74   : > { %2010 = vmatprep.subr.bf16.mxu1 %v2303_v12 }
  0x76   : > { %1475 = vmatpush1.bf16.msra.mxu0 %v2198_v32 }
  0x77   : > { %2011 = vmatpush3.bf16.msra.mxu1 %v2201_v33  ;;  %1476 = vmatprep.subr.bf16.mxu0 %v2204_v34 }
  0x78   : > { %1965 = vmatprep.subr.bf16.mxu1 %v2205_v35 }
  0x7a   : > { %2013 = vmatmul.mubr.bf16.vlgmr.msra.gmra.mrb[8].mxu1 %v2484_v38  ;;  %1477 = vmatpush1.bf16.msra.mxu0 %v2202_v36  ;;  %v2215_v38 = vld [vmem:[%s2870_s2 + $0xf8] ss:$12 sps:$4 sm:$0xff]  }
  0x7b   : > { %1966 = vmatpush3.bf16.msra.mxu1 %v2206_v37  ;;  %1478 = vmatprep.subr.bf16.mxu0 %v2209_v39 }
  0x7c   : > { %1967 = vmatprep.subr.bf16.mxu1 %v2210_v41  ;;  %1578 = vmatprep.mubr.bf16.mxu1 %v2244_v40 }
  0x7e   : > { %1479 = vmatpush1.bf16.msra.mxu0 %v2207_v42 }
  0x7f   : > { %1968 = vmatpush3.bf16.msra.mxu1 %v2211_v43  ;;  %1480 = vmatprep.subr.bf16.mxu0 %v2214_v44 }
  0x80   : > { %1969 = vmatprep.subr.bf16.mxu1 %v2215_v38 }
  0x82   : > { %1481 = vmatpush1.bf16.msra.mxu0 %v2212_v45 }
  0x83   : > { %1970 = vmatpush3.bf16.msra.mxu1 %v2216_v46  ;;  %1482 = vmatprep.subr.bf16.mxu0 %v2219_v47 }
  0x84   : > { %1971 = vmatprep.subr.bf16.mxu1 %v2220_v48 }
  0x86   : > { %1483 = vmatpush1.bf16.msra.mxu0 %v2217_v49 }
  0x87   : > { %1972 = vmatpush3.bf16.msra.mxu1 %v2221_v50  ;;  %1484 = vmatprep.subr.bf16.mxu0 %v2224_v51 }
  0x88   : > { %1973 = vmatprep.subr.bf16.mxu1 %v2225_v52 }
  0x8a   : > { %1485 = vmatpush1.bf16.msra.mxu0 %v2222_v53 }
  0x8b   : > { %1974 = vmatpush3.bf16.msra.mxu1 %v2226_v54  ;;  %1486 = vmatprep.subr.bf16.mxu0 %v2229_v55 }
  0x8c   : > { %1975 = vmatprep.subr.bf16.mxu1 %v2230_v56 }
  0x8e   : > { %1487 = vmatpush1.bf16.msra.mxu0 %v2227_v57 }
  0x8f   : > { %1976 = vmatpush3.bf16.msra.mxu1 %v2231_v58  ;;  %1488 = vmatprep.subr.bf16.mxu0 %v2234_v59 }
  0x90   : > { %1977 = vmatprep.subr.bf16.mxu1 %v2235_v60 }
  0x92   : > { %1489 = vmatpush1.bf16.msra.mxu0 %v2232_v61  ;;  %v1630_v61 = vlaneseq }
  0x93   : > { %1978 = vmatpush3.bf16.msra.mxu1 %v2236_v62  ;;  %1490 = vmatprep.subr.bf16.mxu0 %v2239_v63 }
  0x94   : > { %1979 = vmatprep.subr.bf16.mxu1 %v2240_v0  ;;  %v1631_v62 = vshrl.u32 %v1630_v61, 7 }
  0x96   : > { %1491 = vmatpush1.bf16.msra.mxu0 %v2237_v1  ;;  %v1632_v63 = vsub.s32 0, %v1631_v62  ;;  %v1640_v0 = vsub.s32 2, %v1631_v62  ;;  %v1628_v1 = vld [vmem:[%s2872_s4] sm:$0x7] }
  0x97   : > { %1980 = vmatpush3.bf16.msra.mxu1 %v2241_v2  ;;  %1503 = vmatprep.subr.bf16.mxu0 %v2247_v3  ;;  %v1636_v2 = vsub.s32 1, %v1631_v62 }
  0x98   : > { %2016 = vmatprep.subr.bf16.mxu1 %v2303_v12  ;;  %v1633_v3 = vrot.slane %v1628_v1, %v1632_v63 }
  0x99   : > { %1493 = vmatmul.mubr.bf16.vlgmr.msra.gmra.mrb[4].mxu0 %v2242_v4 }
  0x9a   : > { %1579 = vmatmul.mubr.bf16.vlgmr.msra.gmra.mrb[12].mxu1 %v2242_v4  ;;  %1504 = vmatpush1.bf16.msra.mxu0 %v2245_v5  ;;  %v1641_v4 = vrot.slane %v1628_v1, %v1640_v0 }
  0x9b   : > { %2017 = vmatpush3.bf16.msra.mxu1 %v2248_v7  ;;  %1505 = vmatprep.subr.bf16.mxu0 %v2251_v8  ;;  %v1637_v8 = vrot.slane %v1628_v1, %v1636_v2 }
  0x9c   : > { %2018 = vmatprep.subr.bf16.mxu1 %v2303_v12  ;;  %1535 = vmatprep.mubr.bf16.mxu0 %v2302_v6  ;;  %v2259_v6 = vld [vmem:[%s2870_s2 + $0x1cc] ss:$12 sps:$4 sm:$0xff]  }
  0x9d   : > { %2032 = vmatprep.mubr.msk.bf16.mxu1 %vm2304_vm0, %v2303_v12 }
  0x9e   : > { %1506 = vmatpush1.bf16.msra.mxu0 %v2249_v9 }
  0x9f   : > { %2019 = vmatpush3.bf16.msra.mxu1 %v2252_v10  ;;  %1507 = vmatprep.subr.bf16.mxu0 %v2255_v11 }
  0xa0   : > { %2020 = vmatprep.subr.bf16.mxu1 %v2303_v12 }
  0xa2   : > { %1508 = vmatpush1.bf16.msra.mxu0 %v2253_v13 }
  0xa3   : > { %2021 = vmatpush3.bf16.msra.mxu1 %v2256_v14  ;;  %1509 = vmatprep.subr.bf16.mxu0 %v2259_v6 }
  0xa4   : > { %2022 = vmatprep.subr.bf16.mxu1 %v2303_v12 }
  0xa6   : > { %1510 = vmatpush1.bf16.msra.mxu0 %v2257_v15 }
  0xa7   : > { %2023 = vmatpush3.bf16.msra.mxu1 %v2260_v16  ;;  %1511 = vmatprep.subr.bf16.mxu0 %v2263_v17 }
  0xa8   : > { %2024 = vmatprep.subr.bf16.mxu1 %v2303_v12 }
  0xaa   : > { %1512 = vmatpush1.bf16.msra.mxu0 %v2261_v18 }
  0xab   : > { %2025 = vmatpush3.bf16.msra.mxu1 %v2264_v19  ;;  %1513 = vmatprep.subr.bf16.mxu0 %v2267_v20 }
  0xac   : > { %2026 = vmatprep.subr.bf16.mxu1 %v2303_v12 }
  0xae   : > { %1514 = vmatpush1.bf16.msra.mxu0 %v2265_v21 }
  0xaf   : > { %2027 = vmatpush3.bf16.msra.mxu1 %v2268_v22  ;;  %1515 = vmatprep.subr.bf16.mxu0 %v2271_v23 }
  0xb0   : > { %2028 = vmatprep.subr.bf16.mxu1 %v2303_v12 }
  0xb2   : > { %1516 = vmatpush1.bf16.msra.mxu0 %v2269_v24 }
  0xb3   : > { %2029 = vmatpush3.bf16.msra.mxu1 %v2272_v25  ;;  %1517 = vmatprep.subr.bf16.mxu0 %v2275_v26 }
  0xb4   : > { %2030 = vmatprep.subr.bf16.mxu1 %v2303_v12 }
  0xb6   : > { %1518 = vmatpush1.bf16.msra.mxu0 %v2273_v27 }
  0xb7   : > { %2031 = vmatpush3.bf16.msra.mxu1 %v2276_v28 }
  0xb9   : > { %1536 = vmatmul.mubr.bf16.vlgmr.msra.gmra.mrb[4].mxu0 %v2277_v29 }
  0xba   : > { %2033 = vmatmul.mubr.bf16.vlgmr.msra.gmra.mrb[16].mxu1 %v2277_v29 }
 0x10d   : > { %v969_v30 = vpop.f32.mrb[0].mxu1 }
 0x10e   : > { %v971_v31 = vpop.f32.mrb[1].mxu1 }
 0x10f   : > { %v973_v32 = vpop.f32.mrb[2].mxu1 }
 0x110   : > { %v975_v33 = vpop.f32.mrb[3].mxu1 }
 0x12c   : > { %v926_v34 = vpop.f32.mrb[0].mxu0 }
 0x12d   : > { %v1950_v35 = vpop.f32.mrb[4].mxu1  ;;  %v970_v36 = vadd.f32 %v969_v30, %v926_v34  ;;  %v928_v37 = vpop.f32.mrb[1].mxu0 }
 0x12e   : > { %v1951_v39 = vpop.f32.mrb[5].mxu1  ;;  %v972_v40 = vadd.f32 %v971_v31, %v928_v37  ;;  %v930_v42 = vpop.f32.mrb[2].mxu0 }
 0x12f   : > { %v1952_v41 = vadd.f32 %v1951_v39, %v1950_v35  ;;  %v1953_v43 = vpop.f32.mrb[6].mxu1  ;;  %v974_v44 = vadd.f32 %v973_v32, %v930_v42  ;;  %v932_v12 = vpop.f32.mrb[3].mxu0 }
 0x130   : > { %v1954_v38 = vpop.f32.mrb[7].mxu1  ;;  %v976_v45 = vadd.f32 %v975_v33, %v932_v12 }
 0x131   : > { %v1955_v46 = vadd.f32 %v1954_v38, %v1953_v43 }
 0x14d   : > { %v1053_v47 = vpop.f32.mrb[8].mxu1 }
 0x14e   : > { %v1054_v48 = vadd.f32 %v1952_v41, %v1053_v47  ;;  %v2014_v49 = vpop.f32.mrb[9].mxu1 }
 0x14f   : > { %v1056_v50 = vpop.f32.mrb[10].mxu1 }
 0x150   : > { %v1057_v51 = vadd.f32 %v1955_v46, %v1056_v50  ;;  %v2015_v52 = vpop.f32.mrb[11].mxu1 }
 0x16d   : > { %v1981_v53 = vpop.f32.mrb[12].mxu1 }
 0x16e   : > { %v1982_v54 = vpop.f32.mrb[13].mxu1 }
 0x16f   : > { %v1983_v55 = vadd.f32 %v1982_v54, %v1981_v53  ;;  %v1984_v56 = vpop.f32.mrb[14].mxu1 }
 0x170   : > { %v1985_v57 = vpop.f32.mrb[15].mxu1 }
 0x171   : > { %v1986_v58 = vadd.f32 %v1985_v57, %v1984_v56  ;;  %v1581_v59 = vadd.f32 %v1983_v55, %v1054_v48 }
 0x173   : > { %v1584_v60 = vadd.f32 %v1986_v58, %v1057_v51 }
 0x18c   : > { %v1537_v5 = vpop.f32.mrb[4].mxu0 }
 0x18d   : > { %v1621_v7 = vpop.f32.mrb[16].mxu1  ;;  %v2037_v9 = vadd.f32 %v1537_v5, %v970_v36  ;;  %v1539_v11 = vpop.f32.mrb[5].mxu0 }
 0x18e   : > { %v1622_v10 = vadd.f32 %v1621_v7, %v1581_v59  ;;  %v2034_v13 = vpop.f32.mrb[17].mxu1  ;;  %v2039_v14 = vadd.f32 %v1539_v11, %v972_v40  ;;  %v1541_v6 = vpop.f32.mrb[6].mxu0 }
 0x18f   : > { %v1624_v15 = vpop.f32.mrb[18].mxu1  ;;  %v1645_v16 = vadd.f32 %v2037_v9, %v1633_v3  ;;  %v2041_v18 = vadd.f32 %v1541_v6, %v974_v44  ;;  %v1543_v20 = vpop.f32.mrb[7].mxu0 }
 0x190   : > { %v1647_v17 = vadd.f32 %v1641_v4, %v1622_v10  ;;  %v1625_v19 = vadd.f32 %v1624_v15, %v1584_v60  ;;  %v2035_v21 = vpop.f32.mrb[19].mxu1  ;;  %v1646_v22 = vadd.f32 %v2039_v14, %v1637_v8  ;;  %v2043_v23 = vadd.f32 %v1543_v20, %v976_v45 }
 0x191   : > { %v1648_v25 = vadd.f32 %v2041_v18, %v1633_v3 }
 0x192   : > { %v1931_v24 = vpack.c.bf16 %v1647_v17, %v1647_v17  ;;  %v1650_v26 = vadd.f32 %v1641_v4, %v1625_v19  ;;  %v1930_v27 = vpack.c.bf16 %v1646_v22, %v1645_v16  ;;  %v1649_v28 = vadd.f32 %v2043_v23, %v1637_v8 }
 0x194   : > { %1672 = vst [vmem:[%s289_s26 + $0x8] sm:$0xf] %v1931_v24  ;;  %v1933_v29 = vpack.c.bf16 %v1650_v26, %v1650_v26  ;;  %1671 = vst [vmem:[%s289_s26] sm:$0xff] %v1930_v27  ;;  %v1932_v30 = vpack.c.bf16 %v1649_v28, %v1648_v25 }
 0x196   : > { %1674 = vst [vmem:[%s289_s26 + $0x14] sm:$0xf] %v1933_v29  ;;  %1673 = vst [vmem:[%s289_s26 + $0xc] sm:$0xff] %v1932_v30 }
 0x197 PF: > { %p12_p9 = scmp.ge.s32.totalorder %s2352_s22, 4   ;;  %s2874_s18 = smov %s2296_s19 }
 0x198   : > { %s2875_s19 = smov %s2361_s25  ;;  %s2876_s20 = smov %s2352_s22 }
 0x199   :  { %14 = sbr.rel (!%p12_p9) target bundleno = 2 (0x2), region = 110 }

// kernel: net_forward.44
= control target key start
LH: loop header
LB: loop body
LE: loop exit
PB: predicated region body
PF: predicated region fallthrough
CT: control target
= control target key end

     0   :  { %s413_s9 = smov 0   ;;  %s433_s0 = inlined_call_operand.vmem [shape: bf16[16,16], index: 0, kind: input, shape index: {}]   ;;  %s434_s1 = inlined_call_operand.vmem [shape: bf16[2,16,384], index: 1, kind: input, shape index: {}]   ;;  %s435_s2 = inlined_call_operand.vmem [shape: bf16[2,16,384], index: 2, kind: output, shape index: {}]  }
   0x1 LB: > { %s339_s10 = sadd.s32 4294967295, %s393_s9   ;;  %p343_p0 = scmp.ge.s32.totalorder %s393_s9, 1  ;;  %s393_s9 = sphi %s413_s9, %s12_s9  }
   0x2   : > { %p112_p1 = scmp.lt.s32.totalorder %s393_s9, 3 }
   0x4   : > { %p113_p2 = pnand %p343_p0, %p112_p1 }
   0x5   : > { %p134_p3 = scmp.lt.s32.totalorder (!%p113_p2), %s339_s10, 1  ;;  %v395_v0 = vmov (!%p113_p2), 0.0   ;;  %vm396_vm0 = vmmov (!%p113_p2), 0   ;;  %v397_v1 = vmov (!%p113_p2), 0   ;;  %v386_v5 = vld [vmem:[%s433_s0] sm:$0xff] (!%p113_p2)   ;;  %vm172_vm1 = vcmask (!%p113_p2), 130048  }
   0x6   : > { %116 = sbr.rel (%p113_p2) target bundleno = 240 (0xf0), region = 28  ;;  %364 = vmatprep.subr.bf16.mxu1 (!%p113_p2), %v395_v0  ;;  %366 = vmatprep.mubr.msk.bf16.mxu1 (!%p113_p2), %vm396_vm0, %v395_v0 }
   0x7   : > { %208 = vmatprep.mubr.bf16.mxu0 (!%p113_p2), %v397_v1 }
   0xd   : > { %s437_s10 = smov (!%p134_p3, %s339_s10), 1 }
   0xe   : > { %s370_s11 = smul.u32 24, %s437_s10 }
  0x10   : > { %s138_s14 = scalar_lea.vmem %s434_s1, %s370_s11  ;;  %s143_s19 = scalar_lea.vmem %s435_s2, %s370_s11 }
  0x11   : > { %v382_v2 = vld [vmem:[%s138_s14 + $0x4] ss:$12 sps:$4 sm:$0xff]   ;;  %v384_v3 = vld [vmem:[%s138_s14 + $0x8] ss:$12 sps:$4 sm:$0xff]   ;;  %v385_v4 = vld [vmem:[%s138_s14] ss:$12 sps:$4 sm:$0xff]  }
  0x12   : > { %176 = vmatprep.subr.bf16.mxu0 %v382_v2  ;;  %365 = vmatpush3.bf16.msra.mxu1 %v384_v3 }
  0x13   : > { %177 = vmatpush1.bf16.msra.mxu0 %v385_v4 }
  0x15   : > { %367 = vmatmul.mubr.msk.bf16.vlgmr.msra.gmra.mrb[0].mxu1 %vm172_vm1, %v386_v5 }
  0x16   : > { %350 = vmatmul.mubr.msk.bf16.vlgmr.msra.gmra.mrb[0].mxu0 %vm172_vm1, %v386_v5 }
  0xe8   : > { %v253_v6 = vpop.f32.mrb[0].mxu1 }
  0xe9   : > { %v359_v7 = vpack.c.bf16 %v253_v6, %v253_v6  ;;  %v210_v8 = vpop.f32.mrb[0].mxu0  ;;  %v368_v9 = vpop.f32.mrb[1].mxu1 }
  0xea   : > { %v212_v10 = vpop.f32.mrb[1].mxu0  ;;  %v256_v11 = vpop.f32.mrb[2].mxu1 }
  0xeb   : > { %281 = vst [vmem:[%s143_s19 + $0x8] sm:$0xf] %v359_v7  ;;  %v358_v12 = vpack.c.bf16 %v212_v10, %v210_v8  ;;  %v361_v13 = vpack.c.bf16 %v256_v11, %v256_v11  ;;  %v214_v14 = vpop.f32.mrb[2].mxu0  ;;  %v369_v15 = vpop.f32.mrb[3].mxu1 }
  0xec   : > { %v216_v16 = vpop.f32.mrb[3].mxu0 }
  0xed   : > { %280 = vst [vmem:[%s143_s19] sm:$0xff] %v358_v12  ;;  %283 = vst [vmem:[%s143_s19 + $0x14] sm:$0xf] %v361_v13  ;;  %v360_v17 = vpack.c.bf16 %v216_v16, %v214_v14 }
  0xef   : > { %282 = vst [vmem:[%s143_s19 + $0xc] sm:$0xff] %v360_v17 }
  0xf0 PF: > { %s12_s9 = sadd.s32 1, %s393_s9  }
  0xf1   : > { %p9_p4 = scmp.ge.s32.totalorder %s12_s9, 4  }
  0xf3   :  { %11 = sbr.rel (!%p9_p4) target bundleno = 1 (0x1), region = 58 }

// kernel: net_forward.24
= control target key start
LH: loop header
LB: loop body
LE: loop exit
PB: predicated region body
PF: predicated region fallthrough
CT: control target
= control target key end

     0   :  { %s3503_s12 = smov 0   ;;  %s4468_s0 = inlined_call_operand.vmem [shape: bf16[32,384], index: 0, kind: input, shape index: {}]   ;;  %s4469_s1 = inlined_call_operand.vmem [shape: bf16[384,1536], index: 1, kind: input, shape index: {}]   ;;  %s4470_s2 = inlined_call_operand.vmem [shape: f32[1,1536], index: 2, kind: input, shape index: {}]   ;;  %s4471_s3 = inlined_call_operand.vmem [shape: bf16[32,1536], index: 3, kind: output, shape index: {}]  }
   0x1 LB: > { %s2650_s13 = sadd.s32 4294967295, %s3480_s12   ;;  %p2654_p0 = scmp.ge.s32.totalorder %s3480_s12, 1  ;;  %s3480_s12 = sphi %s3503_s12, %s13_s12  }
   0x2   : > { %p139_p1 = scmp.lt.s32.totalorder %s3480_s12, 3 }
   0x4   : > { %p140_p2 = pnand %p2654_p0, %p139_p1 }
   0x5   : > { %v3035_v0 = vld [vmem:[%s4469_s1 + $0x4] ss:$48 sps:$4 sm:$0xff] (!%p140_p2)   ;;  %v3037_v1 = vld [vmem:[%s4469_s1 + $0xc] ss:$48 sps:$4 sm:$0xff] (!%p140_p2)   ;;  %v3039_v2 = vld [vmem:[%s4469_s1] ss:$48 sps:$4 sm:$0xff] (!%p140_p2)  }
   0x6   : > { %143 = sbr.rel (%p140_p2) target bundleno = 514 (0x202), region = 32  ;;  %1992 = vmatprep.subr.bf16.mxu0 (!%p140_p2), %v3035_v0  ;;  %v3040_v3 = vld [vmem:[%s4469_s1 + $0x8] ss:$48 sps:$4 sm:$0xff] (!%p140_p2)   ;;  %2078 = vmatprep.subr.bf16.mxu1 (!%p140_p2), %v3037_v1  ;;  %v3041_v4 = vld [vmem:[%s4469_s1 + $0x64] ss:$48 sps:$4 sm:$0xff] (!%p140_p2)   ;;  %s2655_s24 = sshll.u32 (!%p140_p2), %s2650_s13, 1 }
   0x7   : > { %1993 = vmatpush1.bf16.msra.mxu0 (!%p140_p2), %v3039_v2  ;;  %2079 = vmatpush1.bf16.msra.mxu1 (!%p140_p2), %v3040_v3  ;;  %v3043_v5 = vld [vmem:[%s4469_s1 + $0x6c] ss:$48 sps:$4 sm:$0xff] (!%p140_p2)   ;;  %v3045_v6 = vld [vmem:[%s4469_s1 + $0x60] ss:$48 sps:$4 sm:$0xff] (!%p140_p2)   ;;  %v3046_v7 = vld [vmem:[%s4469_s1 + $0x68] ss:$48 sps:$4 sm:$0xff] (!%p140_p2)  }
   0x8   : > { %1994 = vmatprep.subr.bf16.mxu0 (!%p140_p2), %v3041_v4  ;;  %2080 = vmatprep.subr.bf16.mxu1 (!%p140_p2), %v3043_v5  ;;  %v3047_v8 = vld [vmem:[%s4469_s1 + $0xc4] ss:$48 sps:$4 sm:$0xff] (!%p140_p2)   ;;  %v3049_v9 = vld [vmem:[%s4469_s1 + $0xcc] ss:$48 sps:$4 sm:$0xff] (!%p140_p2)   ;;  %v3051_v10 = vld [vmem:[%s4469_s1 + $0xc0] ss:$48 sps:$4 sm:$0xff] (!%p140_p2)  }
   0x9   : > { %v3052_v11 = vld [vmem:[%s4469_s1 + $0xc8] ss:$48 sps:$4 sm:$0xff] (!%p140_p2)   ;;  %v3053_v12 = vld [vmem:[%s4469_s1 + $0x124] ss:$48 sps:$4 sm:$0xff] (!%p140_p2)   ;;  %v3055_v13 = vld [vmem:[%s4469_s1 + $0x12c] ss:$48 sps:$4 sm:$0xff] (!%p140_p2)  }
   0xa   : > { %v3057_v14 = vld [vmem:[%s4469_s1 + $0x120] ss:$48 sps:$4 sm:$0xff] (!%p140_p2)   ;;  %v3058_v15 = vld [vmem:[%s4469_s1 + $0x128] ss:$48 sps:$4 sm:$0xff] (!%p140_p2)   ;;  %v3059_v16 = vld [vmem:[%s4469_s1 + $0x184] ss:$48 sps:$4 sm:$0xff] (!%p140_p2)  }
   0xb   : > { %1995 = vmatpush1.bf16.msra.mxu0 (!%p140_p2), %v3045_v6  ;;  %2081 = vmatpush1.bf16.msra.mxu1 (!%p140_p2), %v3046_v7  ;;  %v3061_v17 = vld [vmem:[%s4469_s1 + $0x18c] ss:$48 sps:$4 sm:$0xff] (!%p140_p2)   ;;  %v3063_v18 = vld [vmem:[%s4469_s1 + $0x180] ss:$48 sps:$4 sm:$0xff] (!%p140_p2)   ;;  %v3064_v19 = vld [vmem:[%s4469_s1 + $0x188] ss:$48 sps:$4 sm:$0xff] (!%p140_p2)  }
   0xc   : > { %1996 = vmatprep.subr.bf16.mxu0 (!%p140_p2), %v3047_v8  ;;  %2082 = vmatprep.subr.bf16.mxu1 (!%p140_p2), %v3049_v9  ;;  %v3065_v20 = vld [vmem:[%s4469_s1 + $0x1e4] ss:$48 sps:$4 sm:$0xff] (!%p140_p2)   ;;  %v3067_v21 = vld [vmem:[%s4469_s1 + $0x1ec] ss:$48 sps:$4 sm:$0xff] (!%p140_p2)   ;;  %v3069_v22 = vld [vmem:[%s4469_s1 + $0x1e0] ss:$48 sps:$4 sm:$0xff] (!%p140_p2)  }
   0xd   : > { %v3070_v23 = vld [vmem:[%s4469_s1 + $0x1e8] ss:$48 sps:$4 sm:$0xff]   ;;  %v3071_v24 = vld [vmem:[%s4469_s1 + $0x244] ss:$48 sps:$4 sm:$0xff]   ;;  %v3073_v25 = vld [vmem:[%s4469_s1 + $0x24c] ss:$48 sps:$4 sm:$0xff]  }
   0xe   : > { %v3075_v26 = vld [vmem:[%s4469_s1 + $0x240] ss:$48 sps:$4 sm:$0xff]   ;;  %v3076_v27 = vld [vmem:[%s4469_s1 + $0x248] ss:$48 sps:$4 sm:$0xff]   ;;  %v3077_v28 = vld [vmem:[%s4469_s1 + $0x2a4] ss:$48 sps:$4 sm:$0xff]  }
   0xf   : > { %1997 = vmatpush1.bf16.msra.mxu0 %v3051_v10  ;;  %2083 = vmatpush1.bf16.msra.mxu1 %v3052_v11  ;;  %v3079_v29 = vld [vmem:[%s4469_s1 + $0x2ac] ss:$48 sps:$4 sm:$0xff]   ;;  %v3081_v30 = vld [vmem:[%s4469_s1 + $0x2a0] ss:$48 sps:$4 sm:$0xff]   ;;  %v3082_v31 = vld [vmem:[%s4469_s1 + $0x2a8] ss:$48 sps:$4 sm:$0xff]  }
  0x10   : > { %1998 = vmatprep.subr.bf16.mxu0 %v3053_v12  ;;  %2084 = vmatprep.subr.bf16.mxu1 %v3055_v13  ;;  %v3083_v32 = vld [vmem:[%s4469_s1 + $0x304] ss:$48 sps:$4 sm:$0xff]   ;;  %p166_p3 = scmp.lt.s32.totalorder %s2655_s24, 3  ;;  %v3085_v33 = vld [vmem:[%s4469_s1 + $0x30c] ss:$48 sps:$4 sm:$0xff]   ;;  %v3482_v12 = vmov 0  }
  0x11   : > { %v3087_v34 = vld [vmem:[%s4469_s1 + $0x300] ss:$48 sps:$4 sm:$0xff]   ;;  %v3088_v35 = vld [vmem:[%s4469_s1 + $0x308] ss:$48 sps:$4 sm:$0xff]   ;;  %v3089_v36 = vld [vmem:[%s4469_s1 + $0x364] ss:$48 sps:$4 sm:$0xff]  }
  0x12   : > { %s4473_s24 = smov (!%p166_p3, %s2655_s24), 3  ;;  %v3091_v37 = vld [vmem:[%s4469_s1 + $0x36c] ss:$48 sps:$4 sm:$0xff]   ;;  %v3093_v38 = vld [vmem:[%s4469_s1 + $0x360] ss:$48 sps:$4 sm:$0xff]  }
  0x13   : > { %1999 = vmatpush1.bf16.msra.mxu0 %v3057_v14  ;;  %2085 = vmatpush1.bf16.msra.mxu1 %v3058_v15  ;;  %v3094_v39 = vld [vmem:[%s4469_s1 + $0x368] ss:$48 sps:$4 sm:$0xff]   ;;  %v3095_v40 = vld [vmem:[%s4469_s1 + $0x3c4] ss:$48 sps:$4 sm:$0xff]   ;;  %s3024_s21 = smul.u32 12, %s4473_s24 }
  0x14   : > { %2000 = vmatprep.subr.bf16.mxu0 %v3059_v16  ;;  %2086 = vmatprep.subr.bf16.mxu1 %v3061_v17  ;;  %v3097_v41 = vld [vmem:[%s4469_s1 + $0x3cc] ss:$48 sps:$4 sm:$0xff]   ;;  %v3099_v42 = vld [vmem:[%s4469_s1 + $0x3c0] ss:$48 sps:$4 sm:$0xff]   ;;  %v3100_v43 = vld [vmem:[%s4469_s1 + $0x3c8] ss:$48 sps:$4 sm:$0xff]  }
  0x15   : > { %v3101_v44 = vld [vmem:[%s4469_s1 + $0x424] ss:$48 sps:$4 sm:$0xff]   ;;  %s3654_s13 = scalar_lea.vmem %s4468_s0, %s3024_s21  ;;  %v3103_v45 = vld [vmem:[%s4469_s1 + $0x42c] ss:$48 sps:$4 sm:$0xff]   ;;  %v3105_v46 = vld [vmem:[%s4469_s1 + $0x420] ss:$48 sps:$4 sm:$0xff]  }
  0x16   : > { %v3663_v47 = vld [vmem:[%s3654_s13 + $0x4] ss:$12 sps:$4 sm:$0xff]   ;;  %v3106_v48 = vld [vmem:[%s4469_s1 + $0x428] ss:$48 sps:$4 sm:$0xff]   ;;  %v3109_v50 = vld [vmem:[%s4469_s1 + $0x48c] ss:$48 sps:$4 sm:$0xff]  }
  0x17   : > { %2001 = vmatpush1.bf16.msra.mxu0 %v3063_v18  ;;  %2087 = vmatpush1.bf16.msra.mxu1 %v3064_v19  ;;  %v3107_v49 = vld [vmem:[%s4469_s1 + $0x484] ss:$48 sps:$4 sm:$0xff]   ;;  %v3111_v51 = vld [vmem:[%s4469_s1 + $0x480] ss:$48 sps:$4 sm:$0xff]   ;;  %v3112_v52 = vld [vmem:[%s4469_s1 + $0x488] ss:$48 sps:$4 sm:$0xff]  }
  0x18   : > { %2002 = vmatprep.subr.bf16.mxu0 %v3065_v20  ;;  %2088 = vmatprep.subr.bf16.mxu1 %v3067_v21  ;;  %v3113_v53 = vld [vmem:[%s4469_s1 + $0x4e4] ss:$48 sps:$4 sm:$0xff]   ;;  %v3115_v54 = vld [vmem:[%s4469_s1 + $0x4ec] ss:$48 sps:$4 sm:$0xff]   ;;  %v3117_v55 = vld [vmem:[%s4469_s1 + $0x4e0] ss:$48 sps:$4 sm:$0xff]  }
  0x19   : > { %2024 = vmatprep.mubr.bf16.mxu0 %v3663_v47  ;;  %2110 = vmatprep.mubr.bf16.mxu1 %v3663_v47  ;;  %v3118_v56 = vld [vmem:[%s4469_s1 + $0x4e8] ss:$48 sps:$4 sm:$0xff]   ;;  %v3119_v57 = vld [vmem:[%s4469_s1 + $0x544] ss:$48 sps:$4 sm:$0xff]   ;;  %v3121_v58 = vld [vmem:[%s4469_s1 + $0x54c] ss:$48 sps:$4 sm:$0xff]  }
  0x1a   : > { %v3123_v59 = vld [vmem:[%s4469_s1 + $0x540] ss:$48 sps:$4 sm:$0xff]   ;;  %v3124_v60 = vld [vmem:[%s4469_s1 + $0x548] ss:$48 sps:$4 sm:$0xff]   ;;  %v3125_v61 = vld [vmem:[%s4469_s1 + $0x5a4] ss:$48 sps:$4 sm:$0xff]  }
  0x1b   : > { %2003 = vmatpush1.bf16.msra.mxu0 %v3069_v22  ;;  %2089 = vmatpush1.bf16.msra.mxu1 %v3070_v23  ;;  %v3127_v62 = vld [vmem:[%s4469_s1 + $0x5ac] ss:$48 sps:$4 sm:$0xff]   ;;  %v3129_v63 = vld [vmem:[%s4469_s1 + $0x5a0] ss:$48 sps:$4 sm:$0xff]   ;;  %v3130_v0 = vld [vmem:[%s4469_s1 + $0x5a8] ss:$48 sps:$4 sm:$0xff]  }
  0x1c   : > { %2004 = vmatprep.subr.bf16.mxu0 %v3071_v24  ;;  %2090 = vmatprep.subr.bf16.mxu1 %v3073_v25  ;;  %v3135_v1 = vld [vmem:[%s4469_s1 + $0x604] ss:$48 sps:$4 sm:$0xff]   ;;  %v3138_v2 = vld [vmem:[%s4469_s1 + $0x60c] ss:$48 sps:$4 sm:$0xff]   ;;  %v3133_v3 = vld [vmem:[%s4469_s1 + $0x600] ss:$48 sps:$4 sm:$0xff]  }
  0x1d   : > { %v3136_v4 = vld [vmem:[%s4469_s1 + $0x608] ss:$48 sps:$4 sm:$0xff]   ;;  %v3731_v5 = vld [vmem:[%s3654_s13] ss:$12 sps:$4 sm:$0xff]   ;;  %v3142_v6 = vld [vmem:[%s4469_s1 + $0x664] ss:$48 sps:$4 sm:$0xff]  }
  0x1e   : > { %v3145_v7 = vld [vmem:[%s4469_s1 + $0x66c] ss:$48 sps:$4 sm:$0xff]   ;;  %v3140_v8 = vld [vmem:[%s4469_s1 + $0x660] ss:$48 sps:$4 sm:$0xff]   ;;  %v3143_v9 = vld [vmem:[%s4469_s1 + $0x668] ss:$48 sps:$4 sm:$0xff]  }
  0x1f   : > { %2005 = vmatpush1.bf16.msra.mxu0 %v3075_v26  ;;  %2091 = vmatpush1.bf16.msra.mxu1 %v3076_v27  ;;  %v3148_v10 = vld [vmem:[%s4469_s1 + $0x6c4] ss:$48 sps:$4 sm:$0xff]   ;;  %v3151_v11 = vld [vmem:[%s4469_s1 + $0x6cc] ss:$48 sps:$4 sm:$0xff]   ;;  %v3146_v13 = vld [vmem:[%s4469_s1 + $0x6c0] ss:$48 sps:$4 sm:$0xff]  }
  0x20   : > { %2006 = vmatprep.subr.bf16.mxu0 %v3077_v28  ;;  %2092 = vmatprep.subr.bf16.mxu1 %v3079_v29  ;;  %v3149_v14 = vld [vmem:[%s4469_s1 + $0x6c8] ss:$48 sps:$4 sm:$0xff]   ;;  %v3154_v15 = vld [vmem:[%s4469_s1 + $0x724] ss:$48 sps:$4 sm:$0xff]   ;;  %v3157_v16 = vld [vmem:[%s4469_s1 + $0x72c] ss:$48 sps:$4 sm:$0xff]  }
  0x21   : > { %v3152_v17 = vld [vmem:[%s4469_s1 + $0x720] ss:$48 sps:$4 sm:$0xff]   ;;  %v3155_v18 = vld [vmem:[%s4469_s1 + $0x728] ss:$48 sps:$4 sm:$0xff]   ;;  %v3160_v19 = vld [vmem:[%s4469_s1 + $0x784] ss:$48 sps:$4 sm:$0xff]  }
  0x22   : > { %v3163_v20 = vld [vmem:[%s4469_s1 + $0x78c] ss:$48 sps:$4 sm:$0xff]   ;;  %v3158_v21 = vld [vmem:[%s4469_s1 + $0x780] ss:$48 sps:$4 sm:$0xff]   ;;  %v3161_v22 = vld [vmem:[%s4469_s1 + $0x788] ss:$48 sps:$4 sm:$0xff]  }
  0x23   : > { %2007 = vmatpush1.bf16.msra.mxu0 %v3081_v30  ;;  %2093 = vmatpush1.bf16.msra.mxu1 %v3082_v31  ;;  %v3166_v23 = vld [vmem:[%s4469_s1 + $0x7e4] ss:$48 sps:$4 sm:$0xff]   ;;  %v3169_v24 = vld [vmem:[%s4469_s1 + $0x7ec] ss:$48 sps:$4 sm:$0xff]   ;;  %v3164_v25 = vld [vmem:[%s4469_s1 + $0x7e0] ss:$48 sps:$4 sm:$0xff]  }
  0x24   : > { %2008 = vmatprep.subr.bf16.mxu0 %v3083_v32  ;;  %2094 = vmatprep.subr.bf16.mxu1 %v3085_v33  ;;  %v3167_v26 = vld [vmem:[%s4469_s1 + $0x7e8] ss:$48 sps:$4 sm:$0xff]   ;;  %v3172_v27 = vld [vmem:[%s4469_s1 + $0x844] ss:$48 sps:$4 sm:$0xff]   ;;  %v3175_v28 = vld [vmem:[%s4469_s1 + $0x84c] ss:$48 sps:$4 sm:$0xff]  }
  0x25   : > { %v3170_v29 = vld [vmem:[%s4469_s1 + $0x840] ss:$48 sps:$4 sm:$0xff]   ;;  %v3173_v30 = vld [vmem:[%s4469_s1 + $0x848] ss:$48 sps:$4 sm:$0xff]   ;;  %v3178_v31 = vld [vmem:[%s4469_s1 + $0x8a4] ss:$48 sps:$4 sm:$0xff]  }
  0x26   : > { %v3181_v32 = vld [vmem:[%s4469_s1 + $0x8ac] ss:$48 sps:$4 sm:$0xff]   ;;  %v3176_v33 = vld [vmem:[%s4469_s1 + $0x8a0] ss:$48 sps:$4 sm:$0xff]  }
  0x27   : > { %2009 = vmatpush1.bf16.msra.mxu0 %v3087_v34  ;;  %2095 = vmatpush1.bf16.msra.mxu1 %v3088_v35  ;;  %v3179_v34 = vld [vmem:[%s4469_s1 + $0x8a8] ss:$48 sps:$4 sm:$0xff]   ;;  %v3185_v35 = vld [vmem:[%s4469_s1 + $0x14] ss:$48 sps:$4 sm:$0xff]  }
  0x28   : > { %2010 = vmatprep.subr.bf16.mxu0 %v3089_v36  ;;  %2096 = vmatprep.subr.bf16.mxu1 %v3091_v37  ;;  %v3188_v36 = vld [vmem:[%s4469_s1 + $0x1c] ss:$48 sps:$4 sm:$0xff]   ;;  %v3828_v37 = vld [vmem:[%s3654_s13 + $0x8] ss:$12 sps:$4 sm:$0xff]  }
  0x2b   : > { %2011 = vmatpush1.bf16.msra.mxu0 %v3093_v38  ;;  %2097 = vmatpush1.bf16.msra.mxu1 %v3094_v39  ;;  %v3183_v38 = vld [vmem:[%s4469_s1 + $0x10] ss:$48 sps:$4 sm:$0xff]   ;;  %v3186_v39 = vld [vmem:[%s4469_s1 + $0x18] ss:$48 sps:$4 sm:$0xff]  }
  0x2c   : > { %2012 = vmatprep.subr.bf16.mxu0 %v3095_v40  ;;  %2098 = vmatprep.subr.bf16.mxu1 %v3097_v41  ;;  %v3191_v40 = vld [vmem:[%s4469_s1 + $0x74] ss:$48 sps:$4 sm:$0xff]   ;;  %v3194_v41 = vld [vmem:[%s4469_s1 + $0x7c] ss:$48 sps:$4 sm:$0xff]  }
  0x2f   : > { %2013 = vmatpush1.bf16.msra.mxu0 %v3099_v42  ;;  %2099 = vmatpush1.bf16.msra.mxu1 %v3100_v43  ;;  %v3189_v42 = vld [vmem:[%s4469_s1 + $0x70] ss:$48 sps:$4 sm:$0xff]   ;;  %v3192_v43 = vld [vmem:[%s4469_s1 + $0x78] ss:$48 sps:$4 sm:$0xff]  }
  0x30   : > { %2014 = vmatprep.subr.bf16.mxu0 %v3101_v44  ;;  %2100 = vmatprep.subr.bf16.mxu1 %v3103_v45  ;;  %v3197_v44 = vld [vmem:[%s4469_s1 + $0xd4] ss:$48 sps:$4 sm:$0xff]   ;;  %v3200_v45 = vld [vmem:[%s4469_s1 + $0xdc] ss:$48 sps:$4 sm:$0xff]  }
  0x33   : > { %2015 = vmatpush1.bf16.msra.mxu0 %v3105_v46  ;;  %2101 = vmatpush1.bf16.msra.mxu1 %v3106_v48  ;;  %v3195_v46 = vld [vmem:[%s4469_s1 + $0xd0] ss:$48 sps:$4 sm:$0xff]   ;;  %v3198_v48 = vld [vmem:[%s4469_s1 + $0xd8] ss:$48 sps:$4 sm:$0xff]  }
  0x34   : > { %2016 = vmatprep.subr.bf16.mxu0 %v3107_v49  ;;  %2102 = vmatprep.subr.bf16.mxu1 %v3109_v50  ;;  %v3203_v49 = vld [vmem:[%s4469_s1 + $0x134] ss:$48 sps:$4 sm:$0xff]   ;;  %v3201_v50 = vld [vmem:[%s4469_s1 + $0x130] ss:$48 sps:$4 sm:$0xff]  }
  0x37   : > { %2017 = vmatpush1.bf16.msra.mxu0 %v3111_v51  ;;  %2103 = vmatpush1.bf16.msra.mxu1 %v3112_v52  ;;  %v3204_v51 = vld [vmem:[%s4469_s1 + $0x138] ss:$48 sps:$4 sm:$0xff]   ;;  %v3209_v52 = vld [vmem:[%s4469_s1 + $0x194] ss:$48 sps:$4 sm:$0xff]  }
  0x38   : > { %2018 = vmatprep.subr.bf16.mxu0 %v3113_v53  ;;  %2104 = vmatprep.subr.bf16.mxu1 %v3115_v54  ;;  %v3212_v53 = vld [vmem:[%s4469_s1 + $0x19c] ss:$48 sps:$4 sm:$0xff]   ;;  %v3207_v54 = vld [vmem:[%s4469_s1 + $0x190] ss:$48 sps:$4 sm:$0xff]  }
  0x3b   : > { %2019 = vmatpush1.bf16.msra.mxu0 %v3117_v55  ;;  %2105 = vmatpush1.bf16.msra.mxu1 %v3118_v56  ;;  %v3210_v55 = vld [vmem:[%s4469_s1 + $0x198] ss:$48 sps:$4 sm:$0xff]   ;;  %v3215_v56 = vld [vmem:[%s4469_s1 + $0x1f4] ss:$48 sps:$4 sm:$0xff]  }
  0x3c   : > { %2020 = vmatprep.subr.bf16.mxu0 %v3119_v57  ;;  %2106 = vmatprep.subr.bf16.mxu1 %v3121_v58  ;;  %v3218_v57 = vld [vmem:[%s4469_s1 + $0x1fc] ss:$48 sps:$4 sm:$0xff]   ;;  %v3213_v58 = vld [vmem:[%s4469_s1 + $0x1f0] ss:$48 sps:$4 sm:$0xff]  }
  0x3f   : > { %2021 = vmatpush1.bf16.msra.mxu0 %v3123_v59  ;;  %2107 = vmatpush1.bf16.msra.mxu1 %v3124_v60  ;;  %v3216_v59 = vld [vmem:[%s4469_s1 + $0x1f8] ss:$48 sps:$4 sm:$0xff]   ;;  %v3221_v60 = vld [vmem:[%s4469_s1 + $0x254] ss:$48 sps:$4 sm:$0xff]  }
  0x40   : > { %2022 = vmatprep.subr.bf16.mxu0 %v3125_v61  ;;  %2108 = vmatprep.subr.bf16.mxu1 %v3127_v62  ;;  %v3224_v61 = vld [vmem:[%s4469_s1 + $0x25c] ss:$48 sps:$4 sm:$0xff]   ;;  %v3219_v62 = vld [vmem:[%s4469_s1 + $0x250] ss:$48 sps:$4 sm:$0xff]  }
  0x43   : > { %2023 = vmatpush1.bf16.msra.mxu0 %v3129_v63  ;;  %2109 = vmatpush1.bf16.msra.mxu1 %v3130_v0  ;;  %v3222_v63 = vld [vmem:[%s4469_s1 + $0x258] ss:$48 sps:$4 sm:$0xff]   ;;  %v3227_v0 = vld [vmem:[%s4469_s1 + $0x2b4] ss:$48 sps:$4 sm:$0xff]  }
  0x44   : > { %2035 = vmatprep.subr.bf16.mxu0 %v3135_v1  ;;  %2121 = vmatprep.subr.bf16.mxu1 %v3138_v2  ;;  %v3230_v1 = vld [vmem:[%s4469_s1 + $0x2bc] ss:$48 sps:$4 sm:$0xff]   ;;  %v3225_v2 = vld [vmem:[%s4469_s1 + $0x2b0] ss:$48 sps:$4 sm:$0xff]  }
  0x46   : > { %2025 = vmatmul.mubr.bf16.vlgmr.msra.gmra.mrb[0].mxu0 %v3731_v5  ;;  %2111 = vmatmul.mubr.bf16.vlgmr.msra.gmra.mrb[0].mxu1 %v3731_v5 }
  0x47   : > { %2036 = vmatpush1.bf16.msra.mxu0 %v3133_v3  ;;  %2122 = vmatpush1.bf16.msra.mxu1 %v3136_v4  ;;  %v3228_v3 = vld [vmem:[%s4469_s1 + $0x2b8] ss:$48 sps:$4 sm:$0xff]   ;;  %v3233_v4 = vld [vmem:[%s4469_s1 + $0x314] ss:$48 sps:$4 sm:$0xff]  }
  0x48   : > { %2037 = vmatprep.subr.bf16.mxu0 %v3142_v6  ;;  %2123 = vmatprep.subr.bf16.mxu1 %v3145_v7  ;;  %v3236_v6 = vld [vmem:[%s4469_s1 + $0x31c] ss:$48 sps:$4 sm:$0xff]   ;;  %v3231_v7 = vld [vmem:[%s4469_s1 + $0x310] ss:$48 sps:$4 sm:$0xff]  }
  0x49   : > { %2067 = vmatprep.mubr.bf16.mxu0 %v3482_v12  ;;  %2153 = vmatprep.mubr.bf16.mxu1 %v3482_v12 }
  0x4b   : > { %2038 = vmatpush1.bf16.msra.mxu0 %v3140_v8  ;;  %2124 = vmatpush1.bf16.msra.mxu1 %v3143_v9  ;;  %v3234_v8 = vld [vmem:[%s4469_s1 + $0x318] ss:$48 sps:$4 sm:$0xff]   ;;  %v3239_v9 = vld [vmem:[%s4469_s1 + $0x374] ss:$48 sps:$4 sm:$0xff]  }
  0x4c   : > { %2039 = vmatprep.subr.bf16.mxu0 %v3148_v10  ;;  %2125 = vmatprep.subr.bf16.mxu1 %v3151_v11  ;;  %v3242_v10 = vld [vmem:[%s4469_s1 + $0x37c] ss:$48 sps:$4 sm:$0xff]   ;;  %v3237_v11 = vld [vmem:[%s4469_s1 + $0x370] ss:$48 sps:$4 sm:$0xff]  }
  0x4f   : > { %2040 = vmatpush1.bf16.msra.mxu0 %v3146_v13  ;;  %2126 = vmatpush1.bf16.msra.mxu1 %v3149_v14  ;;  %v3240_v13 = vld [vmem:[%s4469_s1 + $0x378] ss:$48 sps:$4 sm:$0xff]   ;;  %v3245_v14 = vld [vmem:[%s4469_s1 + $0x3d4] ss:$48 sps:$4 sm:$0xff]  }
  0x50   : > { %2041 = vmatprep.subr.bf16.mxu0 %v3154_v15  ;;  %2127 = vmatprep.subr.bf16.mxu1 %v3157_v16  ;;  %v3248_v15 = vld [vmem:[%s4469_s1 + $0x3dc] ss:$48 sps:$4 sm:$0xff]   ;;  %v3243_v16 = vld [vmem:[%s4469_s1 + $0x3d0] ss:$48 sps:$4 sm:$0xff]  }
  0x53   : > { %2042 = vmatpush1.bf16.msra.mxu0 %v3152_v17  ;;  %2128 = vmatpush1.bf16.msra.mxu1 %v3155_v18  ;;  %v3246_v17 = vld [vmem:[%s4469_s1 + $0x3d8] ss:$48 sps:$4 sm:$0xff]   ;;  %v3251_v18 = vld [vmem:[%s4469_s1 + $0x434] ss:$48 sps:$4 sm:$0xff]  }
  0x54   : > { %2043 = vmatprep.subr.bf16.mxu0 %v3160_v19  ;;  %2129 = vmatprep.subr.bf16.mxu1 %v3163_v20  ;;  %v3254_v19 = vld [vmem:[%s4469_s1 + $0x43c] ss:$48 sps:$4 sm:$0xff]   ;;  %v3249_v20 = vld [vmem:[%s4469_s1 + $0x430] ss:$48 sps:$4 sm:$0xff]  }
  0x57   : > { %2044 = vmatpush1.bf16.msra.mxu0 %v3158_v21  ;;  %2130 = vmatpush1.bf16.msra.mxu1 %v3161_v22  ;;  %v3252_v21 = vld [vmem:[%s4469_s1 + $0x438] ss:$48 sps:$4 sm:$0xff]   ;;  %v3257_v22 = vld [vmem:[%s4469_s1 + $0x494] ss:$48 sps:$4 sm:$0xff]  }
  0x58   : > { %2045 = vmatprep.subr.bf16.mxu0 %v3166_v23  ;;  %2131 = vmatprep.subr.bf16.mxu1 %v3169_v24  ;;  %v3260_v23 = vld [vmem:[%s4469_s1 + $0x49c] ss:$48 sps:$4 sm:$0xff]   ;;  %v3255_v24 = vld [vmem:[%s4469_s1 + $0x490] ss:$48 sps:$4 sm:$0xff]  }
  0x5b   : > { %2046 = vmatpush1.bf16.msra.mxu0 %v3164_v25  ;;  %2132 = vmatpush1.bf16.msra.mxu1 %v3167_v26  ;;  %v3258_v25 = vld [vmem:[%s4469_s1 + $0x498] ss:$48 sps:$4 sm:$0xff]   ;;  %v3263_v26 = vld [vmem:[%s4469_s1 + $0x4f4] ss:$48 sps:$4 sm:$0xff]  }
  0x5c   : > { %2047 = vmatprep.subr.bf16.mxu0 %v3172_v27  ;;  %2133 = vmatprep.subr.bf16.mxu1 %v3175_v28  ;;  %v3266_v27 = vld [vmem:[%s4469_s1 + $0x4fc] ss:$48 sps:$4 sm:$0xff]   ;;  %v3261_v28 = vld [vmem:[%s4469_s1 + $0x4f0] ss:$48 sps:$4 sm:$0xff]  }
  0x5f   : > { %2048 = vmatpush1.bf16.msra.mxu0 %v3170_v29  ;;  %2134 = vmatpush1.bf16.msra.mxu1 %v3173_v30  ;;  %v3264_v29 = vld [vmem:[%s4469_s1 + $0x4f8] ss:$48 sps:$4 sm:$0xff]   ;;  %v3269_v30 = vld [vmem:[%s4469_s1 + $0x554] ss:$48 sps:$4 sm:$0xff]  }
  0x60   : > { %2049 = vmatprep.subr.bf16.mxu0 %v3178_v31  ;;  %2135 = vmatprep.subr.bf16.mxu1 %v3181_v32  ;;  %v3272_v31 = vld [vmem:[%s4469_s1 + $0x55c] ss:$48 sps:$4 sm:$0xff]   ;;  %v3267_v32 = vld [vmem:[%s4469_s1 + $0x550] ss:$48 sps:$4 sm:$0xff]  }
  0x63   : > { %2050 = vmatpush1.bf16.msra.mxu0 %v3176_v33  ;;  %2136 = vmatpush1.bf16.msra.mxu1 %v3179_v34  ;;  %v3270_v33 = vld [vmem:[%s4469_s1 + $0x558] ss:$48 sps:$4 sm:$0xff]   ;;  %v3275_v34 = vld [vmem:[%s4469_s1 + $0x5b4] ss:$48 sps:$4 sm:$0xff]  }
  0x64   : > { %2164 = vmatprep.subr.bf16.mxu0 %v3185_v35  ;;  %2250 = vmatprep.subr.bf16.mxu1 %v3188_v36  ;;  %v3278_v35 = vld [vmem:[%s4469_s1 + $0x5bc] ss:$48 sps:$4 sm:$0xff]   ;;  %v3273_v36 = vld [vmem:[%s4469_s1 + $0x5b0] ss:$48 sps:$4 sm:$0xff]  }
  0x66   : > { %2068 = vmatmul.mubr.bf16.vlgmr.msra.gmra.mrb[0].mxu0 %v3828_v37  ;;  %2154 = vmatmul.mubr.bf16.vlgmr.msra.gmra.mrb[0].mxu1 %v3828_v37 }
  0x67   : > { %2165 = vmatpush1.bf16.msra.mxu0 %v3183_v38  ;;  %2251 = vmatpush1.bf16.msra.mxu1 %v3186_v39  ;;  %v3276_v38 = vld [vmem:[%s4469_s1 + $0x5b8] ss:$48 sps:$4 sm:$0xff]   ;;  %v3281_v39 = vld [vmem:[%s4469_s1 + $0x614] ss:$48 sps:$4 sm:$0xff]  }
  0x68   : > { %2166 = vmatprep.subr.bf16.mxu0 %v3191_v40  ;;  %2252 = vmatprep.subr.bf16.mxu1 %v3194_v41  ;;  %v3284_v40 = vld [vmem:[%s4469_s1 + $0x61c] ss:$48 sps:$4 sm:$0xff]   ;;  %v3279_v41 = vld [vmem:[%s4469_s1 + $0x610] ss:$48 sps:$4 sm:$0xff]  }
  0x69   : > { %2196 = vmatprep.mubr.bf16.mxu0 %v3663_v47  ;;  %2282 = vmatprep.mubr.bf16.mxu1 %v3663_v47  ;;  %v3206_v47 = vld [vmem:[%s4469_s1 + $0x13c] ss:$48 sps:$4 sm:$0xff]  }
  0x6b   : > { %2167 = vmatpush1.bf16.msra.mxu0 %v3189_v42  ;;  %2253 = vmatpush1.bf16.msra.mxu1 %v3192_v43  ;;  %v3282_v42 = vld [vmem:[%s4469_s1 + $0x618] ss:$48 sps:$4 sm:$0xff]   ;;  %v3287_v43 = vld [vmem:[%s4469_s1 + $0x674] ss:$48 sps:$4 sm:$0xff]  }
  0x6c   : > { %2168 = vmatprep.subr.bf16.mxu0 %v3197_v44  ;;  %2254 = vmatprep.subr.bf16.mxu1 %v3200_v45  ;;  %v3290_v44 = vld [vmem:[%s4469_s1 + $0x67c] ss:$48 sps:$4 sm:$0xff]   ;;  %v3285_v45 = vld [vmem:[%s4469_s1 + $0x670] ss:$48 sps:$4 sm:$0xff]  }
  0x6f   : > { %2169 = vmatpush1.bf16.msra.mxu0 %v3195_v46  ;;  %2255 = vmatpush1.bf16.msra.mxu1 %v3198_v48  ;;  %v3288_v46 = vld [vmem:[%s4469_s1 + $0x678] ss:$48 sps:$4 sm:$0xff]   ;;  %v3293_v48 = vld [vmem:[%s4469_s1 + $0x6d4] ss:$48 sps:$4 sm:$0xff]  }
  0x70   : > { %2170 = vmatprep.subr.bf16.mxu0 %v3203_v49  ;;  %2256 = vmatprep.subr.bf16.mxu1 %v3206_v47  ;;  %v3291_v49 = vld [vmem:[%s4469_s1 + $0x6d0] ss:$48 sps:$4 sm:$0xff]   ;;  %v3294_v47 = vld [vmem:[%s4469_s1 + $0x6d8] ss:$48 sps:$4 sm:$0xff]  }
  0x73   : > { %2171 = vmatpush1.bf16.msra.mxu0 %v3201_v50  ;;  %2257 = vmatpush1.bf16.msra.mxu1 %v3204_v51  ;;  %v3299_v50 = vld [vmem:[%s4469_s1 + $0x734] ss:$48 sps:$4 sm:$0xff]   ;;  %v3302_v51 = vld [vmem:[%s4469_s1 + $0x73c] ss:$48 sps:$4 sm:$0xff]  }
  0x74   : > { %2172 = vmatprep.subr.bf16.mxu0 %v3209_v52  ;;  %2258 = vmatprep.subr.bf16.mxu1 %v3212_v53  ;;  %v3297_v52 = vld [vmem:[%s4469_s1 + $0x730] ss:$48 sps:$4 sm:$0xff]   ;;  %v3300_v53 = vld [vmem:[%s4469_s1 + $0x738] ss:$48 sps:$4 sm:$0xff]  }
  0x77   : > { %2173 = vmatpush1.bf16.msra.mxu0 %v3207_v54  ;;  %2259 = vmatpush1.bf16.msra.mxu1 %v3210_v55  ;;  %v3305_v54 = vld [vmem:[%s4469_s1 + $0x794] ss:$48 sps:$4 sm:$0xff]   ;;  %v3308_v55 = vld [vmem:[%s4469_s1 + $0x79c] ss:$48 sps:$4 sm:$0xff]  }
  0x78   : > { %2174 = vmatprep.subr.bf16.mxu0 %v3215_v56  ;;  %2260 = vmatprep.subr.bf16.mxu1 %v3218_v57  ;;  %v3303_v56 = vld [vmem:[%s4469_s1 + $0x790] ss:$48 sps:$4 sm:$0xff]   ;;  %v3306_v57 = vld [vmem:[%s4469_s1 + $0x798] ss:$48 sps:$4 sm:$0xff]  }
  0x7b   : > { %2175 = vmatpush1.bf16.msra.mxu0 %v3213_v58  ;;  %2261 = vmatpush1.bf16.msra.mxu1 %v3216_v59  ;;  %v3311_v58 = vld [vmem:[%s4469_s1 + $0x7f4] ss:$48 sps:$4 sm:$0xff]   ;;  %v3314_v59 = vld [vmem:[%s4469_s1 + $0x7fc] ss:$48 sps:$4 sm:$0xff]  }
  0x7c   : > { %2176 = vmatprep.subr.bf16.mxu0 %v3221_v60  ;;  %2262 = vmatprep.subr.bf16.mxu1 %v3224_v61  ;;  %v3309_v60 = vld [vmem:[%s4469_s1 + $0x7f0] ss:$48 sps:$4 sm:$0xff]   ;;  %v3312_v61 = vld [vmem:[%s4469_s1 + $0x7f8] ss:$48 sps:$4 sm:$0xff]  }
  0x7f   : > { %2177 = vmatpush1.bf16.msra.mxu0 %v3219_v62  ;;  %2263 = vmatpush1.bf16.msra.mxu1 %v3222_v63  ;;  %v3317_v62 = vld [vmem:[%s4469_s1 + $0x854] ss:$48 sps:$4 sm:$0xff]   ;;  %v3320_v63 = vld [vmem:[%s4469_s1 + $0x85c] ss:$48 sps:$4 sm:$0xff]  }
  0x80   : > { %2178 = vmatprep.subr.bf16.mxu0 %v3227_v0  ;;  %2264 = vmatprep.subr.bf16.mxu1 %v3230_v1  ;;  %v3315_v0 = vld [vmem:[%s4469_s1 + $0x850] ss:$48 sps:$4 sm:$0xff]   ;;  %v3318_v1 = vld [vmem:[%s4469_s1 + $0x858] ss:$48 sps:$4 sm:$0xff]  }
  0x83   : > { %2179 = vmatpush1.bf16.msra.mxu0 %v3225_v2  ;;  %2265 = vmatpush1.bf16.msra.mxu1 %v3228_v3  ;;  %v3323_v2 = vld [vmem:[%s4469_s1 + $0x8b4] ss:$48 sps:$4 sm:$0xff]   ;;  %v3326_v3 = vld [vmem:[%s4469_s1 + $0x8bc] ss:$48 sps:$4 sm:$0xff]  }
  0x84   : > { %2180 = vmatprep.subr.bf16.mxu0 %v3233_v4  ;;  %2266 = vmatprep.subr.bf16.mxu1 %v3236_v6  ;;  %v3321_v4 = vld [vmem:[%s4469_s1 + $0x8b0] ss:$48 sps:$4 sm:$0xff]   ;;  %v3324_v6 = vld [vmem:[%s4469_s1 + $0x8b8] ss:$48 sps:$4 sm:$0xff]  }
  0x87   : > { %2181 = vmatpush1.bf16.msra.mxu0 %v3231_v7  ;;  %2267 = vmatpush1.bf16.msra.mxu1 %v3234_v8  ;;  %v3329_v7 = vld [vmem:[%s4469_s1 + $0x24] ss:$48 sps:$4 sm:$0xff]   ;;  %v3332_v8 = vld [vmem:[%s4469_s1 + $0x2c] ss:$48 sps:$4 sm:$0xff]  }
  0x88   : > { %2182 = vmatprep.subr.bf16.mxu0 %v3239_v9  ;;  %2268 = vmatprep.subr.bf16.mxu1 %v3242_v10  ;;  %v3327_v9 = vld [vmem:[%s4469_s1 + $0x20] ss:$48 sps:$4 sm:$0xff]   ;;  %v3330_v10 = vld [vmem:[%s4469_s1 + $0x28] ss:$48 sps:$4 sm:$0xff]  }
  0x8b   : > { %2183 = vmatpush1.bf16.msra.mxu0 %v3237_v11  ;;  %2269 = vmatpush1.bf16.msra.mxu1 %v3240_v13  ;;  %v3335_v11 = vld [vmem:[%s4469_s1 + $0x84] ss:$48 sps:$4 sm:$0xff]   ;;  %v3338_v13 = vld [vmem:[%s4469_s1 + $0x8c] ss:$48 sps:$4 sm:$0xff]  }
  0x8c   : > { %2184 = vmatprep.subr.bf16.mxu0 %v3245_v14  ;;  %2270 = vmatprep.subr.bf16.mxu1 %v3248_v15  ;;  %v3333_v14 = vld [vmem:[%s4469_s1 + $0x80] ss:$48 sps:$4 sm:$0xff]   ;;  %v3336_v15 = vld [vmem:[%s4469_s1 + $0x88] ss:$48 sps:$4 sm:$0xff]  }
  0x8f   : > { %2185 = vmatpush1.bf16.msra.mxu0 %v3243_v16  ;;  %2271 = vmatpush1.bf16.msra.mxu1 %v3246_v17  ;;  %v3341_v16 = vld [vmem:[%s4469_s1 + $0xe4] ss:$48 sps:$4 sm:$0xff]  }
  0x90   : > { %2186 = vmatprep.subr.bf16.mxu0 %v3251_v18  ;;  %2272 = vmatprep.subr.bf16.mxu1 %v3254_v19  ;;  %v3471_v17 = vld [vmem:[%s3654_s13 + $0x4] ss:$12 sps:$4 sm:$0xff]   ;;  %v3342_v19 = vld [vmem:[%s4469_s1 + $0xe8] ss:$48 sps:$4 sm:$0xff]  }
  0x91   : > { %v3339_v18 = vld [vmem:[%s4469_s1 + $0xe0] ss:$48 sps:$4 sm:$0xff]  }
  0x93   : > { %2187 = vmatpush1.bf16.msra.mxu0 %v3249_v20  ;;  %2273 = vmatpush1.bf16.msra.mxu1 %v3252_v21  ;;  %v3347_v20 = vld [vmem:[%s4469_s1 + $0x144] ss:$48 sps:$4 sm:$0xff]   ;;  %v3350_v21 = vld [vmem:[%s4469_s1 + $0x14c] ss:$48 sps:$4 sm:$0xff]  }
  0x94   : > { %2188 = vmatprep.subr.bf16.mxu0 %v3257_v22  ;;  %2274 = vmatprep.subr.bf16.mxu1 %v3260_v23  ;;  %v3345_v22 = vld [vmem:[%s4469_s1 + $0x140] ss:$48 sps:$4 sm:$0xff]   ;;  %v3348_v23 = vld [vmem:[%s4469_s1 + $0x148] ss:$48 sps:$4 sm:$0xff]  }
  0x97   : > { %2189 = vmatpush1.bf16.msra.mxu0 %v3255_v24  ;;  %2275 = vmatpush1.bf16.msra.mxu1 %v3258_v25  ;;  %v3353_v24 = vld [vmem:[%s4469_s1 + $0x1a4] ss:$48 sps:$4 sm:$0xff]   ;;  %v3356_v25 = vld [vmem:[%s4469_s1 + $0x1ac] ss:$48 sps:$4 sm:$0xff]  }
  0x98   : > { %2190 = vmatprep.subr.bf16.mxu0 %v3263_v26  ;;  %2276 = vmatprep.subr.bf16.mxu1 %v3266_v27  ;;  %v3351_v26 = vld [vmem:[%s4469_s1 + $0x1a0] ss:$48 sps:$4 sm:$0xff]   ;;  %v3354_v27 = vld [vmem:[%s4469_s1 + $0x1a8] ss:$48 sps:$4 sm:$0xff]  }
  0x9b   : > { %2191 = vmatpush1.bf16.msra.mxu0 %v3261_v28  ;;  %2277 = vmatpush1.bf16.msra.mxu1 %v3264_v29  ;;  %v3359_v28 = vld [vmem:[%s4469_s1 + $0x204] ss:$48 sps:$4 sm:$0xff]   ;;  %v3362_v29 = vld [vmem:[%s4469_s1 + $0x20c] ss:$48 sps:$4 sm:$0xff]  }
  0x9c   : > { %2192 = vmatprep.subr.bf16.mxu0 %v3269_v30  ;;  %2278 = vmatprep.subr.bf16.mxu1 %v3272_v31  ;;  %v3357_v30 = vld [vmem:[%s4469_s1 + $0x200] ss:$48 sps:$4 sm:$0xff]   ;;  %v3360_v31 = vld [vmem:[%s4469_s1 + $0x208] ss:$48 sps:$4 sm:$0xff]  }
  0x9f   : > { %2193 = vmatpush1.bf16.msra.mxu0 %v3267_v32  ;;  %2279 = vmatpush1.bf16.msra.mxu1 %v3270_v33  ;;  %v3365_v32 = vld [vmem:[%s4469_s1 + $0x264] ss:$48 sps:$4 sm:$0xff]   ;;  %v3368_v33 = vld [vmem:[%s4469_s1 + $0x26c] ss:$48 sps:$4 sm:$0xff]  }
  0xa0   : > { %2194 = vmatprep.subr.bf16.mxu0 %v3275_v34  ;;  %2280 = vmatprep.subr.bf16.mxu1 %v3278_v35  ;;  %v3363_v34 = vld [vmem:[%s4469_s1 + $0x260] ss:$48 sps:$4 sm:$0xff]   ;;  %v3366_v35 = vld [vmem:[%s4469_s1 + $0x268] ss:$48 sps:$4 sm:$0xff]  }
  0xa3   : > { %2195 = vmatpush1.bf16.msra.mxu0 %v3273_v36  ;;  %2281 = vmatpush1.bf16.msra.mxu1 %v3276_v38  ;;  %v3371_v36 = vld [vmem:[%s4469_s1 + $0x2c4] ss:$48 sps:$4 sm:$0xff]   ;;  %v3374_v38 = vld [vmem:[%s4469_s1 + $0x2cc] ss:$48 sps:$4 sm:$0xff]  }
  0xa4   : > { %2207 = vmatprep.subr.bf16.mxu0 %v3281_v39  ;;  %2293 = vmatprep.subr.bf16.mxu1 %v3284_v40  ;;  %v3369_v39 = vld [vmem:[%s4469_s1 + $0x2c0] ss:$48 sps:$4 sm:$0xff]   ;;  %v3372_v40 = vld [vmem:[%s4469_s1 + $0x2c8] ss:$48 sps:$4 sm:$0xff]  }
  0xa6   : > { %2197 = vmatmul.mubr.bf16.vlgmr.msra.gmra.mrb[4].mxu0 %v3731_v5  ;;  %2283 = vmatmul.mubr.bf16.vlgmr.msra.gmra.mrb[4].mxu1 %v3731_v5  ;;  %v3296_v5 = vld [vmem:[%s4469_s1 + $0x6dc] ss:$48 sps:$4 sm:$0xff]  }
  0xa7   : > { %2208 = vmatpush1.bf16.msra.mxu0 %v3279_v41  ;;  %2294 = vmatpush1.bf16.msra.mxu1 %v3282_v42  ;;  %v3377_v41 = vld [vmem:[%s4469_s1 + $0x324] ss:$48 sps:$4 sm:$0xff]   ;;  %v3380_v42 = vld [vmem:[%s4469_s1 + $0x32c] ss:$48 sps:$4 sm:$0xff]  }
  0xa8   : > { %2209 = vmatprep.subr.bf16.mxu0 %v3287_v43  ;;  %2295 = vmatprep.subr.bf16.mxu1 %v3290_v44  ;;  %v3375_v43 = vld [vmem:[%s4469_s1 + $0x320] ss:$48 sps:$4 sm:$0xff]   ;;  %v3378_v44 = vld [vmem:[%s4469_s1 + $0x328] ss:$48 sps:$4 sm:$0xff]  }
  0xa9   : > { %2239 = vmatprep.mubr.bf16.mxu0 %v3482_v12  ;;  %2325 = vmatprep.mubr.bf16.mxu1 %v3482_v12 }
  0xab   : > { %2210 = vmatpush1.bf16.msra.mxu0 %v3285_v45  ;;  %2296 = vmatpush1.bf16.msra.mxu1 %v3288_v46  ;;  %v3383_v45 = vld [vmem:[%s4469_s1 + $0x384] ss:$48 sps:$4 sm:$0xff]   ;;  %v3386_v46 = vld [vmem:[%s4469_s1 + $0x38c] ss:$48 sps:$4 sm:$0xff]  }
  0xac   : > { %2211 = vmatprep.subr.bf16.mxu0 %v3293_v48  ;;  %2297 = vmatprep.subr.bf16.mxu1 %v3296_v5  ;;  %v3381_v48 = vld [vmem:[%s4469_s1 + $0x380] ss:$48 sps:$4 sm:$0xff]   ;;  %v3384_v5 = vld [vmem:[%s4469_s1 + $0x388] ss:$48 sps:$4 sm:$0xff]  }
  0xaf   : > { %2212 = vmatpush1.bf16.msra.mxu0 %v3291_v49  ;;  %2298 = vmatpush1.bf16.msra.mxu1 %v3294_v47  ;;  %v3389_v49 = vld [vmem:[%s4469_s1 + $0x3e4] ss:$48 sps:$4 sm:$0xff]   ;;  %v3392_v47 = vld [vmem:[%s4469_s1 + $0x3ec] ss:$48 sps:$4 sm:$0xff]  }
  0xb0   : > { %2213 = vmatprep.subr.bf16.mxu0 %v3299_v50  ;;  %2299 = vmatprep.subr.bf16.mxu1 %v3302_v51  ;;  %v3387_v50 = vld [vmem:[%s4469_s1 + $0x3e0] ss:$48 sps:$4 sm:$0xff]   ;;  %v3390_v51 = vld [vmem:[%s4469_s1 + $0x3e8] ss:$48 sps:$4 sm:$0xff]  }
  0xb3   : > { %2214 = vmatpush1.bf16.msra.mxu0 %v3297_v52  ;;  %2300 = vmatpush1.bf16.msra.mxu1 %v3300_v53  ;;  %v3395_v52 = vld [vmem:[%s4469_s1 + $0x444] ss:$48 sps:$4 sm:$0xff]   ;;  %v3398_v53 = vld [vmem:[%s4469_s1 + $0x44c] ss:$48 sps:$4 sm:$0xff]  }
  0xb4   : > { %2215 = vmatprep.subr.bf16.mxu0 %v3305_v54  ;;  %2301 = vmatprep.subr.bf16.mxu1 %v3308_v55  ;;  %v3393_v54 = vld [vmem:[%s4469_s1 + $0x440] ss:$48 sps:$4 sm:$0xff]   ;;  %v3396_v55 = vld [vmem:[%s4469_s1 + $0x448] ss:$48 sps:$4 sm:$0xff]  }
  0xb7   : > { %2216 = vmatpush1.bf16.msra.mxu0 %v3303_v56  ;;  %2302 = vmatpush1.bf16.msra.mxu1 %v3306_v57  ;;  %v3401_v56 = vld [vmem:[%s4469_s1 + $0x4a4] ss:$48 sps:$4 sm:$0xff]   ;;  %v3404_v57 = vld [vmem:[%s4469_s1 + $0x4ac] ss:$48 sps:$4 sm:$0xff]  }
  0xb8   : > { %2217 = vmatprep.subr.bf16.mxu0 %v3311_v58  ;;  %2303 = vmatprep.subr.bf16.mxu1 %v3314_v59  ;;  %v3399_v58 = vld [vmem:[%s4469_s1 + $0x4a0] ss:$48 sps:$4 sm:$0xff]   ;;  %v3402_v59 = vld [vmem:[%s4469_s1 + $0x4a8] ss:$48 sps:$4 sm:$0xff]  }
  0xbb   : > { %2218 = vmatpush1.bf16.msra.mxu0 %v3309_v60  ;;  %2304 = vmatpush1.bf16.msra.mxu1 %v3312_v61  ;;  %v3407_v60 = vld [vmem:[%s4469_s1 + $0x504] ss:$48 sps:$4 sm:$0xff]   ;;  %v3410_v61 = vld [vmem:[%s4469_s1 + $0x50c] ss:$48 sps:$4 sm:$0xff]  }
  0xbc   : > { %2219 = vmatprep.subr.bf16.mxu0 %v3317_v62  ;;  %2305 = vmatprep.subr.bf16.mxu1 %v3320_v63  ;;  %v3405_v62 = vld [vmem:[%s4469_s1 + $0x500] ss:$48 sps:$4 sm:$0xff]   ;;  %v3408_v63 = vld [vmem:[%s4469_s1 + $0x508] ss:$48 sps:$4 sm:$0xff]  }
  0xbf   : > { %2220 = vmatpush1.bf16.msra.mxu0 %v3315_v0  ;;  %2306 = vmatpush1.bf16.msra.mxu1 %v3318_v1  ;;  %v3413_v0 = vld [vmem:[%s4469_s1 + $0x564] ss:$48 sps:$4 sm:$0xff]   ;;  %v3416_v1 = vld [vmem:[%s4469_s1 + $0x56c] ss:$48 sps:$4 sm:$0xff]  }
  0xc0   : > { %2221 = vmatprep.subr.bf16.mxu0 %v3323_v2  ;;  %2307 = vmatprep.subr.bf16.mxu1 %v3326_v3  ;;  %v3411_v2 = vld [vmem:[%s4469_s1 + $0x560] ss:$48 sps:$4 sm:$0xff]   ;;  %v3414_v3 = vld [vmem:[%s4469_s1 + $0x568] ss:$48 sps:$4 sm:$0xff]  }
  0xc3   : > { %2222 = vmatpush1.bf16.msra.mxu0 %v3321_v4  ;;  %2308 = vmatpush1.bf16.msra.mxu1 %v3324_v6  ;;  %v3419_v4 = vld [vmem:[%s4469_s1 + $0x5c4] ss:$48 sps:$4 sm:$0xff]   ;;  %v3422_v6 = vld [vmem:[%s4469_s1 + $0x5cc] ss:$48 sps:$4 sm:$0xff]  }
  0xc4   : > { %2336 = vmatprep.subr.bf16.mxu0 %v3329_v7  ;;  %2422 = vmatprep.subr.bf16.mxu1 %v3332_v8  ;;  %v3417_v7 = vld [vmem:[%s4469_s1 + $0x5c0] ss:$48 sps:$4 sm:$0xff]   ;;  %v3420_v8 = vld [vmem:[%s4469_s1 + $0x5c8] ss:$48 sps:$4 sm:$0xff]  }
  0xc6   : > { %2240 = vmatmul.mubr.bf16.vlgmr.msra.gmra.mrb[4].mxu0 %v3828_v37  ;;  %2326 = vmatmul.mubr.bf16.vlgmr.msra.gmra.mrb[4].mxu1 %v3828_v37  ;;  %v3344_v37 = vld [vmem:[%s4469_s1 + $0xec] ss:$48 sps:$4 sm:$0xff]  }
  0xc7   : > { %2337 = vmatpush1.bf16.msra.mxu0 %v3327_v9  ;;  %2423 = vmatpush1.bf16.msra.mxu1 %v3330_v10  ;;  %v3425_v9 = vld [vmem:[%s4469_s1 + $0x624] ss:$48 sps:$4 sm:$0xff]   ;;  %v3428_v10 = vld [vmem:[%s4469_s1 + $0x62c] ss:$48 sps:$4 sm:$0xff]  }
  0xc8   : > { %2338 = vmatprep.subr.bf16.mxu0 %v3335_v11  ;;  %2424 = vmatprep.subr.bf16.mxu1 %v3338_v13  ;;  %v3423_v11 = vld [vmem:[%s4469_s1 + $0x620] ss:$48 sps:$4 sm:$0xff]   ;;  %v3426_v13 = vld [vmem:[%s4469_s1 + $0x628] ss:$48 sps:$4 sm:$0xff]  }
  0xc9   : > { %2368 = vmatprep.mubr.bf16.mxu0 %v3471_v17  ;;  %2454 = vmatprep.mubr.bf16.mxu1 %v3471_v17  ;;  %v3432_v17 = vld [vmem:[%s4469_s1 + $0x688] ss:$48 sps:$4 sm:$0xff]  }
  0xcb   : > { %2339 = vmatpush1.bf16.msra.mxu0 %v3333_v14  ;;  %2425 = vmatpush1.bf16.msra.mxu1 %v3336_v15  ;;  %v3431_v14 = vld [vmem:[%s4469_s1 + $0x684] ss:$48 sps:$4 sm:$0xff]   ;;  %v3434_v15 = vld [vmem:[%s4469_s1 + $0x68c] ss:$48 sps:$4 sm:$0xff]  }
  0xcc   : > { %2340 = vmatprep.subr.bf16.mxu0 %v3341_v16  ;;  %2426 = vmatprep.subr.bf16.mxu1 %v3344_v37  ;;  %v3472_v16 = vld [vmem:[%s3654_s13] ss:$12 sps:$4 sm:$0xff]  }
  0xcd   : > { %v3429_v37 = vld [vmem:[%s4469_s1 + $0x680] ss:$48 sps:$4 sm:$0xff]  }
  0xcf   : > { %2341 = vmatpush1.bf16.msra.mxu0 %v3339_v18  ;;  %2427 = vmatpush1.bf16.msra.mxu1 %v3342_v19  ;;  %v3437_v18 = vld [vmem:[%s4469_s1 + $0x6e4] ss:$48 sps:$4 sm:$0xff]   ;;  %v3440_v19 = vld [vmem:[%s4469_s1 + $0x6ec] ss:$48 sps:$4 sm:$0xff]  }
  0xd0   : > { %2342 = vmatprep.subr.bf16.mxu0 %v3347_v20  ;;  %2428 = vmatprep.subr.bf16.mxu1 %v3350_v21  ;;  %v3435_v20 = vld [vmem:[%s4469_s1 + $0x6e0] ss:$48 sps:$4 sm:$0xff]   ;;  %v3438_v21 = vld [vmem:[%s4469_s1 + $0x6e8] ss:$48 sps:$4 sm:$0xff]  }
  0xd3   : > { %2343 = vmatpush1.bf16.msra.mxu0 %v3345_v22  ;;  %2429 = vmatpush1.bf16.msra.mxu1 %v3348_v23  ;;  %v3443_v22 = vld [vmem:[%s4469_s1 + $0x744] ss:$48 sps:$4 sm:$0xff]   ;;  %v3441_v23 = vld [vmem:[%s4469_s1 + $0x740] ss:$48 sps:$4 sm:$0xff]  }
  0xd4   : > { %2344 = vmatprep.subr.bf16.mxu0 %v3353_v24  ;;  %2430 = vmatprep.subr.bf16.mxu1 %v3356_v25  ;;  %v3444_v24 = vld [vmem:[%s4469_s1 + $0x748] ss:$48 sps:$4 sm:$0xff]   ;;  %v3449_v25 = vld [vmem:[%s4469_s1 + $0x7a4] ss:$48 sps:$4 sm:$0xff]  }
  0xd7   : > { %2345 = vmatpush1.bf16.msra.mxu0 %v3351_v26  ;;  %2431 = vmatpush1.bf16.msra.mxu1 %v3354_v27  ;;  %v3452_v26 = vld [vmem:[%s4469_s1 + $0x7ac] ss:$48 sps:$4 sm:$0xff]   ;;  %v3447_v27 = vld [vmem:[%s4469_s1 + $0x7a0] ss:$48 sps:$4 sm:$0xff]  }
  0xd8   : > { %2346 = vmatprep.subr.bf16.mxu0 %v3359_v28  ;;  %2432 = vmatprep.subr.bf16.mxu1 %v3362_v29  ;;  %v3450_v28 = vld [vmem:[%s4469_s1 + $0x7a8] ss:$48 sps:$4 sm:$0xff]   ;;  %v3455_v29 = vld [vmem:[%s4469_s1 + $0x804] ss:$48 sps:$4 sm:$0xff]  }
  0xdb   : > { %2347 = vmatpush1.bf16.msra.mxu0 %v3357_v30  ;;  %2433 = vmatpush1.bf16.msra.mxu1 %v3360_v31  ;;  %v3458_v30 = vld [vmem:[%s4469_s1 + $0x80c] ss:$48 sps:$4 sm:$0xff]   ;;  %v3453_v31 = vld [vmem:[%s4469_s1 + $0x800] ss:$48 sps:$4 sm:$0xff]  }
  0xdc   : > { %2348 = vmatprep.subr.bf16.mxu0 %v3365_v32  ;;  %2434 = vmatprep.subr.bf16.mxu1 %v3368_v33  ;;  %v3456_v32 = vld [vmem:[%s4469_s1 + $0x808] ss:$48 sps:$4 sm:$0xff]   ;;  %v3461_v33 = vld [vmem:[%s4469_s1 + $0x864] ss:$48 sps:$4 sm:$0xff]  }
  0xdf   : > { %2349 = vmatpush1.bf16.msra.mxu0 %v3363_v34  ;;  %2435 = vmatpush1.bf16.msra.mxu1 %v3366_v35  ;;  %v3464_v34 = vld [vmem:[%s4469_s1 + $0x86c] ss:$48 sps:$4 sm:$0xff]   ;;  %v3459_v35 = vld [vmem:[%s4469_s1 + $0x860] ss:$48 sps:$4 sm:$0xff]  }
  0xe0   : > { %2350 = vmatprep.subr.bf16.mxu0 %v3371_v36  ;;  %2436 = vmatprep.subr.bf16.mxu1 %v3374_v38  ;;  %v3462_v36 = vld [vmem:[%s4469_s1 + $0x868] ss:$48 sps:$4 sm:$0xff]   ;;  %v3467_v38 = vld [vmem:[%s4469_s1 + $0x8c4] ss:$48 sps:$4 sm:$0xff]  }
  0xe3   : > { %2351 = vmatpush1.bf16.msra.mxu0 %v3369_v39  ;;  %2437 = vmatpush1.bf16.msra.mxu1 %v3372_v40  ;;  %v3470_v39 = vld [vmem:[%s4469_s1 + $0x8cc] ss:$48 sps:$4 sm:$0xff]   ;;  %v3465_v40 = vld [vmem:[%s4469_s1 + $0x8c0] ss:$48 sps:$4 sm:$0xff]  }
  0xe4   : > { %2352 = vmatprep.subr.bf16.mxu0 %v3377_v41  ;;  %2438 = vmatprep.subr.bf16.mxu1 %v3380_v42  ;;  %v3468_v41 = vld [vmem:[%s4469_s1 + $0x8c8] ss:$48 sps:$4 sm:$0xff]  }
  0xe5   : > { %v3473_v42 = vld [vmem:[%s3654_s13 + $0x8] ss:$12 sps:$4 sm:$0xff]   ;;  %s3025_s13 = smul.u32 48, %s4473_s24 }
  0xe7   : > { %2353 = vmatpush1.bf16.msra.mxu0 %v3375_v43  ;;  %2439 = vmatpush1.bf16.msra.mxu1 %v3378_v44  ;;  %v476_v43 = vlaneseq  ;;  %s4436_s18 = scalar_lea.vmem %s4471_s3, %s3025_s13 }
  0xe8   : > { %2354 = vmatprep.subr.bf16.mxu0 %v3383_v45  ;;  %2440 = vmatprep.subr.bf16.mxu1 %v3386_v46 }
  0xe9   : > { %v4415_v44 = vshrl.u32 %v476_v43, 7 }
  0xeb   : > { %2355 = vmatpush1.bf16.msra.mxu0 %v3381_v48  ;;  %2441 = vmatpush1.bf16.msra.mxu1 %v3384_v5  ;;  %v478_v45 = vsub.s32 0, %v4415_v44  ;;  %v486_v46 = vsub.s32 2, %v4415_v44  ;;  %v472_v48 = vld [vmem:[%s4470_s2] sm:$0xff]  ;;  %v482_v5 = vsub.s32 1, %v4415_v44 }
  0xec   : > { %2356 = vmatprep.subr.bf16.mxu0 %v3389_v49  ;;  %2442 = vmatprep.subr.bf16.mxu1 %v3392_v47  ;;  %v490_v49 = vsub.s32 3, %v4415_v44 }
  0xed   : > { %v479_v47 = vrot.slane %v472_v48, %v478_v45 }
  0xef   : > { %2357 = vmatpush1.bf16.msra.mxu0 %v3387_v50  ;;  %2443 = vmatpush1.bf16.msra.mxu1 %v3390_v51  ;;  %v487_v50 = vrot.slane %v472_v48, %v486_v46  ;;  %v483_v51 = vrot.slane %v472_v48, %v482_v5 }
  0xf0   : > { %2358 = vmatprep.subr.bf16.mxu0 %v3395_v52  ;;  %2444 = vmatprep.subr.bf16.mxu1 %v3398_v53  ;;  %v491_v52 = vrot.slane %v472_v48, %v490_v49 }
  0xf3   : > { %2359 = vmatpush1.bf16.msra.mxu0 %v3393_v54  ;;  %2445 = vmatpush1.bf16.msra.mxu1 %v3396_v55 }
  0xf4   : > { %2360 = vmatprep.subr.bf16.mxu0 %v3401_v56  ;;  %2446 = vmatprep.subr.bf16.mxu1 %v3404_v57 }
  0xf7   : > { %2361 = vmatpush1.bf16.msra.mxu0 %v3399_v58  ;;  %2447 = vmatpush1.bf16.msra.mxu1 %v3402_v59 }
  0xf8   : > { %2362 = vmatprep.subr.bf16.mxu0 %v3407_v60  ;;  %2448 = vmatprep.subr.bf16.mxu1 %v3410_v61 }
  0xfb   : > { %2363 = vmatpush1.bf16.msra.mxu0 %v3405_v62  ;;  %2449 = vmatpush1.bf16.msra.mxu1 %v3408_v63 }
  0xfc   : > { %2364 = vmatprep.subr.bf16.mxu0 %v3413_v0  ;;  %2450 = vmatprep.subr.bf16.mxu1 %v3416_v1 }
  0xff   : > { %2365 = vmatpush1.bf16.msra.mxu0 %v3411_v2  ;;  %2451 = vmatpush1.bf16.msra.mxu1 %v3414_v3 }
 0x100   : > { %2366 = vmatprep.subr.bf16.mxu0 %v3419_v4  ;;  %2452 = vmatprep.subr.bf16.mxu1 %v3422_v6 }
 0x103   : > { %2367 = vmatpush1.bf16.msra.mxu0 %v3417_v7  ;;  %2453 = vmatpush1.bf16.msra.mxu1 %v3420_v8 }
 0x104   : > { %2379 = vmatprep.subr.bf16.mxu0 %v3425_v9  ;;  %2465 = vmatprep.subr.bf16.mxu1 %v3428_v10  ;;  %v494_v10 = vsub.s32 4, %v4415_v44 }
 0x106   : > { %2369 = vmatmul.mubr.bf16.vlgmr.msra.gmra.mrb[8].mxu0 %v3472_v16  ;;  %2455 = vmatmul.mubr.bf16.vlgmr.msra.gmra.mrb[8].mxu1 %v3472_v16 }
 0x107   : > { %2380 = vmatpush1.bf16.msra.mxu0 %v3423_v11  ;;  %2466 = vmatpush1.bf16.msra.mxu1 %v3426_v13  ;;  %v502_v11 = vsub.s32 6, %v4415_v44  ;;  %v498_v13 = vsub.s32 5, %v4415_v44 }
 0x108   : > { %2381 = vmatprep.subr.bf16.mxu0 %v3431_v14  ;;  %2467 = vmatprep.subr.bf16.mxu1 %v3434_v15  ;;  %v506_v14 = vsub.s32 7, %v4415_v44  ;;  %v495_v15 = vrot.slane %v472_v48, %v494_v10 }
 0x109   : > { %2411 = vmatprep.mubr.bf16.mxu0 %v3482_v12  ;;  %2497 = vmatprep.mubr.bf16.mxu1 %v3482_v12  ;;  %v3446_v12 = vld [vmem:[%s4469_s1 + $0x74c] ss:$48 sps:$4 sm:$0xff]   ;;  %v503_v16 = vrot.slane %v472_v48, %v502_v11 }
 0x10b   : > { %2382 = vmatpush1.bf16.msra.mxu0 %v3429_v37  ;;  %2468 = vmatpush1.bf16.msra.mxu1 %v3432_v17  ;;  %v499_v37 = vrot.slane %v472_v48, %v498_v13  ;;  %v507_v17 = vrot.slane %v472_v48, %v506_v14 }
 0x10c   : > { %2383 = vmatprep.subr.bf16.mxu0 %v3437_v18  ;;  %2469 = vmatprep.subr.bf16.mxu1 %v3440_v19 }
 0x10f   : > { %2384 = vmatpush1.bf16.msra.mxu0 %v3435_v20  ;;  %2470 = vmatpush1.bf16.msra.mxu1 %v3438_v21 }
 0x110   : > { %2385 = vmatprep.subr.bf16.mxu0 %v3443_v22  ;;  %2471 = vmatprep.subr.bf16.mxu1 %v3446_v12 }
 0x113   : > { %2386 = vmatpush1.bf16.msra.mxu0 %v3441_v23  ;;  %2472 = vmatpush1.bf16.msra.mxu1 %v3444_v24 }
 0x114   : > { %2387 = vmatprep.subr.bf16.mxu0 %v3449_v25  ;;  %2473 = vmatprep.subr.bf16.mxu1 %v3452_v26 }
 0x117   : > { %2388 = vmatpush1.bf16.msra.mxu0 %v3447_v27  ;;  %2474 = vmatpush1.bf16.msra.mxu1 %v3450_v28 }
 0x118   : > { %2389 = vmatprep.subr.bf16.mxu0 %v3455_v29  ;;  %2475 = vmatprep.subr.bf16.mxu1 %v3458_v30 }
 0x11b   : > { %2390 = vmatpush1.bf16.msra.mxu0 %v3453_v31  ;;  %2476 = vmatpush1.bf16.msra.mxu1 %v3456_v32 }
 0x11c   : > { %2391 = vmatprep.subr.bf16.mxu0 %v3461_v33  ;;  %2477 = vmatprep.subr.bf16.mxu1 %v3464_v34 }
 0x11f   : > { %2392 = vmatpush1.bf16.msra.mxu0 %v3459_v35  ;;  %2478 = vmatpush1.bf16.msra.mxu1 %v3462_v36 }
 0x120   : > { %2393 = vmatprep.subr.bf16.mxu0 %v3467_v38  ;;  %2479 = vmatprep.subr.bf16.mxu1 %v3470_v39  ;;  %v473_v38 = vld [vmem:[%s4470_s2 + $0x8] sm:$0xf] }
 0x121   : > { %v511_v39 = vrot.slane %v473_v38, %v478_v45 }
 0x123   : > { %2394 = vmatpush1.bf16.msra.mxu0 %v3465_v40  ;;  %2480 = vmatpush1.bf16.msra.mxu1 %v3468_v41  ;;  %v519_v40 = vrot.slane %v473_v38, %v486_v46  ;;  %v515_v41 = vrot.slane %v473_v38, %v482_v5 }
 0x126   : > { %2412 = vmatmul.mubr.bf16.vlgmr.msra.gmra.mrb[8].mxu0 %v3473_v42  ;;  %2498 = vmatmul.mubr.bf16.vlgmr.msra.gmra.mrb[8].mxu1 %v3473_v42  ;;  %v523_v42 = vrot.slane %v473_v38, %v490_v49 }
 0x139   : > { %v2069_v53 = vpop.f32.mrb[0].mxu0  ;;  %v2155_v54 = vpop.f32.mrb[0].mxu1 }
 0x13a   : > { %v2976_v55 = vadd.f32 %v2069_v53, %v479_v47  ;;  %v2980_v56 = vadd.f32 %v2155_v54, %v487_v50  ;;  %v2071_v57 = vpop.f32.mrb[1].mxu0  ;;  %v2157_v58 = vpop.f32.mrb[1].mxu1 }
 0x13b   : > { %v2977_v59 = vadd.f32 %v2071_v57, %v483_v51  ;;  %v2981_v60 = vadd.f32 %v2157_v58, %v491_v52  ;;  %v2073_v61 = vpop.f32.mrb[2].mxu0  ;;  %v2159_v62 = vpop.f32.mrb[2].mxu1 }
 0x13c   : > { %v2978_v63 = vadd.f32 %v2073_v61, %v479_v47  ;;  %v2982_v0 = vadd.f32 %v2159_v62, %v487_v50  ;;  %v2075_v1 = vpop.f32.mrb[3].mxu0  ;;  %v2161_v2 = vpop.f32.mrb[3].mxu1 }
 0x13d   : > { %v2964_v3 = vpack.c.bf16 %v2977_v59, %v2976_v55  ;;  %v2965_v4 = vpack.c.bf16 %v2981_v60, %v2980_v56  ;;  %v2979_v6 = vadd.f32 %v2075_v1, %v483_v51  ;;  %v2983_v7 = vadd.f32 %v2161_v2, %v491_v52 }
 0x13f   : > { %2580 = vst [vmem:[%s4436_s18] sm:$0xff] %v2964_v3  ;;  %2581 = vst [vmem:[%s4436_s18 + $0x8] sm:$0xff] %v2965_v4  ;;  %v2970_v8 = vpack.c.bf16 %v2979_v6, %v2978_v63  ;;  %v2971_v9 = vpack.c.bf16 %v2983_v7, %v2982_v0 }
 0x141   : > { %2586 = vst [vmem:[%s4436_s18 + $0x30] sm:$0xff] %v2970_v8  ;;  %2587 = vst [vmem:[%s4436_s18 + $0x38] sm:$0xff] %v2971_v9 }
 0x199   : > { %v2241_v18 = vpop.f32.mrb[4].mxu0  ;;  %v2327_v19 = vpop.f32.mrb[4].mxu1 }
 0x19a   : > { %v2984_v20 = vadd.f32 %v2241_v18, %v495_v15  ;;  %v2988_v21 = vadd.f32 %v2327_v19, %v503_v16  ;;  %v2243_v22 = vpop.f32.mrb[5].mxu0  ;;  %v2329_v12 = vpop.f32.mrb[5].mxu1 }
 0x19b   : > { %v2985_v23 = vadd.f32 %v2243_v22, %v499_v37  ;;  %v2989_v24 = vadd.f32 %v2329_v12, %v507_v17  ;;  %v2245_v25 = vpop.f32.mrb[6].mxu0  ;;  %v2331_v26 = vpop.f32.mrb[6].mxu1 }
 0x19c   : > { %v2986_v27 = vadd.f32 %v2245_v25, %v495_v15  ;;  %v2990_v28 = vadd.f32 %v2331_v26, %v503_v16  ;;  %v2247_v29 = vpop.f32.mrb[7].mxu0  ;;  %v2333_v30 = vpop.f32.mrb[7].mxu1 }
 0x19d   : > { %v2966_v31 = vpack.c.bf16 %v2985_v23, %v2984_v20  ;;  %v2967_v32 = vpack.c.bf16 %v2989_v24, %v2988_v21  ;;  %v2987_v33 = vadd.f32 %v2247_v29, %v499_v37  ;;  %v2991_v34 = vadd.f32 %v2333_v30, %v507_v17 }
 0x19f   : > { %2582 = vst [vmem:[%s4436_s18 + $0x10] sm:$0xff] %v2966_v31  ;;  %2583 = vst [vmem:[%s4436_s18 + $0x18] sm:$0xff] %v2967_v32  ;;  %v2972_v35 = vpack.c.bf16 %v2987_v33, %v2986_v27  ;;  %v2973_v36 = vpack.c.bf16 %v2991_v34, %v2990_v28 }
 0x1a1   : > { %2588 = vst [vmem:[%s4436_s18 + $0x40] sm:$0xff] %v2972_v35  ;;  %2589 = vst [vmem:[%s4436_s18 + $0x48] sm:$0xff] %v2973_v36 }
 0x1f9   : > { %v2413_v43 = vpop.f32.mrb[8].mxu0  ;;  %v2499_v48 = vpop.f32.mrb[8].mxu1 }
 0x1fa   : > { %v2992_v47 = vadd.f32 %v2413_v43, %v511_v39  ;;  %v2996_v50 = vadd.f32 %v2499_v48, %v519_v40  ;;  %v2415_v51 = vpop.f32.mrb[9].mxu0  ;;  %v2501_v52 = vpop.f32.mrb[9].mxu1 }
 0x1fb   : > { %v2993_v53 = vadd.f32 %v2415_v51, %v515_v41  ;;  %v2997_v45 = vadd.f32 %v2501_v52, %v523_v42  ;;  %v2417_v54 = vpop.f32.mrb[10].mxu0  ;;  %v2503_v46 = vpop.f32.mrb[10].mxu1 }
 0x1fc   : > { %v2994_v55 = vadd.f32 %v2417_v54, %v511_v39  ;;  %v2998_v56 = vadd.f32 %v2503_v46, %v519_v40  ;;  %v2419_v5 = vpop.f32.mrb[11].mxu0  ;;  %v2505_v57 = vpop.f32.mrb[11].mxu1 }
 0x1fd   : > { %v2968_v44 = vpack.c.bf16 %v2993_v53, %v2992_v47  ;;  %v2969_v49 = vpack.c.bf16 %v2997_v45, %v2996_v50  ;;  %v2995_v58 = vadd.f32 %v2419_v5, %v515_v41  ;;  %v2999_v59 = vadd.f32 %v2505_v57, %v523_v42 }
 0x1ff   : > { %2584 = vst [vmem:[%s4436_s18 + $0x20] sm:$0xff] %v2968_v44  ;;  %2585 = vst [vmem:[%s4436_s18 + $0x28] sm:$0xff] %v2969_v49  ;;  %v2974_v60 = vpack.c.bf16 %v2995_v58, %v2994_v55  ;;  %v2975_v61 = vpack.c.bf16 %v2999_v59, %v2998_v56 }
 0x201   : > { %2590 = vst [vmem:[%s4436_s18 + $0x50] sm:$0xff] %v2974_v60  ;;  %2591 = vst [vmem:[%s4436_s18 + $0x58] sm:$0xff] %v2975_v61 }
 0x202 PF: > { %s13_s12 = sadd.s32 1, %s3480_s12  }
 0x203   : > { %p10_p4 = scmp.ge.s32.totalorder %s13_s12, 4  }
 0x205   :  { %12 = sbr.rel (!%p10_p4) target bundleno = 1 (0x1), region = 62 }

// kernel: net_forward.43
= control target key start
LH: loop header
LB: loop body
LE: loop exit
PB: predicated region body
PF: predicated region fallthrough
CT: control target
= control target key end

     0   :  { %s892_s12 = smov 0   ;;  %s1062_s0 = inlined_call_operand.vmem [shape: bf16[32,256], index: 0, kind: input, shape index: {}]   ;;  %s1063_s1 = inlined_call_operand.vmem [shape: bf16[256,384], index: 1, kind: input, shape index: {}]   ;;  %s1064_s2 = inlined_call_operand.vmem [shape: f32[1,384], index: 2, kind: input, shape index: {}]   ;;  %s1065_s3 = inlined_call_operand.vmem [shape: bf16[32,384], index: 3, kind: output, shape index: {}]  }
   0x1 LB: > { %s695_s13 = sadd.s32 4294967295, %s870_s12   ;;  %p699_p0 = scmp.ge.s32.totalorder %s870_s12, 1  ;;  %s870_s12 = sphi %s892_s12, %s13_s12  }
   0x2   : > { %p139_p1 = scmp.lt.s32.totalorder %s870_s12, 3 }
   0x4   : > { %p140_p2 = pnand %p699_p0, %p139_p1 }
   0x5   : > { %v797_v0 = vld [vmem:[%s1063_s1 + $0x4] ss:$12 sps:$4 sm:$0xff] (!%p140_p2)   ;;  %v799_v1 = vld [vmem:[%s1063_s1] ss:$12 sps:$4 sm:$0xff] (!%p140_p2)   ;;  %v800_v2 = vld [vmem:[%s1063_s1 + $0x1c] ss:$12 sps:$4 sm:$0xff] (!%p140_p2)   ;;  %v248_v50 = vlaneseq (!%p140_p2) }
   0x6   : > { %143 = sbr.rel (%p140_p2) target bundleno = 290 (0x122), region = 32  ;;  %529 = vmatprep.subr.bf16.mxu0 (!%p140_p2), %v797_v0  ;;  %v802_v3 = vld [vmem:[%s1063_s1 + $0x18] ss:$12 sps:$4 sm:$0xff] (!%p140_p2)   ;;  %v803_v4 = vld [vmem:[%s1063_s1 + $0x34] ss:$12 sps:$4 sm:$0xff] (!%p140_p2)   ;;  %s700_s23 = sshll.u32 (!%p140_p2), %s695_s13, 1 }
   0x7   : > { %530 = vmatpush1.bf16.msra.mxu0 (!%p140_p2), %v799_v1  ;;  %v805_v5 = vld [vmem:[%s1063_s1 + $0x30] ss:$12 sps:$4 sm:$0xff] (!%p140_p2)   ;;  %v806_v6 = vld [vmem:[%s1063_s1 + $0x4c] ss:$12 sps:$4 sm:$0xff] (!%p140_p2)   ;;  %v818_v7 = vld [vmem:[%s1063_s1 + $0xc8] ss:$12 sps:$4 sm:$0xff] (!%p140_p2)  }
   0x8   : > { %531 = vmatprep.subr.bf16.mxu0 (!%p140_p2), %v800_v2  ;;  %v808_v8 = vld [vmem:[%s1063_s1 + $0x48] ss:$12 sps:$4 sm:$0xff] (!%p140_p2)   ;;  %v809_v9 = vld [vmem:[%s1063_s1 + $0x64] ss:$12 sps:$4 sm:$0xff] (!%p140_p2)   ;;  %766 = vmatprep.subr.bf16.mxu1 (!%p140_p2), %v818_v7  ;;  %v823_v11 = vld [vmem:[%s1063_s1 + $0xe0] ss:$12 sps:$4 sm:$0xff] (!%p140_p2)  }
   0x9   : > { %v821_v10 = vld [vmem:[%s1063_s1 + $0x8] ss:$12 sps:$4 sm:$0xff] (!%p140_p2)   ;;  %v811_v12 = vld [vmem:[%s1063_s1 + $0x60] ss:$12 sps:$4 sm:$0xff] (!%p140_p2)   ;;  %v828_v15 = vld [vmem:[%s1063_s1 + $0xf8] ss:$12 sps:$4 sm:$0xff] (!%p140_p2)  }
   0xa   : > { %767 = vmatpush3.bf16.msra.mxu1 (!%p140_p2), %v821_v10  ;;  %v812_v13 = vld [vmem:[%s1063_s1 + $0x7c] ss:$12 sps:$4 sm:$0xff] (!%p140_p2)   ;;  %v826_v14 = vld [vmem:[%s1063_s1 + $0x20] ss:$12 sps:$4 sm:$0xff] (!%p140_p2)   ;;  %v814_v16 = vld [vmem:[%s1063_s1 + $0x78] ss:$12 sps:$4 sm:$0xff] (!%p140_p2)  }
   0xb   : > { %532 = vmatpush1.bf16.msra.mxu0 (!%p140_p2), %v802_v3  ;;  %768 = vmatprep.subr.bf16.mxu1 (!%p140_p2), %v823_v11  ;;  %v831_v17 = vld [vmem:[%s1063_s1 + $0x38] ss:$12 sps:$4 sm:$0xff] (!%p140_p2)   ;;  %v815_v18 = vld [vmem:[%s1063_s1 + $0x94] ss:$12 sps:$4 sm:$0xff] (!%p140_p2)   ;;  %v833_v19 = vld [vmem:[%s1063_s1 + $0x110] ss:$12 sps:$4 sm:$0xff] (!%p140_p2)  }
   0xc   : > { %533 = vmatprep.subr.bf16.mxu0 (!%p140_p2), %v803_v4  ;;  %p166_p3 = scmp.lt.s32.totalorder (!%p140_p2), %s700_s23, 3  ;;  %v817_v20 = vld [vmem:[%s1063_s1 + $0x90] ss:$12 sps:$4 sm:$0xff] (!%p140_p2)   ;;  %v838_v22 = vld [vmem:[%s1063_s1 + $0x128] ss:$12 sps:$4 sm:$0xff] (!%p140_p2)   ;;  %v249_v51 = vshrl.u32 (!%p140_p2), %v248_v50, 7 }
   0xd   : > { %v836_v21 = vld [vmem:[%s1063_s1 + $0x50] ss:$12 sps:$4 sm:$0xff]   ;;  %v819_v23 = vld [vmem:[%s1063_s1 + $0xac] ss:$12 sps:$4 sm:$0xff]   ;;  %v822_v24 = vld [vmem:[%s1063_s1 + $0xa8] ss:$12 sps:$4 sm:$0xff]  }
   0xe   : > { %769 = vmatpush3.bf16.msra.mxu1 %v826_v14  ;;  %s1067_s23 = smov (!%p166_p3, %s700_s23), 3  ;;  %v841_v25 = vld [vmem:[%s1063_s1 + $0x68] ss:$12 sps:$4 sm:$0xff]   ;;  %v843_v26 = vld [vmem:[%s1063_s1 + $0x140] ss:$12 sps:$4 sm:$0xff]   ;;  %v258_v52 = vsub.s32 2, %v249_v51 }
   0xf   : > { %534 = vmatpush1.bf16.msra.mxu0 %v805_v5  ;;  %770 = vmatprep.subr.bf16.mxu1 %v828_v15  ;;  %v824_v27 = vld [vmem:[%s1063_s1 + $0xc4] ss:$12 sps:$4 sm:$0xff]   ;;  %v827_v28 = vld [vmem:[%s1063_s1 + $0xc0] ss:$12 sps:$4 sm:$0xff]   ;;  %s761_s25 = sshll.u32 %s1067_s23, 3  ;;  %s788_s16 = smul.u32 12, %s1067_s23 }
  0x10   : > { %535 = vmatprep.subr.bf16.mxu0 %v806_v6  ;;  %v846_v29 = vld [vmem:[%s1063_s1 + $0x80] ss:$12 sps:$4 sm:$0xff]   ;;  %v848_v30 = vld [vmem:[%s1063_s1 + $0x158] ss:$12 sps:$4 sm:$0xff]   ;;  %v829_v31 = vld [vmem:[%s1063_s1 + $0xdc] ss:$12 sps:$4 sm:$0xff]   ;;  %s170_s6 = scalar_lea.vmem %s1062_s0, %s761_s25 }
  0x11   : > { %v851_v32 = vld [vmem:[%s1063_s1 + $0x98] ss:$12 sps:$4 sm:$0xff]   ;;  %v853_v34 = vld [vmem:[%s1063_s1 + $0x170] ss:$12 sps:$4 sm:$0xff]   ;;  %v834_v35 = vld [vmem:[%s1063_s1 + $0xf4] ss:$12 sps:$4 sm:$0xff]   ;;  %s177_s19 = scalar_lea.vmem %s1065_s3, %s788_s16 }
  0x12   : > { %771 = vmatpush3.bf16.msra.mxu1 %v831_v17  ;;  %v832_v33 = vld [vmem:[%s1063_s1 + $0xd8] ss:$12 sps:$4 sm:$0xff]   ;;  %v856_v37 = vld [vmem:[%s1063_s1 + $0xb0] ss:$12 sps:$4 sm:$0xff]   ;;  %v858_v40 = vld [vmem:[%s170_s6] ss:$8 sps:$4 sm:$0xff]  }
  0x13   : > { %536 = vmatpush1.bf16.msra.mxu0 %v808_v8  ;;  %772 = vmatprep.subr.bf16.mxu1 %v833_v19  ;;  %v860_v36 = vld [vmem:[%s170_s6 + $0x4] ss:$8 sps:$4 sm:$0xff]   ;;  %v837_v38 = vld [vmem:[%s1063_s1 + $0xf0] ss:$12 sps:$4 sm:$0xff]   ;;  %v842_v41 = vld [vmem:[%s1063_s1 + $0x108] ss:$12 sps:$4 sm:$0xff]  }
  0x14   : > { %537 = vmatprep.subr.bf16.mxu0 %v809_v9  ;;  %v839_v39 = vld [vmem:[%s1063_s1 + $0x10c] ss:$12 sps:$4 sm:$0xff]   ;;  %604 = vmatprep.mubr.bf16.mxu1 %v860_v36  ;;  %v844_v42 = vld [vmem:[%s1063_s1 + $0x124] ss:$12 sps:$4 sm:$0xff]   ;;  %v849_v44 = vld [vmem:[%s1063_s1 + $0x13c] ss:$12 sps:$4 sm:$0xff]  }
  0x15   : > { %561 = vmatprep.mubr.bf16.mxu0 %v860_v36  ;;  %v847_v43 = vld [vmem:[%s1063_s1 + $0x120] ss:$12 sps:$4 sm:$0xff]   ;;  %v852_v45 = vld [vmem:[%s1063_s1 + $0x138] ss:$12 sps:$4 sm:$0xff]   ;;  %v857_v47 = vld [vmem:[%s1063_s1 + $0x150] ss:$12 sps:$4 sm:$0xff]  }
  0x16   : > { %773 = vmatpush3.bf16.msra.mxu1 %v836_v21  ;;  %v854_v46 = vld [vmem:[%s1063_s1 + $0x154] ss:$12 sps:$4 sm:$0xff]   ;;  %v861_v48 = vld [vmem:[%s1063_s1 + $0x16c] ss:$12 sps:$4 sm:$0xff]   ;;  %v250_v1 = vsub.s32 0, %v249_v51  ;;  %v254_v2 = vsub.s32 1, %v249_v51 }
  0x17   : > { %538 = vmatpush1.bf16.msra.mxu0 %v811_v12  ;;  %774 = vmatprep.subr.bf16.mxu1 %v838_v22  ;;  %v863_v49 = vld [vmem:[%s1063_s1 + $0x168] ss:$12 sps:$4 sm:$0xff]   ;;  %v246_v53 = vld [vmem:[%s1064_s2] sm:$0x7] }
  0x18   : > { %539 = vmatprep.subr.bf16.mxu0 %v812_v13  ;;  %v259_v55 = vrot.slane %v246_v53, %v258_v52  ;;  %v251_v3 = vrot.slane %v246_v53, %v250_v1  ;;  %v255_v4 = vrot.slane %v246_v53, %v254_v2 }
  0x1a   : > { %775 = vmatpush3.bf16.msra.mxu1 %v841_v25 }
  0x1b   : > { %540 = vmatpush1.bf16.msra.mxu0 %v814_v16  ;;  %776 = vmatprep.subr.bf16.mxu1 %v843_v26 }
  0x1c   : > { %541 = vmatprep.subr.bf16.mxu0 %v815_v18 }
  0x1e   : > { %777 = vmatpush3.bf16.msra.mxu1 %v846_v29 }
  0x1f   : > { %542 = vmatpush1.bf16.msra.mxu0 %v817_v20  ;;  %778 = vmatprep.subr.bf16.mxu1 %v848_v30 }
  0x20   : > { %543 = vmatprep.subr.bf16.mxu0 %v819_v23 }
  0x22   : > { %779 = vmatpush3.bf16.msra.mxu1 %v851_v32 }
  0x23   : > { %544 = vmatpush1.bf16.msra.mxu0 %v822_v24  ;;  %780 = vmatprep.subr.bf16.mxu1 %v853_v34 }
  0x24   : > { %545 = vmatprep.subr.bf16.mxu0 %v824_v27 }
  0x26   : > { %781 = vmatpush3.bf16.msra.mxu1 %v856_v37 }
  0x27   : > { %546 = vmatpush1.bf16.msra.mxu0 %v827_v28 }
  0x28   : > { %547 = vmatprep.subr.bf16.mxu0 %v829_v31 }
  0x29   : > { %605 = vmatmul.mubr.bf16.vlgmr.msra.gmra.mrb[0].mxu1 %v858_v40 }
  0x2b   : > { %548 = vmatpush1.bf16.msra.mxu0 %v832_v33 }
  0x2c   : > { %549 = vmatprep.subr.bf16.mxu0 %v834_v35 }
  0x2f   : > { %550 = vmatpush1.bf16.msra.mxu0 %v837_v38 }
  0x30   : > { %551 = vmatprep.subr.bf16.mxu0 %v839_v39 }
  0x33   : > { %552 = vmatpush1.bf16.msra.mxu0 %v842_v41 }
  0x34   : > { %553 = vmatprep.subr.bf16.mxu0 %v844_v42 }
  0x37   : > { %554 = vmatpush1.bf16.msra.mxu0 %v847_v43 }
  0x38   : > { %555 = vmatprep.subr.bf16.mxu0 %v849_v44 }
  0x3b   : > { %556 = vmatpush1.bf16.msra.mxu0 %v852_v45 }
  0x3c   : > { %557 = vmatprep.subr.bf16.mxu0 %v854_v46 }
  0x3f   : > { %558 = vmatpush1.bf16.msra.mxu0 %v857_v47 }
  0x40   : > { %559 = vmatprep.subr.bf16.mxu0 %v861_v48 }
  0x43   : > { %560 = vmatpush1.bf16.msra.mxu0 %v863_v49 }
  0x46   : > { %562 = vmatmul.mubr.bf16.vlgmr.msra.gmra.mrb[0].mxu0 %v858_v40 }
  0xfc   : > { %v782_v54 = vpop.f32.mrb[0].mxu1 }
  0xfd   : > { %v783_v56 = vpop.f32.mrb[1].mxu1 }
  0xfe   : > { %v784_v57 = vadd.f32 %v783_v56, %v782_v54  ;;  %v785_v58 = vpop.f32.mrb[2].mxu1 }
  0xff   : > { %v786_v59 = vpop.f32.mrb[3].mxu1 }
 0x100   : > { %v607_v60 = vadd.f32 %v784_v57, %v259_v55  ;;  %v787_v61 = vadd.f32 %v786_v59, %v785_v58 }
 0x102   : > { %v763_v62 = vpack.c.bf16 %v607_v60, %v607_v60  ;;  %v610_v63 = vadd.f32 %v787_v61, %v259_v55 }
 0x104   : > { %634 = vst [vmem:[%s177_s19 + $0x8] sm:$0xf] %v763_v62  ;;  %v765_v0 = vpack.c.bf16 %v610_v63, %v610_v63 }
 0x106   : > { %636 = vst [vmem:[%s177_s19 + $0x14] sm:$0xf] %v765_v0 }
 0x119   : > { %v563_v5 = vpop.f32.mrb[0].mxu0 }
 0x11a   : > { %v564_v6 = vadd.f32 %v563_v5, %v251_v3  ;;  %v565_v7 = vpop.f32.mrb[1].mxu0 }
 0x11b   : > { %v566_v8 = vadd.f32 %v565_v7, %v255_v4  ;;  %v567_v9 = vpop.f32.mrb[2].mxu0 }
 0x11c   : > { %v568_v10 = vadd.f32 %v567_v9, %v251_v3  ;;  %v569_v11 = vpop.f32.mrb[3].mxu0 }
 0x11d   : > { %v762_v12 = vpack.c.bf16 %v566_v8, %v564_v6  ;;  %v570_v13 = vadd.f32 %v569_v11, %v255_v4 }
 0x11f   : > { %633 = vst [vmem:[%s177_s19] sm:$0xff] %v762_v12  ;;  %v764_v14 = vpack.c.bf16 %v570_v13, %v568_v10 }
 0x121   : > { %635 = vst [vmem:[%s177_s19 + $0xc] sm:$0xff] %v764_v14 }
 0x122 PF: > { %s13_s12 = sadd.s32 1, %s870_s12  }
 0x123   : > { %p10_p4 = scmp.ge.s32.totalorder %s13_s12, 4  }
 0x125   :  { %12 = sbr.rel (!%p10_p4) target bundleno = 1 (0x1), region = 62 }

// kernel: net_forward.26
= control target key start
LH: loop header
LB: loop body
LE: loop exit
PB: predicated region body
PF: predicated region fallthrough
CT: control target
= control target key end

     0   :  { %s1243_s12 = smov 0   ;;  %s1491_s0 = inlined_call_operand.vmem [shape: bf16[32,384], index: 0, kind: input, shape index: {}]   ;;  %s1492_s1 = inlined_call_operand.vmem [shape: bf16[384,384], index: 1, kind: input, shape index: {}]   ;;  %s1493_s2 = inlined_call_operand.vmem [shape: f32[1,384], index: 2, kind: input, shape index: {}]   ;;  %s1494_s3 = inlined_call_operand.vmem [shape: bf16[32,384], index: 3, kind: output, shape index: {}]  }
   0x1 LB: > { %s947_s13 = sadd.s32 4294967295, %s1218_s12   ;;  %p951_p0 = scmp.ge.s32.totalorder %s1218_s12, 1  ;;  %s1218_s12 = sphi %s1243_s12, %s13_s12  }
   0x2   : > { %p139_p1 = scmp.lt.s32.totalorder %s1218_s12, 3 }
   0x4   : > { %p140_p2 = pnand %p951_p0, %p139_p1 }
   0x5   : > { %v1112_v0 = vld [vmem:[%s1492_s1 + $0x4] ss:$12 sps:$4 sm:$0xff] (!%p140_p2)   ;;  %v1114_v1 = vld [vmem:[%s1492_s1] ss:$12 sps:$4 sm:$0xff] (!%p140_p2)   ;;  %v1115_v2 = vld [vmem:[%s1492_s1 + $0x1c] ss:$12 sps:$4 sm:$0xff] (!%p140_p2)  }
   0x6   : > { %143 = sbr.rel (%p140_p2) target bundleno = 322 (0x142), region = 32  ;;  %697 = vmatprep.subr.bf16.mxu0 (!%p140_p2), %v1112_v0  ;;  %v1117_v3 = vld [vmem:[%s1492_s1 + $0xc8] ss:$12 sps:$4 sm:$0xff] (!%p140_p2)   ;;  %v1118_v4 = vld [vmem:[%s1492_s1 + $0x18] ss:$12 sps:$4 sm:$0xff] (!%p140_p2)   ;;  %s952_s9 = sshll.u32 (!%p140_p2), %s947_s13, 1 }
   0x7   : > { %698 = vmatpush1.bf16.msra.mxu0 (!%p140_p2), %v1114_v1  ;;  %v1119_v5 = vld [vmem:[%s1492_s1 + $0x8] ss:$12 sps:$4 sm:$0xff] (!%p140_p2)   ;;  %1041 = vmatprep.subr.bf16.mxu1 (!%p140_p2), %v1117_v3  ;;  %v1122_v7 = vld [vmem:[%s1492_s1 + $0xe0] ss:$12 sps:$4 sm:$0xff] (!%p140_p2)   ;;  %v1123_v8 = vld [vmem:[%s1492_s1 + $0x30] ss:$12 sps:$4 sm:$0xff] (!%p140_p2)  }
   0x8   : > { %699 = vmatprep.subr.bf16.mxu0 (!%p140_p2), %v1115_v2  ;;  %v1120_v6 = vld [vmem:[%s1492_s1 + $0x34] ss:$12 sps:$4 sm:$0xff] (!%p140_p2)   ;;  %1042 = vmatpush3.bf16.msra.mxu1 (!%p140_p2), %v1119_v5  ;;  %v1125_v10 = vld [vmem:[%s1492_s1 + $0x4c] ss:$12 sps:$4 sm:$0xff] (!%p140_p2)   ;;  %p166_p3 = scmp.lt.s32.totalorder (!%p140_p2), %s952_s9, 3  ;;  %v1220_v38 = vmov (!%p140_p2), 0.0  }
   0x9   : > { %v1124_v9 = vld [vmem:[%s1492_s1 + $0x20] ss:$12 sps:$4 sm:$0xff] (!%p140_p2)   ;;  %1043 = vmatprep.subr.bf16.mxu1 (!%p140_p2), %v1122_v7  ;;  %v1127_v11 = vld [vmem:[%s1492_s1 + $0xf8] ss:$12 sps:$4 sm:$0xff] (!%p140_p2)   ;;  %v1128_v12 = vld [vmem:[%s1492_s1 + $0x48] ss:$12 sps:$4 sm:$0xff] (!%p140_p2)  }
   0xa   : > { %v1129_v13 = vld [vmem:[%s1492_s1 + $0x38] ss:$12 sps:$4 sm:$0xff] (!%p140_p2)   ;;  %v1132_v15 = vld [vmem:[%s1492_s1 + $0x110] ss:$12 sps:$4 sm:$0xff] (!%p140_p2)   ;;  %v1133_v17 = vld [vmem:[%s1492_s1 + $0x60] ss:$12 sps:$4 sm:$0xff] (!%p140_p2)  }
   0xb   : > { %700 = vmatpush1.bf16.msra.mxu0 (!%p140_p2), %v1118_v4  ;;  %v1130_v14 = vld [vmem:[%s1492_s1 + $0x64] ss:$12 sps:$4 sm:$0xff] (!%p140_p2)   ;;  %v1135_v18 = vld [vmem:[%s1492_s1 + $0x7c] ss:$12 sps:$4 sm:$0xff] (!%p140_p2)   ;;  %v1142_v22 = vld [vmem:[%s1492_s1 + $0x140] ss:$12 sps:$4 sm:$0xff] (!%p140_p2)  }
   0xc   : > { %701 = vmatprep.subr.bf16.mxu0 (!%p140_p2), %v1120_v6  ;;  %1044 = vmatpush3.bf16.msra.mxu1 (!%p140_p2), %v1124_v9  ;;  %v1134_v16 = vld [vmem:[%s1492_s1 + $0x50] ss:$12 sps:$4 sm:$0xff] (!%p140_p2)   ;;  %v1137_v19 = vld [vmem:[%s1492_s1 + $0x128] ss:$12 sps:$4 sm:$0xff] (!%p140_p2)   ;;  %v1138_v20 = vld [vmem:[%s1492_s1 + $0x78] ss:$12 sps:$4 sm:$0xff] (!%p140_p2)  }
   0xd   : > { %1045 = vmatprep.subr.bf16.mxu1 %v1127_v11  ;;  %s1496_s9 = smov (!%p166_p3, %s952_s9), 3  ;;  %v1139_v21 = vld [vmem:[%s1492_s1 + $0x68] ss:$12 sps:$4 sm:$0xff]   ;;  %v1144_v24 = vld [vmem:[%s1492_s1 + $0x80] ss:$12 sps:$4 sm:$0xff]   ;;  %vm1221_vm0 = vmmov 0  }
   0xe   : > { %v1140_v23 = vld [vmem:[%s1492_s1 + $0x94] ss:$12 sps:$4 sm:$0xff]   ;;  %s1100_s11 = smul.u32 12, %s1496_s9  ;;  %v1143_v25 = vld [vmem:[%s1492_s1 + $0x90] ss:$12 sps:$4 sm:$0xff]   ;;  %v1222_v0 = vmov 0  }
   0xf   : > { %702 = vmatpush1.bf16.msra.mxu0 %v1123_v8  ;;  %v1147_v26 = vld [vmem:[%s1492_s1 + $0x158] ss:$12 sps:$4 sm:$0xff]   ;;  %v1148_v28 = vld [vmem:[%s1492_s1 + $0xa8] ss:$12 sps:$4 sm:$0xff]   ;;  %v1152_v30 = vld [vmem:[%s1492_s1 + $0x170] ss:$12 sps:$4 sm:$0xff]  }
  0x10   : > { %703 = vmatprep.subr.bf16.mxu0 %v1125_v10  ;;  %1046 = vmatpush3.bf16.msra.mxu1 %v1129_v13  ;;  %v1145_v27 = vld [vmem:[%s1492_s1 + $0xac] ss:$12 sps:$4 sm:$0xff]   ;;  %s1352_s29 = scalar_lea.vmem %s1491_s0, %s1100_s11  ;;  %v1150_v31 = vld [vmem:[%s1492_s1 + $0xc4] ss:$12 sps:$4 sm:$0xff]   ;;  %v1155_v35 = vld [vmem:[%s1492_s1 + $0xdc] ss:$12 sps:$4 sm:$0xff]  }
  0x11   : > { %1047 = vmatprep.subr.bf16.mxu1 %v1132_v15  ;;  %v1149_v29 = vld [vmem:[%s1492_s1 + $0x98] ss:$12 sps:$4 sm:$0xff]   ;;  %v1154_v32 = vld [vmem:[%s1492_s1 + $0xb0] ss:$12 sps:$4 sm:$0xff]   ;;  %v1153_v34 = vld [vmem:[%s1492_s1 + $0xc0] ss:$12 sps:$4 sm:$0xff]  }
  0x12   : > { %v1159_v33 = vld [vmem:[%s1352_s29 + $0x4] ss:$12 sps:$4 sm:$0xff]   ;;  %v1157_v36 = vld [vmem:[%s1352_s29] ss:$12 sps:$4 sm:$0xff]   ;;  %v1161_v37 = vld [vmem:[%s1492_s1 + $0x188] ss:$12 sps:$4 sm:$0xff]  }
  0x13   : > { %704 = vmatpush1.bf16.msra.mxu0 %v1128_v12  ;;  %815 = vmatprep.mubr.bf16.mxu1 %v1159_v33  ;;  %v1160_v39 = vld [vmem:[%s1492_s1 + $0xd8] ss:$12 sps:$4 sm:$0xff]   ;;  %v1162_v40 = vld [vmem:[%s1492_s1 + $0xf4] ss:$12 sps:$4 sm:$0xff]   ;;  %v1164_v42 = vld [vmem:[%s1492_s1 + $0xf0] ss:$12 sps:$4 sm:$0xff]  }
  0x14   : > { %705 = vmatprep.subr.bf16.mxu0 %v1130_v14  ;;  %1048 = vmatpush3.bf16.msra.mxu1 %v1134_v16  ;;  %v1165_v41 = vld [vmem:[%s1492_s1 + $0x1a0] ss:$12 sps:$4 sm:$0xff]   ;;  %v1169_v44 = vld [vmem:[%s1492_s1 + $0x1b8] ss:$12 sps:$4 sm:$0xff]   ;;  %v1168_v45 = vld [vmem:[%s1492_s1 + $0x108] ss:$12 sps:$4 sm:$0xff]  }
  0x15   : > { %1049 = vmatprep.subr.bf16.mxu1 %v1137_v19  ;;  %729 = vmatprep.mubr.bf16.mxu0 %v1159_v33  ;;  %v1166_v43 = vld [vmem:[%s1492_s1 + $0x10c] ss:$12 sps:$4 sm:$0xff]   ;;  %v1170_v46 = vld [vmem:[%s1492_s1 + $0x124] ss:$12 sps:$4 sm:$0xff]   ;;  %v1174_v49 = vld [vmem:[%s1492_s1 + $0x13c] ss:$12 sps:$4 sm:$0xff]   ;;  %v282_v19 = vlaneseq }
  0x16   : > { %v1173_v47 = vld [vmem:[%s1492_s1 + $0x1d0] ss:$12 sps:$4 sm:$0xff]   ;;  %v1172_v48 = vld [vmem:[%s1492_s1 + $0x120] ss:$12 sps:$4 sm:$0xff]   ;;  %v1177_v50 = vld [vmem:[%s1492_s1 + $0x1e8] ss:$12 sps:$4 sm:$0xff]  }
  0x17   : > { %706 = vmatpush1.bf16.msra.mxu0 %v1133_v17  ;;  %v1176_v51 = vld [vmem:[%s1492_s1 + $0x138] ss:$12 sps:$4 sm:$0xff]   ;;  %v1178_v52 = vld [vmem:[%s1492_s1 + $0x154] ss:$12 sps:$4 sm:$0xff]   ;;  %v1180_v54 = vld [vmem:[%s1492_s1 + $0x150] ss:$12 sps:$4 sm:$0xff]  }
  0x18   : > { %707 = vmatprep.subr.bf16.mxu0 %v1135_v18  ;;  %1050 = vmatpush3.bf16.msra.mxu1 %v1139_v21  ;;  %v1181_v53 = vld [vmem:[%s1492_s1 + $0x200] ss:$12 sps:$4 sm:$0xff]   ;;  %v1185_v56 = vld [vmem:[%s1492_s1 + $0x218] ss:$12 sps:$4 sm:$0xff]   ;;  %v1184_v57 = vld [vmem:[%s1492_s1 + $0x168] ss:$12 sps:$4 sm:$0xff]  }
  0x19   : > { %1051 = vmatprep.subr.bf16.mxu1 %v1142_v22  ;;  %v1182_v55 = vld [vmem:[%s1492_s1 + $0x16c] ss:$12 sps:$4 sm:$0xff]   ;;  %v1188_v58 = vld [vmem:[%s1492_s1 + $0x184] ss:$12 sps:$4 sm:$0xff]   ;;  %v1192_v61 = vld [vmem:[%s1492_s1 + $0x19c] ss:$12 sps:$4 sm:$0xff]  }
  0x1a   : > { %v1189_v59 = vld [vmem:[%s1492_s1 + $0x230] ss:$12 sps:$4 sm:$0xff]   ;;  %v1186_v60 = vld [vmem:[%s1492_s1 + $0x180] ss:$12 sps:$4 sm:$0xff]   ;;  %v1193_v62 = vld [vmem:[%s1352_s29 + $0x8] ss:$12 sps:$4 sm:$0xff]   ;;  %s177_s29 = scalar_lea.vmem %s1494_s3, %s1100_s11 }
  0x1b   : > { %708 = vmatpush1.bf16.msra.mxu0 %v1138_v20  ;;  %v1190_v63 = vld [vmem:[%s1492_s1 + $0x198] ss:$12 sps:$4 sm:$0xff]   ;;  %v1196_v1 = vld [vmem:[%s1492_s1 + $0x1b4] ss:$12 sps:$4 sm:$0xff]   ;;  %v1194_v2 = vld [vmem:[%s1492_s1 + $0x1b0] ss:$12 sps:$4 sm:$0xff]  }
  0x1c   : > { %709 = vmatprep.subr.bf16.mxu0 %v1140_v23  ;;  %1052 = vmatpush3.bf16.msra.mxu1 %v1144_v24  ;;  %v1199_v3 = vld [vmem:[%s1492_s1 + $0x1cc] ss:$12 sps:$4 sm:$0xff]   ;;  %v1197_v4 = vld [vmem:[%s1492_s1 + $0x1c8] ss:$12 sps:$4 sm:$0xff]   ;;  %v1202_v5 = vld [vmem:[%s1492_s1 + $0x1e4] ss:$12 sps:$4 sm:$0xff]  }
  0x1d   : > { %1053 = vmatprep.subr.bf16.mxu1 %v1147_v26  ;;  %v1200_v6 = vld [vmem:[%s1492_s1 + $0x1e0] ss:$12 sps:$4 sm:$0xff]   ;;  %v1205_v7 = vld [vmem:[%s1492_s1 + $0x1fc] ss:$12 sps:$4 sm:$0xff]   ;;  %v1203_v8 = vld [vmem:[%s1492_s1 + $0x1f8] ss:$12 sps:$4 sm:$0xff]  }
  0x1e   : > { %v1208_v9 = vld [vmem:[%s1492_s1 + $0x214] ss:$12 sps:$4 sm:$0xff]   ;;  %v1206_v10 = vld [vmem:[%s1492_s1 + $0x210] ss:$12 sps:$4 sm:$0xff]   ;;  %v1211_v11 = vld [vmem:[%s1492_s1 + $0x22c] ss:$12 sps:$4 sm:$0xff]  }
  0x1f   : > { %710 = vmatpush1.bf16.msra.mxu0 %v1143_v25  ;;  %v1209_v12 = vld [vmem:[%s1492_s1 + $0x228] ss:$12 sps:$4 sm:$0xff]   ;;  %v283_v20 = vshrl.u32 %v282_v19, 7  ;;  %v280_v22 = vld [vmem:[%s1493_s2] sm:$0x7] }
  0x20   : > { %711 = vmatprep.subr.bf16.mxu0 %v1145_v27  ;;  %1054 = vmatpush3.bf16.msra.mxu1 %v1149_v29 }
  0x21   : > { %1055 = vmatprep.subr.bf16.mxu1 %v1152_v30  ;;  %v292_v21 = vsub.s32 2, %v283_v20 }
  0x23   : > { %712 = vmatpush1.bf16.msra.mxu0 %v1148_v28  ;;  %v293_v23 = vrot.slane %v280_v22, %v292_v21 }
  0x24   : > { %713 = vmatprep.subr.bf16.mxu0 %v1150_v31  ;;  %1056 = vmatpush3.bf16.msra.mxu1 %v1154_v32 }
  0x25   : > { %1072 = vmatprep.subr.bf16.mxu1 %v1220_v38 }
  0x27   : > { %714 = vmatpush1.bf16.msra.mxu0 %v1153_v34  ;;  %816 = vmatmul.mubr.bf16.vlgmr.msra.gmra.mrb[0].mxu1 %v1157_v36  ;;  %v284_v34 = vsub.s32 0, %v283_v20 }
  0x28   : > { %715 = vmatprep.subr.bf16.mxu0 %v1155_v35  ;;  %1073 = vmatpush3.bf16.msra.mxu1 %v1161_v37  ;;  %v288_v35 = vsub.s32 1, %v283_v20 }
  0x29   : > { %1088 = vmatprep.mubr.msk.bf16.mxu1 %vm1221_vm0, %v1220_v38  ;;  %1074 = vmatprep.subr.bf16.mxu1 %v1220_v38 }
  0x2a   : > { %v289_v37 = vrot.slane %v280_v22, %v288_v35 }
  0x2b   : > { %716 = vmatpush1.bf16.msra.mxu0 %v1160_v39 }
  0x2c   : > { %717 = vmatprep.subr.bf16.mxu0 %v1162_v40  ;;  %1075 = vmatpush3.bf16.msra.mxu1 %v1165_v41 }
  0x2d   : > { %1076 = vmatprep.subr.bf16.mxu1 %v1220_v38 }
  0x2f   : > { %718 = vmatpush1.bf16.msra.mxu0 %v1164_v42 }
  0x30   : > { %719 = vmatprep.subr.bf16.mxu0 %v1166_v43  ;;  %1077 = vmatpush3.bf16.msra.mxu1 %v1169_v44 }
  0x31   : > { %1078 = vmatprep.subr.bf16.mxu1 %v1220_v38 }
  0x33   : > { %720 = vmatpush1.bf16.msra.mxu0 %v1168_v45 }
  0x34   : > { %721 = vmatprep.subr.bf16.mxu0 %v1170_v46  ;;  %1079 = vmatpush3.bf16.msra.mxu1 %v1173_v47 }
  0x35   : > { %1080 = vmatprep.subr.bf16.mxu1 %v1220_v38 }
  0x37   : > { %722 = vmatpush1.bf16.msra.mxu0 %v1172_v48 }
  0x38   : > { %723 = vmatprep.subr.bf16.mxu0 %v1174_v49  ;;  %1081 = vmatpush3.bf16.msra.mxu1 %v1177_v50 }
  0x39   : > { %1082 = vmatprep.subr.bf16.mxu1 %v1220_v38 }
  0x3b   : > { %724 = vmatpush1.bf16.msra.mxu0 %v1176_v51 }
  0x3c   : > { %725 = vmatprep.subr.bf16.mxu0 %v1178_v52  ;;  %1083 = vmatpush3.bf16.msra.mxu1 %v1181_v53 }
  0x3d   : > { %1084 = vmatprep.subr.bf16.mxu1 %v1220_v38 }
  0x3f   : > { %726 = vmatpush1.bf16.msra.mxu0 %v1180_v54 }
  0x40   : > { %727 = vmatprep.subr.bf16.mxu0 %v1182_v55  ;;  %1085 = vmatpush3.bf16.msra.mxu1 %v1185_v56 }
  0x41   : > { %1086 = vmatprep.subr.bf16.mxu1 %v1220_v38 }
  0x43   : > { %728 = vmatpush1.bf16.msra.mxu0 %v1184_v57 }
  0x44   : > { %740 = vmatprep.subr.bf16.mxu0 %v1188_v58  ;;  %1087 = vmatpush3.bf16.msra.mxu1 %v1189_v59 }
  0x46   : > { %730 = vmatmul.mubr.bf16.vlgmr.msra.gmra.mrb[0].mxu0 %v1157_v36  ;;  %v285_v36 = vrot.slane %v280_v22, %v284_v34 }
  0x47   : > { %741 = vmatpush1.bf16.msra.mxu0 %v1186_v60  ;;  %772 = vmatprep.mubr.bf16.mxu0 %v1222_v0 }
  0x48   : > { %742 = vmatprep.subr.bf16.mxu0 %v1192_v61  ;;  %1089 = vmatmul.mubr.bf16.vlgmr.msra.gmra.mrb[4].mxu1 %v1193_v62 }
  0x4b   : > { %743 = vmatpush1.bf16.msra.mxu0 %v1190_v63 }
  0x4c   : > { %744 = vmatprep.subr.bf16.mxu0 %v1196_v1 }
  0x4f   : > { %745 = vmatpush1.bf16.msra.mxu0 %v1194_v2 }
  0x50   : > { %746 = vmatprep.subr.bf16.mxu0 %v1199_v3 }
  0x53   : > { %747 = vmatpush1.bf16.msra.mxu0 %v1197_v4 }
  0x54   : > { %748 = vmatprep.subr.bf16.mxu0 %v1202_v5 }
  0x57   : > { %749 = vmatpush1.bf16.msra.mxu0 %v1200_v6 }
  0x58   : > { %750 = vmatprep.subr.bf16.mxu0 %v1205_v7 }
  0x5b   : > { %751 = vmatpush1.bf16.msra.mxu0 %v1203_v8 }
  0x5c   : > { %752 = vmatprep.subr.bf16.mxu0 %v1208_v9 }
  0x5f   : > { %753 = vmatpush1.bf16.msra.mxu0 %v1206_v10 }
  0x60   : > { %754 = vmatprep.subr.bf16.mxu0 %v1211_v11 }
  0x63   : > { %755 = vmatpush1.bf16.msra.mxu0 %v1209_v12 }
  0x66   : > { %773 = vmatmul.mubr.bf16.vlgmr.msra.gmra.mrb[0].mxu0 %v1193_v62 }
  0xfa   : > { %v1057_v13 = vpop.f32.mrb[0].mxu1 }
  0xfb   : > { %v1058_v14 = vpop.f32.mrb[1].mxu1 }
  0xfc   : > { %v1059_v15 = vadd.f32 %v1058_v14, %v1057_v13  ;;  %v1060_v16 = vpop.f32.mrb[2].mxu1 }
  0xfd   : > { %v1061_v17 = vpop.f32.mrb[3].mxu1 }
  0xfe   : > { %v1062_v18 = vadd.f32 %v1061_v17, %v1060_v16  ;;  %v818_v24 = vadd.f32 %v1059_v15, %v293_v23 }
 0x100   : > { %v821_v25 = vadd.f32 %v1062_v18, %v293_v23 }
 0x11b   : > { %v858_v26 = vpop.f32.mrb[4].mxu1 }
 0x11c   : > { %v859_v27 = vadd.f32 %v858_v26, %v818_v24  ;;  %v1090_v28 = vpop.f32.mrb[5].mxu1 }
 0x11d   : > { %v861_v29 = vpop.f32.mrb[6].mxu1 }
 0x11e   : > { %v1038_v30 = vpack.c.bf16 %v859_v27, %v859_v27  ;;  %v862_v31 = vadd.f32 %v861_v29, %v821_v25  ;;  %v1091_v32 = vpop.f32.mrb[7].mxu1 }
 0x120   : > { %886 = vst [vmem:[%s177_s29 + $0x8] sm:$0xf] %v1038_v30  ;;  %v1040_v33 = vpack.c.bf16 %v862_v31, %v862_v31 }
 0x122   : > { %888 = vst [vmem:[%s177_s29 + $0x14] sm:$0xf] %v1040_v33 }
 0x139   : > { %v774_v38 = vpop.f32.mrb[0].mxu0 }
 0x13a   : > { %v1092_v39 = vadd.f32 %v774_v38, %v285_v36  ;;  %v776_v40 = vpop.f32.mrb[1].mxu0 }
 0x13b   : > { %v1093_v41 = vadd.f32 %v776_v40, %v289_v37  ;;  %v778_v42 = vpop.f32.mrb[2].mxu0 }
 0x13c   : > { %v1094_v43 = vadd.f32 %v778_v42, %v285_v36  ;;  %v780_v44 = vpop.f32.mrb[3].mxu0 }
 0x13d   : > { %v1037_v45 = vpack.c.bf16 %v1093_v41, %v1092_v39  ;;  %v1095_v46 = vadd.f32 %v780_v44, %v289_v37 }
 0x13f   : > { %885 = vst [vmem:[%s177_s29] sm:$0xff] %v1037_v45  ;;  %v1039_v47 = vpack.c.bf16 %v1095_v46, %v1094_v43 }
 0x141   : > { %887 = vst [vmem:[%s177_s29 + $0xc] sm:$0xff] %v1039_v47 }
 0x142 PF: > { %s13_s12 = sadd.s32 1, %s1218_s12  }
 0x143   : > { %p10_p4 = scmp.ge.s32.totalorder %s13_s12, 4  }
 0x145   :  { %12 = sbr.rel (!%p10_p4) target bundleno = 1 (0x1), region = 62 }

// kernel: net_forward.42
= control target key start
LH: loop header
LB: loop body
LE: loop exit
PB: predicated region body
PF: predicated region fallthrough
CT: control target
= control target key end

     0   :  { %s6087_s12 = smov 0   ;;  %s7675_s0 = inlined_call_operand.vmem [shape: bf16[2,3,48,384], index: 0, kind: input, shape index: {}]   ;;  %s7676_s1 = inlined_call_operand.vmem [shape: bf16[9,384,256], index: 1, kind: input, shape index: {}]   ;;  %s7677_s2 = inlined_call_operand.vmem [shape: f32[1,256], index: 2, kind: input, shape index: {}]   ;;  %s7678_s3 = inlined_call_operand.vmem [shape: bf16[2,32,256], index: 3, kind: output, shape index: {}]  }
   0x1 LB: > { %s4255_s13 = sadd.s32 4294967295, %s6064_s12   ;;  %p4259_p0 = scmp.ge.s32.totalorder %s6064_s12, 1  ;;  %s6064_s12 = sphi %s6087_s12, %s13_s12  }
   0x2   : > { %p137_p1 = scmp.lt.s32.totalorder %s6064_s12, 3 }
   0x4   : > { %p138_p2 = pnand %p4259_p0, %p137_p1 }
   0x5   : > { %v5354_v0 = vld [vmem:[%s7676_s1 + $0x184] ss:$8 sps:$4 sm:$0xff] (!%p138_p2)   ;;  %v6066_v2 = vmov (!%p138_p2), 0   ;;  %v5358_v3 = vld [vmem:[%s7676_s1 + $0x180] ss:$8 sps:$4 sm:$0xff] (!%p138_p2)   ;;  %p161_p3 = scmp.lt.s32.totalorder (!%p138_p2), %s4255_s13, 1 }
   0x6   : > { %141 = sbr.rel (%p138_p2) target bundleno = 679 (0x2a7), region = 32  ;;  %v5356_v1 = vld [vmem:[%s7676_s1 + $0x104] ss:$8 sps:$4 sm:$0xff] (!%p138_p2)   ;;  %1021 = vmatprep.mubr.bf16.mxu0 (!%p138_p2), %v6066_v2  ;;  %558 = vmatprep.subr.bf16.mxu1 (!%p138_p2), %v5354_v0  ;;  %v5359_v4 = vld [vmem:[%s7676_s1 + $0x100] ss:$8 sps:$4 sm:$0xff] (!%p138_p2)  }
   0x7   : > { %989 = vmatprep.subr.bf16.mxu0 (!%p138_p2), %v5356_v1  ;;  %v5360_v5 = vld [vmem:[%s7676_s1 + $0x194] ss:$8 sps:$4 sm:$0xff] (!%p138_p2)   ;;  %559 = vmatpush1.bf16.msra.mxu1 (!%p138_p2), %v5358_v3  ;;  %v5364_v7 = vld [vmem:[%s7676_s1 + $0x190] ss:$8 sps:$4 sm:$0xff] (!%p138_p2)   ;;  %v5366_v9 = vld [vmem:[%s7676_s1 + $0x1a4] ss:$8 sps:$4 sm:$0xff] (!%p138_p2)  }
   0x8   : > { %990 = vmatpush1.bf16.msra.mxu0 (!%p138_p2), %v5359_v4  ;;  %v5362_v6 = vld [vmem:[%s7676_s1 + $0x114] ss:$8 sps:$4 sm:$0xff] (!%p138_p2)   ;;  %560 = vmatprep.subr.bf16.mxu1 (!%p138_p2), %v5360_v5  ;;  %v5365_v8 = vld [vmem:[%s7676_s1 + $0x110] ss:$8 sps:$4 sm:$0xff] (!%p138_p2)   ;;  %v5368_v10 = vld [vmem:[%s7676_s1 + $0x124] ss:$8 sps:$4 sm:$0xff] (!%p138_p2)  }
   0x9   : > { %991 = vmatprep.subr.bf16.mxu0 (!%p138_p2), %v5362_v6  ;;  %v5370_v11 = vld [vmem:[%s7676_s1 + $0x1a0] ss:$8 sps:$4 sm:$0xff] (!%p138_p2)   ;;  %v5372_v13 = vld [vmem:[%s7676_s1 + $0x1b4] ss:$8 sps:$4 sm:$0xff] (!%p138_p2)   ;;  %v5376_v15 = vld [vmem:[%s7676_s1 + $0x1b0] ss:$8 sps:$4 sm:$0xff] (!%p138_p2)  }
   0xa   : > { %v5371_v12 = vld [vmem:[%s7676_s1 + $0x120] ss:$8 sps:$4 sm:$0xff] (!%p138_p2)   ;;  %v5374_v14 = vld [vmem:[%s7676_s1 + $0x134] ss:$8 sps:$4 sm:$0xff] (!%p138_p2)   ;;  %v5377_v16 = vld [vmem:[%s7676_s1 + $0x130] ss:$8 sps:$4 sm:$0xff] (!%p138_p2)  }
   0xb   : > { %561 = vmatpush1.bf16.msra.mxu1 (!%p138_p2), %v5364_v7  ;;  %v5378_v17 = vld [vmem:[%s7676_s1 + $0x1c4] ss:$8 sps:$4 sm:$0xff] (!%p138_p2)   ;;  %v5382_v19 = vld [vmem:[%s7676_s1 + $0x1c0] ss:$8 sps:$4 sm:$0xff] (!%p138_p2)   ;;  %v5384_v21 = vld [vmem:[%s7676_s1 + $0x1d4] ss:$8 sps:$4 sm:$0xff] (!%p138_p2)  }
   0xc   : > { %992 = vmatpush1.bf16.msra.mxu0 (!%p138_p2), %v5365_v8  ;;  %562 = vmatprep.subr.bf16.mxu1 (!%p138_p2), %v5366_v9  ;;  %v5380_v18 = vld [vmem:[%s7676_s1 + $0x144] ss:$8 sps:$4 sm:$0xff] (!%p138_p2)   ;;  %v5383_v20 = vld [vmem:[%s7676_s1 + $0x140] ss:$8 sps:$4 sm:$0xff] (!%p138_p2)   ;;  %v5386_v22 = vld [vmem:[%s7676_s1 + $0x154] ss:$8 sps:$4 sm:$0xff] (!%p138_p2)  }
   0xd   : > { %993 = vmatprep.subr.bf16.mxu0 %v5368_v10  ;;  %s7680_s13 = smov (!%p161_p3, %s4255_s13), 1  ;;  %v5388_v23 = vld [vmem:[%s7676_s1 + $0x1d0] ss:$8 sps:$4 sm:$0xff]   ;;  %v5390_v25 = vld [vmem:[%s7676_s1 + $0x1e4] ss:$8 sps:$4 sm:$0xff]  }
   0xe   : > { %s5344_s6 = smul.u32 216, %s7680_s13  ;;  %v5389_v24 = vld [vmem:[%s7676_s1 + $0x150] ss:$8 sps:$4 sm:$0xff]   ;;  %v5392_v26 = vld [vmem:[%s7676_s1 + $0x164] ss:$8 sps:$4 sm:$0xff]   ;;  %s5187_s16 = sshll.u32 %s7680_s13, 5 }
   0xf   : > { %563 = vmatpush1.bf16.msra.mxu1 %v5370_v11  ;;  %v5394_v27 = vld [vmem:[%s7676_s1 + $0x1e0] ss:$8 sps:$4 sm:$0xff]   ;;  %v5396_v29 = vld [vmem:[%s7676_s1 + $0x1f4] ss:$8 sps:$4 sm:$0xff]   ;;  %v5400_v31 = vld [vmem:[%s7676_s1 + $0x1f0] ss:$8 sps:$4 sm:$0xff]   ;;  %s170_s20 = scalar_lea.vmem %s7678_s3, %s5187_s16 }
  0x10   : > { %994 = vmatpush1.bf16.msra.mxu0 %v5371_v12  ;;  %564 = vmatprep.subr.bf16.mxu1 %v5372_v13  ;;  %s6184_s19 = scalar_lea.vmem %s7675_s0, %s5344_s6  ;;  %v5395_v28 = vld [vmem:[%s7676_s1 + $0x160] ss:$8 sps:$4 sm:$0xff]   ;;  %v5398_v30 = vld [vmem:[%s7676_s1 + $0x174] ss:$8 sps:$4 sm:$0xff]   ;;  %v5401_v32 = vld [vmem:[%s7676_s1 + $0x170] ss:$8 sps:$4 sm:$0xff]  }
  0x11   : > { %995 = vmatprep.subr.bf16.mxu0 %v5374_v14  ;;  %v5402_v33 = vld [vmem:[%s7676_s1 + $0x204] ss:$8 sps:$4 sm:$0xff]   ;;  %v5404_v35 = vld [vmem:[%s6184_s19 + $0x8] ss:$12 sps:$4 sm:$0xff]   ;;  %v5411_v40 = vld [vmem:[%s7676_s1 + $0x410] ss:$8 sps:$4 sm:$0xff]  }
  0x12   : > { %v5407_v34 = vld [vmem:[%s7676_s1 + $0x404] ss:$8 sps:$4 sm:$0xff]   ;;  %v5405_v36 = vld [vmem:[%s7676_s1 + $0x400] ss:$8 sps:$4 sm:$0xff]   ;;  %v5409_v38 = vld [vmem:[%s7676_s1 + $0x214] ss:$8 sps:$4 sm:$0xff]  }
  0x13   : > { %565 = vmatpush1.bf16.msra.mxu1 %v5376_v15  ;;  %v5408_v37 = vld [vmem:[%s7676_s1 + $0x200] ss:$8 sps:$4 sm:$0xff]   ;;  %v5413_v39 = vld [vmem:[%s7676_s1 + $0x414] ss:$8 sps:$4 sm:$0xff]   ;;  %v5414_v41 = vld [vmem:[%s7676_s1 + $0x210] ss:$8 sps:$4 sm:$0xff]  }
  0x14   : > { %996 = vmatpush1.bf16.msra.mxu0 %v5377_v16  ;;  %566 = vmatprep.subr.bf16.mxu1 %v5378_v17  ;;  %v5415_v42 = vld [vmem:[%s7676_s1 + $0x224] ss:$8 sps:$4 sm:$0xff]   ;;  %v5417_v44 = vld [vmem:[%s7676_s1 + $0x420] ss:$8 sps:$4 sm:$0xff]   ;;  %v5421_v47 = vld [vmem:[%s7676_s1 + $0x234] ss:$8 sps:$4 sm:$0xff]  }
  0x15   : > { %997 = vmatprep.subr.bf16.mxu0 %v5380_v18  ;;  %v5419_v43 = vld [vmem:[%s7676_s1 + $0x424] ss:$8 sps:$4 sm:$0xff]   ;;  %v5420_v46 = vld [vmem:[%s7676_s1 + $0x220] ss:$8 sps:$4 sm:$0xff]   ;;  %v5425_v48 = vld [vmem:[%s7676_s1 + $0x434] ss:$8 sps:$4 sm:$0xff]  }
  0x16   : > { %v5439_v45 = vld [vmem:[%s6184_s19 + $0x20] ss:$12 sps:$4 sm:$0xff]   ;;  %v5423_v49 = vld [vmem:[%s7676_s1 + $0x430] ss:$8 sps:$4 sm:$0xff]   ;;  %v5433_v56 = vld [vmem:[%s7676_s1 + $0x254] ss:$8 sps:$4 sm:$0xff]  }
  0x17   : > { %567 = vmatpush1.bf16.msra.mxu1 %v5382_v19  ;;  %v5426_v50 = vld [vmem:[%s7676_s1 + $0x230] ss:$8 sps:$4 sm:$0xff]   ;;  %v5427_v51 = vld [vmem:[%s7676_s1 + $0x244] ss:$8 sps:$4 sm:$0xff]   ;;  %v5429_v54 = vld [vmem:[%s7676_s1 + $0x440] ss:$8 sps:$4 sm:$0xff]  }
  0x18   : > { %998 = vmatpush1.bf16.msra.mxu0 %v5383_v20  ;;  %568 = vmatprep.subr.bf16.mxu1 %v5384_v21  ;;  %v5431_v52 = vld [vmem:[%s7676_s1 + $0x444] ss:$8 sps:$4 sm:$0xff]   ;;  %v5432_v55 = vld [vmem:[%s7676_s1 + $0x240] ss:$8 sps:$4 sm:$0xff]   ;;  %v5437_v57 = vld [vmem:[%s7676_s1 + $0x454] ss:$8 sps:$4 sm:$0xff]  }
  0x19   : > { %999 = vmatprep.subr.bf16.mxu0 %v5386_v22  ;;  %v5454_v53 = vld [vmem:[%s6184_s19 + $0x4c] ss:$12 sps:$4 sm:$0xff]   ;;  %v5442_v62 = vld [vmem:[%s7676_s1 + $0x460] ss:$8 sps:$4 sm:$0xff]   ;;  %v5446_v0 = vld [vmem:[%s7676_s1 + $0x274] ss:$8 sps:$4 sm:$0xff]  }
  0x1a   : > { %590 = vmatprep.mubr.bf16.mxu1 %v5454_v53  ;;  %v5435_v58 = vld [vmem:[%s7676_s1 + $0x450] ss:$8 sps:$4 sm:$0xff]   ;;  %v5440_v60 = vld [vmem:[%s7676_s1 + $0x264] ss:$8 sps:$4 sm:$0xff]   ;;  %v5445_v63 = vld [vmem:[%s7676_s1 + $0x260] ss:$8 sps:$4 sm:$0xff]  }
  0x1b   : > { %569 = vmatpush1.bf16.msra.mxu1 %v5388_v23  ;;  %v5438_v59 = vld [vmem:[%s7676_s1 + $0x250] ss:$8 sps:$4 sm:$0xff]   ;;  %v5444_v61 = vld [vmem:[%s7676_s1 + $0x464] ss:$8 sps:$4 sm:$0xff]   ;;  %v5450_v1 = vld [vmem:[%s7676_s1 + $0x474] ss:$8 sps:$4 sm:$0xff]  }
  0x1c   : > { %1000 = vmatpush1.bf16.msra.mxu0 %v5389_v24  ;;  %570 = vmatprep.subr.bf16.mxu1 %v5390_v25  ;;  %v5448_v3 = vld [vmem:[%s7676_s1 + $0x470] ss:$8 sps:$4 sm:$0xff]   ;;  %v5452_v5 = vld [vmem:[%s6184_s19 + $0x48] ss:$12 sps:$4 sm:$0xff]   ;;  %v5457_v6 = vld [vmem:[%s7676_s1 + $0x284] ss:$8 sps:$4 sm:$0xff]  }
  0x1d   : > { %1001 = vmatprep.subr.bf16.mxu0 %v5392_v26  ;;  %v5451_v4 = vld [vmem:[%s7676_s1 + $0x270] ss:$8 sps:$4 sm:$0xff]   ;;  %v5461_v7 = vld [vmem:[%s7676_s1 + $0x584] ss:$8 sps:$4 sm:$0xff]   ;;  %v5455_v8 = vld [vmem:[%s7676_s1 + $0x280] ss:$8 sps:$4 sm:$0xff]  }
  0x1e   : > { %v5458_v9 = vld [vmem:[%s6184_s19 + $0x98] ss:$12 sps:$4 sm:$0xff]   ;;  %v5459_v10 = vld [vmem:[%s7676_s1 + $0x580] ss:$8 sps:$4 sm:$0xff]   ;;  %v5464_v11 = vld [vmem:[%s7676_s1 + $0x294] ss:$8 sps:$4 sm:$0xff]  }
  0x1f   : > { %571 = vmatpush1.bf16.msra.mxu1 %v5394_v27  ;;  %v5467_v12 = vld [vmem:[%s7676_s1 + $0x594] ss:$8 sps:$4 sm:$0xff]   ;;  %v5493_v13 = vld [vmem:[%s6184_s19 + $0x64] ss:$12 sps:$4 sm:$0xff]   ;;  %v5468_v18 = vld [vmem:[%s7676_s1 + $0x2a0] ss:$8 sps:$4 sm:$0xff]  }
  0x20   : > { %1002 = vmatpush1.bf16.msra.mxu0 %v5395_v28  ;;  %572 = vmatprep.subr.bf16.mxu1 %v5396_v29  ;;  %v5462_v14 = vld [vmem:[%s7676_s1 + $0x290] ss:$8 sps:$4 sm:$0xff]   ;;  %v5470_v16 = vld [vmem:[%s7676_s1 + $0x2a4] ss:$8 sps:$4 sm:$0xff]   ;;  %v5471_v19 = vld [vmem:[%s7676_s1 + $0x5a0] ss:$8 sps:$4 sm:$0xff]  }
  0x21   : > { %1003 = vmatprep.subr.bf16.mxu0 %v5398_v30  ;;  %v5465_v15 = vld [vmem:[%s7676_s1 + $0x590] ss:$8 sps:$4 sm:$0xff]   ;;  %v5473_v17 = vld [vmem:[%s7676_s1 + $0x5a4] ss:$8 sps:$4 sm:$0xff]   ;;  %v5476_v22 = vld [vmem:[%s7676_s1 + $0x2b4] ss:$8 sps:$4 sm:$0xff]  }
  0x22   : > { %v5492_v20 = vld [vmem:[%s6184_s19 + $0xb0] ss:$12 sps:$4 sm:$0xff]   ;;  %v5501_v21 = vld [vmem:[%s6184_s19 + $0x60] ss:$12 sps:$4 sm:$0xff]  }
  0x23   : > { %573 = vmatpush1.bf16.msra.mxu1 %v5400_v31  ;;  %v5479_v23 = vld [vmem:[%s7676_s1 + $0x5b4] ss:$8 sps:$4 sm:$0xff]   ;;  %v5474_v24 = vld [vmem:[%s7676_s1 + $0x2b0] ss:$8 sps:$4 sm:$0xff]   ;;  %v5482_v26 = vld [vmem:[%s7676_s1 + $0x2c4] ss:$8 sps:$4 sm:$0xff]  }
  0x24   : > { %1004 = vmatpush1.bf16.msra.mxu0 %v5401_v32  ;;  %574 = vmatprep.subr.bf16.mxu1 %v5402_v33  ;;  %v5477_v25 = vld [vmem:[%s7676_s1 + $0x5b0] ss:$8 sps:$4 sm:$0xff]   ;;  %v5485_v27 = vld [vmem:[%s7676_s1 + $0x5c4] ss:$8 sps:$4 sm:$0xff]   ;;  %v5480_v28 = vld [vmem:[%s7676_s1 + $0x2c0] ss:$8 sps:$4 sm:$0xff]  }
  0x25   : > { %1425 = vmatprep.subr.bf16.mxu0 %v5407_v34  ;;  %v5483_v29 = vld [vmem:[%s7676_s1 + $0x5c0] ss:$8 sps:$4 sm:$0xff]   ;;  %v5488_v30 = vld [vmem:[%s7676_s1 + $0x2d4] ss:$8 sps:$4 sm:$0xff]   ;;  %v5486_v32 = vld [vmem:[%s7676_s1 + $0x2d0] ss:$8 sps:$4 sm:$0xff]  }
  0x26   : > { %v5491_v31 = vld [vmem:[%s7676_s1 + $0x5d4] ss:$8 sps:$4 sm:$0xff]   ;;  %v5489_v33 = vld [vmem:[%s7676_s1 + $0x5d0] ss:$8 sps:$4 sm:$0xff]   ;;  %v5497_v34 = vld [vmem:[%s7676_s1 + $0x2e4] ss:$8 sps:$4 sm:$0xff]  }
  0x27   : > { %1022 = vmatmul.mubr.bf16.vlgmr.msra.gmra.mrb[0].mxu0 %v5404_v35  ;;  %575 = vmatpush1.bf16.msra.mxu1 %v5408_v37  ;;  %v5500_v35 = vld [vmem:[%s7676_s1 + $0x5e4] ss:$8 sps:$4 sm:$0xff]   ;;  %v5498_v37 = vld [vmem:[%s7676_s1 + $0x5e0] ss:$8 sps:$4 sm:$0xff]  }
  0x28   : > { %1426 = vmatpush1.bf16.msra.mxu0 %v5405_v36  ;;  %576 = vmatprep.subr.bf16.mxu1 %v5409_v38  ;;  %v5495_v36 = vld [vmem:[%s7676_s1 + $0x2e0] ss:$8 sps:$4 sm:$0xff]   ;;  %v5504_v38 = vld [vmem:[%s7676_s1 + $0x2f4] ss:$8 sps:$4 sm:$0xff]   ;;  %v5527_v53 = vld [vmem:[%s7676_s1 + $0x724] ss:$8 sps:$4 sm:$0xff]  }
  0x29   : > { %1427 = vmatprep.subr.bf16.mxu0 %v5413_v39  ;;  %1031 = vmatprep.mubr.bf16.mxu0 %v6066_v2  ;;  %v5507_v39 = vld [vmem:[%s7676_s1 + $0x5f4] ss:$8 sps:$4 sm:$0xff]  }
  0x2b   : > { %577 = vmatpush1.bf16.msra.mxu1 %v5414_v41  ;;  %v5505_v41 = vld [vmem:[%s7676_s1 + $0x5f0] ss:$8 sps:$4 sm:$0xff]  }
  0x2c   : > { %1428 = vmatpush1.bf16.msra.mxu0 %v5411_v40  ;;  %578 = vmatprep.subr.bf16.mxu1 %v5415_v42  ;;  %v5502_v40 = vld [vmem:[%s7676_s1 + $0x2f0] ss:$8 sps:$4 sm:$0xff]   ;;  %v5510_v42 = vld [vmem:[%s7676_s1 + $0x4] ss:$8 sps:$4 sm:$0xff]  }
  0x2d   : > { %1429 = vmatprep.subr.bf16.mxu0 %v5419_v43  ;;  %v5514_v43 = vld [vmem:[%s7676_s1 + $0x704] ss:$8 sps:$4 sm:$0xff]  }
  0x2f   : > { %1032 = vmatmul.mubr.bf16.gmra.mrb[4].mxu0 %v5439_v45  ;;  %579 = vmatpush1.bf16.msra.mxu1 %v5420_v46  ;;  %v5511_v45 = vld [vmem:[%s6184_s19 + $0x14] ss:$12 sps:$4 sm:$0xff]  }
  0x30   : > { %1430 = vmatpush1.bf16.msra.mxu0 %v5417_v44  ;;  %580 = vmatprep.subr.bf16.mxu1 %v5421_v47  ;;  %v5508_v44 = vld [vmem:[%s7676_s1] ss:$8 sps:$4 sm:$0xff]   ;;  %v5515_v47 = vld [vmem:[%s6184_s19 + $0x50] ss:$12 sps:$4 sm:$0xff]  }
  0x31   : > { %1431 = vmatprep.subr.bf16.mxu0 %v5425_v48  ;;  %1457 = vmatprep.mubr.bf16.mxu0 %v6066_v2  ;;  %v5512_v46 = vld [vmem:[%s7676_s1 + $0x700] ss:$8 sps:$4 sm:$0xff]   ;;  %v5518_v48 = vld [vmem:[%s7676_s1 + $0x14] ss:$8 sps:$4 sm:$0xff]  }
  0x33   : > { %581 = vmatpush1.bf16.msra.mxu1 %v5426_v50  ;;  %v5516_v50 = vld [vmem:[%s7676_s1 + $0x10] ss:$8 sps:$4 sm:$0xff]  }
  0x34   : > { %1432 = vmatpush1.bf16.msra.mxu0 %v5423_v49  ;;  %582 = vmatprep.subr.bf16.mxu1 %v5427_v51  ;;  %v5521_v49 = vld [vmem:[%s7676_s1 + $0x714] ss:$8 sps:$4 sm:$0xff]   ;;  %v5519_v51 = vld [vmem:[%s7676_s1 + $0x710] ss:$8 sps:$4 sm:$0xff]  }
  0x35   : > { %1433 = vmatprep.subr.bf16.mxu0 %v5431_v52  ;;  %v5524_v52 = vld [vmem:[%s7676_s1 + $0x24] ss:$8 sps:$4 sm:$0xff]  }
  0x37   : > { %583 = vmatpush1.bf16.msra.mxu1 %v5432_v55  ;;  %v5525_v55 = vld [vmem:[%s7676_s1 + $0x720] ss:$8 sps:$4 sm:$0xff]  }
  0x38   : > { %1434 = vmatpush1.bf16.msra.mxu0 %v5429_v54  ;;  %584 = vmatprep.subr.bf16.mxu1 %v5433_v56  ;;  %v5522_v54 = vld [vmem:[%s7676_s1 + $0x20] ss:$8 sps:$4 sm:$0xff]   ;;  %v5546_v56 = vld [vmem:[%s6184_s19 + $0x2c] ss:$12 sps:$4 sm:$0xff]  }
  0x39   : > { %1435 = vmatprep.subr.bf16.mxu0 %v5437_v57  ;;  %v5530_v57 = vld [vmem:[%s7676_s1 + $0x34] ss:$8 sps:$4 sm:$0xff]  }
  0x3b   : > { %585 = vmatpush1.bf16.msra.mxu1 %v5438_v59  ;;  %v5528_v59 = vld [vmem:[%s7676_s1 + $0x30] ss:$8 sps:$4 sm:$0xff]  }
  0x3c   : > { %1436 = vmatpush1.bf16.msra.mxu0 %v5435_v58  ;;  %586 = vmatprep.subr.bf16.mxu1 %v5440_v60  ;;  %v5533_v58 = vld [vmem:[%s7676_s1 + $0x734] ss:$8 sps:$4 sm:$0xff]   ;;  %v5531_v60 = vld [vmem:[%s7676_s1 + $0x730] ss:$8 sps:$4 sm:$0xff]  }
  0x3d   : > { %1437 = vmatprep.subr.bf16.mxu0 %v5444_v61  ;;  %v5536_v61 = vld [vmem:[%s7676_s1 + $0x44] ss:$8 sps:$4 sm:$0xff]  }
  0x3f   : > { %587 = vmatpush1.bf16.msra.mxu1 %v5445_v63  ;;  %v5534_v63 = vld [vmem:[%s7676_s1 + $0x40] ss:$8 sps:$4 sm:$0xff]  }
  0x40   : > { %1438 = vmatpush1.bf16.msra.mxu0 %v5442_v62  ;;  %588 = vmatprep.subr.bf16.mxu1 %v5446_v0  ;;  %v5539_v62 = vld [vmem:[%s7676_s1 + $0x744] ss:$8 sps:$4 sm:$0xff]   ;;  %v5537_v0 = vld [vmem:[%s7676_s1 + $0x740] ss:$8 sps:$4 sm:$0xff]  }
  0x41   : > { %1439 = vmatprep.subr.bf16.mxu0 %v5450_v1  ;;  %v5542_v1 = vld [vmem:[%s7676_s1 + $0x54] ss:$8 sps:$4 sm:$0xff]  }
  0x43   : > { %589 = vmatpush1.bf16.msra.mxu1 %v5451_v4  ;;  %v5597_v4 = vld [vmem:[%s6184_s19 + $0x68] ss:$12 sps:$4 sm:$0xff]  }
  0x44   : > { %1440 = vmatpush1.bf16.msra.mxu0 %v5448_v3  ;;  %611 = vmatprep.subr.bf16.mxu1 %v5457_v6  ;;  %v5545_v3 = vld [vmem:[%s7676_s1 + $0x754] ss:$8 sps:$4 sm:$0xff]   ;;  %v5543_v6 = vld [vmem:[%s7676_s1 + $0x750] ss:$8 sps:$4 sm:$0xff]  }
  0x45   : > { %1868 = vmatprep.subr.bf16.mxu0 %v5461_v7  ;;  %v5549_v7 = vld [vmem:[%s7676_s1 + $0x64] ss:$8 sps:$4 sm:$0xff]  }
  0x46   : > { %591 = vmatmul.mubr.bf16.vlgmr.msra.gmra.mrb[0].mxu1 %v5452_v5  ;;  %v5540_v5 = vld [vmem:[%s7676_s1 + $0x50] ss:$8 sps:$4 sm:$0xff]  }
  0x47   : > { %1458 = vmatmul.mubr.bf16.vlgmr.msra.gmra.mrb[8].mxu0 %v5458_v9  ;;  %612 = vmatpush1.bf16.msra.mxu1 %v5455_v8  ;;  %v5552_v8 = vld [vmem:[%s7676_s1 + $0x764] ss:$8 sps:$4 sm:$0xff]   ;;  %v5547_v9 = vld [vmem:[%s7676_s1 + $0x60] ss:$8 sps:$4 sm:$0xff]  }
  0x48   : > { %1869 = vmatpush1.bf16.msra.mxu0 %v5459_v10  ;;  %613 = vmatprep.subr.bf16.mxu1 %v5464_v11  ;;  %v5550_v10 = vld [vmem:[%s7676_s1 + $0x760] ss:$8 sps:$4 sm:$0xff]  }
  0x49   : > { %1870 = vmatprep.subr.bf16.mxu0 %v5467_v12  ;;  %1467 = vmatprep.mubr.bf16.mxu0 %v6066_v2  ;;  %v6501_v11 = vld [vmem:[%s6184_s19] sm:$0xff]  ;;  %v6504_v12 = vld [vmem:[%s6184_s19 + $0xc] sm:$0xff] }
  0x4a   : > { %600 = vmatprep.mubr.bf16.mxu1 %v5493_v13  ;;  %v5555_v13 = vld [vmem:[%s7676_s1 + $0x74] ss:$8 sps:$4 sm:$0xff]  }
  0x4b   : > { %614 = vmatpush1.bf16.msra.mxu1 %v5462_v14  ;;  %v4374_v14 = vcombine.high %v6501_v11, %v6504_v12 }
  0x4c   : > { %1871 = vmatpush1.bf16.msra.mxu0 %v5465_v15  ;;  %615 = vmatprep.subr.bf16.mxu1 %v5470_v16  ;;  %v5558_v15 = vld [vmem:[%s7676_s1 + $0x774] ss:$8 sps:$4 sm:$0xff]   ;;  %v5553_v16 = vld [vmem:[%s7676_s1 + $0x70] ss:$8 sps:$4 sm:$0xff]  }
  0x4d   : > { %1872 = vmatprep.subr.bf16.mxu0 %v5473_v17  ;;  %v5556_v17 = vld [vmem:[%s7676_s1 + $0x770] ss:$8 sps:$4 sm:$0xff]  }
  0x4e   : > { %601 = vmatmul.mubr.bf16.gmra.mrb[4].mxu1 %v5501_v21  ;;  %v5562_v21 = vld [vmem:[%s6184_s19 + $0x5c] ss:$12 sps:$4 sm:$0xff]  }
  0x4f   : > { %1468 = vmatmul.mubr.bf16.gmra.mrb[12].mxu0 %v5492_v20  ;;  %616 = vmatpush1.bf16.msra.mxu1 %v5468_v18  ;;  %v5561_v18 = vld [vmem:[%s7676_s1 + $0x84] ss:$8 sps:$4 sm:$0xff]   ;;  %v5559_v20 = vld [vmem:[%s7676_s1 + $0x80] ss:$8 sps:$4 sm:$0xff]  }
  0x50   : > { %1873 = vmatpush1.bf16.msra.mxu0 %v5471_v19  ;;  %617 = vmatprep.subr.bf16.mxu1 %v5476_v22  ;;  %v5565_v19 = vld [vmem:[%s7676_s1 + $0x884] ss:$8 sps:$4 sm:$0xff]   ;;  %v5563_v22 = vld [vmem:[%s7676_s1 + $0x880] ss:$8 sps:$4 sm:$0xff]  }
  0x51   : > { %1874 = vmatprep.subr.bf16.mxu0 %v5479_v23  ;;  %1900 = vmatprep.mubr.bf16.mxu0 %v6066_v2  ;;  %v5568_v23 = vld [vmem:[%s7676_s1 + $0x94] ss:$8 sps:$4 sm:$0xff]  }
  0x52   : > { %643 = vmatprep.mubr.bf16.mxu1 %v6066_v2 }
  0x53   : > { %618 = vmatpush1.bf16.msra.mxu1 %v5474_v24  ;;  %v5571_v24 = vld [vmem:[%s7676_s1 + $0x894] ss:$8 sps:$4 sm:$0xff]  }
  0x54   : > { %1875 = vmatpush1.bf16.msra.mxu0 %v5477_v25  ;;  %619 = vmatprep.subr.bf16.mxu1 %v5482_v26  ;;  %v5566_v25 = vld [vmem:[%s7676_s1 + $0x90] ss:$8 sps:$4 sm:$0xff]  }
  0x55   : > { %1876 = vmatprep.subr.bf16.mxu0 %v5485_v27  ;;  %v5569_v26 = vld [vmem:[%s7676_s1 + $0x890] ss:$8 sps:$4 sm:$0xff]   ;;  %v5574_v27 = vld [vmem:[%s7676_s1 + $0xa4] ss:$8 sps:$4 sm:$0xff]  }
  0x57   : > { %620 = vmatpush1.bf16.msra.mxu1 %v5480_v28  ;;  %v5577_v28 = vld [vmem:[%s7676_s1 + $0x8a4] ss:$8 sps:$4 sm:$0xff]  }
  0x58   : > { %1877 = vmatpush1.bf16.msra.mxu0 %v5483_v29  ;;  %621 = vmatprep.subr.bf16.mxu1 %v5488_v30  ;;  %v5572_v29 = vld [vmem:[%s7676_s1 + $0xa0] ss:$8 sps:$4 sm:$0xff]  }
  0x59   : > { %1878 = vmatprep.subr.bf16.mxu0 %v5491_v31  ;;  %v5596_v30 = vld [vmem:[%s6184_s19 + $0x74] ss:$12 sps:$4 sm:$0xff]  }
  0x5a   : > { %v5575_v31 = vld [vmem:[%s7676_s1 + $0x8a0] ss:$8 sps:$4 sm:$0xff]  }
  0x5b   : > { %622 = vmatpush1.bf16.msra.mxu1 %v5486_v32  ;;  %v5580_v32 = vld [vmem:[%s7676_s1 + $0xb4] ss:$8 sps:$4 sm:$0xff]  }
  0x5c   : > { %1879 = vmatpush1.bf16.msra.mxu0 %v5489_v33  ;;  %623 = vmatprep.subr.bf16.mxu1 %v5497_v34  ;;  %v5583_v33 = vld [vmem:[%s7676_s1 + $0x8b4] ss:$8 sps:$4 sm:$0xff]   ;;  %v5578_v34 = vld [vmem:[%s7676_s1 + $0xb0] ss:$8 sps:$4 sm:$0xff]  }
  0x5d   : > { %1880 = vmatprep.subr.bf16.mxu0 %v5500_v35  ;;  %v5581_v35 = vld [vmem:[%s7676_s1 + $0x8b0] ss:$8 sps:$4 sm:$0xff]  }
  0x5f   : > { %624 = vmatpush1.bf16.msra.mxu1 %v5495_v36  ;;  %v5586_v36 = vld [vmem:[%s7676_s1 + $0xc4] ss:$8 sps:$4 sm:$0xff]  }
  0x60   : > { %1881 = vmatpush1.bf16.msra.mxu0 %v5498_v37  ;;  %625 = vmatprep.subr.bf16.mxu1 %v5504_v38  ;;  %v5589_v37 = vld [vmem:[%s7676_s1 + $0x8c4] ss:$8 sps:$4 sm:$0xff]   ;;  %v5584_v38 = vld [vmem:[%s7676_s1 + $0xc0] ss:$8 sps:$4 sm:$0xff]  }
  0x61   : > { %1882 = vmatprep.subr.bf16.mxu0 %v5507_v39  ;;  %v5587_v39 = vld [vmem:[%s7676_s1 + $0x8c0] ss:$8 sps:$4 sm:$0xff]  }
  0x63   : > { %626 = vmatpush1.bf16.msra.mxu1 %v5502_v40  ;;  %v5592_v40 = vld [vmem:[%s7676_s1 + $0xd4] ss:$8 sps:$4 sm:$0xff]  }
  0x64   : > { %1883 = vmatpush1.bf16.msra.mxu0 %v5505_v41  ;;  %936 = vmatprep.subr.bf16.mxu1 %v5510_v42  ;;  %v5595_v41 = vld [vmem:[%s7676_s1 + $0x8d4] ss:$8 sps:$4 sm:$0xff]   ;;  %v5590_v42 = vld [vmem:[%s7676_s1 + $0xd0] ss:$8 sps:$4 sm:$0xff]  }
  0x65   : > { %2311 = vmatprep.subr.bf16.mxu0 %v5514_v43  ;;  %v5593_v43 = vld [vmem:[%s7676_s1 + $0x8d0] ss:$8 sps:$4 sm:$0xff]  }
  0x66   : > { %644 = vmatmul.mubr.bf16.vlgmr.msra.gmra.mrb[0].mxu1 %v5515_v47  ;;  %v5601_v47 = vld [vmem:[%s7676_s1 + $0x8e0] ss:$8 sps:$4 sm:$0xff]  }
  0x67   : > { %1901 = vmatmul.mubr.bf16.vlgmr.msra.gmra.mrb[16].mxu0 %v5511_v45  ;;  %937 = vmatpush1.bf16.msra.mxu1 %v5508_v44  ;;  %v5600_v44 = vld [vmem:[%s7676_s1 + $0xe4] ss:$8 sps:$4 sm:$0xff]  }
  0x68   : > { %2312 = vmatpush1.bf16.msra.mxu0 %v5512_v46  ;;  %938 = vmatprep.subr.bf16.mxu1 %v5518_v48  ;;  %v5603_v45 = vld [vmem:[%s7676_s1 + $0x8e4] ss:$8 sps:$4 sm:$0xff]   ;;  %v5598_v46 = vld [vmem:[%s7676_s1 + $0xe0] ss:$8 sps:$4 sm:$0xff]   ;;  %v5606_v48 = vld [vmem:[%s7676_s1 + $0xf4] ss:$8 sps:$4 sm:$0xff]  }
  0x69   : > { %2313 = vmatprep.subr.bf16.mxu0 %v5521_v49  ;;  %1910 = vmatprep.mubr.bf16.mxu0 %v6066_v2  ;;  %v5609_v49 = vld [vmem:[%s7676_s1 + $0x8f4] ss:$8 sps:$4 sm:$0xff]  }
  0x6a   : > { %653 = vmatprep.mubr.bf16.mxu1 %v6066_v2 }
  0x6b   : > { %939 = vmatpush1.bf16.msra.mxu1 %v5516_v50  ;;  %v5604_v50 = vld [vmem:[%s7676_s1 + $0xf0] ss:$8 sps:$4 sm:$0xff]  }
  0x6c   : > { %2314 = vmatpush1.bf16.msra.mxu0 %v5519_v51  ;;  %940 = vmatprep.subr.bf16.mxu1 %v5524_v52  ;;  %v5607_v51 = vld [vmem:[%s7676_s1 + $0x8f0] ss:$8 sps:$4 sm:$0xff]   ;;  %v5614_v52 = vld [vmem:[%s7676_s1 + $0x304] ss:$8 sps:$4 sm:$0xff]  }
  0x6d   : > { %2315 = vmatprep.subr.bf16.mxu0 %v5527_v53  ;;  %v5617_v53 = vld [vmem:[%s7676_s1 + $0x904] ss:$8 sps:$4 sm:$0xff]  }
  0x6e   : > { %654 = vmatmul.mubr.bf16.gmra.mrb[4].mxu1 %v5597_v4  ;;  %v5629_v4 = vld [vmem:[%s7676_s1 + $0x324] ss:$8 sps:$4 sm:$0xff]  }
  0x6f   : > { %1911 = vmatmul.mubr.bf16.gmra.mrb[20].mxu0 %v5546_v56  ;;  %941 = vmatpush1.bf16.msra.mxu1 %v5522_v54  ;;  %v5612_v54 = vld [vmem:[%s7676_s1 + $0x300] ss:$8 sps:$4 sm:$0xff]   ;;  %v6631_v56 = vld [vmem:[%s6184_s19 + $0x18] sm:$0xff] }
  0x70   : > { %2316 = vmatpush1.bf16.msra.mxu0 %v5525_v55  ;;  %942 = vmatprep.subr.bf16.mxu1 %v5530_v57  ;;  %v5618_v55 = vld [vmem:[%s6184_s19 + $0xa4] ss:$12 sps:$4 sm:$0xff]   ;;  %v4373_v57 = vcombine.low %v6501_v11, %v6504_v12  ;;  %v5638_v11 = vld [vmem:[%s7676_s1 + $0x934] ss:$8 sps:$4 sm:$0xff]  }
  0x71   : > { %2317 = vmatprep.subr.bf16.mxu0 %v5533_v58  ;;  %2343 = vmatprep.mubr.bf16.mxu0 %v6066_v2  ;;  %v6636_v58 = vld [vmem:[%s6184_s19 + $0x24] sm:$0xff] }
  0x72   : > { %968 = vmatprep.mubr.bf16.mxu1 %v4374_v14  ;;  %v5633_v14 = vld [vmem:[%s7676_s1 + $0x330] ss:$8 sps:$4 sm:$0xff]  }
  0x73   : > { %943 = vmatpush1.bf16.msra.mxu1 %v5528_v59  ;;  %v5615_v59 = vld [vmem:[%s7676_s1 + $0x900] ss:$8 sps:$4 sm:$0xff]  }
  0x74   : > { %2318 = vmatpush1.bf16.msra.mxu0 %v5531_v60  ;;  %944 = vmatprep.subr.bf16.mxu1 %v5536_v61  ;;  %v4585_v60 = vcombine.low %v6504_v12, %v6631_v56  ;;  %v4586_v61 = vcombine.high %v6504_v12, %v6631_v56  ;;  %v5838_v12 = vld [vmem:[%s7676_s1 + $0xb24] ss:$8 sps:$4 sm:$0xff]  }
  0x75   : > { %2319 = vmatprep.subr.bf16.mxu0 %v5539_v62  ;;  %v5621_v62 = vld [vmem:[%s7676_s1 + $0x314] ss:$8 sps:$4 sm:$0xff]  }
  0x77   : > { %945 = vmatpush1.bf16.msra.mxu1 %v5534_v63  ;;  %v5624_v63 = vld [vmem:[%s7676_s1 + $0x914] ss:$8 sps:$4 sm:$0xff]  }
  0x78   : > { %2320 = vmatpush1.bf16.msra.mxu0 %v5537_v0  ;;  %946 = vmatprep.subr.bf16.mxu1 %v5542_v1  ;;  %v4377_v0 = vcombine.high %v6631_v56, %v6636_v58  ;;  %v5619_v1 = vld [vmem:[%s7676_s1 + $0x310] ss:$8 sps:$4 sm:$0xff]  }
  0x79   : > { %2321 = vmatprep.subr.bf16.mxu0 %v5545_v3  ;;  %v5622_v3 = vld [vmem:[%s7676_s1 + $0x910] ss:$8 sps:$4 sm:$0xff]  }
  0x7b   : > { %947 = vmatpush1.bf16.msra.mxu1 %v5540_v5  ;;  %v5632_v5 = vld [vmem:[%s7676_s1 + $0x924] ss:$8 sps:$4 sm:$0xff]  }
  0x7c   : > { %2322 = vmatpush1.bf16.msra.mxu0 %v5543_v6  ;;  %948 = vmatprep.subr.bf16.mxu1 %v5549_v7  ;;  %v5627_v6 = vld [vmem:[%s7676_s1 + $0x320] ss:$8 sps:$4 sm:$0xff]   ;;  %v6671_v7 = vcombine.low %v6631_v56, %v6636_v58 }
  0x7d   : > { %2323 = vmatprep.subr.bf16.mxu0 %v5552_v8  ;;  %v5630_v8 = vld [vmem:[%s7676_s1 + $0x920] ss:$8 sps:$4 sm:$0xff]  }
  0x7e   : > { %v5833_v56 = vld [vmem:[%s7676_s1 + $0x620] ss:$8 sps:$4 sm:$0xff]  }
  0x7f   : > { %949 = vmatpush1.bf16.msra.mxu1 %v5547_v9  ;;  %v5705_v9 = vld [vmem:[%s6184_s19 + $0xbc] ss:$12 sps:$4 sm:$0xff]  }
  0x80   : > { %2324 = vmatpush1.bf16.msra.mxu0 %v5550_v10  ;;  %950 = vmatprep.subr.bf16.mxu1 %v5555_v13  ;;  %v5635_v10 = vld [vmem:[%s7676_s1 + $0x334] ss:$8 sps:$4 sm:$0xff]  }
  0x81   : > { %2325 = vmatprep.subr.bf16.mxu0 %v5558_v15  ;;  %v5714_v13 = vld [vmem:[%s6184_s19 + $0x94] ss:$12 sps:$4 sm:$0xff]   ;;  %v5636_v15 = vld [vmem:[%s7676_s1 + $0x930] ss:$8 sps:$4 sm:$0xff]  }
  0x83   : > { %951 = vmatpush1.bf16.msra.mxu1 %v5553_v16  ;;  %v5641_v16 = vld [vmem:[%s7676_s1 + $0x344] ss:$8 sps:$4 sm:$0xff]  }
  0x84   : > { %2326 = vmatpush1.bf16.msra.mxu0 %v5556_v17  ;;  %952 = vmatprep.subr.bf16.mxu1 %v5561_v18  ;;  %v5644_v17 = vld [vmem:[%s7676_s1 + $0x944] ss:$8 sps:$4 sm:$0xff]   ;;  %v5639_v18 = vld [vmem:[%s7676_s1 + $0x340] ss:$8 sps:$4 sm:$0xff]  }
  0x85   : > { %2754 = vmatprep.subr.bf16.mxu0 %v5565_v19  ;;  %v5642_v19 = vld [vmem:[%s7676_s1 + $0x940] ss:$8 sps:$4 sm:$0xff]  }
  0x87   : > { %2344 = vmatmul.mubr.bf16.vlgmr.msra.gmra.mrb[24].mxu0 %v5562_v21  ;;  %953 = vmatpush1.bf16.msra.mxu1 %v5559_v20  ;;  %v5647_v20 = vld [vmem:[%s7676_s1 + $0x354] ss:$8 sps:$4 sm:$0xff]  }
  0x88   : > { %2755 = vmatpush1.bf16.msra.mxu0 %v5563_v22  ;;  %954 = vmatprep.subr.bf16.mxu1 %v5568_v23  ;;  %v5650_v21 = vld [vmem:[%s7676_s1 + $0x954] ss:$8 sps:$4 sm:$0xff]   ;;  %v5645_v22 = vld [vmem:[%s7676_s1 + $0x350] ss:$8 sps:$4 sm:$0xff]  }
  0x89   : > { %2756 = vmatprep.subr.bf16.mxu0 %v5571_v24  ;;  %2353 = vmatprep.mubr.bf16.mxu0 %v6066_v2  ;;  %v5648_v23 = vld [vmem:[%s7676_s1 + $0x950] ss:$8 sps:$4 sm:$0xff]   ;;  %v5653_v24 = vld [vmem:[%s7676_s1 + $0x364] ss:$8 sps:$4 sm:$0xff]  }
  0x8b   : > { %955 = vmatpush1.bf16.msra.mxu1 %v5566_v25  ;;  %v5656_v25 = vld [vmem:[%s7676_s1 + $0x964] ss:$8 sps:$4 sm:$0xff]  }
  0x8c   : > { %2757 = vmatpush1.bf16.msra.mxu0 %v5569_v26  ;;  %956 = vmatprep.subr.bf16.mxu1 %v5574_v27  ;;  %v5651_v26 = vld [vmem:[%s7676_s1 + $0x360] ss:$8 sps:$4 sm:$0xff]  }
  0x8d   : > { %2758 = vmatprep.subr.bf16.mxu0 %v5577_v28  ;;  %v5654_v27 = vld [vmem:[%s7676_s1 + $0x960] ss:$8 sps:$4 sm:$0xff]   ;;  %v5659_v28 = vld [vmem:[%s7676_s1 + $0x374] ss:$8 sps:$4 sm:$0xff]  }
  0x8f   : > { %2354 = vmatmul.mubr.bf16.gmra.mrb[28].mxu0 %v5596_v30  ;;  %957 = vmatpush1.bf16.msra.mxu1 %v5572_v29  ;;  %v5662_v29 = vld [vmem:[%s7676_s1 + $0x974] ss:$8 sps:$4 sm:$0xff]  }
  0x90   : > { %2759 = vmatpush1.bf16.msra.mxu0 %v5575_v31  ;;  %958 = vmatprep.subr.bf16.mxu1 %v5580_v32  ;;  %v6734_v30 = vld [vmem:[%s6184_s19 + $0x30] sm:$0xff] }
  0x91   : > { %2760 = vmatprep.subr.bf16.mxu0 %v5583_v33  ;;  %2786 = vmatprep.mubr.bf16.mxu0 %v6066_v2  ;;  %v4589_v31 = vcombine.high %v6636_v58, %v6734_v30  ;;  %v4588_v32 = vcombine.low %v6636_v58, %v6734_v30  ;;  %v5657_v33 = vld [vmem:[%s7676_s1 + $0x370] ss:$8 sps:$4 sm:$0xff]   ;;  %v5850_v58 = vld [vmem:[%s7676_s1 + $0xb44] ss:$8 sps:$4 sm:$0xff]  }
  0x93   : > { %959 = vmatpush1.bf16.msra.mxu1 %v5578_v34  ;;  %v5660_v34 = vld [vmem:[%s7676_s1 + $0x970] ss:$8 sps:$4 sm:$0xff]  }
  0x94   : > { %2761 = vmatpush1.bf16.msra.mxu0 %v5581_v35  ;;  %960 = vmatprep.subr.bf16.mxu1 %v5586_v36  ;;  %v5665_v35 = vld [vmem:[%s7676_s1 + $0x384] ss:$8 sps:$4 sm:$0xff]  }
  0x95   : > { %2762 = vmatprep.subr.bf16.mxu0 %v5589_v37  ;;  %v5668_v36 = vld [vmem:[%s7676_s1 + $0x984] ss:$8 sps:$4 sm:$0xff]   ;;  %v5663_v37 = vld [vmem:[%s7676_s1 + $0x380] ss:$8 sps:$4 sm:$0xff]  }
  0x97   : > { %961 = vmatpush1.bf16.msra.mxu1 %v5584_v38  ;;  %v5666_v38 = vld [vmem:[%s7676_s1 + $0x980] ss:$8 sps:$4 sm:$0xff]  }
  0x98   : > { %2763 = vmatpush1.bf16.msra.mxu0 %v5587_v39  ;;  %962 = vmatprep.subr.bf16.mxu1 %v5592_v40  ;;  %v5671_v39 = vld [vmem:[%s7676_s1 + $0x394] ss:$8 sps:$4 sm:$0xff]  }
  0x99   : > { %2764 = vmatprep.subr.bf16.mxu0 %v5595_v41  ;;  %v5674_v40 = vld [vmem:[%s7676_s1 + $0x994] ss:$8 sps:$4 sm:$0xff]   ;;  %v5669_v41 = vld [vmem:[%s7676_s1 + $0x390] ss:$8 sps:$4 sm:$0xff]  }
  0x9b   : > { %963 = vmatpush1.bf16.msra.mxu1 %v5590_v42  ;;  %v5672_v42 = vld [vmem:[%s7676_s1 + $0x990] ss:$8 sps:$4 sm:$0xff]  }
  0x9c   : > { %2765 = vmatpush1.bf16.msra.mxu0 %v5593_v43  ;;  %964 = vmatprep.subr.bf16.mxu1 %v5600_v44  ;;  %v5677_v43 = vld [vmem:[%s7676_s1 + $0x3a4] ss:$8 sps:$4 sm:$0xff]  }
  0x9d   : > { %2766 = vmatprep.subr.bf16.mxu0 %v5603_v45  ;;  %v5680_v44 = vld [vmem:[%s7676_s1 + $0x9a4] ss:$8 sps:$4 sm:$0xff]   ;;  %v5675_v45 = vld [vmem:[%s7676_s1 + $0x3a0] ss:$8 sps:$4 sm:$0xff]  }
  0x9f   : > { %965 = vmatpush1.bf16.msra.mxu1 %v5598_v46  ;;  %v5678_v46 = vld [vmem:[%s7676_s1 + $0x9a0] ss:$8 sps:$4 sm:$0xff]  }
  0xa0   : > { %2767 = vmatpush1.bf16.msra.mxu0 %v5601_v47  ;;  %966 = vmatprep.subr.bf16.mxu1 %v5606_v48  ;;  %v5683_v47 = vld [vmem:[%s7676_s1 + $0x3b4] ss:$8 sps:$4 sm:$0xff]  }
  0xa1   : > { %2768 = vmatprep.subr.bf16.mxu0 %v5609_v49  ;;  %v5686_v48 = vld [vmem:[%s7676_s1 + $0x9b4] ss:$8 sps:$4 sm:$0xff]   ;;  %v5681_v49 = vld [vmem:[%s7676_s1 + $0x3b0] ss:$8 sps:$4 sm:$0xff]  }
  0xa3   : > { %967 = vmatpush1.bf16.msra.mxu1 %v5604_v50  ;;  %v5684_v50 = vld [vmem:[%s7676_s1 + $0x9b0] ss:$8 sps:$4 sm:$0xff]  }
  0xa4   : > { %2769 = vmatpush1.bf16.msra.mxu0 %v5607_v51  ;;  %1372 = vmatprep.subr.bf16.mxu1 %v5614_v52  ;;  %v5689_v51 = vld [vmem:[%s7676_s1 + $0x3c4] ss:$8 sps:$4 sm:$0xff]  }
  0xa5   : > { %3144 = vmatprep.subr.bf16.mxu0 %v5617_v53  ;;  %v5692_v52 = vld [vmem:[%s7676_s1 + $0x9c4] ss:$8 sps:$4 sm:$0xff]   ;;  %v5687_v53 = vld [vmem:[%s7676_s1 + $0x3c0] ss:$8 sps:$4 sm:$0xff]  }
  0xa6   : > { %969 = vmatmul.mubr.bf16.vlgmr.msra.gmra.mrb[0].mxu1 %v4373_v57  ;;  %v5698_v57 = vld [vmem:[%s7676_s1 + $0x9d4] ss:$8 sps:$4 sm:$0xff]  }
  0xa7   : > { %2787 = vmatmul.mubr.bf16.vlgmr.msra.gmra.mrb[32].mxu0 %v5618_v55  ;;  %1373 = vmatpush1.bf16.msra.mxu1 %v5612_v54  ;;  %v5690_v54 = vld [vmem:[%s7676_s1 + $0x9c0] ss:$8 sps:$4 sm:$0xff]   ;;  %v5695_v55 = vld [vmem:[%s7676_s1 + $0x3d4] ss:$8 sps:$4 sm:$0xff]  }
  0xa8   : > { %3145 = vmatpush1.bf16.msra.mxu0 %v5615_v59  ;;  %1374 = vmatprep.subr.bf16.mxu1 %v5621_v62  ;;  %v5693_v59 = vld [vmem:[%s7676_s1 + $0x3d0] ss:$8 sps:$4 sm:$0xff]  }
  0xa9   : > { %3146 = vmatprep.subr.bf16.mxu0 %v5624_v63  ;;  %978 = vmatprep.mubr.bf16.mxu1 %v4377_v0  ;;  %v5696_v62 = vld [vmem:[%s7676_s1 + $0x9d0] ss:$8 sps:$4 sm:$0xff]   ;;  %v5701_v63 = vld [vmem:[%s7676_s1 + $0x3e4] ss:$8 sps:$4 sm:$0xff]  }
  0xaa   : > { %2796 = vmatprep.mubr.bf16.mxu0 %v6066_v2 }
  0xab   : > { %1375 = vmatpush1.bf16.msra.mxu1 %v5619_v1  ;;  %v5699_v1 = vld [vmem:[%s7676_s1 + $0x3e0] ss:$8 sps:$4 sm:$0xff]  }
  0xac   : > { %3147 = vmatpush1.bf16.msra.mxu0 %v5622_v3  ;;  %1376 = vmatprep.subr.bf16.mxu1 %v5629_v4  ;;  %v5702_v3 = vld [vmem:[%s7676_s1 + $0x9e0] ss:$8 sps:$4 sm:$0xff]   ;;  %v5708_v4 = vld [vmem:[%s7676_s1 + $0x3f4] ss:$8 sps:$4 sm:$0xff]  }
  0xad   : > { %3148 = vmatprep.subr.bf16.mxu0 %v5632_v5  ;;  %v5711_v5 = vld [vmem:[%s7676_s1 + $0x9f4] ss:$8 sps:$4 sm:$0xff]  }
  0xae   : > { %979 = vmatmul.mubr.bf16.gmra.mrb[4].mxu1 %v6671_v7 }
  0xaf   : > { %2797 = vmatmul.mubr.bf16.gmra.mrb[36].mxu0 %v5705_v9  ;;  %1377 = vmatpush1.bf16.msra.mxu1 %v5627_v6  ;;  %v5706_v6 = vld [vmem:[%s7676_s1 + $0x3f0] ss:$8 sps:$4 sm:$0xff]   ;;  %v5717_v9 = vld [vmem:[%s7676_s1 + $0x484] ss:$8 sps:$4 sm:$0xff]  }
  0xb0   : > { %3149 = vmatpush1.bf16.msra.mxu0 %v5630_v8  ;;  %1378 = vmatprep.subr.bf16.mxu1 %v5635_v10  ;;  %v5709_v8 = vld [vmem:[%s7676_s1 + $0x9f0] ss:$8 sps:$4 sm:$0xff]   ;;  %v5720_v10 = vld [vmem:[%s7676_s1 + $0xa04] ss:$8 sps:$4 sm:$0xff]  }
  0xb1   : > { %3150 = vmatprep.subr.bf16.mxu0 %v5638_v11  ;;  %1404 = vmatprep.mubr.bf16.mxu1 %v5714_v13  ;;  %v5712_v11 = vld [vmem:[%s6184_s19 + $0x90] ss:$12 sps:$4 sm:$0xff]   ;;  %v5715_v13 = vld [vmem:[%s7676_s1 + $0x480] ss:$8 sps:$4 sm:$0xff]  }
  0xb2   : > { %3176 = vmatprep.mubr.bf16.mxu0 %v4377_v0  ;;  %v5704_v0 = vld [vmem:[%s7676_s1 + $0x9e4] ss:$8 sps:$4 sm:$0xff]  }
  0xb3   : > { %1379 = vmatpush1.bf16.msra.mxu1 %v5633_v14  ;;  %v2821_v14 = vld [vmem:[%s6184_s19 + $0x3c] sm:$0xff] }
  0xb4   : > { %3151 = vmatpush1.bf16.msra.mxu0 %v5636_v15  ;;  %1380 = vmatprep.subr.bf16.mxu1 %v5641_v16  ;;  %v5718_v15 = vld [vmem:[%s7676_s1 + $0xa00] ss:$8 sps:$4 sm:$0xff]   ;;  %v5723_v16 = vld [vmem:[%s7676_s1 + $0x494] ss:$8 sps:$4 sm:$0xff]  }
  0xb5   : > { %3152 = vmatprep.subr.bf16.mxu0 %v5644_v17  ;;  %v5726_v17 = vld [vmem:[%s7676_s1 + $0xa14] ss:$8 sps:$4 sm:$0xff]  }
  0xb7   : > { %1381 = vmatpush1.bf16.msra.mxu1 %v5639_v18  ;;  %v5727_v18 = vld [vmem:[%s6184_s19 + $0xac] ss:$12 sps:$4 sm:$0xff]  }
  0xb8   : > { %3153 = vmatpush1.bf16.msra.mxu0 %v5642_v19  ;;  %1382 = vmatprep.subr.bf16.mxu1 %v5647_v20  ;;  %v4911_v19 = vcombine.high %v6734_v30, %v2821_v14  ;;  %v5721_v20 = vld [vmem:[%s7676_s1 + $0x490] ss:$8 sps:$4 sm:$0xff]  }
  0xb9   : > { %3154 = vmatprep.subr.bf16.mxu0 %v5650_v21  ;;  %v5724_v21 = vld [vmem:[%s7676_s1 + $0xa10] ss:$8 sps:$4 sm:$0xff]  }
  0xbb   : > { %1383 = vmatpush1.bf16.msra.mxu1 %v5645_v22  ;;  %v5732_v22 = vld [vmem:[%s7676_s1 + $0x4a4] ss:$8 sps:$4 sm:$0xff]  }
  0xbc   : > { %3155 = vmatpush1.bf16.msra.mxu0 %v5648_v23  ;;  %1384 = vmatprep.subr.bf16.mxu1 %v5653_v24  ;;  %v5729_v23 = vld [vmem:[%s6184_s19 + $0xa8] ss:$12 sps:$4 sm:$0xff]  }
  0xbd   : > { %3156 = vmatprep.subr.bf16.mxu0 %v5656_v25  ;;  %v5730_v24 = vld [vmem:[%s7676_s1 + $0x4a0] ss:$8 sps:$4 sm:$0xff]  }
  0xbe   : > { %v5733_v25 = vld [vmem:[%s7676_s1 + $0xa20] ss:$8 sps:$4 sm:$0xff]  }
  0xbf   : > { %1385 = vmatpush1.bf16.msra.mxu1 %v5651_v26  ;;  %v4910_v26 = vcombine.low %v6734_v30, %v2821_v14  ;;  %v7005_v14 = vld [vmem:[%s6184_s19 + $0x60] sm:$0xff] }
  0xc0   : > { %3157 = vmatpush1.bf16.msra.mxu0 %v5654_v27  ;;  %1386 = vmatprep.subr.bf16.mxu1 %v5659_v28  ;;  %v5738_v27 = vld [vmem:[%s7676_s1 + $0x4b4] ss:$8 sps:$4 sm:$0xff]   ;;  %v5845_v30 = vld [vmem:[%s7676_s1 + $0x640] ss:$8 sps:$4 sm:$0xff]  }
  0xc1   : > { %3158 = vmatprep.subr.bf16.mxu0 %v5662_v29  ;;  %v5741_v28 = vld [vmem:[%s7676_s1 + $0xa34] ss:$8 sps:$4 sm:$0xff]   ;;  %v5736_v29 = vld [vmem:[%s7676_s1 + $0x4b0] ss:$8 sps:$4 sm:$0xff]  }
  0xc3   : > { %1387 = vmatpush1.bf16.msra.mxu1 %v5657_v33  ;;  %v5739_v33 = vld [vmem:[%s7676_s1 + $0xa30] ss:$8 sps:$4 sm:$0xff]  }
  0xc4   : > { %3159 = vmatpush1.bf16.msra.mxu0 %v5660_v34  ;;  %1388 = vmatprep.subr.bf16.mxu1 %v5665_v35  ;;  %v5744_v34 = vld [vmem:[%s7676_s1 + $0x4c4] ss:$8 sps:$4 sm:$0xff]  }
  0xc5   : > { %3160 = vmatprep.subr.bf16.mxu0 %v5668_v36  ;;  %v5747_v35 = vld [vmem:[%s7676_s1 + $0xa44] ss:$8 sps:$4 sm:$0xff]   ;;  %v5742_v36 = vld [vmem:[%s7676_s1 + $0x4c0] ss:$8 sps:$4 sm:$0xff]  }
  0xc7   : > { %1389 = vmatpush1.bf16.msra.mxu1 %v5663_v37  ;;  %v5745_v37 = vld [vmem:[%s7676_s1 + $0xa40] ss:$8 sps:$4 sm:$0xff]  }
  0xc8   : > { %3161 = vmatpush1.bf16.msra.mxu0 %v5666_v38  ;;  %1390 = vmatprep.subr.bf16.mxu1 %v5671_v39  ;;  %v5750_v38 = vld [vmem:[%s7676_s1 + $0x4d4] ss:$8 sps:$4 sm:$0xff]   ;;  %v5748_v39 = vld [vmem:[%s7676_s1 + $0x4d0] ss:$8 sps:$4 sm:$0xff]  }
  0xc9   : > { %3162 = vmatprep.subr.bf16.mxu0 %v5674_v40  ;;  %v5751_v40 = vld [vmem:[%s7676_s1 + $0xa50] ss:$8 sps:$4 sm:$0xff]  }
  0xcb   : > { %1391 = vmatpush1.bf16.msra.mxu1 %v5669_v41  ;;  %v5756_v41 = vld [vmem:[%s7676_s1 + $0x4e4] ss:$8 sps:$4 sm:$0xff]  }
  0xcc   : > { %3163 = vmatpush1.bf16.msra.mxu0 %v5672_v42  ;;  %1392 = vmatprep.subr.bf16.mxu1 %v5677_v43  ;;  %v5760_v42 = vld [vmem:[%s7676_s1 + $0xa64] ss:$8 sps:$4 sm:$0xff]  }
  0xcd   : > { %3164 = vmatprep.subr.bf16.mxu0 %v5680_v44 }
  0xcf   : > { %1393 = vmatpush1.bf16.msra.mxu1 %v5675_v45 }
  0xd0   : > { %3165 = vmatpush1.bf16.msra.mxu0 %v5678_v46  ;;  %1394 = vmatprep.subr.bf16.mxu1 %v5683_v47  ;;  %v5754_v46 = vld [vmem:[%s7676_s1 + $0x4e0] ss:$8 sps:$4 sm:$0xff]  }
  0xd1   : > { %3166 = vmatprep.subr.bf16.mxu0 %v5686_v48  ;;  %v5758_v47 = vld [vmem:[%s7676_s1 + $0xa60] ss:$8 sps:$4 sm:$0xff]  }
  0xd3   : > { %1395 = vmatpush1.bf16.msra.mxu1 %v5681_v49  ;;  %v5764_v49 = vld [vmem:[%s7676_s1 + $0x4f4] ss:$8 sps:$4 sm:$0xff]  }
  0xd4   : > { %3167 = vmatpush1.bf16.msra.mxu0 %v5684_v50  ;;  %1396 = vmatprep.subr.bf16.mxu1 %v5689_v51  ;;  %v5767_v50 = vld [vmem:[%s7676_s1 + $0xa74] ss:$8 sps:$4 sm:$0xff]   ;;  %v5762_v51 = vld [vmem:[%s7676_s1 + $0x4f0] ss:$8 sps:$4 sm:$0xff]  }
  0xd5   : > { %3168 = vmatprep.subr.bf16.mxu0 %v5692_v52  ;;  %v5765_v52 = vld [vmem:[%s7676_s1 + $0xa70] ss:$8 sps:$4 sm:$0xff]  }
  0xd7   : > { %1397 = vmatpush1.bf16.msra.mxu1 %v5687_v53  ;;  %v5770_v53 = vld [vmem:[%s7676_s1 + $0x504] ss:$8 sps:$4 sm:$0xff]  }
  0xd8   : > { %3169 = vmatpush1.bf16.msra.mxu0 %v5690_v54  ;;  %1398 = vmatprep.subr.bf16.mxu1 %v5695_v55  ;;  %v5773_v54 = vld [vmem:[%s7676_s1 + $0xa84] ss:$8 sps:$4 sm:$0xff]  }
  0xd9   : > { %3170 = vmatprep.subr.bf16.mxu0 %v5698_v57  ;;  %v5768_v57 = vld [vmem:[%s7676_s1 + $0x500] ss:$8 sps:$4 sm:$0xff]  }
  0xdb   : > { %1399 = vmatpush1.bf16.msra.mxu1 %v5693_v59  ;;  %v5774_v59 = vld [vmem:[%s6184_s19 + $0x20] ss:$12 sps:$4 sm:$0xff]  }
  0xdc   : > { %3171 = vmatpush1.bf16.msra.mxu0 %v5696_v62  ;;  %1400 = vmatprep.subr.bf16.mxu1 %v5701_v63  ;;  %v5771_v63 = vld [vmem:[%s7676_s1 + $0xa80] ss:$8 sps:$4 sm:$0xff]  }
  0xdd   : > { %3172 = vmatprep.subr.bf16.mxu0 %v5704_v0 }
  0xdf   : > { %1401 = vmatpush1.bf16.msra.mxu1 %v5699_v1  ;;  %v5777_v1 = vld [vmem:[%s7676_s1 + $0x514] ss:$8 sps:$4 sm:$0xff]  }
  0xe0   : > { %3173 = vmatpush1.bf16.msra.mxu0 %v5702_v3  ;;  %1402 = vmatprep.subr.bf16.mxu1 %v5708_v4  ;;  %v5780_v3 = vld [vmem:[%s7676_s1 + $0xa94] ss:$8 sps:$4 sm:$0xff]  }
  0xe1   : > { %3174 = vmatprep.subr.bf16.mxu0 %v5711_v5  ;;  %v5775_v5 = vld [vmem:[%s7676_s1 + $0x510] ss:$8 sps:$4 sm:$0xff]  }
  0xe3   : > { %1403 = vmatpush1.bf16.msra.mxu1 %v5706_v6  ;;  %v5778_v6 = vld [vmem:[%s7676_s1 + $0xa90] ss:$8 sps:$4 sm:$0xff]  }
  0xe4   : > { %3175 = vmatpush1.bf16.msra.mxu0 %v5709_v8  ;;  %1815 = vmatprep.subr.bf16.mxu1 %v5717_v9  ;;  %v5783_v8 = vld [vmem:[%s7676_s1 + $0x524] ss:$8 sps:$4 sm:$0xff]  }
  0xe5   : > { %3197 = vmatprep.subr.bf16.mxu0 %v5720_v10  ;;  %v5786_v9 = vld [vmem:[%s7676_s1 + $0xaa4] ss:$8 sps:$4 sm:$0xff]   ;;  %v5781_v10 = vld [vmem:[%s7676_s1 + $0x520] ss:$8 sps:$4 sm:$0xff]  }
  0xe6   : > { %1405 = vmatmul.mubr.bf16.vlgmr.msra.gmra.mrb[8].mxu1 %v5712_v11  ;;  %v5784_v11 = vld [vmem:[%s7676_s1 + $0xaa0] ss:$8 sps:$4 sm:$0xff]  }
  0xe7   : > { %3177 = vmatmul.mubr.bf16.vlgmr.msra.gmra.mrb[32].mxu0 %v6671_v7  ;;  %1816 = vmatpush1.bf16.msra.mxu1 %v5715_v13  ;;  %v5735_v7 = vld [vmem:[%s7676_s1 + $0xa24] ss:$8 sps:$4 sm:$0xff]  }
  0xe8   : > { %3198 = vmatpush1.bf16.msra.mxu0 %v5718_v15  ;;  %1817 = vmatprep.subr.bf16.mxu1 %v5723_v16  ;;  %v5863_v13 = vld [vmem:[%s6184_s19 + $0x38] ss:$12 sps:$4 sm:$0xff]   ;;  %v7008_v15 = vld [vmem:[%s6184_s19 + $0x6c] sm:$0xff]  ;;  %v5789_v16 = vld [vmem:[%s7676_s1 + $0x534] ss:$8 sps:$4 sm:$0xff]  }
  0xe9   : > { %3199 = vmatprep.subr.bf16.mxu0 %v5726_v17  ;;  %1414 = vmatprep.mubr.bf16.mxu1 %v5727_v18  ;;  %v5792_v17 = vld [vmem:[%s7676_s1 + $0xab4] ss:$8 sps:$4 sm:$0xff]   ;;  %v5018_v18 = vcombine.high %v7005_v14, %v7008_v15 }
  0xea   : > { %3186 = vmatprep.mubr.bf16.mxu0 %v4911_v19  ;;  %v5787_v19 = vld [vmem:[%s7676_s1 + $0x530] ss:$8 sps:$4 sm:$0xff]  }
  0xeb   : > { %1818 = vmatpush1.bf16.msra.mxu1 %v5721_v20  ;;  %v5790_v20 = vld [vmem:[%s7676_s1 + $0xab0] ss:$8 sps:$4 sm:$0xff]  }
  0xec   : > { %3200 = vmatpush1.bf16.msra.mxu0 %v5724_v21  ;;  %1819 = vmatprep.subr.bf16.mxu1 %v5732_v22  ;;  %v5795_v21 = vld [vmem:[%s7676_s1 + $0x544] ss:$8 sps:$4 sm:$0xff]  }
  0xed   : > { %3201 = vmatprep.subr.bf16.mxu0 %v5735_v7  ;;  %v5798_v22 = vld [vmem:[%s7676_s1 + $0xac4] ss:$8 sps:$4 sm:$0xff]   ;;  %v5793_v7 = vld [vmem:[%s7676_s1 + $0x540] ss:$8 sps:$4 sm:$0xff]  }
  0xee   : > { %1415 = vmatmul.mubr.bf16.gmra.mrb[12].mxu1 %v5729_v23  ;;  %v5796_v23 = vld [vmem:[%s7676_s1 + $0xac0] ss:$8 sps:$4 sm:$0xff]  }
  0xef   : > { %3187 = vmatmul.mubr.bf16.gmra.mrb[36].mxu0 %v4910_v26  ;;  %1820 = vmatpush1.bf16.msra.mxu1 %v5730_v24  ;;  %v5801_v24 = vld [vmem:[%s7676_s1 + $0x554] ss:$8 sps:$4 sm:$0xff]   ;;  %v5799_v26 = vld [vmem:[%s7676_s1 + $0x550] ss:$8 sps:$4 sm:$0xff]  }
  0xf0   : > { %3202 = vmatpush1.bf16.msra.mxu0 %v5733_v25  ;;  %1821 = vmatprep.subr.bf16.mxu1 %v5738_v27  ;;  %v5804_v25 = vld [vmem:[%s7676_s1 + $0xad4] ss:$8 sps:$4 sm:$0xff]   ;;  %v5802_v27 = vld [vmem:[%s7676_s1 + $0xad0] ss:$8 sps:$4 sm:$0xff]  }
  0xf1   : > { %3203 = vmatprep.subr.bf16.mxu0 %v5741_v28  ;;  %3229 = vmatprep.mubr.bf16.mxu0 %v6066_v2  ;;  %v5807_v28 = vld [vmem:[%s7676_s1 + $0x564] ss:$8 sps:$4 sm:$0xff]  }
  0xf2   : > { %1847 = vmatprep.mubr.bf16.mxu1 %v4586_v61  ;;  %v5753_v61 = vld [vmem:[%s7676_s1 + $0xa54] ss:$8 sps:$4 sm:$0xff]  }
  0xf3   : > { %1822 = vmatpush1.bf16.msra.mxu1 %v5736_v29  ;;  %v5810_v29 = vld [vmem:[%s7676_s1 + $0xae4] ss:$8 sps:$4 sm:$0xff]  }
  0xf4   : > { %3204 = vmatpush1.bf16.msra.mxu0 %v5739_v33  ;;  %1823 = vmatprep.subr.bf16.mxu1 %v5744_v34 }
  0xf5   : > { %3205 = vmatprep.subr.bf16.mxu0 %v5747_v35  ;;  %v5805_v35 = vld [vmem:[%s7676_s1 + $0x560] ss:$8 sps:$4 sm:$0xff]  }
  0xf7   : > { %1824 = vmatpush1.bf16.msra.mxu1 %v5742_v36  ;;  %v5808_v36 = vld [vmem:[%s7676_s1 + $0xae0] ss:$8 sps:$4 sm:$0xff]  }
  0xf8   : > { %3206 = vmatpush1.bf16.msra.mxu0 %v5745_v37  ;;  %1825 = vmatprep.subr.bf16.mxu1 %v5750_v38  ;;  %v5813_v38 = vld [vmem:[%s7676_s1 + $0x574] ss:$8 sps:$4 sm:$0xff]  }
  0xf9   : > { %3207 = vmatprep.subr.bf16.mxu0 %v5753_v61 }
  0xfa   : > { %v6931_v43 = vpop.f32.mrb[0].mxu0 }
  0xfb   : > { %v6933_v44 = vpop.f32.mrb[1].mxu0  ;;  %1826 = vmatpush1.bf16.msra.mxu1 %v5748_v39  ;;  %v5816_v39 = vld [vmem:[%s7676_s1 + $0xaf4] ss:$8 sps:$4 sm:$0xff]  }
  0xfc   : > { %v6935_v45 = vpop.f32.mrb[2].mxu0  ;;  %3208 = vmatpush1.bf16.msra.mxu0 %v5751_v40  ;;  %1827 = vmatprep.subr.bf16.mxu1 %v5756_v41  ;;  %v5811_v40 = vld [vmem:[%s7676_s1 + $0x570] ss:$8 sps:$4 sm:$0xff]  }
  0xfd   : > { %v6943_v48 = vpop.f32.mrb[3].mxu0  ;;  %3209 = vmatprep.subr.bf16.mxu0 %v5760_v42  ;;  %v5814_v41 = vld [vmem:[%s7676_s1 + $0xaf0] ss:$8 sps:$4 sm:$0xff]   ;;  %v5821_v42 = vld [vmem:[%s7676_s1 + $0x604] ss:$8 sps:$4 sm:$0xff]  }
  0xff   : > { %1828 = vmatpush1.bf16.msra.mxu1 %v5754_v46  ;;  %v5824_v46 = vld [vmem:[%s7676_s1 + $0xb04] ss:$8 sps:$4 sm:$0xff]  }
 0x100   : > { %3210 = vmatpush1.bf16.msra.mxu0 %v5758_v47  ;;  %1829 = vmatprep.subr.bf16.mxu1 %v5764_v49  ;;  %v5819_v49 = vld [vmem:[%s7676_s1 + $0x600] ss:$8 sps:$4 sm:$0xff]  }
 0x101   : > { %3211 = vmatprep.subr.bf16.mxu0 %v5767_v50  ;;  %v5822_v50 = vld [vmem:[%s7676_s1 + $0xb00] ss:$8 sps:$4 sm:$0xff]  }
 0x102   : > { %v6963_v55 = vpop.f32.mrb[4].mxu0 }
 0x103   : > { %v6969_v62 = vpop.f32.mrb[5].mxu0  ;;  %1830 = vmatpush1.bf16.msra.mxu1 %v5762_v51 }
 0x104   : > { %3212 = vmatpush1.bf16.msra.mxu0 %v5765_v52  ;;  %v6974_v0 = vpop.f32.mrb[6].mxu0  ;;  %1831 = vmatprep.subr.bf16.mxu1 %v5770_v53  ;;  %v5827_v52 = vld [vmem:[%s7676_s1 + $0x614] ss:$8 sps:$4 sm:$0xff]  }
 0x105   : > { %3587 = vmatprep.subr.bf16.mxu0 %v5773_v54  ;;  %v6982_v4 = vpop.f32.mrb[7].mxu0  ;;  %v5830_v54 = vld [vmem:[%s7676_s1 + $0xb14] ss:$8 sps:$4 sm:$0xff]  }
 0x107   : > { %3230 = vmatmul.mubr.bf16.vlgmr.msra.gmra.mrb[32].mxu0 %v5774_v59  ;;  %1832 = vmatpush1.bf16.msra.mxu1 %v5768_v57  ;;  %v5825_v59 = vld [vmem:[%s7676_s1 + $0x610] ss:$8 sps:$4 sm:$0xff]  }
 0x108   : > { %3588 = vmatpush1.bf16.msra.mxu0 %v5771_v63  ;;  %1833 = vmatprep.subr.bf16.mxu1 %v5777_v1  ;;  %v5828_v63 = vld [vmem:[%s7676_s1 + $0xb10] ss:$8 sps:$4 sm:$0xff]   ;;  %v5835_v1 = vld [vmem:[%s7676_s1 + $0x624] ss:$8 sps:$4 sm:$0xff]  }
 0x109   : > { %3589 = vmatprep.subr.bf16.mxu0 %v5780_v3  ;;  %3239 = vmatprep.mubr.bf16.mxu0 %v6066_v2  ;;  %v7131_v3 = vld [vmem:[%s6184_s19 + $0x54] sm:$0xff] }
 0x10b   : > { %1834 = vmatpush1.bf16.msra.mxu1 %v5775_v5  ;;  %v5841_v5 = vld [vmem:[%s7676_s1 + $0x634] ss:$8 sps:$4 sm:$0xff]  }
 0x10c   : > { %3590 = vmatpush1.bf16.msra.mxu0 %v5778_v6  ;;  %1835 = vmatprep.subr.bf16.mxu1 %v5783_v8  ;;  %v4696_v6 = vcombine.high %v7131_v3, %v7005_v14  ;;  %v5839_v8 = vld [vmem:[%s7676_s1 + $0x630] ss:$8 sps:$4 sm:$0xff]  }
 0x10d   : > { %3591 = vmatprep.subr.bf16.mxu0 %v5786_v9  ;;  %v5842_v9 = vld [vmem:[%s7676_s1 + $0xb30] ss:$8 sps:$4 sm:$0xff]  }
 0x10f   : > { %3240 = vmatmul.mubr.bf16.gmra.mrb[36].mxu0 %v5863_v13  ;;  %1836 = vmatpush1.bf16.msra.mxu1 %v5781_v10  ;;  %v5847_v10 = vld [vmem:[%s7676_s1 + $0x644] ss:$8 sps:$4 sm:$0xff]   ;;  %v5856_v13 = vld [vmem:[%s7676_s1 + $0xb54] ss:$8 sps:$4 sm:$0xff]  }
 0x110   : > { %3592 = vmatpush1.bf16.msra.mxu0 %v5784_v11  ;;  %1837 = vmatprep.subr.bf16.mxu1 %v5789_v16  ;;  %v5853_v11 = vld [vmem:[%s7676_s1 + $0x654] ss:$8 sps:$4 sm:$0xff]   ;;  %v5851_v16 = vld [vmem:[%s7676_s1 + $0x650] ss:$8 sps:$4 sm:$0xff]  }
 0x111   : > { %3593 = vmatprep.subr.bf16.mxu0 %v5792_v17  ;;  %3619 = vmatprep.mubr.bf16.mxu0 %v5018_v18  ;;  %v5854_v17 = vld [vmem:[%s7676_s1 + $0xb50] ss:$8 sps:$4 sm:$0xff]   ;;  %v5859_v18 = vld [vmem:[%s7676_s1 + $0x664] ss:$8 sps:$4 sm:$0xff]  }
 0x113   : > { %1838 = vmatpush1.bf16.msra.mxu1 %v5787_v19  ;;  %v5862_v19 = vld [vmem:[%s7676_s1 + $0xb64] ss:$8 sps:$4 sm:$0xff]  }
 0x114   : > { %3594 = vmatpush1.bf16.msra.mxu0 %v5790_v20  ;;  %1839 = vmatprep.subr.bf16.mxu1 %v5795_v21  ;;  %v5857_v21 = vld [vmem:[%s7676_s1 + $0x660] ss:$8 sps:$4 sm:$0xff]  }
 0x115   : > { %3595 = vmatprep.subr.bf16.mxu0 %v5798_v22 }
 0x117   : > { %1840 = vmatpush1.bf16.msra.mxu1 %v5793_v7  ;;  %v5860_v7 = vld [vmem:[%s7676_s1 + $0xb60] ss:$8 sps:$4 sm:$0xff]  }
 0x118   : > { %3596 = vmatpush1.bf16.msra.mxu0 %v5796_v23  ;;  %1841 = vmatprep.subr.bf16.mxu1 %v5801_v24  ;;  %v5866_v23 = vld [vmem:[%s7676_s1 + $0x674] ss:$8 sps:$4 sm:$0xff]  }
 0x119   : > { %3597 = vmatprep.subr.bf16.mxu0 %v5804_v25 }
 0x11a   : > { %v7054_v33 = vpop.f32.mrb[8].mxu0 }
 0x11b   : > { %v7056_v34 = vpop.f32.mrb[9].mxu0  ;;  %1842 = vmatpush1.bf16.msra.mxu1 %v5799_v26  ;;  %v5869_v26 = vld [vmem:[%s7676_s1 + $0xb74] ss:$8 sps:$4 sm:$0xff]  }
 0x11c   : > { %v7064_v37 = vpop.f32.mrb[10].mxu0  ;;  %3598 = vmatpush1.bf16.msra.mxu0 %v5802_v27  ;;  %1843 = vmatprep.subr.bf16.mxu1 %v5807_v28  ;;  %v5864_v27 = vld [vmem:[%s7676_s1 + $0x670] ss:$8 sps:$4 sm:$0xff]  }
 0x11d   : > { %v7069_v61 = vpop.f32.mrb[11].mxu0  ;;  %3599 = vmatprep.subr.bf16.mxu0 %v5810_v29  ;;  %v5867_v28 = vld [vmem:[%s7676_s1 + $0xb70] ss:$8 sps:$4 sm:$0xff]   ;;  %v5872_v29 = vld [vmem:[%s7676_s1 + $0x684] ss:$8 sps:$4 sm:$0xff]  }
 0x11f   : > { %1844 = vmatpush1.bf16.msra.mxu1 %v5805_v35  ;;  %v5877_v35 = vld [vmem:[%s7676_s1 + $0xb84] ss:$8 sps:$4 sm:$0xff]  }
 0x120   : > { %3600 = vmatpush1.bf16.msra.mxu0 %v5808_v36  ;;  %1845 = vmatprep.subr.bf16.mxu1 %v5813_v38  ;;  %v5017_v38 = vcombine.low %v7005_v14, %v7008_v15 }
 0x121   : > { %3601 = vmatprep.subr.bf16.mxu0 %v5816_v39 }
 0x122   : > { %v7086_v47 = vpop.f32.mrb[12].mxu0 }
 0x123   : > { %v7094_v51 = vpop.f32.mrb[13].mxu0  ;;  %1846 = vmatpush1.bf16.msra.mxu1 %v5811_v40  ;;  %v7219_v40 = vld [vmem:[%s6184_s19 + $0x78] sm:$0xff] }
 0x124   : > { %3602 = vmatpush1.bf16.msra.mxu0 %v5814_v41  ;;  %v7099_v53 = vpop.f32.mrb[14].mxu0  ;;  %2258 = vmatprep.subr.bf16.mxu1 %v5821_v42  ;;  %v4967_v41 = vld [vmem:[%s6184_s19 + $0x84] sm:$0xff] }
 0x125   : > { %3603 = vmatprep.subr.bf16.mxu0 %v5824_v46  ;;  %v7104_v57 = vpop.f32.mrb[15].mxu0  ;;  %v5870_v42 = vld [vmem:[%s7676_s1 + $0x680] ss:$8 sps:$4 sm:$0xff]  }
 0x126   : > { %1848 = vmatmul.mubr.bf16.vlgmr.msra.gmra.mrb[16].mxu1 %v4585_v60  ;;  %v5836_v60 = vld [vmem:[%s7676_s1 + $0xb20] ss:$8 sps:$4 sm:$0xff]  }
 0x127   : > { %2259 = vmatpush1.bf16.msra.mxu1 %v5819_v49  ;;  %1857 = vmatprep.mubr.bf16.mxu1 %v4589_v31  ;;  %v5844_v31 = vld [vmem:[%s7676_s1 + $0xb34] ss:$8 sps:$4 sm:$0xff]   ;;  %v5875_v46 = vld [vmem:[%s7676_s1 + $0xb80] ss:$8 sps:$4 sm:$0xff]  }
 0x128   : > { %3604 = vmatpush1.bf16.msra.mxu0 %v5822_v50  ;;  %2260 = vmatprep.subr.bf16.mxu1 %v5827_v52  ;;  %v5880_v50 = vld [vmem:[%s7676_s1 + $0x694] ss:$8 sps:$4 sm:$0xff]  }
 0x129   : > { %3605 = vmatprep.subr.bf16.mxu0 %v5830_v54  ;;  %v5883_v52 = vld [vmem:[%s7676_s1 + $0xb94] ss:$8 sps:$4 sm:$0xff]  }
 0x12b   : > { %2261 = vmatpush1.bf16.msra.mxu1 %v5825_v59  ;;  %v5021_v59 = vcombine.high %v7219_v40, %v4967_v41 }
 0x12c   : > { %3606 = vmatpush1.bf16.msra.mxu0 %v5828_v63  ;;  %2262 = vmatprep.subr.bf16.mxu1 %v5835_v1  ;;  %v5878_v63 = vld [vmem:[%s7676_s1 + $0x690] ss:$8 sps:$4 sm:$0xff]  }
 0x12d   : > { %3607 = vmatprep.subr.bf16.mxu0 %v5838_v12  ;;  %v5881_v1 = vld [vmem:[%s7676_s1 + $0xb90] ss:$8 sps:$4 sm:$0xff]   ;;  %v5886_v12 = vld [vmem:[%s7676_s1 + $0x6a4] ss:$8 sps:$4 sm:$0xff]  }
 0x12e   : > { %1858 = vmatmul.mubr.bf16.gmra.mrb[20].mxu1 %v4588_v32  ;;  %v5848_v32 = vld [vmem:[%s7676_s1 + $0xb40] ss:$8 sps:$4 sm:$0xff]  }
 0x12f   : > { %2263 = vmatpush1.bf16.msra.mxu1 %v5833_v56  ;;  %2290 = vmatprep.mubr.bf16.mxu1 %v4696_v6  ;;  %v5889_v56 = vld [vmem:[%s7676_s1 + $0xba4] ss:$8 sps:$4 sm:$0xff]   ;;  %v5892_v6 = vld [vmem:[%s7676_s1 + $0x6b4] ss:$8 sps:$4 sm:$0xff]  }
 0x130   : > { %3608 = vmatpush1.bf16.msra.mxu0 %v5836_v60  ;;  %2264 = vmatprep.subr.bf16.mxu1 %v5841_v5  ;;  %v5020_v60 = vcombine.low %v7219_v40, %v4967_v41  ;;  %v5884_v5 = vld [vmem:[%s7676_s1 + $0x6a0] ss:$8 sps:$4 sm:$0xff]   ;;  %v5916_v41 = vld [vmem:[%s7676_s1 + $0x6f0] ss:$8 sps:$4 sm:$0xff]  }
 0x131   : > { %3609 = vmatprep.subr.bf16.mxu0 %v5844_v31  ;;  %v5887_v31 = vld [vmem:[%s7676_s1 + $0xba0] ss:$8 sps:$4 sm:$0xff]  }
 0x133   : > { %2265 = vmatpush1.bf16.msra.mxu1 %v5839_v8  ;;  %v5895_v8 = vld [vmem:[%s7676_s1 + $0xbb4] ss:$8 sps:$4 sm:$0xff]  }
 0x134   : > { %3610 = vmatpush1.bf16.msra.mxu0 %v5842_v9  ;;  %2266 = vmatprep.subr.bf16.mxu1 %v5847_v10  ;;  %v5890_v9 = vld [vmem:[%s7676_s1 + $0x6b0] ss:$8 sps:$4 sm:$0xff]  }
 0x135   : > { %3611 = vmatprep.subr.bf16.mxu0 %v5850_v58  ;;  %v5893_v10 = vld [vmem:[%s7676_s1 + $0xbb0] ss:$8 sps:$4 sm:$0xff]   ;;  %v5898_v58 = vld [vmem:[%s7676_s1 + $0x6c4] ss:$8 sps:$4 sm:$0xff]  }
 0x137   : > { %2267 = vmatpush1.bf16.msra.mxu1 %v5845_v30  ;;  %v5901_v30 = vld [vmem:[%s7676_s1 + $0xbc4] ss:$8 sps:$4 sm:$0xff]  }
 0x138   : > { %3612 = vmatpush1.bf16.msra.mxu0 %v5848_v32  ;;  %2268 = vmatprep.subr.bf16.mxu1 %v5853_v11  ;;  %v5896_v32 = vld [vmem:[%s7676_s1 + $0x6c0] ss:$8 sps:$4 sm:$0xff]  }
 0x139   : > { %3613 = vmatprep.subr.bf16.mxu0 %v5856_v13  ;;  %v5899_v11 = vld [vmem:[%s7676_s1 + $0xbc0] ss:$8 sps:$4 sm:$0xff]   ;;  %v5904_v13 = vld [vmem:[%s7676_s1 + $0x6d4] ss:$8 sps:$4 sm:$0xff]  }
 0x13a   : > { %v7180_v20 = vpop.f32.mrb[16].mxu0 }
 0x13b   : > { %v7185_v22 = vpop.f32.mrb[17].mxu0  ;;  %2269 = vmatpush1.bf16.msra.mxu1 %v5851_v16  ;;  %v5907_v16 = vld [vmem:[%s7676_s1 + $0xbd4] ss:$8 sps:$4 sm:$0xff]  }
 0x13c   : > { %v7193_v24 = vpop.f32.mrb[18].mxu0  ;;  %3614 = vmatpush1.bf16.msra.mxu0 %v5854_v17  ;;  %2270 = vmatprep.subr.bf16.mxu1 %v5859_v18  ;;  %v5902_v17 = vld [vmem:[%s7676_s1 + $0x6d0] ss:$8 sps:$4 sm:$0xff]  }
 0x13d   : > { %v7195_v25 = vpop.f32.mrb[19].mxu0  ;;  %3615 = vmatprep.subr.bf16.mxu0 %v5862_v19  ;;  %v5905_v18 = vld [vmem:[%s7676_s1 + $0xbd0] ss:$8 sps:$4 sm:$0xff]   ;;  %v5910_v19 = vld [vmem:[%s7676_s1 + $0x6e4] ss:$8 sps:$4 sm:$0xff]  }
 0x13f   : > { %2271 = vmatpush1.bf16.msra.mxu1 %v5857_v21  ;;  %v5914_v21 = vld [vmem:[%s7676_s1 + $0xbe4] ss:$8 sps:$4 sm:$0xff]  }
 0x140   : > { %3616 = vmatpush1.bf16.msra.mxu0 %v5860_v7  ;;  %2272 = vmatprep.subr.bf16.mxu1 %v5866_v23 }
 0x141   : > { %3617 = vmatprep.subr.bf16.mxu0 %v5869_v26 }
 0x142   : > { %v7212_v36 = vpop.f32.mrb[20].mxu0 }
 0x143   : > { %v7216_v39 = vpop.f32.mrb[21].mxu0  ;;  %2273 = vmatpush1.bf16.msra.mxu1 %v5864_v27  ;;  %v5908_v27 = vld [vmem:[%s7676_s1 + $0x6e0] ss:$8 sps:$4 sm:$0xff]  }
 0x144   : > { %3618 = vmatpush1.bf16.msra.mxu0 %v5867_v28  ;;  %v7228_v49 = vpop.f32.mrb[22].mxu0  ;;  %2274 = vmatprep.subr.bf16.mxu1 %v5872_v29  ;;  %v5912_v28 = vld [vmem:[%s7676_s1 + $0xbe0] ss:$8 sps:$4 sm:$0xff]  }
 0x145   : > { %3640 = vmatprep.subr.bf16.mxu0 %v5877_v35  ;;  %v7236_v54 = vpop.f32.mrb[23].mxu0  ;;  %v5918_v35 = vld [vmem:[%s7676_s1 + $0x6f4] ss:$8 sps:$4 sm:$0xff]  }
 0x147   : > { %3620 = vmatmul.mubr.bf16.vlgmr.msra.gmra.mrb[32].mxu0 %v5017_v38  ;;  %2275 = vmatpush1.bf16.msra.mxu1 %v5870_v42  ;;  %v5921_v38 = vld [vmem:[%s7676_s1 + $0xbf4] ss:$8 sps:$4 sm:$0xff]   ;;  %v5919_v42 = vld [vmem:[%s7676_s1 + $0xbf0] ss:$8 sps:$4 sm:$0xff]  }
 0x148   : > { %3641 = vmatpush1.bf16.msra.mxu0 %v5875_v46  ;;  %2276 = vmatprep.subr.bf16.mxu1 %v5880_v50  ;;  %v5926_v46 = vld [vmem:[%s7676_s1 + $0x784] ss:$8 sps:$4 sm:$0xff]  }
 0x149   : > { %3642 = vmatprep.subr.bf16.mxu0 %v5883_v52  ;;  %3629 = vmatprep.mubr.bf16.mxu0 %v5021_v59  ;;  %v5929_v50 = vld [vmem:[%s7676_s1 + $0xc04] ss:$8 sps:$4 sm:$0xff]   ;;  %v4695_v59 = vcombine.low %v7131_v3, %v7005_v14  ;;  %v5933_v14 = vld [vmem:[%s7676_s1 + $0x794] ss:$8 sps:$4 sm:$0xff]  }
 0x14a   : > { %v5936_v3 = vld [vmem:[%s7676_s1 + $0xc14] ss:$8 sps:$4 sm:$0xff]  }
 0x14b   : > { %2277 = vmatpush1.bf16.msra.mxu1 %v5878_v63  ;;  %v5930_v63 = vld [vmem:[%s6184_s19 + $0x68] ss:$12 sps:$4 sm:$0xff]  }
 0x14c   : > { %3643 = vmatpush1.bf16.msra.mxu0 %v5881_v1  ;;  %2278 = vmatprep.subr.bf16.mxu1 %v5886_v12  ;;  %v5924_v12 = vld [vmem:[%s7676_s1 + $0x780] ss:$8 sps:$4 sm:$0xff]  }
 0x14d   : > { %3644 = vmatprep.subr.bf16.mxu0 %v5889_v56  ;;  %v5927_v56 = vld [vmem:[%s7676_s1 + $0xc00] ss:$8 sps:$4 sm:$0xff]  }
 0x14f   : > { %3630 = vmatmul.mubr.bf16.gmra.mrb[36].mxu0 %v5020_v60  ;;  %2279 = vmatpush1.bf16.msra.mxu1 %v5884_v5 }
 0x150   : > { %3645 = vmatpush1.bf16.msra.mxu0 %v5887_v31  ;;  %2280 = vmatprep.subr.bf16.mxu1 %v5892_v6  ;;  %v4699_v31 = vcombine.high %v7008_v15, %v7219_v40  ;;  %v5931_v6 = vld [vmem:[%s7676_s1 + $0x790] ss:$8 sps:$4 sm:$0xff]  }
 0x151   : > { %3646 = vmatprep.subr.bf16.mxu0 %v5895_v8  ;;  %3672 = vmatprep.mubr.bf16.mxu0 %v6066_v2  ;;  %v5934_v8 = vld [vmem:[%s7676_s1 + $0xc10] ss:$8 sps:$4 sm:$0xff]  }
 0x153   : > { %2281 = vmatpush1.bf16.msra.mxu1 %v5890_v9  ;;  %v5941_v9 = vld [vmem:[%s7676_s1 + $0x7a4] ss:$8 sps:$4 sm:$0xff]  }
 0x154   : > { %3647 = vmatpush1.bf16.msra.mxu0 %v5893_v10  ;;  %2282 = vmatprep.subr.bf16.mxu1 %v5898_v58  ;;  %v5944_v10 = vld [vmem:[%s7676_s1 + $0xc24] ss:$8 sps:$4 sm:$0xff]  }
 0x155   : > { %3648 = vmatprep.subr.bf16.mxu0 %v5901_v30  ;;  %v6014_v58 = vld [vmem:[%s6184_s19 + $0x80] ss:$12 sps:$4 sm:$0xff]   ;;  %v4698_v30 = vcombine.low %v7008_v15, %v7219_v40  ;;  %v5947_v15 = vld [vmem:[%s7676_s1 + $0x7b4] ss:$8 sps:$4 sm:$0xff]  }
 0x156   : > { %v5950_v40 = vld [vmem:[%s7676_s1 + $0xc34] ss:$8 sps:$4 sm:$0xff]  }
 0x157   : > { %2283 = vmatpush1.bf16.msra.mxu1 %v5896_v32  ;;  %v7375_v32 = vld [vmem:[%s6184_s19 + $0x9c] sm:$0xff] }
 0x158   : > { %3649 = vmatpush1.bf16.msra.mxu0 %v5899_v11  ;;  %2284 = vmatprep.subr.bf16.mxu1 %v5904_v13  ;;  %v7378_v11 = vld [vmem:[%s6184_s19 + $0xa8] sm:$0xff]  ;;  %v7381_v13 = vld [vmem:[%s6184_s19 + $0xb4] sm:$0xff] }
 0x159   : > { %3650 = vmatprep.subr.bf16.mxu0 %v5907_v16  ;;  %v5939_v16 = vld [vmem:[%s7676_s1 + $0x7a0] ss:$8 sps:$4 sm:$0xff]  }
 0x15a   : > { %v7301_v7 = vpop.f32.mrb[24].mxu0 }
 0x15b   : > { %v7303_v23 = vpop.f32.mrb[25].mxu0  ;;  %2285 = vmatpush1.bf16.msra.mxu1 %v5902_v17  ;;  %v5942_v17 = vld [vmem:[%s7676_s1 + $0xc20] ss:$8 sps:$4 sm:$0xff]  }
 0x15c   : > { %v7305_v26 = vpop.f32.mrb[26].mxu0  ;;  %3651 = vmatpush1.bf16.msra.mxu0 %v5905_v18  ;;  %2286 = vmatprep.subr.bf16.mxu1 %v5910_v19  ;;  %v4806_v18 = vcombine.high %v7375_v32, %v7378_v11  ;;  %v5128_v19 = vcombine.high %v7378_v11, %v7381_v13 }
 0x15d   : > { %v7313_v29 = vpop.f32.mrb[27].mxu0  ;;  %3652 = vmatprep.subr.bf16.mxu0 %v5914_v21  ;;  %v5945_v21 = vld [vmem:[%s7676_s1 + $0x7b0] ss:$8 sps:$4 sm:$0xff]  }
 0x15f   : > { %2287 = vmatpush1.bf16.msra.mxu1 %v5908_v27  ;;  %v5948_v27 = vld [vmem:[%s7676_s1 + $0xc30] ss:$8 sps:$4 sm:$0xff]  }
 0x160   : > { %3653 = vmatpush1.bf16.msra.mxu0 %v5912_v28  ;;  %2288 = vmatprep.subr.bf16.mxu1 %v5918_v35  ;;  %v5953_v28 = vld [vmem:[%s7676_s1 + $0x7c4] ss:$8 sps:$4 sm:$0xff]  }
 0x161   : > { %3654 = vmatprep.subr.bf16.mxu0 %v5921_v38  ;;  %v5956_v35 = vld [vmem:[%s7676_s1 + $0xc44] ss:$8 sps:$4 sm:$0xff]   ;;  %v5951_v38 = vld [vmem:[%s7676_s1 + $0x7c0] ss:$8 sps:$4 sm:$0xff]  }
 0x162   : > { %v7333_v52 = vpop.f32.mrb[28].mxu0 }
 0x163   : > { %v7338_v1 = vpop.f32.mrb[29].mxu0  ;;  %2289 = vmatpush1.bf16.msra.mxu1 %v5916_v41  ;;  %v5954_v41 = vld [vmem:[%s7676_s1 + $0xc40] ss:$8 sps:$4 sm:$0xff]  }
 0x164   : > { %3655 = vmatpush1.bf16.msra.mxu0 %v5919_v42  ;;  %v7346_v60 = vpop.f32.mrb[30].mxu0  ;;  %2701 = vmatprep.subr.bf16.mxu1 %v5926_v46  ;;  %v5959_v42 = vld [vmem:[%s7676_s1 + $0x7d4] ss:$8 sps:$4 sm:$0xff]  }
 0x165   : > { %4030 = vmatprep.subr.bf16.mxu0 %v5929_v50  ;;  %v7354_v5 = vpop.f32.mrb[31].mxu0  ;;  %v5962_v46 = vld [vmem:[%s7676_s1 + $0xc54] ss:$8 sps:$4 sm:$0xff]   ;;  %v5957_v50 = vld [vmem:[%s7676_s1 + $0x7d0] ss:$8 sps:$4 sm:$0xff]  }
 0x166   : > { %2291 = vmatmul.mubr.bf16.vlgmr.msra.gmra.mrb[24].mxu1 %v4695_v59  ;;  %v5960_v59 = vld [vmem:[%s7676_s1 + $0xc50] ss:$8 sps:$4 sm:$0xff]  }
 0x167   : > { %3673 = vmatmul.mubr.bf16.vlgmr.msra.gmra.mrb[32].mxu0 %v5930_v63  ;;  %2702 = vmatpush1.bf16.msra.mxu1 %v5924_v12  ;;  %v5965_v63 = vld [vmem:[%s7676_s1 + $0x7e4] ss:$8 sps:$4 sm:$0xff]  }
 0x168   : > { %4031 = vmatpush1.bf16.msra.mxu0 %v5927_v56  ;;  %2703 = vmatprep.subr.bf16.mxu1 %v5933_v14  ;;  %v5968_v12 = vld [vmem:[%s7676_s1 + $0xc64] ss:$8 sps:$4 sm:$0xff]  }
 0x169   : > { %4032 = vmatprep.subr.bf16.mxu0 %v5936_v3  ;;  %2300 = vmatprep.mubr.bf16.mxu1 %v4699_v31 }
 0x16a   : > { %3682 = vmatprep.mubr.bf16.mxu0 %v6066_v2 }
 0x16b   : > { %2704 = vmatpush1.bf16.msra.mxu1 %v5931_v6 }
 0x16c   : > { %4033 = vmatpush1.bf16.msra.mxu0 %v5934_v8  ;;  %2705 = vmatprep.subr.bf16.mxu1 %v5941_v9  ;;  %v5963_v8 = vld [vmem:[%s7676_s1 + $0x7e0] ss:$8 sps:$4 sm:$0xff]  }
 0x16d   : > { %4034 = vmatprep.subr.bf16.mxu0 %v5944_v10  ;;  %v5966_v9 = vld [vmem:[%s7676_s1 + $0xc60] ss:$8 sps:$4 sm:$0xff]  }
 0x16e   : > { %2301 = vmatmul.mubr.bf16.gmra.mrb[28].mxu1 %v4698_v30 }
 0x16f   : > { %3683 = vmatmul.mubr.bf16.gmra.mrb[36].mxu0 %v6014_v58  ;;  %2706 = vmatpush1.bf16.msra.mxu1 %v5939_v16  ;;  %v5974_v58 = vld [vmem:[%s7676_s1 + $0xc74] ss:$8 sps:$4 sm:$0xff]   ;;  %v5972_v16 = vld [vmem:[%s7676_s1 + $0xc70] ss:$8 sps:$4 sm:$0xff]  }
 0x170   : > { %4035 = vmatpush1.bf16.msra.mxu0 %v5942_v17  ;;  %2707 = vmatprep.subr.bf16.mxu1 %v5947_v15  ;;  %v5977_v17 = vld [vmem:[%s7676_s1 + $0x804] ss:$8 sps:$4 sm:$0xff]  }
 0x171   : > { %4036 = vmatprep.subr.bf16.mxu0 %v5950_v40  ;;  %2733 = vmatprep.mubr.bf16.mxu1 %v4806_v18 }
 0x172   : > { %4062 = vmatprep.mubr.bf16.mxu0 %v5128_v19 }
 0x173   : > { %2708 = vmatpush1.bf16.msra.mxu1 %v5945_v21 }
 0x174   : > { %4037 = vmatpush1.bf16.msra.mxu0 %v5948_v27  ;;  %2709 = vmatprep.subr.bf16.mxu1 %v5953_v28  ;;  %v5975_v27 = vld [vmem:[%s7676_s1 + $0x800] ss:$8 sps:$4 sm:$0xff]  }
 0x175   : > { %4038 = vmatprep.subr.bf16.mxu0 %v5956_v35  ;;  %v5978_v28 = vld [vmem:[%s7676_s1 + $0xc80] ss:$8 sps:$4 sm:$0xff]  }
 0x177   : > { %2710 = vmatpush1.bf16.msra.mxu1 %v5951_v38  ;;  %v5986_v38 = vld [vmem:[%s7676_s1 + $0xc94] ss:$8 sps:$4 sm:$0xff]  }
 0x178   : > { %4039 = vmatpush1.bf16.msra.mxu0 %v5954_v41  ;;  %2711 = vmatprep.subr.bf16.mxu1 %v5959_v42  ;;  %v5984_v42 = vld [vmem:[%s7676_s1 + $0xc90] ss:$8 sps:$4 sm:$0xff]  }
 0x179   : > { %4040 = vmatprep.subr.bf16.mxu0 %v5962_v46  ;;  %v970_v56 = vpop.f32.mrb[0].mxu1  ;;  %v5989_v46 = vld [vmem:[%s7676_s1 + $0x824] ss:$8 sps:$4 sm:$0xff]  }
 0x17a   : > { %v7436_v14 = vadd.f32 %v6931_v43, %v970_v56  ;;  %v972_v3 = vpop.f32.mrb[1].mxu1  ;;  %v5993_v56 = vld [vmem:[%s7676_s1 + $0x830] ss:$8 sps:$4 sm:$0xff]  }
 0x17b   : > { %v7439_v31 = vadd.f32 %v6933_v44, %v972_v3  ;;  %v974_v6 = vpop.f32.mrb[2].mxu1  ;;  %2712 = vmatpush1.bf16.msra.mxu1 %v5957_v50  ;;  %v5971_v44 = vld [vmem:[%s7676_s1 + $0x7f4] ss:$8 sps:$4 sm:$0xff]   ;;  %v5987_v50 = vld [vmem:[%s7676_s1 + $0x820] ss:$8 sps:$4 sm:$0xff]  }
 0x17c   : > { %4041 = vmatpush1.bf16.msra.mxu0 %v5960_v59  ;;  %v7448_v10 = vadd.f32 %v6935_v45, %v974_v6  ;;  %v976_v43 = vpop.f32.mrb[3].mxu1  ;;  %2713 = vmatprep.subr.bf16.mxu1 %v5965_v63  ;;  %v5969_v45 = vld [vmem:[%s7676_s1 + $0x7f0] ss:$8 sps:$4 sm:$0xff]   ;;  %v5990_v59 = vld [vmem:[%s7676_s1 + $0xca0] ss:$8 sps:$4 sm:$0xff]  }
 0x17d   : > { %4042 = vmatprep.subr.bf16.mxu0 %v5968_v12  ;;  %v7457_v30 = vadd.f32 %v6943_v48, %v976_v43  ;;  %v5980_v48 = vld [vmem:[%s7676_s1 + $0xc84] ss:$8 sps:$4 sm:$0xff]   ;;  %v5995_v63 = vld [vmem:[%s7676_s1 + $0x834] ss:$8 sps:$4 sm:$0xff]   ;;  %v5996_v3 = vld [vmem:[%s7676_s1 + $0xcb0] ss:$8 sps:$4 sm:$0xff]  }
 0x17e   : > { %v5998_v12 = vld [vmem:[%s7676_s1 + $0xcb4] ss:$8 sps:$4 sm:$0xff]   ;;  %v6001_v6 = vld [vmem:[%s7676_s1 + $0x844] ss:$8 sps:$4 sm:$0xff]   ;;  %v6002_v43 = vld [vmem:[%s7676_s1 + $0xcc0] ss:$8 sps:$4 sm:$0xff]  }
 0x17f   : > { %2714 = vmatpush1.bf16.msra.mxu1 %v5963_v8  ;;  %v6004_v8 = vld [vmem:[%s7676_s1 + $0xcc4] ss:$8 sps:$4 sm:$0xff]  }
 0x180   : > { %4043 = vmatpush1.bf16.msra.mxu0 %v5966_v9  ;;  %2715 = vmatprep.subr.bf16.mxu1 %v5971_v44  ;;  %v5999_v9 = vld [vmem:[%s7676_s1 + $0x840] ss:$8 sps:$4 sm:$0xff]   ;;  %v6007_v44 = vld [vmem:[%s7676_s1 + $0x854] ss:$8 sps:$4 sm:$0xff]  }
 0x181   : > { %4044 = vmatprep.subr.bf16.mxu0 %v5974_v58  ;;  %v980_v15 = vpop.f32.mrb[4].mxu1  ;;  %v6010_v58 = vld [vmem:[%s7676_s1 + $0xcd4] ss:$8 sps:$4 sm:$0xff]  }
 0x182   : > { %v7472_v40 = vadd.f32 %v6963_v55, %v980_v15  ;;  %v982_v18 = vpop.f32.mrb[5].mxu1  ;;  %v6011_v15 = vld [vmem:[%s7676_s1 + $0x860] ss:$8 sps:$4 sm:$0xff]  }
 0x183   : > { %v7475_v19 = vadd.f32 %v6969_v62, %v982_v18  ;;  %v984_v21 = vpop.f32.mrb[6].mxu1  ;;  %2716 = vmatpush1.bf16.msra.mxu1 %v5969_v45  ;;  %v5983_v62 = vld [vmem:[%s7676_s1 + $0x814] ss:$8 sps:$4 sm:$0xff]   ;;  %v6005_v45 = vld [vmem:[%s7676_s1 + $0x850] ss:$8 sps:$4 sm:$0xff]  }
 0x184   : > { %4045 = vmatpush1.bf16.msra.mxu0 %v5972_v16  ;;  %v7484_v35 = vadd.f32 %v6974_v0, %v984_v21  ;;  %v986_v55 = vpop.f32.mrb[7].mxu1  ;;  %2717 = vmatprep.subr.bf16.mxu1 %v5977_v17  ;;  %v5981_v0 = vld [vmem:[%s7676_s1 + $0x810] ss:$8 sps:$4 sm:$0xff]   ;;  %v6013_v17 = vld [vmem:[%s7676_s1 + $0x864] ss:$8 sps:$4 sm:$0xff]  }
 0x185   : > { %4046 = vmatprep.subr.bf16.mxu0 %v5980_v48  ;;  %v7493_v41 = vadd.f32 %v6982_v4, %v986_v55  ;;  %v5992_v4 = vld [vmem:[%s7676_s1 + $0xca4] ss:$8 sps:$4 sm:$0xff]   ;;  %v6008_v16 = vld [vmem:[%s7676_s1 + $0xcd0] ss:$8 sps:$4 sm:$0xff]   ;;  %v6015_v18 = vld [vmem:[%s7676_s1 + $0xce0] ss:$8 sps:$4 sm:$0xff]  }
 0x186   : > { %v6017_v48 = vld [vmem:[%s7676_s1 + $0xce4] ss:$8 sps:$4 sm:$0xff]   ;;  %v6020_v21 = vld [vmem:[%s7676_s1 + $0x874] ss:$8 sps:$4 sm:$0xff]   ;;  %v6021_v55 = vld [vmem:[%s7676_s1 + $0xcf0] ss:$8 sps:$4 sm:$0xff]  }
 0x187   : > { %2718 = vmatpush1.bf16.msra.mxu1 %v5975_v27  ;;  %v6023_v27 = vld [vmem:[%s7676_s1 + $0xcf4] ss:$8 sps:$4 sm:$0xff]  }
 0x188   : > { %4047 = vmatpush1.bf16.msra.mxu0 %v5978_v28  ;;  %2719 = vmatprep.subr.bf16.mxu1 %v5983_v62  ;;  %v6018_v28 = vld [vmem:[%s7676_s1 + $0x870] ss:$8 sps:$4 sm:$0xff]   ;;  %v6030_v62 = vld [vmem:[%s7676_s1 + $0xd04] ss:$8 sps:$4 sm:$0xff]  }
 0x189   : > { %4048 = vmatprep.subr.bf16.mxu0 %v5986_v38  ;;  %v4805_v38 = vcombine.low %v7375_v32, %v7378_v11 }
 0x18b   : > { %2720 = vmatpush1.bf16.msra.mxu1 %v5981_v0  ;;  %v5127_v0 = vcombine.low %v7378_v11, %v7381_v13  ;;  %v6031_v11 = vld [vmem:[%s7676_s1 + $0xd10] ss:$8 sps:$4 sm:$0xff]  }
 0x18c   : > { %4049 = vmatpush1.bf16.msra.mxu0 %v5984_v42  ;;  %2721 = vmatprep.subr.bf16.mxu1 %v5989_v46  ;;  %v4755_v42 = vld [vmem:[%s6184_s19 + $0xc0] sm:$0xff]  ;;  %v5077_v46 = vld [vmem:[%s6184_s19 + $0xcc] sm:$0xff] }
 0x18d   : > { %4050 = vmatprep.subr.bf16.mxu0 %v5992_v4  ;;  %v6028_v4 = vld [vmem:[%s7676_s1 + $0xd00] ss:$8 sps:$4 sm:$0xff]   ;;  %v5131_v32 = vcombine.high %v4755_v42, %v5077_v46 }
 0x18f   : > { %2722 = vmatpush1.bf16.msra.mxu1 %v5987_v50  ;;  %v6033_v50 = vld [vmem:[%s7676_s1 + $0xd14] ss:$8 sps:$4 sm:$0xff]  }
 0x190   : > { %4051 = vmatpush1.bf16.msra.mxu0 %v5990_v59  ;;  %2723 = vmatprep.subr.bf16.mxu1 %v5995_v63  ;;  %v4809_v59 = vcombine.high %v7381_v13, %v4755_v42  ;;  %v6040_v63 = vld [vmem:[%s7676_s1 + $0xd24] ss:$8 sps:$4 sm:$0xff]  }
 0x191   : > { %4052 = vmatprep.subr.bf16.mxu0 %v5998_v12  ;;  %v4808_v12 = vcombine.low %v7381_v13, %v4755_v42  ;;  %v6041_v13 = vld [vmem:[%s7676_s1 + $0xd30] ss:$8 sps:$4 sm:$0xff]  }
 0x193   : > { %2724 = vmatpush1.bf16.msra.mxu1 %v5993_v56  ;;  %v5130_v56 = vcombine.low %v4755_v42, %v5077_v46  ;;  %v6056_v42 = vld [vmem:[%s6184_s19 + $0xb0] ss:$12 sps:$4 sm:$0xff]  }
 0x194   : > { %4053 = vmatpush1.bf16.msra.mxu0 %v5996_v3  ;;  %2725 = vmatprep.subr.bf16.mxu1 %v6001_v6  ;;  %v6038_v3 = vld [vmem:[%s7676_s1 + $0xd20] ss:$8 sps:$4 sm:$0xff]   ;;  %v6043_v6 = vld [vmem:[%s7676_s1 + $0xd34] ss:$8 sps:$4 sm:$0xff]  }
 0x195   : > { %4054 = vmatprep.subr.bf16.mxu0 %v6004_v8  ;;  %v6046_v8 = vld [vmem:[%s7676_s1 + $0xd44] ss:$8 sps:$4 sm:$0xff]  }
 0x197   : > { %2726 = vmatpush1.bf16.msra.mxu1 %v5999_v9  ;;  %v6044_v9 = vld [vmem:[%s7676_s1 + $0xd40] ss:$8 sps:$4 sm:$0xff]  }
 0x198   : > { %4055 = vmatpush1.bf16.msra.mxu0 %v6002_v43  ;;  %2727 = vmatprep.subr.bf16.mxu1 %v6007_v44  ;;  %v6049_v43 = vld [vmem:[%s7676_s1 + $0xd54] ss:$8 sps:$4 sm:$0xff]   ;;  %v6047_v44 = vld [vmem:[%s7676_s1 + $0xd50] ss:$8 sps:$4 sm:$0xff]  }
 0x199   : > { %4056 = vmatprep.subr.bf16.mxu0 %v6010_v58 }
 0x19b   : > { %2728 = vmatpush1.bf16.msra.mxu1 %v6005_v45 }
 0x19c   : > { %4057 = vmatpush1.bf16.msra.mxu0 %v6008_v16  ;;  %2729 = vmatprep.subr.bf16.mxu1 %v6013_v17 }
 0x19d   : > { %4058 = vmatprep.subr.bf16.mxu0 %v6017_v48 }
 0x19f   : > { %2730 = vmatpush1.bf16.msra.mxu1 %v6011_v15  ;;  %v6050_v15 = vld [vmem:[%s7676_s1 + $0xd60] ss:$8 sps:$4 sm:$0xff]  }
 0x1a0   : > { %4059 = vmatpush1.bf16.msra.mxu0 %v6015_v18  ;;  %2731 = vmatprep.subr.bf16.mxu1 %v6020_v21 }
 0x1a1   : > { %4060 = vmatprep.subr.bf16.mxu0 %v6023_v27 }
 0x1a3   : > { %2732 = vmatpush1.bf16.msra.mxu1 %v6018_v28 }
 0x1a4   : > { %4061 = vmatpush1.bf16.msra.mxu0 %v6021_v55  ;;  %5192 = vmatprep.subr.bf16.mxu1 %v6030_v62 }
 0x1a5   : > { %4083 = vmatprep.subr.bf16.mxu0 %v6030_v62 }
 0x1a6   : > { %2734 = vmatmul.mubr.bf16.vlgmr.msra.gmra.mrb[32].mxu1 %v4805_v38 }
 0x1a7   : > { %4063 = vmatmul.mubr.bf16.vlgmr.msra.gmra.mrb[32].mxu0 %v5127_v0  ;;  %5200 = vmatpush1.bf16.msra.mxu1 %v6028_v4 }
 0x1a8   : > { %4084 = vmatpush1.bf16.msra.mxu0 %v6028_v4  ;;  %5193 = vmatprep.subr.bf16.mxu1 %v6033_v50 }
 0x1a9   : > { %4085 = vmatprep.subr.bf16.mxu0 %v6033_v50  ;;  %2743 = vmatprep.mubr.bf16.mxu1 %v4809_v59 }
 0x1aa   : > { %4072 = vmatprep.mubr.bf16.mxu0 %v5131_v32 }
 0x1ab   : > { %5201 = vmatpush1.bf16.msra.mxu1 %v6031_v11 }
 0x1ac   : > { %4086 = vmatpush1.bf16.msra.mxu0 %v6031_v11  ;;  %5194 = vmatprep.subr.bf16.mxu1 %v6040_v63 }
 0x1ad   : > { %4087 = vmatprep.subr.bf16.mxu0 %v6040_v63 }
 0x1ae   : > { %2744 = vmatmul.mubr.bf16.gmra.mrb[36].mxu1 %v4808_v12 }
 0x1af   : > { %4073 = vmatmul.mubr.bf16.gmra.mrb[36].mxu0 %v5130_v56  ;;  %5202 = vmatpush1.bf16.msra.mxu1 %v6038_v3 }
 0x1b0   : > { %4088 = vmatpush1.bf16.msra.mxu0 %v6038_v3  ;;  %5195 = vmatprep.subr.bf16.mxu1 %v6043_v6 }
 0x1b1   : > { %4089 = vmatprep.subr.bf16.mxu0 %v6043_v6  ;;  %4115 = vmatprep.mubr.bf16.mxu0 %v6066_v2 }
 0x1b2   : > { %4125 = vmatprep.mubr.bf16.mxu1 %v6066_v2  ;;  %v6052_v2 = vld [vmem:[%s7676_s1 + $0xd64] ss:$8 sps:$4 sm:$0xff]  }
 0x1b3   : > { %5203 = vmatpush1.bf16.msra.mxu1 %v6041_v13 }
 0x1b4   : > { %4090 = vmatpush1.bf16.msra.mxu0 %v6041_v13  ;;  %5196 = vmatprep.subr.bf16.mxu1 %v6046_v8 }
 0x1b5   : > { %4091 = vmatprep.subr.bf16.mxu0 %v6046_v8 }
 0x1b7   : > { %5204 = vmatpush1.bf16.msra.mxu1 %v6044_v9 }
 0x1b8   : > { %4092 = vmatpush1.bf16.msra.mxu0 %v6044_v9  ;;  %5197 = vmatprep.subr.bf16.mxu1 %v6049_v43 }
 0x1b9   : > { %4093 = vmatprep.subr.bf16.mxu0 %v6049_v43  ;;  %v1406_v58 = vpop.f32.mrb[8].mxu1 }
 0x1ba   : > { %v5209_v45 = vadd.f32 %v7436_v14, %v1406_v58  ;;  %v1408_v16 = vpop.f32.mrb[9].mxu1  ;;  %v6055_v14 = vld [vmem:[%s7676_s1 + $0xd74] ss:$8 sps:$4 sm:$0xff]  }
 0x1bb   : > { %v5218_v17 = vadd.f32 %v7439_v31, %v1408_v16  ;;  %v1410_v48 = vpop.f32.mrb[10].mxu1  ;;  %5205 = vmatpush1.bf16.msra.mxu1 %v6047_v44 }
 0x1bc   : > { %4094 = vmatpush1.bf16.msra.mxu0 %v6047_v44  ;;  %v5227_v18 = vadd.f32 %v7448_v10, %v1410_v48  ;;  %v1412_v21 = vpop.f32.mrb[11].mxu1  ;;  %5198 = vmatprep.subr.bf16.mxu1 %v6052_v2  ;;  %v5210_v31 = vadd.f32 %v5209_v45, %v7054_v33  ;;  %v6053_v10 = vld [vmem:[%s7676_s1 + $0xd70] ss:$8 sps:$4 sm:$0xff]  }
 0x1bd   : > { %4095 = vmatprep.subr.bf16.mxu0 %v6052_v2  ;;  %v5236_v27 = vadd.f32 %v7457_v30, %v1412_v21  ;;  %v5219_v28 = vadd.f32 %v5218_v17, %v7056_v34  ;;  %v6057_v30 = vld [vmem:[%s6184_s19 + $0xc8] ss:$12 sps:$4 sm:$0xff]  }
 0x1be   : > { %v5228_v55 = vadd.f32 %v5227_v18, %v7064_v37 }
 0x1bf   : > { %5206 = vmatpush1.bf16.msra.mxu1 %v6050_v15  ;;  %v5237_v62 = vadd.f32 %v5236_v27, %v7069_v61 }
 0x1c0   : > { %4096 = vmatpush1.bf16.msra.mxu0 %v6050_v15  ;;  %5199 = vmatprep.subr.bf16.mxu1 %v6055_v14 }
 0x1c1   : > { %4097 = vmatprep.subr.bf16.mxu0 %v6055_v14  ;;  %v1416_v38 = vpop.f32.mrb[12].mxu1 }
 0x1c2   : > { %v5245_v0 = vadd.f32 %v7472_v40, %v1416_v38  ;;  %v1418_v33 = vpop.f32.mrb[13].mxu1 }
 0x1c3   : > { %v5255_v34 = vadd.f32 %v7475_v19, %v1418_v33  ;;  %v1420_v46 = vpop.f32.mrb[14].mxu1  ;;  %5207 = vmatpush1.bf16.msra.mxu1 %v6053_v10 }
 0x1c4   : > { %4098 = vmatpush1.bf16.msra.mxu0 %v6053_v10  ;;  %v5265_v37 = vadd.f32 %v7484_v35, %v1420_v46  ;;  %v1422_v4 = vpop.f32.mrb[15].mxu1  ;;  %v5246_v50 = vadd.f32 %v5245_v0, %v7086_v47 }
 0x1c5   : > { %v5275_v61 = vadd.f32 %v7493_v41, %v1422_v4  ;;  %v5256_v59 = vadd.f32 %v5255_v34, %v7094_v51 }
 0x1c6   : > { %4126 = vmatmul.mubr.bf16.vlgmr.msra.gmra.mrb[40].mxu1 %v6057_v30  ;;  %v5266_v40 = vadd.f32 %v5265_v37, %v7099_v53 }
 0x1c7   : > { %4116 = vmatmul.mubr.bf16.vlgmr.msra.gmra.mrb[32].mxu0 %v6056_v42  ;;  %v5276_v32 = vadd.f32 %v5275_v61, %v7104_v57 }
 0x1f9   : > { %v1849_v11 = vpop.f32.mrb[16].mxu1 }
 0x1fa   : > { %v5211_v19 = vadd.f32 %v5210_v31, %v1849_v11  ;;  %v1851_v63 = vpop.f32.mrb[17].mxu1 }
 0x1fb   : > { %v5220_v12 = vadd.f32 %v5219_v28, %v1851_v63  ;;  %v1853_v56 = vpop.f32.mrb[18].mxu1 }
 0x1fc   : > { %v5229_v3 = vadd.f32 %v5228_v55, %v1853_v56  ;;  %v1855_v35 = vpop.f32.mrb[19].mxu1  ;;  %v5212_v6 = vadd.f32 %v5211_v19, %v7180_v20 }
 0x1fd   : > { %v5238_v47 = vadd.f32 %v5237_v62, %v1855_v35  ;;  %v5221_v41 = vadd.f32 %v5220_v12, %v7185_v22 }
 0x1fe   : > { %v5230_v51 = vadd.f32 %v5229_v3, %v7193_v24 }
 0x1ff   : > { %v5239_v13 = vadd.f32 %v5238_v47, %v7195_v25  ;;  %v4146_v47 = vlaneseq }
 0x201   : > { %v1859_v8 = vpop.f32.mrb[20].mxu1 }
 0x202   : > { %v5247_v53 = vadd.f32 %v5246_v50, %v1859_v8  ;;  %v1861_v9 = vpop.f32.mrb[21].mxu1 }
 0x203   : > { %v5257_v57 = vadd.f32 %v5256_v59, %v1861_v9  ;;  %v1863_v43 = vpop.f32.mrb[22].mxu1 }
 0x204   : > { %v5267_v44 = vadd.f32 %v5266_v40, %v1863_v43  ;;  %v1865_v2 = vpop.f32.mrb[23].mxu1  ;;  %v5248_v58 = vadd.f32 %v5247_v53, %v7212_v36 }
 0x205   : > { %v5277_v45 = vadd.f32 %v5276_v32, %v1865_v2  ;;  %v5258_v16 = vadd.f32 %v5257_v57, %v7216_v39 }
 0x206   : > { %v5268_v20 = vadd.f32 %v5267_v44, %v7228_v49 }
 0x207   : > { %v5278_v22 = vadd.f32 %v5277_v45, %v7236_v54 }
 0x239   : > { %v2292_v17 = vpop.f32.mrb[24].mxu1 }
 0x23a   : > { %v5213_v24 = vadd.f32 %v5212_v6, %v2292_v17  ;;  %v2294_v48 = vpop.f32.mrb[25].mxu1 }
 0x23b   : > { %v5222_v25 = vadd.f32 %v5221_v41, %v2294_v48  ;;  %v2296_v15 = vpop.f32.mrb[26].mxu1  ;;  %v4147_v41 = vshrl.u32 %v4146_v47, 7 }
 0x23c   : > { %v5231_v18 = vadd.f32 %v5230_v51, %v2296_v15  ;;  %v2298_v21 = vpop.f32.mrb[27].mxu1  ;;  %v5214_v14 = vadd.f32 %v5213_v24, %v7301_v7 }
 0x23d   : > { %v5240_v31 = vadd.f32 %v5239_v13, %v2298_v21  ;;  %v5223_v27 = vadd.f32 %v5222_v25, %v7303_v23  ;;  %v4148_v51 = vsub.s32 0, %v4147_v41  ;;  %v4144_v13 = vld [vmem:[%s7677_s2] sm:$0x3]  ;;  %v4152_v8 = vsub.s32 1, %v4147_v41 }
 0x23e   : > { %v5232_v36 = vadd.f32 %v5231_v18, %v7305_v26 }
 0x23f   : > { %v5241_v39 = vadd.f32 %v5240_v31, %v7313_v29  ;;  %v4149_v53 = vrot.slane %v4144_v13, %v4148_v51  ;;  %v4153_v43 = vrot.slane %v4144_v13, %v4152_v8 }
 0x241   : > { %v2302_v28 = vpop.f32.mrb[28].mxu1 }
 0x242   : > { %v5249_v49 = vadd.f32 %v5248_v58, %v2302_v28  ;;  %v2304_v55 = vpop.f32.mrb[29].mxu1 }
 0x243   : > { %v5259_v54 = vadd.f32 %v5258_v16, %v2304_v55  ;;  %v2306_v10 = vpop.f32.mrb[30].mxu1 }
 0x244   : > { %v5269_v62 = vadd.f32 %v5268_v20, %v2306_v10  ;;  %v2308_v38 = vpop.f32.mrb[31].mxu1  ;;  %v5250_v0 = vadd.f32 %v5249_v49, %v7333_v52 }
 0x245   : > { %v5279_v33 = vadd.f32 %v5278_v22, %v2308_v38  ;;  %v5260_v42 = vadd.f32 %v5259_v54, %v7338_v1 }
 0x246   : > { %v5270_v7 = vadd.f32 %v5269_v62, %v7346_v60 }
 0x247   : > { %v5280_v23 = vadd.f32 %v5279_v33, %v7354_v5 }
 0x279   : > { %v2735_v30 = vpop.f32.mrb[32].mxu1 }
 0x27a   : > { %v5215_v26 = vadd.f32 %v5214_v14, %v2735_v30  ;;  %v2737_v34 = vpop.f32.mrb[33].mxu1 }
 0x27b   : > { %v5224_v29 = vadd.f32 %v5223_v27, %v2737_v34  ;;  %v2739_v46 = vpop.f32.mrb[34].mxu1 }
 0x27c   : > { %v5233_v37 = vadd.f32 %v5232_v36, %v2739_v46  ;;  %v2741_v4 = vpop.f32.mrb[35].mxu1 }
 0x27d   : > { %v5242_v50 = vadd.f32 %v5241_v39, %v2741_v4 }
 0x281   : > { %v2745_v61 = vpop.f32.mrb[36].mxu1 }
 0x282   : > { %v4074_v59 = vpop.f32.mrb[36].mxu0  ;;  %v5251_v40 = vadd.f32 %v5250_v0, %v2745_v61  ;;  %v2747_v32 = vpop.f32.mrb[37].mxu1 }
 0x283   : > { %v4076_v52 = vpop.f32.mrb[37].mxu0  ;;  %v5261_v11 = vadd.f32 %v5260_v42, %v2747_v32  ;;  %v2749_v19 = vpop.f32.mrb[38].mxu1 }
 0x284   : > { %v4078_v1 = vpop.f32.mrb[38].mxu0  ;;  %v5252_v63 = vadd.f32 %v5251_v40, %v4074_v59  ;;  %v5271_v60 = vadd.f32 %v5270_v7, %v2749_v19  ;;  %v2751_v12 = vpop.f32.mrb[39].mxu1 }
 0x285   : > { %v4080_v5 = vpop.f32.mrb[39].mxu0  ;;  %v5262_v56 = vadd.f32 %v5261_v11, %v4076_v52  ;;  %v5281_v3 = vadd.f32 %v5280_v23, %v2751_v12 }
 0x286   : > { %v5272_v35 = vadd.f32 %v5271_v60, %v4078_v1 }
 0x287   : > { %v5282_v6 = vadd.f32 %v5281_v3, %v4080_v5 }
 0x299   : > { %v4127_v57 = vpop.f32.mrb[40].mxu1 }
 0x29a   : > { %v4117_v9 = vpop.f32.mrb[32].mxu0  ;;  %v5253_v2 = vadd.f32 %v5252_v63, %v4127_v57  ;;  %v4129_v45 = vpop.f32.mrb[41].mxu1 }
 0x29b   : > { %v5216_v44 = vadd.f32 %v5215_v26, %v4117_v9  ;;  %v4119_v58 = vpop.f32.mrb[33].mxu0  ;;  %v5263_v20 = vadd.f32 %v5262_v56, %v4129_v45  ;;  %v4131_v17 = vpop.f32.mrb[42].mxu1 }
 0x29c   : > { %v5225_v16 = vadd.f32 %v5224_v29, %v4119_v58  ;;  %v4121_v22 = vpop.f32.mrb[34].mxu0  ;;  %v4160_v48 = vadd.f32 %v5253_v2, %v4149_v53  ;;  %v5273_v15 = vadd.f32 %v5272_v35, %v4131_v17  ;;  %v4133_v21 = vpop.f32.mrb[43].mxu1 }
 0x29d   : > { %v4156_v24 = vadd.f32 %v5216_v44, %v4149_v53  ;;  %v5234_v25 = vadd.f32 %v5233_v37, %v4121_v22  ;;  %v4123_v18 = vpop.f32.mrb[35].mxu0  ;;  %v4161_v31 = vadd.f32 %v5263_v20, %v4153_v43  ;;  %v5283_v36 = vadd.f32 %v5282_v6, %v4133_v21 }
 0x29e   : > { %v4157_v14 = vadd.f32 %v5225_v16, %v4153_v43  ;;  %v5243_v27 = vadd.f32 %v5242_v50, %v4123_v18  ;;  %v4168_v28 = vmax.f32 %v4160_v48, 0.0  ;;  %v4162_v55 = vadd.f32 %v5273_v15, %v4149_v53 }
 0x29f   : > { %v4164_v39 = vmax.f32 %v4156_v24, 0.0  ;;  %v4158_v49 = vadd.f32 %v5234_v25, %v4149_v53  ;;  %v4169_v10 = vmax.f32 %v4161_v31, 0.0  ;;  %v4163_v38 = vadd.f32 %v5283_v36, %v4153_v43 }
 0x2a0   : > { %v4165_v54 = vmax.f32 %v4157_v14, 0.0  ;;  %v4159_v62 = vadd.f32 %v5243_v27, %v4153_v43  ;;  %v4170_v33 = vmax.f32 %v4162_v55, 0.0 }
 0x2a1   : > { %v4166_v0 = vmax.f32 %v4158_v49, 0.0  ;;  %v5190_v7 = vpack.c.bf16 %v4169_v10, %v4168_v28  ;;  %v4171_v30 = vmax.f32 %v4163_v38, 0.0 }
 0x2a2   : > { %v5188_v42 = vpack.c.bf16 %v4165_v54, %v4164_v39  ;;  %v4167_v23 = vmax.f32 %v4159_v62, 0.0 }
 0x2a3   : > { %4198 = vst [vmem:[%s170_s20 + $0x10] sm:$0xff] %v5190_v7  ;;  %v5191_v34 = vpack.c.bf16 %v4171_v30, %v4170_v33 }
 0x2a4   : > { %4196 = vst [vmem:[%s170_s20] sm:$0xff] %v5188_v42  ;;  %v5189_v26 = vpack.c.bf16 %v4167_v23, %v4166_v0 }
 0x2a5   : > { %4199 = vst [vmem:[%s170_s20 + $0x18] sm:$0xff] %v5191_v34 }
 0x2a6   : > { %4197 = vst [vmem:[%s170_s20 + $0x8] sm:$0xff] %v5189_v26 }
 0x2a7 PF: > { %s13_s12 = sadd.s32 1, %s6064_s12  }
 0x2a8   : > { %p10_p4 = scmp.ge.s32.totalorder %s13_s12, 4  }
 0x2aa   :  { %12 = sbr.rel (!%p10_p4) target bundleno = 1 (0x1), region = 72 }

// kernel: net_forward.34
= control target key start
LH: loop header
LB: loop body
LE: loop exit
PB: predicated region body
PF: predicated region fallthrough
CT: control target
= control target key end

     0   :  { %s2335_s18 = smov 0   ;;  %s2337_s19 = smov 0   ;;  %s2868_s0 = inlined_call_operand.vmem [shape: bf16[32,1536], index: 0, kind: input, shape index: {}]   ;;  %s2869_s1 = inlined_call_operand.vmem [shape: bf16[32,384], index: 1, kind: input, shape index: {}]   ;;  %s2870_s2 = inlined_call_operand.vmem [shape: bf16[384,384], index: 2, kind: input, shape index: {}]   ;;  %s2871_s3 = inlined_call_operand.vmem [shape: bf16[384,384], index: 3, kind: input, shape index: {}]   ;;  %s2872_s4 = inlined_call_operand.vmem [shape: f32[1,384], index: 4, kind: input, shape index: {}]   ;;  %s2873_s5 = inlined_call_operand.vmem [shape: bf16[32,384], index: 5, kind: output, shape index: {}]  }
   0x1   :  { %s2339_s20 = smov 0  }
   0x2 LB: > { %s1758_s21 = sadd.s32 4294967295, %s2300_s20   ;;  %s2352_s22 = sadd.s32 1, %s2300_s20   ;;  %s2300_s20 = sphi %s2339_s20, %s2876_s20   ;;  %s2296_s19 = sphi %s2337_s19, %s2875_s19   ;;  %s2292_s18 = sphi %s2335_s18, %s2874_s18  }
   0x3   : > { %s19_s23 = ssub.s32 %s2300_s20, %s2352_s22  ;;  %s22_s24 = sadd.s32 1, %s2296_s19 }
   0x4   : > { %p20_p0 = scmp.eq.s32.totalorder %s19_s23, 0  ;;  %p29_p1 = scmp.ne.s32.totalorder %s2296_s19, %s2292_s18 }
   0x5   : > { %p30_p2 = scmp.eq.s32.totalorder %s2300_s20, 0  ;;  %p1761_p4 = scmp.ge.s32.totalorder %s2300_s20, 2 }
   0x6   : > { %s2361_s25 = scalar_select %p20_p0, %s2296_s19, %s22_s24  }
   0x7   : > { %p31_p3 = por %p30_p2, %p29_p1  ;;  %179 = sbr.rel (%p1761_p4) target bundleno = 21 (0x15), region = 28 }
   0xe   : > { %182 = sbr.rel (!%p31_p3) target bundleno = 21 (0x15), region = 32  ;;  %s184_s26 = sand.u32 (%p31_p3), 1, %s2296_s19  }
   0xf   : > { %s1762_s27 = smul.u32 (%p31_p3), 96, %s2300_s20 }
  0x10   : > { %s2048_s28 = smul.u32 (%p31_p3), 24, %s184_s26 }
  0x11   : > { %s1703_s6 = scalar_lea.vmem (%p31_p3), %s2868_s0, %s1762_s27 }
  0x12   : > { %v1763_v0 = vld [vmem:[%s1703_s6 + $0x18] sm:$0xff] (%p31_p3)  ;;  %v1764_v1 = vld [vmem:[%s1703_s6 + $0x48] sm:$0xff] (%p31_p3)  ;;  %v1765_v2 = vld [vmem:[%s1703_s6 + $0x20] sm:$0xf] (%p31_p3)  ;;  %s186_s7 = scalar_lea.vmem (%p31_p3), [#allocation2], %s2048_s28 }
  0x13   : > { %207 = vst [vmem:[%s186_s7] sm:$0xff] (%p31_p3), %v1763_v0  ;;  %209 = vst [vmem:[%s186_s7 + $0xc] sm:$0xff] (%p31_p3), %v1764_v1  ;;  %v1767_v3 = vld [vmem:[%s1703_s6 + $0x50] sm:$0xf] (%p31_p3) }
  0x14   : > { %1766 = vst [vmem:[%s186_s7 + $0x8] sm:$0xf] (%p31_p3), %v1765_v2  ;;  %1768 = vst [vmem:[%s186_s7 + $0x14] sm:$0xf] (%p31_p3), %v1767_v3 }
  0x15 PF: > { %p1769_p5 = scmp.ge.s32.totalorder %s2300_s20, 1  ;;  %p235_p6 = scmp.lt.s32.totalorder %s2300_s20, 3 }
  0x17   : > { %p236_p7 = pnand %p1769_p5, %p235_p6 }
  0x18   : > { %v2078_v4 = vld [vmem:[%s2871_s3 + $0x4] ss:$12 sps:$4 sm:$0xff] (!%p236_p7)   ;;  %v2302_v6 = vmov (!%p236_p7), 0   ;;  %v2082_v7 = vld [vmem:[%s2871_s3] ss:$12 sps:$4 sm:$0xff] (!%p236_p7)   ;;  %s1770_s7 = sshll.u32 (!%p236_p7), %s1758_s21, 1 }
  0x19   : > { %239 = sbr.rel (%p236_p7) target bundleno = 407 (0x197), region = 62  ;;  %v2080_v5 = vld [vmem:[%s2871_s3 + $0x184] ss:$12 sps:$4 sm:$0xff] (!%p236_p7)   ;;  %967 = vmatprep.mubr.bf16.mxu1 (!%p236_p7), %v2302_v6  ;;  %892 = vmatprep.subr.bf16.mxu0 (!%p236_p7), %v2078_v4  ;;  %v2083_v8 = vld [vmem:[%s2871_s3 + $0x180] ss:$12 sps:$4 sm:$0xff] (!%p236_p7)   ;;  %p278_p8 = scmp.lt.s32.totalorder (!%p236_p7), %s1770_s7, 3 }
  0x1a   : > { %935 = vmatprep.subr.bf16.mxu1 (!%p236_p7), %v2080_v5  ;;  %v2084_v9 = vld [vmem:[%s2871_s3 + $0x1c] ss:$12 sps:$4 sm:$0xff] (!%p236_p7)   ;;  %893 = vmatpush1.bf16.msra.mxu0 (!%p236_p7), %v2082_v7  ;;  %v2088_v11 = vld [vmem:[%s2871_s3 + $0x18] ss:$12 sps:$4 sm:$0xff] (!%p236_p7)   ;;  %v2090_v13 = vld [vmem:[%s2871_s3 + $0x34] ss:$12 sps:$4 sm:$0xff] (!%p236_p7)  }
  0x1b   : > { %936 = vmatpush1.bf16.msra.mxu1 (!%p236_p7), %v2083_v8  ;;  %v2086_v10 = vld [vmem:[%s2871_s3 + $0x19c] ss:$12 sps:$4 sm:$0xff] (!%p236_p7)   ;;  %894 = vmatprep.subr.bf16.mxu0 (!%p236_p7), %v2084_v9  ;;  %v2089_v12 = vld [vmem:[%s2871_s3 + $0x198] ss:$12 sps:$4 sm:$0xff] (!%p236_p7)   ;;  %v2092_v14 = vld [vmem:[%s2871_s3 + $0x1b4] ss:$12 sps:$4 sm:$0xff] (!%p236_p7)  }
  0x1c   : > { %937 = vmatprep.subr.bf16.mxu1 (!%p236_p7), %v2086_v10  ;;  %v2094_v15 = vld [vmem:[%s2871_s3 + $0x30] ss:$12 sps:$4 sm:$0xff] (!%p236_p7)   ;;  %v2096_v17 = vld [vmem:[%s2871_s3 + $0x4c] ss:$12 sps:$4 sm:$0xff] (!%p236_p7)   ;;  %v2100_v19 = vld [vmem:[%s2871_s3 + $0x48] ss:$12 sps:$4 sm:$0xff] (!%p236_p7)  }
  0x1d   : > { %v2095_v16 = vld [vmem:[%s2871_s3 + $0x1b0] ss:$12 sps:$4 sm:$0xff] (!%p236_p7)   ;;  %v2098_v18 = vld [vmem:[%s2871_s3 + $0x1cc] ss:$12 sps:$4 sm:$0xff] (!%p236_p7)   ;;  %v2101_v20 = vld [vmem:[%s2871_s3 + $0x1c8] ss:$12 sps:$4 sm:$0xff] (!%p236_p7)  }
  0x1e   : > { %895 = vmatpush1.bf16.msra.mxu0 (!%p236_p7), %v2088_v11  ;;  %v2102_v21 = vld [vmem:[%s2871_s3 + $0x64] ss:$12 sps:$4 sm:$0xff] (!%p236_p7)   ;;  %v2106_v23 = vld [vmem:[%s2871_s3 + $0x60] ss:$12 sps:$4 sm:$0xff] (!%p236_p7)   ;;  %v2108_v25 = vld [vmem:[%s2871_s3 + $0x7c] ss:$12 sps:$4 sm:$0xff] (!%p236_p7)  }
  0x1f   : > { %938 = vmatpush1.bf16.msra.mxu1 (!%p236_p7), %v2089_v12  ;;  %896 = vmatprep.subr.bf16.mxu0 (!%p236_p7), %v2090_v13  ;;  %v2104_v22 = vld [vmem:[%s2871_s3 + $0x1e4] ss:$12 sps:$4 sm:$0xff] (!%p236_p7)   ;;  %v2107_v24 = vld [vmem:[%s2871_s3 + $0x1e0] ss:$12 sps:$4 sm:$0xff] (!%p236_p7)   ;;  %v2110_v26 = vld [vmem:[%s2871_s3 + $0x1fc] ss:$12 sps:$4 sm:$0xff] (!%p236_p7)  }
  0x20   : > { %939 = vmatprep.subr.bf16.mxu1 %v2092_v14  ;;  %s2878_s7 = smov (!%p278_p8, %s1770_s7), 3  ;;  %v2112_v27 = vld [vmem:[%s2871_s3 + $0x78] ss:$12 sps:$4 sm:$0xff]   ;;  %v2114_v29 = vld [vmem:[%s2871_s3 + $0x94] ss:$12 sps:$4 sm:$0xff]   ;;  %v2303_v12 = vmov 0.0  }
  0x21   : > { %s2050_s14 = smul.u32 12, %s2878_s7  ;;  %v2113_v28 = vld [vmem:[%s2871_s3 + $0x1f8] ss:$12 sps:$4 sm:$0xff]   ;;  %v2116_v30 = vld [vmem:[%s2871_s3 + $0x214] ss:$12 sps:$4 sm:$0xff]   ;;  %vm2304_vm0 = vmmov 0  }
  0x22   : > { %897 = vmatpush1.bf16.msra.mxu0 %v2094_v15  ;;  %v2118_v31 = vld [vmem:[%s2871_s3 + $0x90] ss:$12 sps:$4 sm:$0xff]   ;;  %v2120_v33 = vld [vmem:[%s2871_s3 + $0xac] ss:$12 sps:$4 sm:$0xff]   ;;  %v2124_v35 = vld [vmem:[%s2871_s3 + $0xa8] ss:$12 sps:$4 sm:$0xff]  }
  0x23   : > { %940 = vmatpush1.bf16.msra.mxu1 %v2095_v16  ;;  %898 = vmatprep.subr.bf16.mxu0 %v2096_v17  ;;  %s2460_s29 = scalar_lea.vmem %s2869_s1, %s2050_s14  ;;  %v2119_v32 = vld [vmem:[%s2871_s3 + $0x210] ss:$12 sps:$4 sm:$0xff]   ;;  %v2122_v34 = vld [vmem:[%s2871_s3 + $0x22c] ss:$12 sps:$4 sm:$0xff]   ;;  %v2125_v36 = vld [vmem:[%s2871_s3 + $0x228] ss:$12 sps:$4 sm:$0xff]   ;;  %s289_s26 = scalar_lea.vmem %s2873_s5, %s2050_s14 }
  0x24   : > { %941 = vmatprep.subr.bf16.mxu1 %v2098_v18  ;;  %v2126_v37 = vld [vmem:[%s2871_s3 + $0xc4] ss:$12 sps:$4 sm:$0xff]   ;;  %v2484_v38 = vld [vmem:[%s2460_s29 + $0x8] ss:$12 sps:$4 sm:$0xff]   ;;  %v2130_v40 = vld [vmem:[%s2871_s3 + $0xc0] ss:$12 sps:$4 sm:$0xff]  }
  0x25   : > { %v2129_v39 = vld [vmem:[%s2871_s3 + $0xc8] ss:$12 sps:$4 sm:$0xff]   ;;  %v2134_v43 = vld [vmem:[%s2871_s3 + $0xe0] ss:$12 sps:$4 sm:$0xff]   ;;  %v2135_v44 = vld [vmem:[%s2871_s3 + $0xd8] ss:$12 sps:$4 sm:$0xff]  }
  0x26   : > { %899 = vmatpush1.bf16.msra.mxu0 %v2100_v19  ;;  %v2131_v41 = vld [vmem:[%s2871_s3 + $0x8] ss:$12 sps:$4 sm:$0xff]   ;;  %v2136_v45 = vld [vmem:[%s2871_s3 + $0x20] ss:$12 sps:$4 sm:$0xff]   ;;  %v2139_v47 = vld [vmem:[%s2871_s3 + $0xf8] ss:$12 sps:$4 sm:$0xff]  }
  0x27   : > { %942 = vmatpush1.bf16.msra.mxu1 %v2101_v20  ;;  %900 = vmatprep.subr.bf16.mxu0 %v2102_v21  ;;  %v2132_v42 = vld [vmem:[%s2871_s3 + $0xdc] ss:$12 sps:$4 sm:$0xff]   ;;  %v2137_v46 = vld [vmem:[%s2871_s3 + $0xf4] ss:$12 sps:$4 sm:$0xff]   ;;  %v2141_v49 = vld [vmem:[%s2871_s3 + $0x38] ss:$12 sps:$4 sm:$0xff]  }
  0x28   : > { %943 = vmatprep.subr.bf16.mxu1 %v2104_v22  ;;  %v2140_v48 = vld [vmem:[%s2871_s3 + $0xf0] ss:$12 sps:$4 sm:$0xff]   ;;  %v2142_v50 = vld [vmem:[%s2871_s3 + $0x10c] ss:$12 sps:$4 sm:$0xff]   ;;  %v2145_v52 = vld [vmem:[%s2871_s3 + $0x108] ss:$12 sps:$4 sm:$0xff]  }
  0x29   : > { %v2144_v51 = vld [vmem:[%s2871_s3 + $0x110] ss:$12 sps:$4 sm:$0xff]   ;;  %v2149_v55 = vld [vmem:[%s2871_s3 + $0x128] ss:$12 sps:$4 sm:$0xff]   ;;  %v2150_v56 = vld [vmem:[%s2871_s3 + $0x120] ss:$12 sps:$4 sm:$0xff]  }
  0x2a   : > { %901 = vmatpush1.bf16.msra.mxu0 %v2106_v23  ;;  %v2146_v53 = vld [vmem:[%s2871_s3 + $0x50] ss:$12 sps:$4 sm:$0xff]   ;;  %v2151_v57 = vld [vmem:[%s2871_s3 + $0x68] ss:$12 sps:$4 sm:$0xff]   ;;  %v2154_v59 = vld [vmem:[%s2871_s3 + $0x140] ss:$12 sps:$4 sm:$0xff]  }
  0x2b   : > { %944 = vmatpush1.bf16.msra.mxu1 %v2107_v24  ;;  %902 = vmatprep.subr.bf16.mxu0 %v2108_v25  ;;  %v2147_v54 = vld [vmem:[%s2871_s3 + $0x124] ss:$12 sps:$4 sm:$0xff]   ;;  %v2152_v58 = vld [vmem:[%s2871_s3 + $0x13c] ss:$12 sps:$4 sm:$0xff]   ;;  %v2156_v62 = vld [vmem:[%s2871_s3 + $0x80] ss:$12 sps:$4 sm:$0xff]  }
  0x2c   : > { %945 = vmatprep.subr.bf16.mxu1 %v2110_v26  ;;  %v2169_v60 = vld [vmem:[%s2460_s29 + $0x4] ss:$12 sps:$4 sm:$0xff]   ;;  %v2157_v63 = vld [vmem:[%s2871_s3 + $0x154] ss:$12 sps:$4 sm:$0xff]   ;;  %v2162_v3 = vld [vmem:[%s2871_s3 + $0x16c] ss:$12 sps:$4 sm:$0xff]  }
  0x2d   : > { %v2155_v61 = vld [vmem:[%s2871_s3 + $0x138] ss:$12 sps:$4 sm:$0xff]   ;;  %v2160_v1 = vld [vmem:[%s2871_s3 + $0x150] ss:$12 sps:$4 sm:$0xff]   ;;  %924 = vmatprep.mubr.bf16.mxu0 %v2169_v60  ;;  %v2165_v5 = vld [vmem:[%s2871_s3 + $0x168] ss:$12 sps:$4 sm:$0xff]  }
  0x2e   : > { %903 = vmatpush1.bf16.msra.mxu0 %v2112_v27  ;;  %v2159_v0 = vld [vmem:[%s2871_s3 + $0x158] ss:$12 sps:$4 sm:$0xff]   ;;  %v2164_v4 = vld [vmem:[%s2871_s3 + $0x170] ss:$12 sps:$4 sm:$0xff]   ;;  %v2167_v9 = vld [vmem:[%s2460_s29] ss:$12 sps:$4 sm:$0xff]  }
  0x2f   : > { %946 = vmatpush1.bf16.msra.mxu1 %v2113_v28  ;;  %904 = vmatprep.subr.bf16.mxu0 %v2114_v29  ;;  %v2161_v2 = vld [vmem:[%s2871_s3 + $0x98] ss:$12 sps:$4 sm:$0xff]   ;;  %v2166_v7 = vld [vmem:[%s2871_s3 + $0xb0] ss:$12 sps:$4 sm:$0xff]   ;;  %v2170_v10 = vld [vmem:[%s2870_s2] ss:$12 sps:$4 sm:$0xff]  }
  0x30   : > { %947 = vmatprep.subr.bf16.mxu1 %v2116_v30  ;;  %v2172_v8 = vld [vmem:[%s2870_s2 + $0x4] ss:$12 sps:$4 sm:$0xff]   ;;  %v2173_v11 = vld [vmem:[%s2871_s3 + $0x188] ss:$12 sps:$4 sm:$0xff]   ;;  %v2177_v15 = vld [vmem:[%s2871_s3 + $0x1a0] ss:$12 sps:$4 sm:$0xff]  }
  0x31   : > { %v2176_v13 = vld [vmem:[%s2870_s2 + $0x1c] ss:$12 sps:$4 sm:$0xff]   ;;  %v2174_v14 = vld [vmem:[%s2870_s2 + $0x18] ss:$12 sps:$4 sm:$0xff]   ;;  %v2180_v16 = vld [vmem:[%s2870_s2 + $0x34] ss:$12 sps:$4 sm:$0xff]  }
  0x32   : > { %905 = vmatpush1.bf16.msra.mxu0 %v2118_v31  ;;  %v2178_v17 = vld [vmem:[%s2870_s2 + $0x30] ss:$12 sps:$4 sm:$0xff]   ;;  %v2181_v18 = vld [vmem:[%s2871_s3 + $0x1b8] ss:$12 sps:$4 sm:$0xff]   ;;  %v2182_v20 = vld [vmem:[%s2870_s2 + $0x48] ss:$12 sps:$4 sm:$0xff]  }
  0x33   : > { %948 = vmatpush1.bf16.msra.mxu1 %v2119_v32  ;;  %906 = vmatprep.subr.bf16.mxu0 %v2120_v33  ;;  %v2184_v19 = vld [vmem:[%s2870_s2 + $0x4c] ss:$12 sps:$4 sm:$0xff]   ;;  %v2185_v21 = vld [vmem:[%s2871_s3 + $0x1d0] ss:$12 sps:$4 sm:$0xff]   ;;  %v2189_v24 = vld [vmem:[%s2871_s3 + $0x1e8] ss:$12 sps:$4 sm:$0xff]  }
  0x34   : > { %949 = vmatprep.subr.bf16.mxu1 %v2122_v34  ;;  %v2188_v22 = vld [vmem:[%s2870_s2 + $0x64] ss:$12 sps:$4 sm:$0xff]   ;;  %v2186_v23 = vld [vmem:[%s2870_s2 + $0x60] ss:$12 sps:$4 sm:$0xff]   ;;  %v2192_v25 = vld [vmem:[%s2870_s2 + $0x7c] ss:$12 sps:$4 sm:$0xff]  }
  0x35   : > { %v2190_v26 = vld [vmem:[%s2870_s2 + $0x78] ss:$12 sps:$4 sm:$0xff]   ;;  %s242_s30 = sand.u32 1, %s2292_s18   ;;  %v2193_v27 = vld [vmem:[%s2871_s3 + $0x200] ss:$12 sps:$4 sm:$0xff]  }
  0x36   : > { %907 = vmatpush1.bf16.msra.mxu0 %v2124_v35  ;;  %v2196_v28 = vld [vmem:[%s2870_s2 + $0x94] ss:$12 sps:$4 sm:$0xff]   ;;  %s2049_s11 = smul.u32 24, %s242_s30  ;;  %v2194_v29 = vld [vmem:[%s2870_s2 + $0x90] ss:$12 sps:$4 sm:$0xff]  }
  0x37   : > { %950 = vmatpush1.bf16.msra.mxu1 %v2125_v36  ;;  %908 = vmatprep.subr.bf16.mxu0 %v2126_v37  ;;  %v2197_v30 = vld [vmem:[%s2871_s3 + $0x218] ss:$12 sps:$4 sm:$0xff]   ;;  %v2198_v32 = vld [vmem:[%s2870_s2 + $0xa8] ss:$12 sps:$4 sm:$0xff]   ;;  %v2201_v33 = vld [vmem:[%s2871_s3 + $0x230] ss:$12 sps:$4 sm:$0xff]  }
  0x38   : > { %1934 = vmatprep.subr.bf16.mxu1 %v2129_v39  ;;  %v2200_v31 = vld [vmem:[%s2870_s2 + $0xac] ss:$12 sps:$4 sm:$0xff]   ;;  %v2204_v34 = vld [vmem:[%s2870_s2 + $0xc4] ss:$12 sps:$4 sm:$0xff]   ;;  %v2205_v35 = vld [vmem:[%s2870_s2 + $0xc8] ss:$12 sps:$4 sm:$0xff]  }
  0x39   : > { %v2202_v36 = vld [vmem:[%s2870_s2 + $0xc0] ss:$12 sps:$4 sm:$0xff]   ;;  %v2206_v37 = vld [vmem:[%s2870_s2 + $0x8] ss:$12 sps:$4 sm:$0xff]   ;;  %s2677_s10 = scalar_lea.vmem [#allocation2], %s2049_s11 }
  0x3a   : > { %968 = vmatmul.mubr.bf16.vlgmr.msra.gmra.mrb[0].mxu1 %v2484_v38  ;;  %909 = vmatpush1.bf16.msra.mxu0 %v2130_v40  ;;  %v2209_v39 = vld [vmem:[%s2870_s2 + $0xdc] ss:$12 sps:$4 sm:$0xff]  }
  0x3b   : > { %1935 = vmatpush3.bf16.msra.mxu1 %v2131_v41  ;;  %910 = vmatprep.subr.bf16.mxu0 %v2132_v42  ;;  %v2244_v40 = vld [vmem:[%s2677_s10 + $0x4] ss:$12 sps:$4 sm:$0xff]   ;;  %v2210_v41 = vld [vmem:[%s2870_s2 + $0xe0] ss:$12 sps:$4 sm:$0xff]  }
  0x3c   : > { %1936 = vmatprep.subr.bf16.mxu1 %v2134_v43  ;;  %1010 = vmatprep.mubr.bf16.mxu1 %v2169_v60  ;;  %v2207_v42 = vld [vmem:[%s2870_s2 + $0xd8] ss:$12 sps:$4 sm:$0xff]   ;;  %v2211_v43 = vld [vmem:[%s2870_s2 + $0x20] ss:$12 sps:$4 sm:$0xff]  }
  0x3d   : > { %v2235_v60 = vld [vmem:[%s2870_s2 + $0x158] ss:$12 sps:$4 sm:$0xff]  }
  0x3e   : > { %911 = vmatpush1.bf16.msra.mxu0 %v2135_v44  ;;  %v2214_v44 = vld [vmem:[%s2870_s2 + $0xf4] ss:$12 sps:$4 sm:$0xff]  }
  0x3f   : > { %1937 = vmatpush3.bf16.msra.mxu1 %v2136_v45  ;;  %912 = vmatprep.subr.bf16.mxu0 %v2137_v46  ;;  %v2212_v45 = vld [vmem:[%s2870_s2 + $0xf0] ss:$12 sps:$4 sm:$0xff]   ;;  %v2216_v46 = vld [vmem:[%s2870_s2 + $0x38] ss:$12 sps:$4 sm:$0xff]  }
  0x40   : > { %1938 = vmatprep.subr.bf16.mxu1 %v2139_v47  ;;  %v2219_v47 = vld [vmem:[%s2870_s2 + $0x10c] ss:$12 sps:$4 sm:$0xff]  }
  0x42   : > { %913 = vmatpush1.bf16.msra.mxu0 %v2140_v48  ;;  %v2220_v48 = vld [vmem:[%s2870_s2 + $0x110] ss:$12 sps:$4 sm:$0xff]  }
  0x43   : > { %1939 = vmatpush3.bf16.msra.mxu1 %v2141_v49  ;;  %914 = vmatprep.subr.bf16.mxu0 %v2142_v50  ;;  %v2217_v49 = vld [vmem:[%s2870_s2 + $0x108] ss:$12 sps:$4 sm:$0xff]   ;;  %v2221_v50 = vld [vmem:[%s2870_s2 + $0x50] ss:$12 sps:$4 sm:$0xff]  }
  0x44   : > { %1940 = vmatprep.subr.bf16.mxu1 %v2144_v51  ;;  %v2224_v51 = vld [vmem:[%s2870_s2 + $0x124] ss:$12 sps:$4 sm:$0xff]  }
  0x46   : > { %915 = vmatpush1.bf16.msra.mxu0 %v2145_v52  ;;  %v2225_v52 = vld [vmem:[%s2870_s2 + $0x128] ss:$12 sps:$4 sm:$0xff]  }
  0x47   : > { %1941 = vmatpush3.bf16.msra.mxu1 %v2146_v53  ;;  %916 = vmatprep.subr.bf16.mxu0 %v2147_v54  ;;  %v2222_v53 = vld [vmem:[%s2870_s2 + $0x120] ss:$12 sps:$4 sm:$0xff]   ;;  %v2226_v54 = vld [vmem:[%s2870_s2 + $0x68] ss:$12 sps:$4 sm:$0xff]  }
  0x48   : > { %1942 = vmatprep.subr.bf16.mxu1 %v2149_v55  ;;  %v2229_v55 = vld [vmem:[%s2870_s2 + $0x13c] ss:$12 sps:$4 sm:$0xff]  }
  0x4a   : > { %917 = vmatpush1.bf16.msra.mxu0 %v2150_v56  ;;  %v2230_v56 = vld [vmem:[%s2870_s2 + $0x140] ss:$12 sps:$4 sm:$0xff]  }
  0x4b   : > { %1943 = vmatpush3.bf16.msra.mxu1 %v2151_v57  ;;  %918 = vmatprep.subr.bf16.mxu0 %v2152_v58  ;;  %v2227_v57 = vld [vmem:[%s2870_s2 + $0x138] ss:$12 sps:$4 sm:$0xff]   ;;  %v2231_v58 = vld [vmem:[%s2870_s2 + $0x80] ss:$12 sps:$4 sm:$0xff]  }
  0x4c   : > { %1944 = vmatprep.subr.bf16.mxu1 %v2154_v59  ;;  %v2234_v59 = vld [vmem:[%s2870_s2 + $0x154] ss:$12 sps:$4 sm:$0xff]  }
  0x4e   : > { %919 = vmatpush1.bf16.msra.mxu0 %v2155_v61  ;;  %v2232_v61 = vld [vmem:[%s2870_s2 + $0x150] ss:$12 sps:$4 sm:$0xff]  }
  0x4f   : > { %1945 = vmatpush3.bf16.msra.mxu1 %v2156_v62  ;;  %920 = vmatprep.subr.bf16.mxu0 %v2157_v63  ;;  %v2236_v62 = vld [vmem:[%s2870_s2 + $0x98] ss:$12 sps:$4 sm:$0xff]  }
  0x50   : > { %1946 = vmatprep.subr.bf16.mxu1 %v2159_v0  ;;  %v2239_v63 = vld [vmem:[%s2870_s2 + $0x16c] ss:$12 sps:$4 sm:$0xff]   ;;  %v2240_v0 = vld [vmem:[%s2870_s2 + $0x170] ss:$12 sps:$4 sm:$0xff]  }
  0x52   : > { %921 = vmatpush1.bf16.msra.mxu0 %v2160_v1  ;;  %v2237_v1 = vld [vmem:[%s2870_s2 + $0x168] ss:$12 sps:$4 sm:$0xff]  }
  0x53   : > { %1947 = vmatpush3.bf16.msra.mxu1 %v2161_v2  ;;  %922 = vmatprep.subr.bf16.mxu0 %v2162_v3  ;;  %v2241_v2 = vld [vmem:[%s2870_s2 + $0xb0] ss:$12 sps:$4 sm:$0xff]  }
  0x54   : > { %1948 = vmatprep.subr.bf16.mxu1 %v2164_v4  ;;  %v2247_v3 = vld [vmem:[%s2870_s2 + $0x184] ss:$12 sps:$4 sm:$0xff]  }
  0x55   : > { %v2242_v4 = vld [vmem:[%s2677_s10] ss:$12 sps:$4 sm:$0xff]  }
  0x56   : > { %923 = vmatpush1.bf16.msra.mxu0 %v2165_v5  ;;  %v2245_v5 = vld [vmem:[%s2870_s2 + $0x180] ss:$12 sps:$4 sm:$0xff]  }
  0x57   : > { %1949 = vmatpush3.bf16.msra.mxu1 %v2166_v7  ;;  %1460 = vmatprep.subr.bf16.mxu0 %v2172_v8  ;;  %v2248_v7 = vld [vmem:[%s2870_s2 + $0x188] ss:$12 sps:$4 sm:$0xff]  }
  0x58   : > { %1996 = vmatprep.subr.bf16.mxu1 %v2303_v12  ;;  %v2251_v8 = vld [vmem:[%s2870_s2 + $0x19c] ss:$12 sps:$4 sm:$0xff]  }
  0x59   : > { %925 = vmatmul.mubr.bf16.vlgmr.msra.gmra.mrb[0].mxu0 %v2167_v9 }
  0x5a   : > { %1011 = vmatmul.mubr.bf16.vlgmr.msra.gmra.mrb[4].mxu1 %v2167_v9  ;;  %1461 = vmatpush1.bf16.msra.mxu0 %v2170_v10  ;;  %v2249_v9 = vld [vmem:[%s2870_s2 + $0x198] ss:$12 sps:$4 sm:$0xff]   ;;  %v2252_v10 = vld [vmem:[%s2870_s2 + $0x1a0] ss:$12 sps:$4 sm:$0xff]  }
  0x5b   : > { %1997 = vmatpush3.bf16.msra.mxu1 %v2173_v11  ;;  %1462 = vmatprep.subr.bf16.mxu0 %v2176_v13  ;;  %v2255_v11 = vld [vmem:[%s2870_s2 + $0x1b4] ss:$12 sps:$4 sm:$0xff]   ;;  %v2253_v13 = vld [vmem:[%s2870_s2 + $0x1b0] ss:$12 sps:$4 sm:$0xff]  }
  0x5c   : > { %1998 = vmatprep.subr.bf16.mxu1 %v2303_v12  ;;  %2012 = vmatprep.mubr.msk.bf16.mxu1 %vm2304_vm0, %v2303_v12 }
  0x5d   : > { %1492 = vmatprep.mubr.bf16.mxu0 %v2244_v40 }
  0x5e   : > { %1463 = vmatpush1.bf16.msra.mxu0 %v2174_v14  ;;  %v2256_v14 = vld [vmem:[%s2870_s2 + $0x1b8] ss:$12 sps:$4 sm:$0xff]  }
  0x5f   : > { %1999 = vmatpush3.bf16.msra.mxu1 %v2177_v15  ;;  %1464 = vmatprep.subr.bf16.mxu0 %v2180_v16  ;;  %v2257_v15 = vld [vmem:[%s2870_s2 + $0x1c8] ss:$12 sps:$4 sm:$0xff]   ;;  %v2260_v16 = vld [vmem:[%s2870_s2 + $0x1d0] ss:$12 sps:$4 sm:$0xff]  }
  0x60   : > { %2000 = vmatprep.subr.bf16.mxu1 %v2303_v12 }
  0x62   : > { %1465 = vmatpush1.bf16.msra.mxu0 %v2178_v17  ;;  %v2263_v17 = vld [vmem:[%s2870_s2 + $0x1e4] ss:$12 sps:$4 sm:$0xff]  }
  0x63   : > { %2001 = vmatpush3.bf16.msra.mxu1 %v2181_v18  ;;  %1466 = vmatprep.subr.bf16.mxu0 %v2184_v19  ;;  %v2261_v18 = vld [vmem:[%s2870_s2 + $0x1e0] ss:$12 sps:$4 sm:$0xff]   ;;  %v2264_v19 = vld [vmem:[%s2870_s2 + $0x1e8] ss:$12 sps:$4 sm:$0xff]  }
  0x64   : > { %2002 = vmatprep.subr.bf16.mxu1 %v2303_v12 }
  0x66   : > { %1467 = vmatpush1.bf16.msra.mxu0 %v2182_v20  ;;  %v2267_v20 = vld [vmem:[%s2870_s2 + $0x1fc] ss:$12 sps:$4 sm:$0xff]  }
  0x67   : > { %2003 = vmatpush3.bf16.msra.mxu1 %v2185_v21  ;;  %1468 = vmatprep.subr.bf16.mxu0 %v2188_v22  ;;  %v2265_v21 = vld [vmem:[%s2870_s2 + $0x1f8] ss:$12 sps:$4 sm:$0xff]   ;;  %v2268_v22 = vld [vmem:[%s2870_s2 + $0x200] ss:$12 sps:$4 sm:$0xff]  }
  0x68   : > { %2004 = vmatprep.subr.bf16.mxu1 %v2303_v12 }
  0x6a   : > { %1469 = vmatpush1.bf16.msra.mxu0 %v2186_v23  ;;  %v2271_v23 = vld [vmem:[%s2870_s2 + $0x214] ss:$12 sps:$4 sm:$0xff]  }
  0x6b   : > { %2005 = vmatpush3.bf16.msra.mxu1 %v2189_v24  ;;  %1470 = vmatprep.subr.bf16.mxu0 %v2192_v25  ;;  %v2269_v24 = vld [vmem:[%s2870_s2 + $0x210] ss:$12 sps:$4 sm:$0xff]   ;;  %v2272_v25 = vld [vmem:[%s2870_s2 + $0x218] ss:$12 sps:$4 sm:$0xff]  }
  0x6c   : > { %2006 = vmatprep.subr.bf16.mxu1 %v2303_v12 }
  0x6e   : > { %1471 = vmatpush1.bf16.msra.mxu0 %v2190_v26  ;;  %v2275_v26 = vld [vmem:[%s2870_s2 + $0x22c] ss:$12 sps:$4 sm:$0xff]  }
  0x6f   : > { %2007 = vmatpush3.bf16.msra.mxu1 %v2193_v27  ;;  %1472 = vmatprep.subr.bf16.mxu0 %v2196_v28  ;;  %v2273_v27 = vld [vmem:[%s2870_s2 + $0x228] ss:$12 sps:$4 sm:$0xff]   ;;  %v2276_v28 = vld [vmem:[%s2870_s2 + $0x230] ss:$12 sps:$4 sm:$0xff]  }
  0x70   : > { %2008 = vmatprep.subr.bf16.mxu1 %v2303_v12 }
  0x72   : > { %1473 = vmatpush1.bf16.msra.mxu0 %v2194_v29  ;;  %v2277_v29 = vld [vmem:[%s2677_s10 + $0x8] ss:$12 sps:$4 sm:$0xff]  }
  0x73   : > { %2009 = vmatpush3.bf16.msra.mxu1 %v2197_v30  ;;  %1474 = vmatprep.subr.bf16.mxu0 %v2200_v31 }
  0x74   : > { %2010 = vmatprep.subr.bf16.mxu1 %v2303_v12 }
  0x76   : > { %1475 = vmatpush1.bf16.msra.mxu0 %v2198_v32 }
  0x77   : > { %2011 = vmatpush3.bf16.msra.mxu1 %v2201_v33  ;;  %1476 = vmatprep.subr.bf16.mxu0 %v2204_v34 }
  0x78   : > { %1965 = vmatprep.subr.bf16.mxu1 %v2205_v35 }
  0x7a   : > { %2013 = vmatmul.mubr.bf16.vlgmr.msra.gmra.mrb[8].mxu1 %v2484_v38  ;;  %1477 = vmatpush1.bf16.msra.mxu0 %v2202_v36  ;;  %v2215_v38 = vld [vmem:[%s2870_s2 + $0xf8] ss:$12 sps:$4 sm:$0xff]  }
  0x7b   : > { %1966 = vmatpush3.bf16.msra.mxu1 %v2206_v37  ;;  %1478 = vmatprep.subr.bf16.mxu0 %v2209_v39 }
  0x7c   : > { %1967 = vmatprep.subr.bf16.mxu1 %v2210_v41  ;;  %1578 = vmatprep.mubr.bf16.mxu1 %v2244_v40 }
  0x7e   : > { %1479 = vmatpush1.bf16.msra.mxu0 %v2207_v42 }
  0x7f   : > { %1968 = vmatpush3.bf16.msra.mxu1 %v2211_v43  ;;  %1480 = vmatprep.subr.bf16.mxu0 %v2214_v44 }
  0x80   : > { %1969 = vmatprep.subr.bf16.mxu1 %v2215_v38 }
  0x82   : > { %1481 = vmatpush1.bf16.msra.mxu0 %v2212_v45 }
  0x83   : > { %1970 = vmatpush3.bf16.msra.mxu1 %v2216_v46  ;;  %1482 = vmatprep.subr.bf16.mxu0 %v2219_v47 }
  0x84   : > { %1971 = vmatprep.subr.bf16.mxu1 %v2220_v48 }
  0x86   : > { %1483 = vmatpush1.bf16.msra.mxu0 %v2217_v49 }
  0x87   : > { %1972 = vmatpush3.bf16.msra.mxu1 %v2221_v50  ;;  %1484 = vmatprep.subr.bf16.mxu0 %v2224_v51 }
  0x88   : > { %1973 = vmatprep.subr.bf16.mxu1 %v2225_v52 }
  0x8a   : > { %1485 = vmatpush1.bf16.msra.mxu0 %v2222_v53 }
  0x8b   : > { %1974 = vmatpush3.bf16.msra.mxu1 %v2226_v54  ;;  %1486 = vmatprep.subr.bf16.mxu0 %v2229_v55 }
  0x8c   : > { %1975 = vmatprep.subr.bf16.mxu1 %v2230_v56 }
  0x8e   : > { %1487 = vmatpush1.bf16.msra.mxu0 %v2227_v57 }
  0x8f   : > { %1976 = vmatpush3.bf16.msra.mxu1 %v2231_v58  ;;  %1488 = vmatprep.subr.bf16.mxu0 %v2234_v59 }
  0x90   : > { %1977 = vmatprep.subr.bf16.mxu1 %v2235_v60 }
  0x92   : > { %1489 = vmatpush1.bf16.msra.mxu0 %v2232_v61  ;;  %v1630_v61 = vlaneseq }
  0x93   : > { %1978 = vmatpush3.bf16.msra.mxu1 %v2236_v62  ;;  %1490 = vmatprep.subr.bf16.mxu0 %v2239_v63 }
  0x94   : > { %1979 = vmatprep.subr.bf16.mxu1 %v2240_v0  ;;  %v1631_v62 = vshrl.u32 %v1630_v61, 7 }
  0x96   : > { %1491 = vmatpush1.bf16.msra.mxu0 %v2237_v1  ;;  %v1632_v63 = vsub.s32 0, %v1631_v62  ;;  %v1640_v0 = vsub.s32 2, %v1631_v62  ;;  %v1628_v1 = vld [vmem:[%s2872_s4] sm:$0x7] }
  0x97   : > { %1980 = vmatpush3.bf16.msra.mxu1 %v2241_v2  ;;  %1503 = vmatprep.subr.bf16.mxu0 %v2247_v3  ;;  %v1636_v2 = vsub.s32 1, %v1631_v62 }
  0x98   : > { %2016 = vmatprep.subr.bf16.mxu1 %v2303_v12  ;;  %v1633_v3 = vrot.slane %v1628_v1, %v1632_v63 }
  0x99   : > { %1493 = vmatmul.mubr.bf16.vlgmr.msra.gmra.mrb[4].mxu0 %v2242_v4 }
  0x9a   : > { %1579 = vmatmul.mubr.bf16.vlgmr.msra.gmra.mrb[12].mxu1 %v2242_v4  ;;  %1504 = vmatpush1.bf16.msra.mxu0 %v2245_v5  ;;  %v1641_v4 = vrot.slane %v1628_v1, %v1640_v0 }
  0x9b   : > { %2017 = vmatpush3.bf16.msra.mxu1 %v2248_v7  ;;  %1505 = vmatprep.subr.bf16.mxu0 %v2251_v8  ;;  %v1637_v8 = vrot.slane %v1628_v1, %v1636_v2 }
  0x9c   : > { %2018 = vmatprep.subr.bf16.mxu1 %v2303_v12  ;;  %1535 = vmatprep.mubr.bf16.mxu0 %v2302_v6  ;;  %v2259_v6 = vld [vmem:[%s2870_s2 + $0x1cc] ss:$12 sps:$4 sm:$0xff]  }
  0x9d   : > { %2032 = vmatprep.mubr.msk.bf16.mxu1 %vm2304_vm0, %v2303_v12 }
  0x9e   : > { %1506 = vmatpush1.bf16.msra.mxu0 %v2249_v9 }
  0x9f   : > { %2019 = vmatpush3.bf16.msra.mxu1 %v2252_v10  ;;  %1507 = vmatprep.subr.bf16.mxu0 %v2255_v11 }
  0xa0   : > { %2020 = vmatprep.subr.bf16.mxu1 %v2303_v12 }
  0xa2   : > { %1508 = vmatpush1.bf16.msra.mxu0 %v2253_v13 }
  0xa3   : > { %2021 = vmatpush3.bf16.msra.mxu1 %v2256_v14  ;;  %1509 = vmatprep.subr.bf16.mxu0 %v2259_v6 }
  0xa4   : > { %2022 = vmatprep.subr.bf16.mxu1 %v2303_v12 }
  0xa6   : > { %1510 = vmatpush1.bf16.msra.mxu0 %v2257_v15 }
  0xa7   : > { %2023 = vmatpush3.bf16.msra.mxu1 %v2260_v16  ;;  %1511 = vmatprep.subr.bf16.mxu0 %v2263_v17 }
  0xa8   : > { %2024 = vmatprep.subr.bf16.mxu1 %v2303_v12 }
  0xaa   : > { %1512 = vmatpush1.bf16.msra.mxu0 %v2261_v18 }
  0xab   : > { %2025 = vmatpush3.bf16.msra.mxu1 %v2264_v19  ;;  %1513 = vmatprep.subr.bf16.mxu0 %v2267_v20 }
  0xac   : > { %2026 = vmatprep.subr.bf16.mxu1 %v2303_v12 }
  0xae   : > { %1514 = vmatpush1.bf16.msra.mxu0 %v2265_v21 }
  0xaf   : > { %2027 = vmatpush3.bf16.msra.mxu1 %v2268_v22  ;;  %1515 = vmatprep.subr.bf16.mxu0 %v2271_v23 }
  0xb0   : > { %2028 = vmatprep.subr.bf16.mxu1 %v2303_v12 }
  0xb2   : > { %1516 = vmatpush1.bf16.msra.mxu0 %v2269_v24 }
  0xb3   : > { %2029 = vmatpush3.bf16.msra.mxu1 %v2272_v25  ;;  %1517 = vmatprep.subr.bf16.mxu0 %v2275_v26 }
  0xb4   : > { %2030 = vmatprep.subr.bf16.mxu1 %v2303_v12 }
  0xb6   : > { %1518 = vmatpush1.bf16.msra.mxu0 %v2273_v27 }
  0xb7   : > { %2031 = vmatpush3.bf16.msra.mxu1 %v2276_v28 }
  0xb9   : > { %1536 = vmatmul.mubr.bf16.vlgmr.msra.gmra.mrb[4].mxu0 %v2277_v29 }
  0xba   : > { %2033 = vmatmul.mubr.bf16.vlgmr.msra.gmra.mrb[16].mxu1 %v2277_v29 }
 0x10d   : > { %v969_v30 = vpop.f32.mrb[0].mxu1 }
 0x10e   : > { %v971_v31 = vpop.f32.mrb[1].mxu1 }
 0x10f   : > { %v973_v32 = vpop.f32.mrb[2].mxu1 }
 0x110   : > { %v975_v33 = vpop.f32.mrb[3].mxu1 }
 0x12c   : > { %v926_v34 = vpop.f32.mrb[0].mxu0 }
 0x12d   : > { %v1950_v35 = vpop.f32.mrb[4].mxu1  ;;  %v970_v36 = vadd.f32 %v969_v30, %v926_v34  ;;  %v928_v37 = vpop.f32.mrb[1].mxu0 }
 0x12e   : > { %v1951_v39 = vpop.f32.mrb[5].mxu1  ;;  %v972_v40 = vadd.f32 %v971_v31, %v928_v37  ;;  %v930_v42 = vpop.f32.mrb[2].mxu0 }
 0x12f   : > { %v1952_v41 = vadd.f32 %v1951_v39, %v1950_v35  ;;  %v1953_v43 = vpop.f32.mrb[6].mxu1  ;;  %v974_v44 = vadd.f32 %v973_v32, %v930_v42  ;;  %v932_v12 = vpop.f32.mrb[3].mxu0 }
 0x130   : > { %v1954_v38 = vpop.f32.mrb[7].mxu1  ;;  %v976_v45 = vadd.f32 %v975_v33, %v932_v12 }
 0x131   : > { %v1955_v46 = vadd.f32 %v1954_v38, %v1953_v43 }
 0x14d   : > { %v1053_v47 = vpop.f32.mrb[8].mxu1 }
 0x14e   : > { %v1054_v48 = vadd.f32 %v1952_v41, %v1053_v47  ;;  %v2014_v49 = vpop.f32.mrb[9].mxu1 }
 0x14f   : > { %v1056_v50 = vpop.f32.mrb[10].mxu1 }
 0x150   : > { %v1057_v51 = vadd.f32 %v1955_v46, %v1056_v50  ;;  %v2015_v52 = vpop.f32.mrb[11].mxu1 }
 0x16d   : > { %v1981_v53 = vpop.f32.mrb[12].mxu1 }
 0x16e   : > { %v1982_v54 = vpop.f32.mrb[13].mxu1 }
 0x16f   : > { %v1983_v55 = vadd.f32 %v1982_v54, %v1981_v53  ;;  %v1984_v56 = vpop.f32.mrb[14].mxu1 }
 0x170   : > { %v1985_v57 = vpop.f32.mrb[15].mxu1 }
 0x171   : > { %v1986_v58 = vadd.f32 %v1985_v57, %v1984_v56  ;;  %v1581_v59 = vadd.f32 %v1983_v55, %v1054_v48 }
 0x173   : > { %v1584_v60 = vadd.f32 %v1986_v58, %v1057_v51 }
 0x18c   : > { %v1537_v5 = vpop.f32.mrb[4].mxu0 }
 0x18d   : > { %v1621_v7 = vpop.f32.mrb[16].mxu1  ;;  %v2037_v9 = vadd.f32 %v1537_v5, %v970_v36  ;;  %v1539_v11 = vpop.f32.mrb[5].mxu0 }
 0x18e   : > { %v1622_v10 = vadd.f32 %v1621_v7, %v1581_v59  ;;  %v2034_v13 = vpop.f32.mrb[17].mxu1  ;;  %v2039_v14 = vadd.f32 %v1539_v11, %v972_v40  ;;  %v1541_v6 = vpop.f32.mrb[6].mxu0 }
 0x18f   : > { %v1624_v15 = vpop.f32.mrb[18].mxu1  ;;  %v1645_v16 = vadd.f32 %v2037_v9, %v1633_v3  ;;  %v2041_v18 = vadd.f32 %v1541_v6, %v974_v44  ;;  %v1543_v20 = vpop.f32.mrb[7].mxu0 }
 0x190   : > { %v1647_v17 = vadd.f32 %v1641_v4, %v1622_v10  ;;  %v1625_v19 = vadd.f32 %v1624_v15, %v1584_v60  ;;  %v2035_v21 = vpop.f32.mrb[19].mxu1  ;;  %v1646_v22 = vadd.f32 %v2039_v14, %v1637_v8  ;;  %v2043_v23 = vadd.f32 %v1543_v20, %v976_v45 }
 0x191   : > { %v1648_v25 = vadd.f32 %v2041_v18, %v1633_v3 }
 0x192   : > { %v1931_v24 = vpack.c.bf16 %v1647_v17, %v1647_v17  ;;  %v1650_v26 = vadd.f32 %v1641_v4, %v1625_v19  ;;  %v1930_v27 = vpack.c.bf16 %v1646_v22, %v1645_v16  ;;  %v1649_v28 = vadd.f32 %v2043_v23, %v1637_v8 }
 0x194   : > { %1672 = vst [vmem:[%s289_s26 + $0x8] sm:$0xf] %v1931_v24  ;;  %v1933_v29 = vpack.c.bf16 %v1650_v26, %v1650_v26  ;;  %1671 = vst [vmem:[%s289_s26] sm:$0xff] %v1930_v27  ;;  %v1932_v30 = vpack.c.bf16 %v1649_v28, %v1648_v25 }
 0x196   : > { %1674 = vst [vmem:[%s289_s26 + $0x14] sm:$0xf] %v1933_v29  ;;  %1673 = vst [vmem:[%s289_s26 + $0xc] sm:$0xff] %v1932_v30 }
 0x197 PF: > { %p12_p9 = scmp.ge.s32.totalorder %s2352_s22, 4   ;;  %s2874_s18 = smov %s2296_s19 }
 0x198   : > { %s2875_s19 = smov %s2361_s25  ;;  %s2876_s20 = smov %s2352_s22 }
 0x199   :  { %14 = sbr.rel (!%p12_p9) target bundleno = 2 (0x2), region = 110 }

// kernel: net_forward.33
= control target key start
LH: loop header
LB: loop body
LE: loop exit
PB: predicated region body
PF: predicated region fallthrough
CT: control target
= control target key end

     0   :  { %s2335_s18 = smov 0   ;;  %s2337_s19 = smov 0   ;;  %s2868_s0 = inlined_call_operand.vmem [shape: bf16[32,1536], index: 0, kind: input, shape index: {}]   ;;  %s2869_s1 = inlined_call_operand.vmem [shape: bf16[32,384], index: 1, kind: input, shape index: {}]   ;;  %s2870_s2 = inlined_call_operand.vmem [shape: bf16[384,384], index: 2, kind: input, shape index: {}]   ;;  %s2871_s3 = inlined_call_operand.vmem [shape: bf16[384,384], index: 3, kind: input, shape index: {}]   ;;  %s2872_s4 = inlined_call_operand.vmem [shape: f32[1,384], index: 4, kind: input, shape index: {}]   ;;  %s2873_s5 = inlined_call_operand.vmem [shape: bf16[32,384], index: 5, kind: output, shape index: {}]  }
   0x1   :  { %s2339_s20 = smov 0  }
   0x2 LB: > { %s1758_s21 = sadd.s32 4294967295, %s2300_s20   ;;  %s2352_s22 = sadd.s32 1, %s2300_s20   ;;  %s2300_s20 = sphi %s2339_s20, %s2876_s20   ;;  %s2296_s19 = sphi %s2337_s19, %s2875_s19   ;;  %s2292_s18 = sphi %s2335_s18, %s2874_s18  }
   0x3   : > { %s19_s23 = ssub.s32 %s2300_s20, %s2352_s22  ;;  %s22_s24 = sadd.s32 1, %s2296_s19 }
   0x4   : > { %p20_p0 = scmp.eq.s32.totalorder %s19_s23, 0  ;;  %p29_p1 = scmp.ne.s32.totalorder %s2296_s19, %s2292_s18 }
   0x5   : > { %p30_p2 = scmp.eq.s32.totalorder %s2300_s20, 0  ;;  %p1761_p4 = scmp.ge.s32.totalorder %s2300_s20, 2 }
   0x6   : > { %s2361_s25 = scalar_select %p20_p0, %s2296_s19, %s22_s24  }
   0x7   : > { %p31_p3 = por %p30_p2, %p29_p1  ;;  %179 = sbr.rel (%p1761_p4) target bundleno = 21 (0x15), region = 28 }
   0xe   : > { %182 = sbr.rel (!%p31_p3) target bundleno = 21 (0x15), region = 32  ;;  %s184_s26 = sand.u32 (%p31_p3), 1, %s2296_s19  }
   0xf   : > { %s1762_s27 = smul.u32 (%p31_p3), 96, %s2300_s20 }
  0x10   : > { %s2048_s28 = smul.u32 (%p31_p3), 24, %s184_s26 }
  0x11   : > { %s1703_s6 = scalar_lea.vmem (%p31_p3), %s2868_s0, %s1762_s27 }
  0x12   : > { %v1763_v0 = vld [vmem:[%s1703_s6 + $0xc] sm:$0xff] (%p31_p3)  ;;  %v1764_v1 = vld [vmem:[%s1703_s6 + $0x3c] sm:$0xff] (%p31_p3)  ;;  %v1765_v2 = vld [vmem:[%s1703_s6 + $0x14] sm:$0xf] (%p31_p3)  ;;  %s186_s7 = scalar_lea.vmem (%p31_p3), [#allocation2], %s2048_s28 }
  0x13   : > { %207 = vst [vmem:[%s186_s7] sm:$0xff] (%p31_p3), %v1763_v0  ;;  %209 = vst [vmem:[%s186_s7 + $0xc] sm:$0xff] (%p31_p3), %v1764_v1  ;;  %v1767_v3 = vld [vmem:[%s1703_s6 + $0x44] sm:$0xf] (%p31_p3) }
  0x14   : > { %1766 = vst [vmem:[%s186_s7 + $0x8] sm:$0xf] (%p31_p3), %v1765_v2  ;;  %1768 = vst [vmem:[%s186_s7 + $0x14] sm:$0xf] (%p31_p3), %v1767_v3 }
  0x15 PF: > { %p1769_p5 = scmp.ge.s32.totalorder %s2300_s20, 1  ;;  %p235_p6 = scmp.lt.s32.totalorder %s2300_s20, 3 }
  0x17   : > { %p236_p7 = pnand %p1769_p5, %p235_p6 }
  0x18   : > { %v2078_v4 = vld [vmem:[%s2871_s3 + $0x4] ss:$12 sps:$4 sm:$0xff] (!%p236_p7)   ;;  %v2302_v6 = vmov (!%p236_p7), 0   ;;  %v2082_v7 = vld [vmem:[%s2871_s3] ss:$12 sps:$4 sm:$0xff] (!%p236_p7)   ;;  %s1770_s7 = sshll.u32 (!%p236_p7), %s1758_s21, 1 }
  0x19   : > { %239 = sbr.rel (%p236_p7) target bundleno = 407 (0x197), region = 62  ;;  %v2080_v5 = vld [vmem:[%s2871_s3 + $0x184] ss:$12 sps:$4 sm:$0xff] (!%p236_p7)   ;;  %967 = vmatprep.mubr.bf16.mxu1 (!%p236_p7), %v2302_v6  ;;  %892 = vmatprep.subr.bf16.mxu0 (!%p236_p7), %v2078_v4  ;;  %v2083_v8 = vld [vmem:[%s2871_s3 + $0x180] ss:$12 sps:$4 sm:$0xff] (!%p236_p7)   ;;  %p278_p8 = scmp.lt.s32.totalorder (!%p236_p7), %s1770_s7, 3 }
  0x1a   : > { %935 = vmatprep.subr.bf16.mxu1 (!%p236_p7), %v2080_v5  ;;  %v2084_v9 = vld [vmem:[%s2871_s3 + $0x1c] ss:$12 sps:$4 sm:$0xff] (!%p236_p7)   ;;  %893 = vmatpush1.bf16.msra.mxu0 (!%p236_p7), %v2082_v7  ;;  %v2088_v11 = vld [vmem:[%s2871_s3 + $0x18] ss:$12 sps:$4 sm:$0xff] (!%p236_p7)   ;;  %v2090_v13 = vld [vmem:[%s2871_s3 + $0x34] ss:$12 sps:$4 sm:$0xff] (!%p236_p7)  }
  0x1b   : > { %936 = vmatpush1.bf16.msra.mxu1 (!%p236_p7), %v2083_v8  ;;  %v2086_v10 = vld [vmem:[%s2871_s3 + $0x19c] ss:$12 sps:$4 sm:$0xff] (!%p236_p7)   ;;  %894 = vmatprep.subr.bf16.mxu0 (!%p236_p7), %v2084_v9  ;;  %v2089_v12 = vld [vmem:[%s2871_s3 + $0x198] ss:$12 sps:$4 sm:$0xff] (!%p236_p7)   ;;  %v2092_v14 = vld [vmem:[%s2871_s3 + $0x1b4] ss:$12 sps:$4 sm:$0xff] (!%p236_p7)  }
  0x1c   : > { %937 = vmatprep.subr.bf16.mxu1 (!%p236_p7), %v2086_v10  ;;  %v2094_v15 = vld [vmem:[%s2871_s3 + $0x30] ss:$12 sps:$4 sm:$0xff] (!%p236_p7)   ;;  %v2096_v17 = vld [vmem:[%s2871_s3 + $0x4c] ss:$12 sps:$4 sm:$0xff] (!%p236_p7)   ;;  %v2100_v19 = vld [vmem:[%s2871_s3 + $0x48] ss:$12 sps:$4 sm:$0xff] (!%p236_p7)  }
  0x1d   : > { %v2095_v16 = vld [vmem:[%s2871_s3 + $0x1b0] ss:$12 sps:$4 sm:$0xff] (!%p236_p7)   ;;  %v2098_v18 = vld [vmem:[%s2871_s3 + $0x1cc] ss:$12 sps:$4 sm:$0xff] (!%p236_p7)   ;;  %v2101_v20 = vld [vmem:[%s2871_s3 + $0x1c8] ss:$12 sps:$4 sm:$0xff] (!%p236_p7)  }
  0x1e   : > { %895 = vmatpush1.bf16.msra.mxu0 (!%p236_p7), %v2088_v11  ;;  %v2102_v21 = vld [vmem:[%s2871_s3 + $0x64] ss:$12 sps:$4 sm:$0xff] (!%p236_p7)   ;;  %v2106_v23 = vld [vmem:[%s2871_s3 + $0x60] ss:$12 sps:$4 sm:$0xff] (!%p236_p7)   ;;  %v2108_v25 = vld [vmem:[%s2871_s3 + $0x7c] ss:$12 sps:$4 sm:$0xff] (!%p236_p7)  }
  0x1f   : > { %938 = vmatpush1.bf16.msra.mxu1 (!%p236_p7), %v2089_v12  ;;  %896 = vmatprep.subr.bf16.mxu0 (!%p236_p7), %v2090_v13  ;;  %v2104_v22 = vld [vmem:[%s2871_s3 + $0x1e4] ss:$12 sps:$4 sm:$0xff] (!%p236_p7)   ;;  %v2107_v24 = vld [vmem:[%s2871_s3 + $0x1e0] ss:$12 sps:$4 sm:$0xff] (!%p236_p7)   ;;  %v2110_v26 = vld [vmem:[%s2871_s3 + $0x1fc] ss:$12 sps:$4 sm:$0xff] (!%p236_p7)  }
  0x20   : > { %939 = vmatprep.subr.bf16.mxu1 %v2092_v14  ;;  %s2878_s7 = smov (!%p278_p8, %s1770_s7), 3  ;;  %v2112_v27 = vld [vmem:[%s2871_s3 + $0x78] ss:$12 sps:$4 sm:$0xff]   ;;  %v2114_v29 = vld [vmem:[%s2871_s3 + $0x94] ss:$12 sps:$4 sm:$0xff]   ;;  %v2303_v12 = vmov 0.0  }
  0x21   : > { %s2050_s14 = smul.u32 12, %s2878_s7  ;;  %v2113_v28 = vld [vmem:[%s2871_s3 + $0x1f8] ss:$12 sps:$4 sm:$0xff]   ;;  %v2116_v30 = vld [vmem:[%s2871_s3 + $0x214] ss:$12 sps:$4 sm:$0xff]   ;;  %vm2304_vm0 = vmmov 0  }
  0x22   : > { %897 = vmatpush1.bf16.msra.mxu0 %v2094_v15  ;;  %v2118_v31 = vld [vmem:[%s2871_s3 + $0x90] ss:$12 sps:$4 sm:$0xff]   ;;  %v2120_v33 = vld [vmem:[%s2871_s3 + $0xac] ss:$12 sps:$4 sm:$0xff]   ;;  %v2124_v35 = vld [vmem:[%s2871_s3 + $0xa8] ss:$12 sps:$4 sm:$0xff]  }
  0x23   : > { %940 = vmatpush1.bf16.msra.mxu1 %v2095_v16  ;;  %898 = vmatprep.subr.bf16.mxu0 %v2096_v17  ;;  %s2460_s29 = scalar_lea.vmem %s2869_s1, %s2050_s14  ;;  %v2119_v32 = vld [vmem:[%s2871_s3 + $0x210] ss:$12 sps:$4 sm:$0xff]   ;;  %v2122_v34 = vld [vmem:[%s2871_s3 + $0x22c] ss:$12 sps:$4 sm:$0xff]   ;;  %v2125_v36 = vld [vmem:[%s2871_s3 + $0x228] ss:$12 sps:$4 sm:$0xff]   ;;  %s289_s26 = scalar_lea.vmem %s2873_s5, %s2050_s14 }
  0x24   : > { %941 = vmatprep.subr.bf16.mxu1 %v2098_v18  ;;  %v2126_v37 = vld [vmem:[%s2871_s3 + $0xc4] ss:$12 sps:$4 sm:$0xff]   ;;  %v2484_v38 = vld [vmem:[%s2460_s29 + $0x8] ss:$12 sps:$4 sm:$0xff]   ;;  %v2130_v40 = vld [vmem:[%s2871_s3 + $0xc0] ss:$12 sps:$4 sm:$0xff]  }
  0x25   : > { %v2129_v39 = vld [vmem:[%s2871_s3 + $0xc8] ss:$12 sps:$4 sm:$0xff]   ;;  %v2134_v43 = vld [vmem:[%s2871_s3 + $0xe0] ss:$12 sps:$4 sm:$0xff]   ;;  %v2135_v44 = vld [vmem:[%s2871_s3 + $0xd8] ss:$12 sps:$4 sm:$0xff]  }
  0x26   : > { %899 = vmatpush1.bf16.msra.mxu0 %v2100_v19  ;;  %v2131_v41 = vld [vmem:[%s2871_s3 + $0x8] ss:$12 sps:$4 sm:$0xff]   ;;  %v2136_v45 = vld [vmem:[%s2871_s3 + $0x20] ss:$12 sps:$4 sm:$0xff]   ;;  %v2139_v47 = vld [vmem:[%s2871_s3 + $0xf8] ss:$12 sps:$4 sm:$0xff]  }
  0x27   : > { %942 = vmatpush1.bf16.msra.mxu1 %v2101_v20  ;;  %900 = vmatprep.subr.bf16.mxu0 %v2102_v21  ;;  %v2132_v42 = vld [vmem:[%s2871_s3 + $0xdc] ss:$12 sps:$4 sm:$0xff]   ;;  %v2137_v46 = vld [vmem:[%s2871_s3 + $0xf4] ss:$12 sps:$4 sm:$0xff]   ;;  %v2141_v49 = vld [vmem:[%s2871_s3 + $0x38] ss:$12 sps:$4 sm:$0xff]  }
  0x28   : > { %943 = vmatprep.subr.bf16.mxu1 %v2104_v22  ;;  %v2140_v48 = vld [vmem:[%s2871_s3 + $0xf0] ss:$12 sps:$4 sm:$0xff]   ;;  %v2142_v50 = vld [vmem:[%s2871_s3 + $0x10c] ss:$12 sps:$4 sm:$0xff]   ;;  %v2145_v52 = vld [vmem:[%s2871_s3 + $0x108] ss:$12 sps:$4 sm:$0xff]  }
  0x29   : > { %v2144_v51 = vld [vmem:[%s2871_s3 + $0x110] ss:$12 sps:$4 sm:$0xff]   ;;  %v2149_v55 = vld [vmem:[%s2871_s3 + $0x128] ss:$12 sps:$4 sm:$0xff]   ;;  %v2150_v56 = vld [vmem:[%s2871_s3 + $0x120] ss:$12 sps:$4 sm:$0xff]  }
  0x2a   : > { %901 = vmatpush1.bf16.msra.mxu0 %v2106_v23  ;;  %v2146_v53 = vld [vmem:[%s2871_s3 + $0x50] ss:$12 sps:$4 sm:$0xff]   ;;  %v2151_v57 = vld [vmem:[%s2871_s3 + $0x68] ss:$12 sps:$4 sm:$0xff]   ;;  %v2154_v59 = vld [vmem:[%s2871_s3 + $0x140] ss:$12 sps:$4 sm:$0xff]  }
  0x2b   : > { %944 = vmatpush1.bf16.msra.mxu1 %v2107_v24  ;;  %902 = vmatprep.subr.bf16.mxu0 %v2108_v25  ;;  %v2147_v54 = vld [vmem:[%s2871_s3 + $0x124] ss:$12 sps:$4 sm:$0xff]   ;;  %v2152_v58 = vld [vmem:[%s2871_s3 + $0x13c] ss:$12 sps:$4 sm:$0xff]   ;;  %v2156_v62 = vld [vmem:[%s2871_s3 + $0x80] ss:$12 sps:$4 sm:$0xff]  }
  0x2c   : > { %945 = vmatprep.subr.bf16.mxu1 %v2110_v26  ;;  %v2169_v60 = vld [vmem:[%s2460_s29 + $0x4] ss:$12 sps:$4 sm:$0xff]   ;;  %v2157_v63 = vld [vmem:[%s2871_s3 + $0x154] ss:$12 sps:$4 sm:$0xff]   ;;  %v2162_v3 = vld [vmem:[%s2871_s3 + $0x16c] ss:$12 sps:$4 sm:$0xff]  }
  0x2d   : > { %v2155_v61 = vld [vmem:[%s2871_s3 + $0x138] ss:$12 sps:$4 sm:$0xff]   ;;  %v2160_v1 = vld [vmem:[%s2871_s3 + $0x150] ss:$12 sps:$4 sm:$0xff]   ;;  %924 = vmatprep.mubr.bf16.mxu0 %v2169_v60  ;;  %v2165_v5 = vld [vmem:[%s2871_s3 + $0x168] ss:$12 sps:$4 sm:$0xff]  }
  0x2e   : > { %903 = vmatpush1.bf16.msra.mxu0 %v2112_v27  ;;  %v2159_v0 = vld [vmem:[%s2871_s3 + $0x158] ss:$12 sps:$4 sm:$0xff]   ;;  %v2164_v4 = vld [vmem:[%s2871_s3 + $0x170] ss:$12 sps:$4 sm:$0xff]   ;;  %v2167_v9 = vld [vmem:[%s2460_s29] ss:$12 sps:$4 sm:$0xff]  }
  0x2f   : > { %946 = vmatpush1.bf16.msra.mxu1 %v2113_v28  ;;  %904 = vmatprep.subr.bf16.mxu0 %v2114_v29  ;;  %v2161_v2 = vld [vmem:[%s2871_s3 + $0x98] ss:$12 sps:$4 sm:$0xff]   ;;  %v2166_v7 = vld [vmem:[%s2871_s3 + $0xb0] ss:$12 sps:$4 sm:$0xff]   ;;  %v2170_v10 = vld [vmem:[%s2870_s2] ss:$12 sps:$4 sm:$0xff]  }
  0x30   : > { %947 = vmatprep.subr.bf16.mxu1 %v2116_v30  ;;  %v2172_v8 = vld [vmem:[%s2870_s2 + $0x4] ss:$12 sps:$4 sm:$0xff]   ;;  %v2173_v11 = vld [vmem:[%s2871_s3 + $0x188] ss:$12 sps:$4 sm:$0xff]   ;;  %v2177_v15 = vld [vmem:[%s2871_s3 + $0x1a0] ss:$12 sps:$4 sm:$0xff]  }
  0x31   : > { %v2176_v13 = vld [vmem:[%s2870_s2 + $0x1c] ss:$12 sps:$4 sm:$0xff]   ;;  %v2174_v14 = vld [vmem:[%s2870_s2 + $0x18] ss:$12 sps:$4 sm:$0xff]   ;;  %v2180_v16 = vld [vmem:[%s2870_s2 + $0x34] ss:$12 sps:$4 sm:$0xff]  }
  0x32   : > { %905 = vmatpush1.bf16.msra.mxu0 %v2118_v31  ;;  %v2178_v17 = vld [vmem:[%s2870_s2 + $0x30] ss:$12 sps:$4 sm:$0xff]   ;;  %v2181_v18 = vld [vmem:[%s2871_s3 + $0x1b8] ss:$12 sps:$4 sm:$0xff]   ;;  %v2182_v20 = vld [vmem:[%s2870_s2 + $0x48] ss:$12 sps:$4 sm:$0xff]  }
  0x33   : > { %948 = vmatpush1.bf16.msra.mxu1 %v2119_v32  ;;  %906 = vmatprep.subr.bf16.mxu0 %v2120_v33  ;;  %v2184_v19 = vld [vmem:[%s2870_s2 + $0x4c] ss:$12 sps:$4 sm:$0xff]   ;;  %v2185_v21 = vld [vmem:[%s2871_s3 + $0x1d0] ss:$12 sps:$4 sm:$0xff]   ;;  %v2189_v24 = vld [vmem:[%s2871_s3 + $0x1e8] ss:$12 sps:$4 sm:$0xff]  }
  0x34   : > { %949 = vmatprep.subr.bf16.mxu1 %v2122_v34  ;;  %v2188_v22 = vld [vmem:[%s2870_s2 + $0x64] ss:$12 sps:$4 sm:$0xff]   ;;  %v2186_v23 = vld [vmem:[%s2870_s2 + $0x60] ss:$12 sps:$4 sm:$0xff]   ;;  %v2192_v25 = vld [vmem:[%s2870_s2 + $0x7c] ss:$12 sps:$4 sm:$0xff]  }
  0x35   : > { %v2190_v26 = vld [vmem:[%s2870_s2 + $0x78] ss:$12 sps:$4 sm:$0xff]   ;;  %s242_s30 = sand.u32 1, %s2292_s18   ;;  %v2193_v27 = vld [vmem:[%s2871_s3 + $0x200] ss:$12 sps:$4 sm:$0xff]  }
  0x36   : > { %907 = vmatpush1.bf16.msra.mxu0 %v2124_v35  ;;  %v2196_v28 = vld [vmem:[%s2870_s2 + $0x94] ss:$12 sps:$4 sm:$0xff]   ;;  %s2049_s11 = smul.u32 24, %s242_s30  ;;  %v2194_v29 = vld [vmem:[%s2870_s2 + $0x90] ss:$12 sps:$4 sm:$0xff]  }
  0x37   : > { %950 = vmatpush1.bf16.msra.mxu1 %v2125_v36  ;;  %908 = vmatprep.subr.bf16.mxu0 %v2126_v37  ;;  %v2197_v30 = vld [vmem:[%s2871_s3 + $0x218] ss:$12 sps:$4 sm:$0xff]   ;;  %v2198_v32 = vld [vmem:[%s2870_s2 + $0xa8] ss:$12 sps:$4 sm:$0xff]   ;;  %v2201_v33 = vld [vmem:[%s2871_s3 + $0x230] ss:$12 sps:$4 sm:$0xff]  }
  0x38   : > { %1934 = vmatprep.subr.bf16.mxu1 %v2129_v39  ;;  %v2200_v31 = vld [vmem:[%s2870_s2 + $0xac] ss:$12 sps:$4 sm:$0xff]   ;;  %v2204_v34 = vld [vmem:[%s2870_s2 + $0xc4] ss:$12 sps:$4 sm:$0xff]   ;;  %v2205_v35 = vld [vmem:[%s2870_s2 + $0xc8] ss:$12 sps:$4 sm:$0xff]  }
  0x39   : > { %v2202_v36 = vld [vmem:[%s2870_s2 + $0xc0] ss:$12 sps:$4 sm:$0xff]   ;;  %v2206_v37 = vld [vmem:[%s2870_s2 + $0x8] ss:$12 sps:$4 sm:$0xff]   ;;  %s2677_s10 = scalar_lea.vmem [#allocation2], %s2049_s11 }
  0x3a   : > { %968 = vmatmul.mubr.bf16.vlgmr.msra.gmra.mrb[0].mxu1 %v2484_v38  ;;  %909 = vmatpush1.bf16.msra.mxu0 %v2130_v40  ;;  %v2209_v39 = vld [vmem:[%s2870_s2 + $0xdc] ss:$12 sps:$4 sm:$0xff]  }
  0x3b   : > { %1935 = vmatpush3.bf16.msra.mxu1 %v2131_v41  ;;  %910 = vmatprep.subr.bf16.mxu0 %v2132_v42  ;;  %v2244_v40 = vld [vmem:[%s2677_s10 + $0x4] ss:$12 sps:$4 sm:$0xff]   ;;  %v2210_v41 = vld [vmem:[%s2870_s2 + $0xe0] ss:$12 sps:$4 sm:$0xff]  }
  0x3c   : > { %1936 = vmatprep.subr.bf16.mxu1 %v2134_v43  ;;  %1010 = vmatprep.mubr.bf16.mxu1 %v2169_v60  ;;  %v2207_v42 = vld [vmem:[%s2870_s2 + $0xd8] ss:$12 sps:$4 sm:$0xff]   ;;  %v2211_v43 = vld [vmem:[%s2870_s2 + $0x20] ss:$12 sps:$4 sm:$0xff]  }
  0x3d   : > { %v2235_v60 = vld [vmem:[%s2870_s2 + $0x158] ss:$12 sps:$4 sm:$0xff]  }
  0x3e   : > { %911 = vmatpush1.bf16.msra.mxu0 %v2135_v44  ;;  %v2214_v44 = vld [vmem:[%s2870_s2 + $0xf4] ss:$12 sps:$4 sm:$0xff]  }
  0x3f   : > { %1937 = vmatpush3.bf16.msra.mxu1 %v2136_v45  ;;  %912 = vmatprep.subr.bf16.mxu0 %v2137_v46  ;;  %v2212_v45 = vld [vmem:[%s2870_s2 + $0xf0] ss:$12 sps:$4 sm:$0xff]   ;;  %v2216_v46 = vld [vmem:[%s2870_s2 + $0x38] ss:$12 sps:$4 sm:$0xff]  }
  0x40   : > { %1938 = vmatprep.subr.bf16.mxu1 %v2139_v47  ;;  %v2219_v47 = vld [vmem:[%s2870_s2 + $0x10c] ss:$12 sps:$4 sm:$0xff]  }
  0x42   : > { %913 = vmatpush1.bf16.msra.mxu0 %v2140_v48  ;;  %v2220_v48 = vld [vmem:[%s2870_s2 + $0x110] ss:$12 sps:$4 sm:$0xff]  }
  0x43   : > { %1939 = vmatpush3.bf16.msra.mxu1 %v2141_v49  ;;  %914 = vmatprep.subr.bf16.mxu0 %v2142_v50  ;;  %v2217_v49 = vld [vmem:[%s2870_s2 + $0x108] ss:$12 sps:$4 sm:$0xff]   ;;  %v2221_v50 = vld [vmem:[%s2870_s2 + $0x50] ss:$12 sps:$4 sm:$0xff]  }
  0x44   : > { %1940 = vmatprep.subr.bf16.mxu1 %v2144_v51  ;;  %v2224_v51 = vld [vmem:[%s2870_s2 + $0x124] ss:$12 sps:$4 sm:$0xff]  }
  0x46   : > { %915 = vmatpush1.bf16.msra.mxu0 %v2145_v52  ;;  %v2225_v52 = vld [vmem:[%s2870_s2 + $0x128] ss:$12 sps:$4 sm:$0xff]  }
  0x47   : > { %1941 = vmatpush3.bf16.msra.mxu1 %v2146_v53  ;;  %916 = vmatprep.subr.bf16.mxu0 %v2147_v54  ;;  %v2222_v53 = vld [vmem:[%s2870_s2 + $0x120] ss:$12 sps:$4 sm:$0xff]   ;;  %v2226_v54 = vld [vmem:[%s2870_s2 + $0x68] ss:$12 sps:$4 sm:$0xff]  }
  0x48   : > { %1942 = vmatprep.subr.bf16.mxu1 %v2149_v55  ;;  %v2229_v55 = vld [vmem:[%s2870_s2 + $0x13c] ss:$12 sps:$4 sm:$0xff]  }
  0x4a   : > { %917 = vmatpush1.bf16.msra.mxu0 %v2150_v56  ;;  %v2230_v56 = vld [vmem:[%s2870_s2 + $0x140] ss:$12 sps:$4 sm:$0xff]  }
  0x4b   : > { %1943 = vmatpush3.bf16.msra.mxu1 %v2151_v57  ;;  %918 = vmatprep.subr.bf16.mxu0 %v2152_v58  ;;  %v2227_v57 = vld [vmem:[%s2870_s2 + $0x138] ss:$12 sps:$4 sm:$0xff]   ;;  %v2231_v58 = vld [vmem:[%s2870_s2 + $0x80] ss:$12 sps:$4 sm:$0xff]  }
  0x4c   : > { %1944 = vmatprep.subr.bf16.mxu1 %v2154_v59  ;;  %v2234_v59 = vld [vmem:[%s2870_s2 + $0x154] ss:$12 sps:$4 sm:$0xff]  }
  0x4e   : > { %919 = vmatpush1.bf16.msra.mxu0 %v2155_v61  ;;  %v2232_v61 = vld [vmem:[%s2870_s2 + $0x150] ss:$12 sps:$4 sm:$0xff]  }
  0x4f   : > { %1945 = vmatpush3.bf16.msra.mxu1 %v2156_v62  ;;  %920 = vmatprep.subr.bf16.mxu0 %v2157_v63  ;;  %v2236_v62 = vld [vmem:[%s2870_s2 + $0x98] ss:$12 sps:$4 sm:$0xff]  }
  0x50   : > { %1946 = vmatprep.subr.bf16.mxu1 %v2159_v0  ;;  %v2239_v63 = vld [vmem:[%s2870_s2 + $0x16c] ss:$12 sps:$4 sm:$0xff]   ;;  %v2240_v0 = vld [vmem:[%s2870_s2 + $0x170] ss:$12 sps:$4 sm:$0xff]  }
  0x52   : > { %921 = vmatpush1.bf16.msra.mxu0 %v2160_v1  ;;  %v2237_v1 = vld [vmem:[%s2870_s2 + $0x168] ss:$12 sps:$4 sm:$0xff]  }
  0x53   : > { %1947 = vmatpush3.bf16.msra.mxu1 %v2161_v2  ;;  %922 = vmatprep.subr.bf16.mxu0 %v2162_v3  ;;  %v2241_v2 = vld [vmem:[%s2870_s2 + $0xb0] ss:$12 sps:$4 sm:$0xff]  }
  0x54   : > { %1948 = vmatprep.subr.bf16.mxu1 %v2164_v4  ;;  %v2247_v3 = vld [vmem:[%s2870_s2 + $0x184] ss:$12 sps:$4 sm:$0xff]  }
  0x55   : > { %v2242_v4 = vld [vmem:[%s2677_s10] ss:$12 sps:$4 sm:$0xff]  }
  0x56   : > { %923 = vmatpush1.bf16.msra.mxu0 %v2165_v5  ;;  %v2245_v5 = vld [vmem:[%s2870_s2 + $0x180] ss:$12 sps:$4 sm:$0xff]  }
  0x57   : > { %1949 = vmatpush3.bf16.msra.mxu1 %v2166_v7  ;;  %1460 = vmatprep.subr.bf16.mxu0 %v2172_v8  ;;  %v2248_v7 = vld [vmem:[%s2870_s2 + $0x188] ss:$12 sps:$4 sm:$0xff]  }
  0x58   : > { %1996 = vmatprep.subr.bf16.mxu1 %v2303_v12  ;;  %v2251_v8 = vld [vmem:[%s2870_s2 + $0x19c] ss:$12 sps:$4 sm:$0xff]  }
  0x59   : > { %925 = vmatmul.mubr.bf16.vlgmr.msra.gmra.mrb[0].mxu0 %v2167_v9 }
  0x5a   : > { %1011 = vmatmul.mubr.bf16.vlgmr.msra.gmra.mrb[4].mxu1 %v2167_v9  ;;  %1461 = vmatpush1.bf16.msra.mxu0 %v2170_v10  ;;  %v2249_v9 = vld [vmem:[%s2870_s2 + $0x198] ss:$12 sps:$4 sm:$0xff]   ;;  %v2252_v10 = vld [vmem:[%s2870_s2 + $0x1a0] ss:$12 sps:$4 sm:$0xff]  }
  0x5b   : > { %1997 = vmatpush3.bf16.msra.mxu1 %v2173_v11  ;;  %1462 = vmatprep.subr.bf16.mxu0 %v2176_v13  ;;  %v2255_v11 = vld [vmem:[%s2870_s2 + $0x1b4] ss:$12 sps:$4 sm:$0xff]   ;;  %v2253_v13 = vld [vmem:[%s2870_s2 + $0x1b0] ss:$12 sps:$4 sm:$0xff]  }
  0x5c   : > { %1998 = vmatprep.subr.bf16.mxu1 %v2303_v12  ;;  %2012 = vmatprep.mubr.msk.bf16.mxu1 %vm2304_vm0, %v2303_v12 }
  0x5d   : > { %1492 = vmatprep.mubr.bf16.mxu0 %v2244_v40 }
  0x5e   : > { %1463 = vmatpush1.bf16.msra.mxu0 %v2174_v14  ;;  %v2256_v14 = vld [vmem:[%s2870_s2 + $0x1b8] ss:$12 sps:$4 sm:$0xff]  }
  0x5f   : > { %1999 = vmatpush3.bf16.msra.mxu1 %v2177_v15  ;;  %1464 = vmatprep.subr.bf16.mxu0 %v2180_v16  ;;  %v2257_v15 = vld [vmem:[%s2870_s2 + $0x1c8] ss:$12 sps:$4 sm:$0xff]   ;;  %v2260_v16 = vld [vmem:[%s2870_s2 + $0x1d0] ss:$12 sps:$4 sm:$0xff]  }
  0x60   : > { %2000 = vmatprep.subr.bf16.mxu1 %v2303_v12 }
  0x62   : > { %1465 = vmatpush1.bf16.msra.mxu0 %v2178_v17  ;;  %v2263_v17 = vld [vmem:[%s2870_s2 + $0x1e4] ss:$12 sps:$4 sm:$0xff]  }
  0x63   : > { %2001 = vmatpush3.bf16.msra.mxu1 %v2181_v18  ;;  %1466 = vmatprep.subr.bf16.mxu0 %v2184_v19  ;;  %v2261_v18 = vld [vmem:[%s2870_s2 + $0x1e0] ss:$12 sps:$4 sm:$0xff]   ;;  %v2264_v19 = vld [vmem:[%s2870_s2 + $0x1e8] ss:$12 sps:$4 sm:$0xff]  }
  0x64   : > { %2002 = vmatprep.subr.bf16.mxu1 %v2303_v12 }
  0x66   : > { %1467 = vmatpush1.bf16.msra.mxu0 %v2182_v20  ;;  %v2267_v20 = vld [vmem:[%s2870_s2 + $0x1fc] ss:$12 sps:$4 sm:$0xff]  }
  0x67   : > { %2003 = vmatpush3.bf16.msra.mxu1 %v2185_v21  ;;  %1468 = vmatprep.subr.bf16.mxu0 %v2188_v22  ;;  %v2265_v21 = vld [vmem:[%s2870_s2 + $0x1f8] ss:$12 sps:$4 sm:$0xff]   ;;  %v2268_v22 = vld [vmem:[%s2870_s2 + $0x200] ss:$12 sps:$4 sm:$0xff]  }
  0x68   : > { %2004 = vmatprep.subr.bf16.mxu1 %v2303_v12 }
  0x6a   : > { %1469 = vmatpush1.bf16.msra.mxu0 %v2186_v23  ;;  %v2271_v23 = vld [vmem:[%s2870_s2 + $0x214] ss:$12 sps:$4 sm:$0xff]  }
  0x6b   : > { %2005 = vmatpush3.bf16.msra.mxu1 %v2189_v24  ;;  %1470 = vmatprep.subr.bf16.mxu0 %v2192_v25  ;;  %v2269_v24 = vld [vmem:[%s2870_s2 + $0x210] ss:$12 sps:$4 sm:$0xff]   ;;  %v2272_v25 = vld [vmem:[%s2870_s2 + $0x218] ss:$12 sps:$4 sm:$0xff]  }
  0x6c   : > { %2006 = vmatprep.subr.bf16.mxu1 %v2303_v12 }
  0x6e   : > { %1471 = vmatpush1.bf16.msra.mxu0 %v2190_v26  ;;  %v2275_v26 = vld [vmem:[%s2870_s2 + $0x22c] ss:$12 sps:$4 sm:$0xff]  }
  0x6f   : > { %2007 = vmatpush3.bf16.msra.mxu1 %v2193_v27  ;;  %1472 = vmatprep.subr.bf16.mxu0 %v2196_v28  ;;  %v2273_v27 = vld [vmem:[%s2870_s2 + $0x228] ss:$12 sps:$4 sm:$0xff]   ;;  %v2276_v28 = vld [vmem:[%s2870_s2 + $0x230] ss:$12 sps:$4 sm:$0xff]  }
  0x70   : > { %2008 = vmatprep.subr.bf16.mxu1 %v2303_v12 }
  0x72   : > { %1473 = vmatpush1.bf16.msra.mxu0 %v2194_v29  ;;  %v2277_v29 = vld [vmem:[%s2677_s10 + $0x8] ss:$12 sps:$4 sm:$0xff]  }
  0x73   : > { %2009 = vmatpush3.bf16.msra.mxu1 %v2197_v30  ;;  %1474 = vmatprep.subr.bf16.mxu0 %v2200_v31 }
  0x74   : > { %2010 = vmatprep.subr.bf16.mxu1 %v2303_v12 }
  0x76   : > { %1475 = vmatpush1.bf16.msra.mxu0 %v2198_v32 }
  0x77   : > { %2011 = vmatpush3.bf16.msra.mxu1 %v2201_v33  ;;  %1476 = vmatprep.subr.bf16.mxu0 %v2204_v34 }
  0x78   : > { %1965 = vmatprep.subr.bf16.mxu1 %v2205_v35 }
  0x7a   : > { %2013 = vmatmul.mubr.bf16.vlgmr.msra.gmra.mrb[8].mxu1 %v2484_v38  ;;  %1477 = vmatpush1.bf16.msra.mxu0 %v2202_v36  ;;  %v2215_v38 = vld [vmem:[%s2870_s2 + $0xf8] ss:$12 sps:$4 sm:$0xff]  }
  0x7b   : > { %1966 = vmatpush3.bf16.msra.mxu1 %v2206_v37  ;;  %1478 = vmatprep.subr.bf16.mxu0 %v2209_v39 }
  0x7c   : > { %1967 = vmatprep.subr.bf16.mxu1 %v2210_v41  ;;  %1578 = vmatprep.mubr.bf16.mxu1 %v2244_v40 }
  0x7e   : > { %1479 = vmatpush1.bf16.msra.mxu0 %v2207_v42 }
  0x7f   : > { %1968 = vmatpush3.bf16.msra.mxu1 %v2211_v43  ;;  %1480 = vmatprep.subr.bf16.mxu0 %v2214_v44 }
  0x80   : > { %1969 = vmatprep.subr.bf16.mxu1 %v2215_v38 }
  0x82   : > { %1481 = vmatpush1.bf16.msra.mxu0 %v2212_v45 }
  0x83   : > { %1970 = vmatpush3.bf16.msra.mxu1 %v2216_v46  ;;  %1482 = vmatprep.subr.bf16.mxu0 %v2219_v47 }
  0x84   : > { %1971 = vmatprep.subr.bf16.mxu1 %v2220_v48 }
  0x86   : > { %1483 = vmatpush1.bf16.msra.mxu0 %v2217_v49 }
  0x87   : > { %1972 = vmatpush3.bf16.msra.mxu1 %v2221_v50  ;;  %1484 = vmatprep.subr.bf16.mxu0 %v2224_v51 }
  0x88   : > { %1973 = vmatprep.subr.bf16.mxu1 %v2225_v52 }
  0x8a   : > { %1485 = vmatpush1.bf16.msra.mxu0 %v2222_v53 }
  0x8b   : > { %1974 = vmatpush3.bf16.msra.mxu1 %v2226_v54  ;;  %1486 = vmatprep.subr.bf16.mxu0 %v2229_v55 }
  0x8c   : > { %1975 = vmatprep.subr.bf16.mxu1 %v2230_v56 }
  0x8e   : > { %1487 = vmatpush1.bf16.msra.mxu0 %v2227_v57 }
  0x8f   : > { %1976 = vmatpush3.bf16.msra.mxu1 %v2231_v58  ;;  %1488 = vmatprep.subr.bf16.mxu0 %v2234_v59 }
  0x90   : > { %1977 = vmatprep.subr.bf16.mxu1 %v2235_v60 }
  0x92   : > { %1489 = vmatpush1.bf16.msra.mxu0 %v2232_v61  ;;  %v1630_v61 = vlaneseq }
  0x93   : > { %1978 = vmatpush3.bf16.msra.mxu1 %v2236_v62  ;;  %1490 = vmatprep.subr.bf16.mxu0 %v2239_v63 }
  0x94   : > { %1979 = vmatprep.subr.bf16.mxu1 %v2240_v0  ;;  %v1631_v62 = vshrl.u32 %v1630_v61, 7 }
  0x96   : > { %1491 = vmatpush1.bf16.msra.mxu0 %v2237_v1  ;;  %v1632_v63 = vsub.s32 0, %v1631_v62  ;;  %v1640_v0 = vsub.s32 2, %v1631_v62  ;;  %v1628_v1 = vld [vmem:[%s2872_s4] sm:$0x7] }
  0x97   : > { %1980 = vmatpush3.bf16.msra.mxu1 %v2241_v2  ;;  %1503 = vmatprep.subr.bf16.mxu0 %v2247_v3  ;;  %v1636_v2 = vsub.s32 1, %v1631_v62 }
  0x98   : > { %2016 = vmatprep.subr.bf16.mxu1 %v2303_v12  ;;  %v1633_v3 = vrot.slane %v1628_v1, %v1632_v63 }
  0x99   : > { %1493 = vmatmul.mubr.bf16.vlgmr.msra.gmra.mrb[4].mxu0 %v2242_v4 }
  0x9a   : > { %1579 = vmatmul.mubr.bf16.vlgmr.msra.gmra.mrb[12].mxu1 %v2242_v4  ;;  %1504 = vmatpush1.bf16.msra.mxu0 %v2245_v5  ;;  %v1641_v4 = vrot.slane %v1628_v1, %v1640_v0 }
  0x9b   : > { %2017 = vmatpush3.bf16.msra.mxu1 %v2248_v7  ;;  %1505 = vmatprep.subr.bf16.mxu0 %v2251_v8  ;;  %v1637_v8 = vrot.slane %v1628_v1, %v1636_v2 }
  0x9c   : > { %2018 = vmatprep.subr.bf16.mxu1 %v2303_v12  ;;  %1535 = vmatprep.mubr.bf16.mxu0 %v2302_v6  ;;  %v2259_v6 = vld [vmem:[%s2870_s2 + $0x1cc] ss:$12 sps:$4 sm:$0xff]  }
  0x9d   : > { %2032 = vmatprep.mubr.msk.bf16.mxu1 %vm2304_vm0, %v2303_v12 }
  0x9e   : > { %1506 = vmatpush1.bf16.msra.mxu0 %v2249_v9 }
  0x9f   : > { %2019 = vmatpush3.bf16.msra.mxu1 %v2252_v10  ;;  %1507 = vmatprep.subr.bf16.mxu0 %v2255_v11 }
  0xa0   : > { %2020 = vmatprep.subr.bf16.mxu1 %v2303_v12 }
  0xa2   : > { %1508 = vmatpush1.bf16.msra.mxu0 %v2253_v13 }
  0xa3   : > { %2021 = vmatpush3.bf16.msra.mxu1 %v2256_v14  ;;  %1509 = vmatprep.subr.bf16.mxu0 %v2259_v6 }
  0xa4   : > { %2022 = vmatprep.subr.bf16.mxu1 %v2303_v12 }
  0xa6   : > { %1510 = vmatpush1.bf16.msra.mxu0 %v2257_v15 }
  0xa7   : > { %2023 = vmatpush3.bf16.msra.mxu1 %v2260_v16  ;;  %1511 = vmatprep.subr.bf16.mxu0 %v2263_v17 }
  0xa8   : > { %2024 = vmatprep.subr.bf16.mxu1 %v2303_v12 }
  0xaa   : > { %1512 = vmatpush1.bf16.msra.mxu0 %v2261_v18 }
  0xab   : > { %2025 = vmatpush3.bf16.msra.mxu1 %v2264_v19  ;;  %1513 = vmatprep.subr.bf16.mxu0 %v2267_v20 }
  0xac   : > { %2026 = vmatprep.subr.bf16.mxu1 %v2303_v12 }
  0xae   : > { %1514 = vmatpush1.bf16.msra.mxu0 %v2265_v21 }
  0xaf   : > { %2027 = vmatpush3.bf16.msra.mxu1 %v2268_v22  ;;  %1515 = vmatprep.subr.bf16.mxu0 %v2271_v23 }
  0xb0   : > { %2028 = vmatprep.subr.bf16.mxu1 %v2303_v12 }
  0xb2   : > { %1516 = vmatpush1.bf16.msra.mxu0 %v2269_v24 }
  0xb3   : > { %2029 = vmatpush3.bf16.msra.mxu1 %v2272_v25  ;;  %1517 = vmatprep.subr.bf16.mxu0 %v2275_v26 }
  0xb4   : > { %2030 = vmatprep.subr.bf16.mxu1 %v2303_v12 }
  0xb6   : > { %1518 = vmatpush1.bf16.msra.mxu0 %v2273_v27 }
  0xb7   : > { %2031 = vmatpush3.bf16.msra.mxu1 %v2276_v28 }
  0xb9   : > { %1536 = vmatmul.mubr.bf16.vlgmr.msra.gmra.mrb[4].mxu0 %v2277_v29 }
  0xba   : > { %2033 = vmatmul.mubr.bf16.vlgmr.msra.gmra.mrb[16].mxu1 %v2277_v29 }
 0x10d   : > { %v969_v30 = vpop.f32.mrb[0].mxu1 }
 0x10e   : > { %v971_v31 = vpop.f32.mrb[1].mxu1 }
 0x10f   : > { %v973_v32 = vpop.f32.mrb[2].mxu1 }
 0x110   : > { %v975_v33 = vpop.f32.mrb[3].mxu1 }
 0x12c   : > { %v926_v34 = vpop.f32.mrb[0].mxu0 }
 0x12d   : > { %v1950_v35 = vpop.f32.mrb[4].mxu1  ;;  %v970_v36 = vadd.f32 %v969_v30, %v926_v34  ;;  %v928_v37 = vpop.f32.mrb[1].mxu0 }
 0x12e   : > { %v1951_v39 = vpop.f32.mrb[5].mxu1  ;;  %v972_v40 = vadd.f32 %v971_v31, %v928_v37  ;;  %v930_v42 = vpop.f32.mrb[2].mxu0 }
 0x12f   : > { %v1952_v41 = vadd.f32 %v1951_v39, %v1950_v35  ;;  %v1953_v43 = vpop.f32.mrb[6].mxu1  ;;  %v974_v44 = vadd.f32 %v973_v32, %v930_v42  ;;  %v932_v12 = vpop.f32.mrb[3].mxu0 }
 0x130   : > { %v1954_v38 = vpop.f32.mrb[7].mxu1  ;;  %v976_v45 = vadd.f32 %v975_v33, %v932_v12 }
 0x131   : > { %v1955_v46 = vadd.f32 %v1954_v38, %v1953_v43 }
 0x14d   : > { %v1053_v47 = vpop.f32.mrb[8].mxu1 }
 0x14e   : > { %v1054_v48 = vadd.f32 %v1952_v41, %v1053_v47  ;;  %v2014_v49 = vpop.f32.mrb[9].mxu1 }
 0x14f   : > { %v1056_v50 = vpop.f32.mrb[10].mxu1 }
 0x150   : > { %v1057_v51 = vadd.f32 %v1955_v46, %v1056_v50  ;;  %v2015_v52 = vpop.f32.mrb[11].mxu1 }
 0x16d   : > { %v1981_v53 = vpop.f32.mrb[12].mxu1 }
 0x16e   : > { %v1982_v54 = vpop.f32.mrb[13].mxu1 }
 0x16f   : > { %v1983_v55 = vadd.f32 %v1982_v54, %v1981_v53  ;;  %v1984_v56 = vpop.f32.mrb[14].mxu1 }
 0x170   : > { %v1985_v57 = vpop.f32.mrb[15].mxu1 }
 0x171   : > { %v1986_v58 = vadd.f32 %v1985_v57, %v1984_v56  ;;  %v1581_v59 = vadd.f32 %v1983_v55, %v1054_v48 }
 0x173   : > { %v1584_v60 = vadd.f32 %v1986_v58, %v1057_v51 }
 0x18c   : > { %v1537_v5 = vpop.f32.mrb[4].mxu0 }
 0x18d   : > { %v1621_v7 = vpop.f32.mrb[16].mxu1  ;;  %v2037_v9 = vadd.f32 %v1537_v5, %v970_v36  ;;  %v1539_v11 = vpop.f32.mrb[5].mxu0 }
 0x18e   : > { %v1622_v10 = vadd.f32 %v1621_v7, %v1581_v59  ;;  %v2034_v13 = vpop.f32.mrb[17].mxu1  ;;  %v2039_v14 = vadd.f32 %v1539_v11, %v972_v40  ;;  %v1541_v6 = vpop.f32.mrb[6].mxu0 }
 0x18f   : > { %v1624_v15 = vpop.f32.mrb[18].mxu1  ;;  %v1645_v16 = vadd.f32 %v2037_v9, %v1633_v3  ;;  %v2041_v18 = vadd.f32 %v1541_v6, %v974_v44  ;;  %v1543_v20 = vpop.f32.mrb[7].mxu0 }
 0x190   : > { %v1647_v17 = vadd.f32 %v1641_v4, %v1622_v10  ;;  %v1625_v19 = vadd.f32 %v1624_v15, %v1584_v60  ;;  %v2035_v21 = vpop.f32.mrb[19].mxu1  ;;  %v1646_v22 = vadd.f32 %v2039_v14, %v1637_v8  ;;  %v2043_v23 = vadd.f32 %v1543_v20, %v976_v45 }
 0x191   : > { %v1648_v25 = vadd.f32 %v2041_v18, %v1633_v3 }
 0x192   : > { %v1931_v24 = vpack.c.bf16 %v1647_v17, %v1647_v17  ;;  %v1650_v26 = vadd.f32 %v1641_v4, %v1625_v19  ;;  %v1930_v27 = vpack.c.bf16 %v1646_v22, %v1645_v16  ;;  %v1649_v28 = vadd.f32 %v2043_v23, %v1637_v8 }
 0x194   : > { %1672 = vst [vmem:[%s289_s26 + $0x8] sm:$0xf] %v1931_v24  ;;  %v1933_v29 = vpack.c.bf16 %v1650_v26, %v1650_v26  ;;  %1671 = vst [vmem:[%s289_s26] sm:$0xff] %v1930_v27  ;;  %v1932_v30 = vpack.c.bf16 %v1649_v28, %v1648_v25 }
 0x196   : > { %1674 = vst [vmem:[%s289_s26 + $0x14] sm:$0xf] %v1933_v29  ;;  %1673 = vst [vmem:[%s289_s26 + $0xc] sm:$0xff] %v1932_v30 }
 0x197 PF: > { %p12_p9 = scmp.ge.s32.totalorder %s2352_s22, 4   ;;  %s2874_s18 = smov %s2296_s19 }
 0x198   : > { %s2875_s19 = smov %s2361_s25  ;;  %s2876_s20 = smov %s2352_s22 }
 0x199   :  { %14 = sbr.rel (!%p12_p9) target bundleno = 2 (0x2), region = 110 }

// kernel: net_forward.32
= control target key start
LH: loop header
LB: loop body
LE: loop exit
PB: predicated region body
PF: predicated region fallthrough
CT: control target
= control target key end

     0   :  { %s2332_s18 = smov 0   ;;  %s2334_s19 = smov 0   ;;  %s2865_s0 = inlined_call_operand.vmem [shape: bf16[32,1536], index: 0, kind: input, shape index: {}]   ;;  %s2866_s1 = inlined_call_operand.vmem [shape: bf16[32,384], index: 1, kind: input, shape index: {}]   ;;  %s2867_s2 = inlined_call_operand.vmem [shape: bf16[384,384], index: 2, kind: input, shape index: {}]   ;;  %s2868_s3 = inlined_call_operand.vmem [shape: bf16[384,384], index: 3, kind: input, shape index: {}]   ;;  %s2869_s4 = inlined_call_operand.vmem [shape: f32[1,384], index: 4, kind: input, shape index: {}]   ;;  %s2870_s5 = inlined_call_operand.vmem [shape: bf16[32,384], index: 5, kind: output, shape index: {}]  }
   0x1   :  { %s2336_s20 = smov 0  }
   0x2 LB: > { %s1754_s21 = sadd.s32 4294967295, %s2297_s20   ;;  %s2349_s22 = sadd.s32 1, %s2297_s20   ;;  %s2297_s20 = sphi %s2336_s20, %s2873_s20   ;;  %s2293_s19 = sphi %s2334_s19, %s2872_s19   ;;  %s2289_s18 = sphi %s2332_s18, %s2871_s18  }
   0x3   : > { %s19_s23 = ssub.s32 %s2297_s20, %s2349_s22  ;;  %s22_s24 = sadd.s32 1, %s2293_s19 }
   0x4   : > { %p20_p0 = scmp.eq.s32.totalorder %s19_s23, 0  ;;  %p29_p1 = scmp.ne.s32.totalorder %s2293_s19, %s2289_s18 }
   0x5   : > { %p30_p2 = scmp.eq.s32.totalorder %s2297_s20, 0  ;;  %p1757_p4 = scmp.ge.s32.totalorder %s2297_s20, 2 }
   0x6   : > { %s2358_s25 = scalar_select %p20_p0, %s2293_s19, %s22_s24  }
   0x7   : > { %p31_p3 = por %p30_p2, %p29_p1  ;;  %179 = sbr.rel (%p1757_p4) target bundleno = 21 (0x15), region = 28 }
   0xe   : > { %182 = sbr.rel (!%p31_p3) target bundleno = 21 (0x15), region = 32  ;;  %s184_s26 = sand.u32 (%p31_p3), 1, %s2293_s19  }
   0xf   : > { %s2045_s27 = smul.u32 (%p31_p3), 96, %s2297_s20 }
  0x10   : > { %s2044_s28 = smul.u32 (%p31_p3), 24, %s184_s26 }
  0x11   : > { %s190_s6 = scalar_lea.vmem (%p31_p3), %s2865_s0, %s2045_s27 }
  0x12   : > { %v205_v0 = vld [vmem:[%s190_s6] sm:$0xff] (%p31_p3)  ;;  %v207_v1 = vld [vmem:[%s190_s6 + $0x30] sm:$0xff] (%p31_p3)  ;;  %v1761_v2 = vld [vmem:[%s190_s6 + $0x8] sm:$0xf] (%p31_p3)  ;;  %s186_s7 = scalar_lea.vmem (%p31_p3), [#allocation2], %s2044_s28 }
  0x13   : > { %206 = vst [vmem:[%s186_s7] sm:$0xff] (%p31_p3), %v205_v0  ;;  %208 = vst [vmem:[%s186_s7 + $0xc] sm:$0xff] (%p31_p3), %v207_v1  ;;  %v1763_v3 = vld [vmem:[%s190_s6 + $0x38] sm:$0xf] (%p31_p3) }
  0x14   : > { %1762 = vst [vmem:[%s186_s7 + $0x8] sm:$0xf] (%p31_p3), %v1761_v2  ;;  %1764 = vst [vmem:[%s186_s7 + $0x14] sm:$0xf] (%p31_p3), %v1763_v3 }
  0x15 PF: > { %p1765_p5 = scmp.ge.s32.totalorder %s2297_s20, 1  ;;  %p234_p6 = scmp.lt.s32.totalorder %s2297_s20, 3 }
  0x17   : > { %p235_p7 = pnand %p1765_p5, %p234_p6 }
  0x18   : > { %v2075_v4 = vld [vmem:[%s2868_s3 + $0x4] ss:$12 sps:$4 sm:$0xff] (!%p235_p7)   ;;  %v2299_v6 = vmov (!%p235_p7), 0   ;;  %v2079_v7 = vld [vmem:[%s2868_s3] ss:$12 sps:$4 sm:$0xff] (!%p235_p7)   ;;  %s1766_s7 = sshll.u32 (!%p235_p7), %s1754_s21, 1 }
  0x19   : > { %238 = sbr.rel (%p235_p7) target bundleno = 407 (0x197), region = 62  ;;  %v2077_v5 = vld [vmem:[%s2868_s3 + $0x184] ss:$12 sps:$4 sm:$0xff] (!%p235_p7)   ;;  %966 = vmatprep.mubr.bf16.mxu1 (!%p235_p7), %v2299_v6  ;;  %891 = vmatprep.subr.bf16.mxu0 (!%p235_p7), %v2075_v4  ;;  %v2080_v8 = vld [vmem:[%s2868_s3 + $0x180] ss:$12 sps:$4 sm:$0xff] (!%p235_p7)   ;;  %p277_p8 = scmp.lt.s32.totalorder (!%p235_p7), %s1766_s7, 3 }
  0x1a   : > { %934 = vmatprep.subr.bf16.mxu1 (!%p235_p7), %v2077_v5  ;;  %v2081_v9 = vld [vmem:[%s2868_s3 + $0x1c] ss:$12 sps:$4 sm:$0xff] (!%p235_p7)   ;;  %892 = vmatpush1.bf16.msra.mxu0 (!%p235_p7), %v2079_v7  ;;  %v2085_v11 = vld [vmem:[%s2868_s3 + $0x18] ss:$12 sps:$4 sm:$0xff] (!%p235_p7)   ;;  %v2087_v13 = vld [vmem:[%s2868_s3 + $0x34] ss:$12 sps:$4 sm:$0xff] (!%p235_p7)  }
  0x1b   : > { %935 = vmatpush1.bf16.msra.mxu1 (!%p235_p7), %v2080_v8  ;;  %v2083_v10 = vld [vmem:[%s2868_s3 + $0x19c] ss:$12 sps:$4 sm:$0xff] (!%p235_p7)   ;;  %893 = vmatprep.subr.bf16.mxu0 (!%p235_p7), %v2081_v9  ;;  %v2086_v12 = vld [vmem:[%s2868_s3 + $0x198] ss:$12 sps:$4 sm:$0xff] (!%p235_p7)   ;;  %v2089_v14 = vld [vmem:[%s2868_s3 + $0x1b4] ss:$12 sps:$4 sm:$0xff] (!%p235_p7)  }
  0x1c   : > { %936 = vmatprep.subr.bf16.mxu1 (!%p235_p7), %v2083_v10  ;;  %v2091_v15 = vld [vmem:[%s2868_s3 + $0x30] ss:$12 sps:$4 sm:$0xff] (!%p235_p7)   ;;  %v2093_v17 = vld [vmem:[%s2868_s3 + $0x4c] ss:$12 sps:$4 sm:$0xff] (!%p235_p7)   ;;  %v2097_v19 = vld [vmem:[%s2868_s3 + $0x48] ss:$12 sps:$4 sm:$0xff] (!%p235_p7)  }
  0x1d   : > { %v2092_v16 = vld [vmem:[%s2868_s3 + $0x1b0] ss:$12 sps:$4 sm:$0xff] (!%p235_p7)   ;;  %v2095_v18 = vld [vmem:[%s2868_s3 + $0x1cc] ss:$12 sps:$4 sm:$0xff] (!%p235_p7)   ;;  %v2098_v20 = vld [vmem:[%s2868_s3 + $0x1c8] ss:$12 sps:$4 sm:$0xff] (!%p235_p7)  }
  0x1e   : > { %894 = vmatpush1.bf16.msra.mxu0 (!%p235_p7), %v2085_v11  ;;  %v2099_v21 = vld [vmem:[%s2868_s3 + $0x64] ss:$12 sps:$4 sm:$0xff] (!%p235_p7)   ;;  %v2103_v23 = vld [vmem:[%s2868_s3 + $0x60] ss:$12 sps:$4 sm:$0xff] (!%p235_p7)   ;;  %v2105_v25 = vld [vmem:[%s2868_s3 + $0x7c] ss:$12 sps:$4 sm:$0xff] (!%p235_p7)  }
  0x1f   : > { %937 = vmatpush1.bf16.msra.mxu1 (!%p235_p7), %v2086_v12  ;;  %895 = vmatprep.subr.bf16.mxu0 (!%p235_p7), %v2087_v13  ;;  %v2101_v22 = vld [vmem:[%s2868_s3 + $0x1e4] ss:$12 sps:$4 sm:$0xff] (!%p235_p7)   ;;  %v2104_v24 = vld [vmem:[%s2868_s3 + $0x1e0] ss:$12 sps:$4 sm:$0xff] (!%p235_p7)   ;;  %v2107_v26 = vld [vmem:[%s2868_s3 + $0x1fc] ss:$12 sps:$4 sm:$0xff] (!%p235_p7)  }
  0x20   : > { %938 = vmatprep.subr.bf16.mxu1 %v2089_v14  ;;  %s2875_s7 = smov (!%p277_p8, %s1766_s7), 3  ;;  %v2109_v27 = vld [vmem:[%s2868_s3 + $0x78] ss:$12 sps:$4 sm:$0xff]   ;;  %v2111_v29 = vld [vmem:[%s2868_s3 + $0x94] ss:$12 sps:$4 sm:$0xff]   ;;  %v2300_v12 = vmov 0.0  }
  0x21   : > { %s2047_s14 = smul.u32 12, %s2875_s7  ;;  %v2110_v28 = vld [vmem:[%s2868_s3 + $0x1f8] ss:$12 sps:$4 sm:$0xff]   ;;  %v2113_v30 = vld [vmem:[%s2868_s3 + $0x214] ss:$12 sps:$4 sm:$0xff]   ;;  %vm2301_vm0 = vmmov 0  }
  0x22   : > { %896 = vmatpush1.bf16.msra.mxu0 %v2091_v15  ;;  %v2115_v31 = vld [vmem:[%s2868_s3 + $0x90] ss:$12 sps:$4 sm:$0xff]   ;;  %v2117_v33 = vld [vmem:[%s2868_s3 + $0xac] ss:$12 sps:$4 sm:$0xff]   ;;  %v2121_v35 = vld [vmem:[%s2868_s3 + $0xa8] ss:$12 sps:$4 sm:$0xff]  }
  0x23   : > { %939 = vmatpush1.bf16.msra.mxu1 %v2092_v16  ;;  %897 = vmatprep.subr.bf16.mxu0 %v2093_v17  ;;  %s2457_s29 = scalar_lea.vmem %s2866_s1, %s2047_s14  ;;  %v2116_v32 = vld [vmem:[%s2868_s3 + $0x210] ss:$12 sps:$4 sm:$0xff]   ;;  %v2119_v34 = vld [vmem:[%s2868_s3 + $0x22c] ss:$12 sps:$4 sm:$0xff]   ;;  %v2122_v36 = vld [vmem:[%s2868_s3 + $0x228] ss:$12 sps:$4 sm:$0xff]   ;;  %s288_s26 = scalar_lea.vmem %s2870_s5, %s2047_s14 }
  0x24   : > { %940 = vmatprep.subr.bf16.mxu1 %v2095_v18  ;;  %v2123_v37 = vld [vmem:[%s2868_s3 + $0xc4] ss:$12 sps:$4 sm:$0xff]   ;;  %v2481_v38 = vld [vmem:[%s2457_s29 + $0x8] ss:$12 sps:$4 sm:$0xff]   ;;  %v2127_v40 = vld [vmem:[%s2868_s3 + $0xc0] ss:$12 sps:$4 sm:$0xff]  }
  0x25   : > { %v2126_v39 = vld [vmem:[%s2868_s3 + $0xc8] ss:$12 sps:$4 sm:$0xff]   ;;  %v2131_v43 = vld [vmem:[%s2868_s3 + $0xe0] ss:$12 sps:$4 sm:$0xff]   ;;  %v2132_v44 = vld [vmem:[%s2868_s3 + $0xd8] ss:$12 sps:$4 sm:$0xff]  }
  0x26   : > { %898 = vmatpush1.bf16.msra.mxu0 %v2097_v19  ;;  %v2128_v41 = vld [vmem:[%s2868_s3 + $0x8] ss:$12 sps:$4 sm:$0xff]   ;;  %v2133_v45 = vld [vmem:[%s2868_s3 + $0x20] ss:$12 sps:$4 sm:$0xff]   ;;  %v2136_v47 = vld [vmem:[%s2868_s3 + $0xf8] ss:$12 sps:$4 sm:$0xff]  }
  0x27   : > { %941 = vmatpush1.bf16.msra.mxu1 %v2098_v20  ;;  %899 = vmatprep.subr.bf16.mxu0 %v2099_v21  ;;  %v2129_v42 = vld [vmem:[%s2868_s3 + $0xdc] ss:$12 sps:$4 sm:$0xff]   ;;  %v2134_v46 = vld [vmem:[%s2868_s3 + $0xf4] ss:$12 sps:$4 sm:$0xff]   ;;  %v2138_v49 = vld [vmem:[%s2868_s3 + $0x38] ss:$12 sps:$4 sm:$0xff]  }
  0x28   : > { %942 = vmatprep.subr.bf16.mxu1 %v2101_v22  ;;  %v2137_v48 = vld [vmem:[%s2868_s3 + $0xf0] ss:$12 sps:$4 sm:$0xff]   ;;  %v2139_v50 = vld [vmem:[%s2868_s3 + $0x10c] ss:$12 sps:$4 sm:$0xff]   ;;  %v2142_v52 = vld [vmem:[%s2868_s3 + $0x108] ss:$12 sps:$4 sm:$0xff]  }
  0x29   : > { %v2141_v51 = vld [vmem:[%s2868_s3 + $0x110] ss:$12 sps:$4 sm:$0xff]   ;;  %v2146_v55 = vld [vmem:[%s2868_s3 + $0x128] ss:$12 sps:$4 sm:$0xff]   ;;  %v2147_v56 = vld [vmem:[%s2868_s3 + $0x120] ss:$12 sps:$4 sm:$0xff]  }
  0x2a   : > { %900 = vmatpush1.bf16.msra.mxu0 %v2103_v23  ;;  %v2143_v53 = vld [vmem:[%s2868_s3 + $0x50] ss:$12 sps:$4 sm:$0xff]   ;;  %v2148_v57 = vld [vmem:[%s2868_s3 + $0x68] ss:$12 sps:$4 sm:$0xff]   ;;  %v2151_v59 = vld [vmem:[%s2868_s3 + $0x140] ss:$12 sps:$4 sm:$0xff]  }
  0x2b   : > { %943 = vmatpush1.bf16.msra.mxu1 %v2104_v24  ;;  %901 = vmatprep.subr.bf16.mxu0 %v2105_v25  ;;  %v2144_v54 = vld [vmem:[%s2868_s3 + $0x124] ss:$12 sps:$4 sm:$0xff]   ;;  %v2149_v58 = vld [vmem:[%s2868_s3 + $0x13c] ss:$12 sps:$4 sm:$0xff]   ;;  %v2153_v62 = vld [vmem:[%s2868_s3 + $0x80] ss:$12 sps:$4 sm:$0xff]  }
  0x2c   : > { %944 = vmatprep.subr.bf16.mxu1 %v2107_v26  ;;  %v2166_v60 = vld [vmem:[%s2457_s29 + $0x4] ss:$12 sps:$4 sm:$0xff]   ;;  %v2154_v63 = vld [vmem:[%s2868_s3 + $0x154] ss:$12 sps:$4 sm:$0xff]   ;;  %v2159_v3 = vld [vmem:[%s2868_s3 + $0x16c] ss:$12 sps:$4 sm:$0xff]  }
  0x2d   : > { %v2152_v61 = vld [vmem:[%s2868_s3 + $0x138] ss:$12 sps:$4 sm:$0xff]   ;;  %v2157_v1 = vld [vmem:[%s2868_s3 + $0x150] ss:$12 sps:$4 sm:$0xff]   ;;  %923 = vmatprep.mubr.bf16.mxu0 %v2166_v60  ;;  %v2162_v5 = vld [vmem:[%s2868_s3 + $0x168] ss:$12 sps:$4 sm:$0xff]  }
  0x2e   : > { %902 = vmatpush1.bf16.msra.mxu0 %v2109_v27  ;;  %v2156_v0 = vld [vmem:[%s2868_s3 + $0x158] ss:$12 sps:$4 sm:$0xff]   ;;  %v2161_v4 = vld [vmem:[%s2868_s3 + $0x170] ss:$12 sps:$4 sm:$0xff]   ;;  %v2164_v9 = vld [vmem:[%s2457_s29] ss:$12 sps:$4 sm:$0xff]  }
  0x2f   : > { %945 = vmatpush1.bf16.msra.mxu1 %v2110_v28  ;;  %903 = vmatprep.subr.bf16.mxu0 %v2111_v29  ;;  %v2158_v2 = vld [vmem:[%s2868_s3 + $0x98] ss:$12 sps:$4 sm:$0xff]   ;;  %v2163_v7 = vld [vmem:[%s2868_s3 + $0xb0] ss:$12 sps:$4 sm:$0xff]   ;;  %v2167_v10 = vld [vmem:[%s2867_s2] ss:$12 sps:$4 sm:$0xff]  }
  0x30   : > { %946 = vmatprep.subr.bf16.mxu1 %v2113_v30  ;;  %v2169_v8 = vld [vmem:[%s2867_s2 + $0x4] ss:$12 sps:$4 sm:$0xff]   ;;  %v2170_v11 = vld [vmem:[%s2868_s3 + $0x188] ss:$12 sps:$4 sm:$0xff]   ;;  %v2174_v15 = vld [vmem:[%s2868_s3 + $0x1a0] ss:$12 sps:$4 sm:$0xff]  }
  0x31   : > { %v2173_v13 = vld [vmem:[%s2867_s2 + $0x1c] ss:$12 sps:$4 sm:$0xff]   ;;  %v2171_v14 = vld [vmem:[%s2867_s2 + $0x18] ss:$12 sps:$4 sm:$0xff]   ;;  %v2177_v16 = vld [vmem:[%s2867_s2 + $0x34] ss:$12 sps:$4 sm:$0xff]  }
  0x32   : > { %904 = vmatpush1.bf16.msra.mxu0 %v2115_v31  ;;  %v2175_v17 = vld [vmem:[%s2867_s2 + $0x30] ss:$12 sps:$4 sm:$0xff]   ;;  %v2178_v18 = vld [vmem:[%s2868_s3 + $0x1b8] ss:$12 sps:$4 sm:$0xff]   ;;  %v2179_v20 = vld [vmem:[%s2867_s2 + $0x48] ss:$12 sps:$4 sm:$0xff]  }
  0x33   : > { %947 = vmatpush1.bf16.msra.mxu1 %v2116_v32  ;;  %905 = vmatprep.subr.bf16.mxu0 %v2117_v33  ;;  %v2181_v19 = vld [vmem:[%s2867_s2 + $0x4c] ss:$12 sps:$4 sm:$0xff]   ;;  %v2182_v21 = vld [vmem:[%s2868_s3 + $0x1d0] ss:$12 sps:$4 sm:$0xff]   ;;  %v2186_v24 = vld [vmem:[%s2868_s3 + $0x1e8] ss:$12 sps:$4 sm:$0xff]  }
  0x34   : > { %948 = vmatprep.subr.bf16.mxu1 %v2119_v34  ;;  %v2185_v22 = vld [vmem:[%s2867_s2 + $0x64] ss:$12 sps:$4 sm:$0xff]   ;;  %v2183_v23 = vld [vmem:[%s2867_s2 + $0x60] ss:$12 sps:$4 sm:$0xff]   ;;  %v2189_v25 = vld [vmem:[%s2867_s2 + $0x7c] ss:$12 sps:$4 sm:$0xff]  }
  0x35   : > { %v2187_v26 = vld [vmem:[%s2867_s2 + $0x78] ss:$12 sps:$4 sm:$0xff]   ;;  %s241_s30 = sand.u32 1, %s2289_s18   ;;  %v2190_v27 = vld [vmem:[%s2868_s3 + $0x200] ss:$12 sps:$4 sm:$0xff]  }
  0x36   : > { %906 = vmatpush1.bf16.msra.mxu0 %v2121_v35  ;;  %v2193_v28 = vld [vmem:[%s2867_s2 + $0x94] ss:$12 sps:$4 sm:$0xff]   ;;  %s2046_s11 = smul.u32 24, %s241_s30  ;;  %v2191_v29 = vld [vmem:[%s2867_s2 + $0x90] ss:$12 sps:$4 sm:$0xff]  }
  0x37   : > { %949 = vmatpush1.bf16.msra.mxu1 %v2122_v36  ;;  %907 = vmatprep.subr.bf16.mxu0 %v2123_v37  ;;  %v2194_v30 = vld [vmem:[%s2868_s3 + $0x218] ss:$12 sps:$4 sm:$0xff]   ;;  %v2195_v32 = vld [vmem:[%s2867_s2 + $0xa8] ss:$12 sps:$4 sm:$0xff]   ;;  %v2198_v33 = vld [vmem:[%s2868_s3 + $0x230] ss:$12 sps:$4 sm:$0xff]  }
  0x38   : > { %1930 = vmatprep.subr.bf16.mxu1 %v2126_v39  ;;  %v2197_v31 = vld [vmem:[%s2867_s2 + $0xac] ss:$12 sps:$4 sm:$0xff]   ;;  %v2201_v34 = vld [vmem:[%s2867_s2 + $0xc4] ss:$12 sps:$4 sm:$0xff]   ;;  %v2202_v35 = vld [vmem:[%s2867_s2 + $0xc8] ss:$12 sps:$4 sm:$0xff]  }
  0x39   : > { %v2199_v36 = vld [vmem:[%s2867_s2 + $0xc0] ss:$12 sps:$4 sm:$0xff]   ;;  %v2203_v37 = vld [vmem:[%s2867_s2 + $0x8] ss:$12 sps:$4 sm:$0xff]   ;;  %s2674_s10 = scalar_lea.vmem [#allocation2], %s2046_s11 }
  0x3a   : > { %967 = vmatmul.mubr.bf16.vlgmr.msra.gmra.mrb[0].mxu1 %v2481_v38  ;;  %908 = vmatpush1.bf16.msra.mxu0 %v2127_v40  ;;  %v2206_v39 = vld [vmem:[%s2867_s2 + $0xdc] ss:$12 sps:$4 sm:$0xff]  }
  0x3b   : > { %1931 = vmatpush3.bf16.msra.mxu1 %v2128_v41  ;;  %909 = vmatprep.subr.bf16.mxu0 %v2129_v42  ;;  %v2241_v40 = vld [vmem:[%s2674_s10 + $0x4] ss:$12 sps:$4 sm:$0xff]   ;;  %v2207_v41 = vld [vmem:[%s2867_s2 + $0xe0] ss:$12 sps:$4 sm:$0xff]  }
  0x3c   : > { %1932 = vmatprep.subr.bf16.mxu1 %v2131_v43  ;;  %1009 = vmatprep.mubr.bf16.mxu1 %v2166_v60  ;;  %v2204_v42 = vld [vmem:[%s2867_s2 + $0xd8] ss:$12 sps:$4 sm:$0xff]   ;;  %v2208_v43 = vld [vmem:[%s2867_s2 + $0x20] ss:$12 sps:$4 sm:$0xff]  }
  0x3d   : > { %v2232_v60 = vld [vmem:[%s2867_s2 + $0x158] ss:$12 sps:$4 sm:$0xff]  }
  0x3e   : > { %910 = vmatpush1.bf16.msra.mxu0 %v2132_v44  ;;  %v2211_v44 = vld [vmem:[%s2867_s2 + $0xf4] ss:$12 sps:$4 sm:$0xff]  }
  0x3f   : > { %1933 = vmatpush3.bf16.msra.mxu1 %v2133_v45  ;;  %911 = vmatprep.subr.bf16.mxu0 %v2134_v46  ;;  %v2209_v45 = vld [vmem:[%s2867_s2 + $0xf0] ss:$12 sps:$4 sm:$0xff]   ;;  %v2213_v46 = vld [vmem:[%s2867_s2 + $0x38] ss:$12 sps:$4 sm:$0xff]  }
  0x40   : > { %1934 = vmatprep.subr.bf16.mxu1 %v2136_v47  ;;  %v2216_v47 = vld [vmem:[%s2867_s2 + $0x10c] ss:$12 sps:$4 sm:$0xff]  }
  0x42   : > { %912 = vmatpush1.bf16.msra.mxu0 %v2137_v48  ;;  %v2217_v48 = vld [vmem:[%s2867_s2 + $0x110] ss:$12 sps:$4 sm:$0xff]  }
  0x43   : > { %1935 = vmatpush3.bf16.msra.mxu1 %v2138_v49  ;;  %913 = vmatprep.subr.bf16.mxu0 %v2139_v50  ;;  %v2214_v49 = vld [vmem:[%s2867_s2 + $0x108] ss:$12 sps:$4 sm:$0xff]   ;;  %v2218_v50 = vld [vmem:[%s2867_s2 + $0x50] ss:$12 sps:$4 sm:$0xff]  }
  0x44   : > { %1936 = vmatprep.subr.bf16.mxu1 %v2141_v51  ;;  %v2221_v51 = vld [vmem:[%s2867_s2 + $0x124] ss:$12 sps:$4 sm:$0xff]  }
  0x46   : > { %914 = vmatpush1.bf16.msra.mxu0 %v2142_v52  ;;  %v2222_v52 = vld [vmem:[%s2867_s2 + $0x128] ss:$12 sps:$4 sm:$0xff]  }
  0x47   : > { %1937 = vmatpush3.bf16.msra.mxu1 %v2143_v53  ;;  %915 = vmatprep.subr.bf16.mxu0 %v2144_v54  ;;  %v2219_v53 = vld [vmem:[%s2867_s2 + $0x120] ss:$12 sps:$4 sm:$0xff]   ;;  %v2223_v54 = vld [vmem:[%s2867_s2 + $0x68] ss:$12 sps:$4 sm:$0xff]  }
  0x48   : > { %1938 = vmatprep.subr.bf16.mxu1 %v2146_v55  ;;  %v2226_v55 = vld [vmem:[%s2867_s2 + $0x13c] ss:$12 sps:$4 sm:$0xff]  }
  0x4a   : > { %916 = vmatpush1.bf16.msra.mxu0 %v2147_v56  ;;  %v2227_v56 = vld [vmem:[%s2867_s2 + $0x140] ss:$12 sps:$4 sm:$0xff]  }
  0x4b   : > { %1939 = vmatpush3.bf16.msra.mxu1 %v2148_v57  ;;  %917 = vmatprep.subr.bf16.mxu0 %v2149_v58  ;;  %v2224_v57 = vld [vmem:[%s2867_s2 + $0x138] ss:$12 sps:$4 sm:$0xff]   ;;  %v2228_v58 = vld [vmem:[%s2867_s2 + $0x80] ss:$12 sps:$4 sm:$0xff]  }
  0x4c   : > { %1940 = vmatprep.subr.bf16.mxu1 %v2151_v59  ;;  %v2231_v59 = vld [vmem:[%s2867_s2 + $0x154] ss:$12 sps:$4 sm:$0xff]  }
  0x4e   : > { %918 = vmatpush1.bf16.msra.mxu0 %v2152_v61  ;;  %v2229_v61 = vld [vmem:[%s2867_s2 + $0x150] ss:$12 sps:$4 sm:$0xff]  }
  0x4f   : > { %1941 = vmatpush3.bf16.msra.mxu1 %v2153_v62  ;;  %919 = vmatprep.subr.bf16.mxu0 %v2154_v63  ;;  %v2233_v62 = vld [vmem:[%s2867_s2 + $0x98] ss:$12 sps:$4 sm:$0xff]  }
  0x50   : > { %1942 = vmatprep.subr.bf16.mxu1 %v2156_v0  ;;  %v2236_v63 = vld [vmem:[%s2867_s2 + $0x16c] ss:$12 sps:$4 sm:$0xff]   ;;  %v2237_v0 = vld [vmem:[%s2867_s2 + $0x170] ss:$12 sps:$4 sm:$0xff]  }
  0x52   : > { %920 = vmatpush1.bf16.msra.mxu0 %v2157_v1  ;;  %v2234_v1 = vld [vmem:[%s2867_s2 + $0x168] ss:$12 sps:$4 sm:$0xff]  }
  0x53   : > { %1943 = vmatpush3.bf16.msra.mxu1 %v2158_v2  ;;  %921 = vmatprep.subr.bf16.mxu0 %v2159_v3  ;;  %v2238_v2 = vld [vmem:[%s2867_s2 + $0xb0] ss:$12 sps:$4 sm:$0xff]  }
  0x54   : > { %1944 = vmatprep.subr.bf16.mxu1 %v2161_v4  ;;  %v2244_v3 = vld [vmem:[%s2867_s2 + $0x184] ss:$12 sps:$4 sm:$0xff]  }
  0x55   : > { %v2239_v4 = vld [vmem:[%s2674_s10] ss:$12 sps:$4 sm:$0xff]  }
  0x56   : > { %922 = vmatpush1.bf16.msra.mxu0 %v2162_v5  ;;  %v2242_v5 = vld [vmem:[%s2867_s2 + $0x180] ss:$12 sps:$4 sm:$0xff]  }
  0x57   : > { %1945 = vmatpush3.bf16.msra.mxu1 %v2163_v7  ;;  %1459 = vmatprep.subr.bf16.mxu0 %v2169_v8  ;;  %v2245_v7 = vld [vmem:[%s2867_s2 + $0x188] ss:$12 sps:$4 sm:$0xff]  }
  0x58   : > { %1992 = vmatprep.subr.bf16.mxu1 %v2300_v12  ;;  %v2248_v8 = vld [vmem:[%s2867_s2 + $0x19c] ss:$12 sps:$4 sm:$0xff]  }
  0x59   : > { %924 = vmatmul.mubr.bf16.vlgmr.msra.gmra.mrb[0].mxu0 %v2164_v9 }
  0x5a   : > { %1010 = vmatmul.mubr.bf16.vlgmr.msra.gmra.mrb[4].mxu1 %v2164_v9  ;;  %1460 = vmatpush1.bf16.msra.mxu0 %v2167_v10  ;;  %v2246_v9 = vld [vmem:[%s2867_s2 + $0x198] ss:$12 sps:$4 sm:$0xff]   ;;  %v2249_v10 = vld [vmem:[%s2867_s2 + $0x1a0] ss:$12 sps:$4 sm:$0xff]  }
  0x5b   : > { %1993 = vmatpush3.bf16.msra.mxu1 %v2170_v11  ;;  %1461 = vmatprep.subr.bf16.mxu0 %v2173_v13  ;;  %v2252_v11 = vld [vmem:[%s2867_s2 + $0x1b4] ss:$12 sps:$4 sm:$0xff]   ;;  %v2250_v13 = vld [vmem:[%s2867_s2 + $0x1b0] ss:$12 sps:$4 sm:$0xff]  }
  0x5c   : > { %1994 = vmatprep.subr.bf16.mxu1 %v2300_v12  ;;  %2008 = vmatprep.mubr.msk.bf16.mxu1 %vm2301_vm0, %v2300_v12 }
  0x5d   : > { %1491 = vmatprep.mubr.bf16.mxu0 %v2241_v40 }
  0x5e   : > { %1462 = vmatpush1.bf16.msra.mxu0 %v2171_v14  ;;  %v2253_v14 = vld [vmem:[%s2867_s2 + $0x1b8] ss:$12 sps:$4 sm:$0xff]  }
  0x5f   : > { %1995 = vmatpush3.bf16.msra.mxu1 %v2174_v15  ;;  %1463 = vmatprep.subr.bf16.mxu0 %v2177_v16  ;;  %v2254_v15 = vld [vmem:[%s2867_s2 + $0x1c8] ss:$12 sps:$4 sm:$0xff]   ;;  %v2257_v16 = vld [vmem:[%s2867_s2 + $0x1d0] ss:$12 sps:$4 sm:$0xff]  }
  0x60   : > { %1996 = vmatprep.subr.bf16.mxu1 %v2300_v12 }
  0x62   : > { %1464 = vmatpush1.bf16.msra.mxu0 %v2175_v17  ;;  %v2260_v17 = vld [vmem:[%s2867_s2 + $0x1e4] ss:$12 sps:$4 sm:$0xff]  }
  0x63   : > { %1997 = vmatpush3.bf16.msra.mxu1 %v2178_v18  ;;  %1465 = vmatprep.subr.bf16.mxu0 %v2181_v19  ;;  %v2258_v18 = vld [vmem:[%s2867_s2 + $0x1e0] ss:$12 sps:$4 sm:$0xff]   ;;  %v2261_v19 = vld [vmem:[%s2867_s2 + $0x1e8] ss:$12 sps:$4 sm:$0xff]  }
  0x64   : > { %1998 = vmatprep.subr.bf16.mxu1 %v2300_v12 }
  0x66   : > { %1466 = vmatpush1.bf16.msra.mxu0 %v2179_v20  ;;  %v2264_v20 = vld [vmem:[%s2867_s2 + $0x1fc] ss:$12 sps:$4 sm:$0xff]  }
  0x67   : > { %1999 = vmatpush3.bf16.msra.mxu1 %v2182_v21  ;;  %1467 = vmatprep.subr.bf16.mxu0 %v2185_v22  ;;  %v2262_v21 = vld [vmem:[%s2867_s2 + $0x1f8] ss:$12 sps:$4 sm:$0xff]   ;;  %v2265_v22 = vld [vmem:[%s2867_s2 + $0x200] ss:$12 sps:$4 sm:$0xff]  }
  0x68   : > { %2000 = vmatprep.subr.bf16.mxu1 %v2300_v12 }
  0x6a   : > { %1468 = vmatpush1.bf16.msra.mxu0 %v2183_v23  ;;  %v2268_v23 = vld [vmem:[%s2867_s2 + $0x214] ss:$12 sps:$4 sm:$0xff]  }
  0x6b   : > { %2001 = vmatpush3.bf16.msra.mxu1 %v2186_v24  ;;  %1469 = vmatprep.subr.bf16.mxu0 %v2189_v25  ;;  %v2266_v24 = vld [vmem:[%s2867_s2 + $0x210] ss:$12 sps:$4 sm:$0xff]   ;;  %v2269_v25 = vld [vmem:[%s2867_s2 + $0x218] ss:$12 sps:$4 sm:$0xff]  }
  0x6c   : > { %2002 = vmatprep.subr.bf16.mxu1 %v2300_v12 }
  0x6e   : > { %1470 = vmatpush1.bf16.msra.mxu0 %v2187_v26  ;;  %v2272_v26 = vld [vmem:[%s2867_s2 + $0x22c] ss:$12 sps:$4 sm:$0xff]  }
  0x6f   : > { %2003 = vmatpush3.bf16.msra.mxu1 %v2190_v27  ;;  %1471 = vmatprep.subr.bf16.mxu0 %v2193_v28  ;;  %v2270_v27 = vld [vmem:[%s2867_s2 + $0x228] ss:$12 sps:$4 sm:$0xff]   ;;  %v2273_v28 = vld [vmem:[%s2867_s2 + $0x230] ss:$12 sps:$4 sm:$0xff]  }
  0x70   : > { %2004 = vmatprep.subr.bf16.mxu1 %v2300_v12 }
  0x72   : > { %1472 = vmatpush1.bf16.msra.mxu0 %v2191_v29  ;;  %v2274_v29 = vld [vmem:[%s2674_s10 + $0x8] ss:$12 sps:$4 sm:$0xff]  }
  0x73   : > { %2005 = vmatpush3.bf16.msra.mxu1 %v2194_v30  ;;  %1473 = vmatprep.subr.bf16.mxu0 %v2197_v31 }
  0x74   : > { %2006 = vmatprep.subr.bf16.mxu1 %v2300_v12 }
  0x76   : > { %1474 = vmatpush1.bf16.msra.mxu0 %v2195_v32 }
  0x77   : > { %2007 = vmatpush3.bf16.msra.mxu1 %v2198_v33  ;;  %1475 = vmatprep.subr.bf16.mxu0 %v2201_v34 }
  0x78   : > { %1961 = vmatprep.subr.bf16.mxu1 %v2202_v35 }
  0x7a   : > { %2009 = vmatmul.mubr.bf16.vlgmr.msra.gmra.mrb[8].mxu1 %v2481_v38  ;;  %1476 = vmatpush1.bf16.msra.mxu0 %v2199_v36  ;;  %v2212_v38 = vld [vmem:[%s2867_s2 + $0xf8] ss:$12 sps:$4 sm:$0xff]  }
  0x7b   : > { %1962 = vmatpush3.bf16.msra.mxu1 %v2203_v37  ;;  %1477 = vmatprep.subr.bf16.mxu0 %v2206_v39 }
  0x7c   : > { %1963 = vmatprep.subr.bf16.mxu1 %v2207_v41  ;;  %1577 = vmatprep.mubr.bf16.mxu1 %v2241_v40 }
  0x7e   : > { %1478 = vmatpush1.bf16.msra.mxu0 %v2204_v42 }
  0x7f   : > { %1964 = vmatpush3.bf16.msra.mxu1 %v2208_v43  ;;  %1479 = vmatprep.subr.bf16.mxu0 %v2211_v44 }
  0x80   : > { %1965 = vmatprep.subr.bf16.mxu1 %v2212_v38 }
  0x82   : > { %1480 = vmatpush1.bf16.msra.mxu0 %v2209_v45 }
  0x83   : > { %1966 = vmatpush3.bf16.msra.mxu1 %v2213_v46  ;;  %1481 = vmatprep.subr.bf16.mxu0 %v2216_v47 }
  0x84   : > { %1967 = vmatprep.subr.bf16.mxu1 %v2217_v48 }
  0x86   : > { %1482 = vmatpush1.bf16.msra.mxu0 %v2214_v49 }
  0x87   : > { %1968 = vmatpush3.bf16.msra.mxu1 %v2218_v50  ;;  %1483 = vmatprep.subr.bf16.mxu0 %v2221_v51 }
  0x88   : > { %1969 = vmatprep.subr.bf16.mxu1 %v2222_v52 }
  0x8a   : > { %1484 = vmatpush1.bf16.msra.mxu0 %v2219_v53 }
  0x8b   : > { %1970 = vmatpush3.bf16.msra.mxu1 %v2223_v54  ;;  %1485 = vmatprep.subr.bf16.mxu0 %v2226_v55 }
  0x8c   : > { %1971 = vmatprep.subr.bf16.mxu1 %v2227_v56 }
  0x8e   : > { %1486 = vmatpush1.bf16.msra.mxu0 %v2224_v57 }
  0x8f   : > { %1972 = vmatpush3.bf16.msra.mxu1 %v2228_v58  ;;  %1487 = vmatprep.subr.bf16.mxu0 %v2231_v59 }
  0x90   : > { %1973 = vmatprep.subr.bf16.mxu1 %v2232_v60 }
  0x92   : > { %1488 = vmatpush1.bf16.msra.mxu0 %v2229_v61  ;;  %v1629_v61 = vlaneseq }
  0x93   : > { %1974 = vmatpush3.bf16.msra.mxu1 %v2233_v62  ;;  %1489 = vmatprep.subr.bf16.mxu0 %v2236_v63 }
  0x94   : > { %1975 = vmatprep.subr.bf16.mxu1 %v2237_v0  ;;  %v1630_v62 = vshrl.u32 %v1629_v61, 7 }
  0x96   : > { %1490 = vmatpush1.bf16.msra.mxu0 %v2234_v1  ;;  %v1631_v63 = vsub.s32 0, %v1630_v62  ;;  %v1639_v0 = vsub.s32 2, %v1630_v62  ;;  %v1627_v1 = vld [vmem:[%s2869_s4] sm:$0x7] }
  0x97   : > { %1976 = vmatpush3.bf16.msra.mxu1 %v2238_v2  ;;  %1502 = vmatprep.subr.bf16.mxu0 %v2244_v3  ;;  %v1635_v2 = vsub.s32 1, %v1630_v62 }
  0x98   : > { %2012 = vmatprep.subr.bf16.mxu1 %v2300_v12  ;;  %v1632_v3 = vrot.slane %v1627_v1, %v1631_v63 }
  0x99   : > { %1492 = vmatmul.mubr.bf16.vlgmr.msra.gmra.mrb[4].mxu0 %v2239_v4 }
  0x9a   : > { %1578 = vmatmul.mubr.bf16.vlgmr.msra.gmra.mrb[12].mxu1 %v2239_v4  ;;  %1503 = vmatpush1.bf16.msra.mxu0 %v2242_v5  ;;  %v1640_v4 = vrot.slane %v1627_v1, %v1639_v0 }
  0x9b   : > { %2013 = vmatpush3.bf16.msra.mxu1 %v2245_v7  ;;  %1504 = vmatprep.subr.bf16.mxu0 %v2248_v8  ;;  %v1636_v8 = vrot.slane %v1627_v1, %v1635_v2 }
  0x9c   : > { %2014 = vmatprep.subr.bf16.mxu1 %v2300_v12  ;;  %1534 = vmatprep.mubr.bf16.mxu0 %v2299_v6  ;;  %v2256_v6 = vld [vmem:[%s2867_s2 + $0x1cc] ss:$12 sps:$4 sm:$0xff]  }
  0x9d   : > { %2028 = vmatprep.mubr.msk.bf16.mxu1 %vm2301_vm0, %v2300_v12 }
  0x9e   : > { %1505 = vmatpush1.bf16.msra.mxu0 %v2246_v9 }
  0x9f   : > { %2015 = vmatpush3.bf16.msra.mxu1 %v2249_v10  ;;  %1506 = vmatprep.subr.bf16.mxu0 %v2252_v11 }
  0xa0   : > { %2016 = vmatprep.subr.bf16.mxu1 %v2300_v12 }
  0xa2   : > { %1507 = vmatpush1.bf16.msra.mxu0 %v2250_v13 }
  0xa3   : > { %2017 = vmatpush3.bf16.msra.mxu1 %v2253_v14  ;;  %1508 = vmatprep.subr.bf16.mxu0 %v2256_v6 }
  0xa4   : > { %2018 = vmatprep.subr.bf16.mxu1 %v2300_v12 }
  0xa6   : > { %1509 = vmatpush1.bf16.msra.mxu0 %v2254_v15 }
  0xa7   : > { %2019 = vmatpush3.bf16.msra.mxu1 %v2257_v16  ;;  %1510 = vmatprep.subr.bf16.mxu0 %v2260_v17 }
  0xa8   : > { %2020 = vmatprep.subr.bf16.mxu1 %v2300_v12 }
  0xaa   : > { %1511 = vmatpush1.bf16.msra.mxu0 %v2258_v18 }
  0xab   : > { %2021 = vmatpush3.bf16.msra.mxu1 %v2261_v19  ;;  %1512 = vmatprep.subr.bf16.mxu0 %v2264_v20 }
  0xac   : > { %2022 = vmatprep.subr.bf16.mxu1 %v2300_v12 }
  0xae   : > { %1513 = vmatpush1.bf16.msra.mxu0 %v2262_v21 }
  0xaf   : > { %2023 = vmatpush3.bf16.msra.mxu1 %v2265_v22  ;;  %1514 = vmatprep.subr.bf16.mxu0 %v2268_v23 }
  0xb0   : > { %2024 = vmatprep.subr.bf16.mxu1 %v2300_v12 }
  0xb2   : > { %1515 = vmatpush1.bf16.msra.mxu0 %v2266_v24 }
  0xb3   : > { %2025 = vmatpush3.bf16.msra.mxu1 %v2269_v25  ;;  %1516 = vmatprep.subr.bf16.mxu0 %v2272_v26 }
  0xb4   : > { %2026 = vmatprep.subr.bf16.mxu1 %v2300_v12 }
  0xb6   : > { %1517 = vmatpush1.bf16.msra.mxu0 %v2270_v27 }
  0xb7   : > { %2027 = vmatpush3.bf16.msra.mxu1 %v2273_v28 }
  0xb9   : > { %1535 = vmatmul.mubr.bf16.vlgmr.msra.gmra.mrb[4].mxu0 %v2274_v29 }
  0xba   : > { %2029 = vmatmul.mubr.bf16.vlgmr.msra.gmra.mrb[16].mxu1 %v2274_v29 }
 0x10d   : > { %v968_v30 = vpop.f32.mrb[0].mxu1 }
 0x10e   : > { %v970_v31 = vpop.f32.mrb[1].mxu1 }
 0x10f   : > { %v972_v32 = vpop.f32.mrb[2].mxu1 }
 0x110   : > { %v974_v33 = vpop.f32.mrb[3].mxu1 }
 0x12c   : > { %v925_v34 = vpop.f32.mrb[0].mxu0 }
 0x12d   : > { %v1946_v35 = vpop.f32.mrb[4].mxu1  ;;  %v969_v36 = vadd.f32 %v968_v30, %v925_v34  ;;  %v927_v37 = vpop.f32.mrb[1].mxu0 }
 0x12e   : > { %v1947_v39 = vpop.f32.mrb[5].mxu1  ;;  %v971_v40 = vadd.f32 %v970_v31, %v927_v37  ;;  %v929_v42 = vpop.f32.mrb[2].mxu0 }
 0x12f   : > { %v1948_v41 = vadd.f32 %v1947_v39, %v1946_v35  ;;  %v1949_v43 = vpop.f32.mrb[6].mxu1  ;;  %v973_v44 = vadd.f32 %v972_v32, %v929_v42  ;;  %v931_v12 = vpop.f32.mrb[3].mxu0 }
 0x130   : > { %v1950_v38 = vpop.f32.mrb[7].mxu1  ;;  %v975_v45 = vadd.f32 %v974_v33, %v931_v12 }
 0x131   : > { %v1951_v46 = vadd.f32 %v1950_v38, %v1949_v43 }
 0x14d   : > { %v1052_v47 = vpop.f32.mrb[8].mxu1 }
 0x14e   : > { %v1053_v48 = vadd.f32 %v1948_v41, %v1052_v47  ;;  %v2010_v49 = vpop.f32.mrb[9].mxu1 }
 0x14f   : > { %v1055_v50 = vpop.f32.mrb[10].mxu1 }
 0x150   : > { %v1056_v51 = vadd.f32 %v1951_v46, %v1055_v50  ;;  %v2011_v52 = vpop.f32.mrb[11].mxu1 }
 0x16d   : > { %v1977_v53 = vpop.f32.mrb[12].mxu1 }
 0x16e   : > { %v1978_v54 = vpop.f32.mrb[13].mxu1 }
 0x16f   : > { %v1979_v55 = vadd.f32 %v1978_v54, %v1977_v53  ;;  %v1980_v56 = vpop.f32.mrb[14].mxu1 }
 0x170   : > { %v1981_v57 = vpop.f32.mrb[15].mxu1 }
 0x171   : > { %v1982_v58 = vadd.f32 %v1981_v57, %v1980_v56  ;;  %v1580_v59 = vadd.f32 %v1979_v55, %v1053_v48 }
 0x173   : > { %v1583_v60 = vadd.f32 %v1982_v58, %v1056_v51 }
 0x18c   : > { %v1536_v5 = vpop.f32.mrb[4].mxu0 }
 0x18d   : > { %v1620_v7 = vpop.f32.mrb[16].mxu1  ;;  %v2033_v9 = vadd.f32 %v1536_v5, %v969_v36  ;;  %v1538_v11 = vpop.f32.mrb[5].mxu0 }
 0x18e   : > { %v1621_v10 = vadd.f32 %v1620_v7, %v1580_v59  ;;  %v2030_v13 = vpop.f32.mrb[17].mxu1  ;;  %v2035_v14 = vadd.f32 %v1538_v11, %v971_v40  ;;  %v1540_v6 = vpop.f32.mrb[6].mxu0 }
 0x18f   : > { %v1623_v15 = vpop.f32.mrb[18].mxu1  ;;  %v1644_v16 = vadd.f32 %v2033_v9, %v1632_v3  ;;  %v2037_v18 = vadd.f32 %v1540_v6, %v973_v44  ;;  %v1542_v20 = vpop.f32.mrb[7].mxu0 }
 0x190   : > { %v1646_v17 = vadd.f32 %v1640_v4, %v1621_v10  ;;  %v1624_v19 = vadd.f32 %v1623_v15, %v1583_v60  ;;  %v2031_v21 = vpop.f32.mrb[19].mxu1  ;;  %v1645_v22 = vadd.f32 %v2035_v14, %v1636_v8  ;;  %v2039_v23 = vadd.f32 %v1542_v20, %v975_v45 }
 0x191   : > { %v1647_v25 = vadd.f32 %v2037_v18, %v1632_v3 }
 0x192   : > { %v1927_v24 = vpack.c.bf16 %v1646_v17, %v1646_v17  ;;  %v1649_v26 = vadd.f32 %v1640_v4, %v1624_v19  ;;  %v1926_v27 = vpack.c.bf16 %v1645_v22, %v1644_v16  ;;  %v1648_v28 = vadd.f32 %v2039_v23, %v1636_v8 }
 0x194   : > { %1671 = vst [vmem:[%s288_s26 + $0x8] sm:$0xf] %v1927_v24  ;;  %v1929_v29 = vpack.c.bf16 %v1649_v26, %v1649_v26  ;;  %1670 = vst [vmem:[%s288_s26] sm:$0xff] %v1926_v27  ;;  %v1928_v30 = vpack.c.bf16 %v1648_v28, %v1647_v25 }
 0x196   : > { %1673 = vst [vmem:[%s288_s26 + $0x14] sm:$0xf] %v1929_v29  ;;  %1672 = vst [vmem:[%s288_s26 + $0xc] sm:$0xff] %v1928_v30 }
 0x197 PF: > { %p12_p9 = scmp.ge.s32.totalorder %s2349_s22, 4   ;;  %s2871_s18 = smov %s2293_s19 }
 0x198   : > { %s2872_s19 = smov %s2358_s25  ;;  %s2873_s20 = smov %s2349_s22 }
 0x199   :  { %14 = sbr.rel (!%p12_p9) target bundleno = 2 (0x2), region = 110 }

// kernel: net_forward.45
= control target key start
LH: loop header
LB: loop body
LE: loop exit
PB: predicated region body
PF: predicated region fallthrough
CT: control target
= control target key end

     0   :  { %s2739_s30 = smov 0   ;;  %s3378_s0 = inlined_call_operand.vmem [shape: bf16[32,384], index: 0, kind: input, shape index: {}]   ;;  %s3379_s1 = inlined_call_operand.vmem [shape: bf16[32,384], index: 1, kind: input, shape index: {}]   ;;  %s3380_s2 = inlined_call_operand.vmem [shape: bf16[32,384], index: 2, kind: input, shape index: {}]   ;;  %s3381_s3 = inlined_call_operand.vmem [shape: bf16[32,384], index: 3, kind: input, shape index: {}]   ;;  %s3382_s4 = inlined_call_operand.vmem [shape: bf16[384,256], index: 4, kind: input, shape index: {}]   ;;  %s3383_s5 = inlined_call_operand.vmem [shape: bf16[384,256], index: 5, kind: input, shape index: {}]   ;;  %s3384_s6 = inlined_call_operand.vmem [shape: bf16[384,256], index: 6, kind: input, shape index: {}]   ;;  %s3385_s7 = inlined_call_operand.vmem [shape: bf16[384,256], index: 7, kind: input, shape index: {}]   ;;  %s3386_s8 = inlined_call_operand.vmem [shape: f32[1,256], index: 8, kind: input, shape index: {}]   ;;  %s3387_s9 = inlined_call_operand.vmem [shape: f32[32,256], index: 9, kind: output, shape index: {}]  }
   0x1 LB: > { %s2115_s10 = sadd.s32 4294967295, %s2686_s30   ;;  %p2119_p0 = scmp.ge.s32.totalorder %s2686_s30, 1  ;;  %s2686_s30 = sphi %s2739_s30, %s19_s30  }
   0x2   : > { %p325_p1 = scmp.lt.s32.totalorder %s2686_s30, 3 }
   0x4   : > { %p326_p2 = pnand %p2119_p0, %p325_p1 }
   0x5   : > { %v2376_v0 = vld [vmem:[%s3383_s5 + $0x4] ss:$8 sps:$4 sm:$0xff] (!%p326_p2)   ;;  %v2688_v2 = vmov (!%p326_p2), 0   ;;  %v2380_v3 = vld [vmem:[%s3383_s5] ss:$8 sps:$4 sm:$0xff] (!%p326_p2)   ;;  %s2120_s29 = sshll.u32 (!%p326_p2), %s2115_s10, 1 }
   0x6   : > { %329 = sbr.rel (%p326_p2) target bundleno = 420 (0x1a4), region = 56  ;;  %v2378_v1 = vld [vmem:[%s3383_s5 + $0x104] ss:$8 sps:$4 sm:$0xff] (!%p326_p2)   ;;  %852 = vmatprep.mubr.bf16.mxu0 (!%p326_p2), %v2688_v2  ;;  %777 = vmatprep.subr.bf16.mxu1 (!%p326_p2), %v2376_v0  ;;  %v2381_v4 = vld [vmem:[%s3383_s5 + $0x100] ss:$8 sps:$4 sm:$0xff] (!%p326_p2)   ;;  %p382_p3 = scmp.lt.s32.totalorder (!%p326_p2), %s2120_s29, 3 }
   0x7   : > { %820 = vmatprep.subr.bf16.mxu0 (!%p326_p2), %v2378_v1  ;;  %v2382_v5 = vld [vmem:[%s3383_s5 + $0x14] ss:$8 sps:$4 sm:$0xff] (!%p326_p2)   ;;  %778 = vmatpush1.bf16.msra.mxu1 (!%p326_p2), %v2380_v3  ;;  %v2386_v7 = vld [vmem:[%s3383_s5 + $0x10] ss:$8 sps:$4 sm:$0xff] (!%p326_p2)   ;;  %v2388_v9 = vld [vmem:[%s3383_s5 + $0x24] ss:$8 sps:$4 sm:$0xff] (!%p326_p2)  }
   0x8   : > { %821 = vmatpush1.bf16.msra.mxu0 (!%p326_p2), %v2381_v4  ;;  %v2384_v6 = vld [vmem:[%s3383_s5 + $0x114] ss:$8 sps:$4 sm:$0xff] (!%p326_p2)   ;;  %779 = vmatprep.subr.bf16.mxu1 (!%p326_p2), %v2382_v5  ;;  %v2387_v8 = vld [vmem:[%s3383_s5 + $0x110] ss:$8 sps:$4 sm:$0xff] (!%p326_p2)   ;;  %v2390_v10 = vld [vmem:[%s3383_s5 + $0x124] ss:$8 sps:$4 sm:$0xff] (!%p326_p2)  }
   0x9   : > { %822 = vmatprep.subr.bf16.mxu0 (!%p326_p2), %v2384_v6  ;;  %v2392_v11 = vld [vmem:[%s3383_s5 + $0x20] ss:$8 sps:$4 sm:$0xff] (!%p326_p2)   ;;  %v2394_v13 = vld [vmem:[%s3383_s5 + $0x34] ss:$8 sps:$4 sm:$0xff] (!%p326_p2)   ;;  %v2398_v15 = vld [vmem:[%s3383_s5 + $0x30] ss:$8 sps:$4 sm:$0xff] (!%p326_p2)  }
   0xa   : > { %v2393_v12 = vld [vmem:[%s3383_s5 + $0x120] ss:$8 sps:$4 sm:$0xff] (!%p326_p2)   ;;  %v2396_v14 = vld [vmem:[%s3383_s5 + $0x134] ss:$8 sps:$4 sm:$0xff] (!%p326_p2)   ;;  %v2399_v16 = vld [vmem:[%s3383_s5 + $0x130] ss:$8 sps:$4 sm:$0xff] (!%p326_p2)  }
   0xb   : > { %780 = vmatpush1.bf16.msra.mxu1 (!%p326_p2), %v2386_v7  ;;  %v2400_v17 = vld [vmem:[%s3383_s5 + $0x44] ss:$8 sps:$4 sm:$0xff] (!%p326_p2)   ;;  %v2404_v19 = vld [vmem:[%s3383_s5 + $0x40] ss:$8 sps:$4 sm:$0xff] (!%p326_p2)   ;;  %v2406_v21 = vld [vmem:[%s3383_s5 + $0x54] ss:$8 sps:$4 sm:$0xff] (!%p326_p2)  }
   0xc   : > { %823 = vmatpush1.bf16.msra.mxu0 (!%p326_p2), %v2387_v8  ;;  %781 = vmatprep.subr.bf16.mxu1 (!%p326_p2), %v2388_v9  ;;  %v2402_v18 = vld [vmem:[%s3383_s5 + $0x144] ss:$8 sps:$4 sm:$0xff] (!%p326_p2)   ;;  %v2405_v20 = vld [vmem:[%s3383_s5 + $0x140] ss:$8 sps:$4 sm:$0xff] (!%p326_p2)   ;;  %v2408_v22 = vld [vmem:[%s3383_s5 + $0x154] ss:$8 sps:$4 sm:$0xff] (!%p326_p2)  }
   0xd   : > { %824 = vmatprep.subr.bf16.mxu0 %v2390_v10  ;;  %s3389_s29 = smov (!%p382_p3, %s2120_s29), 3  ;;  %v2410_v23 = vld [vmem:[%s3383_s5 + $0x50] ss:$8 sps:$4 sm:$0xff]   ;;  %v2412_v25 = vld [vmem:[%s3383_s5 + $0x64] ss:$8 sps:$4 sm:$0xff]  }
   0xe   : > { %s2817_s18 = smul.u32 12, %s3389_s29  ;;  %v2411_v24 = vld [vmem:[%s3383_s5 + $0x150] ss:$8 sps:$4 sm:$0xff]   ;;  %v2414_v26 = vld [vmem:[%s3383_s5 + $0x164] ss:$8 sps:$4 sm:$0xff]   ;;  %s2337_s20 = sshll.u32 %s3389_s29, 4 }
   0xf   : > { %782 = vmatpush1.bf16.msra.mxu1 %v2392_v11  ;;  %v2416_v27 = vld [vmem:[%s3383_s5 + $0x60] ss:$8 sps:$4 sm:$0xff]   ;;  %v2418_v29 = vld [vmem:[%s3383_s5 + $0x74] ss:$8 sps:$4 sm:$0xff]   ;;  %v2422_v31 = vld [vmem:[%s3383_s5 + $0x70] ss:$8 sps:$4 sm:$0xff]  }
  0x10   : > { %825 = vmatpush1.bf16.msra.mxu0 %v2393_v12  ;;  %783 = vmatprep.subr.bf16.mxu1 %v2394_v13  ;;  %s2835_s28 = scalar_lea.vmem %s3379_s1, %s2817_s18  ;;  %v2417_v28 = vld [vmem:[%s3383_s5 + $0x160] ss:$8 sps:$4 sm:$0xff]   ;;  %v2420_v30 = vld [vmem:[%s3383_s5 + $0x174] ss:$8 sps:$4 sm:$0xff]   ;;  %v2423_v32 = vld [vmem:[%s3383_s5 + $0x170] ss:$8 sps:$4 sm:$0xff]   ;;  %s2916_s27 = scalar_lea.vmem %s3378_s0, %s2817_s18 }
  0x11   : > { %826 = vmatprep.subr.bf16.mxu0 %v2396_v14  ;;  %v2424_v33 = vld [vmem:[%s3383_s5 + $0x84] ss:$8 sps:$4 sm:$0xff]   ;;  %v2426_v35 = vld [vmem:[%s2835_s28 + $0x8] ss:$12 sps:$4 sm:$0xff]   ;;  %v2433_v40 = vld [vmem:[%s3382_s4 + $0x110] ss:$8 sps:$4 sm:$0xff]   ;;  %s2996_s12 = scalar_lea.vmem %s3380_s2, %s2817_s18  ;;  %s3128_s17 = scalar_lea.vmem %s3381_s3, %s2817_s18 }
  0x12   : > { %v2429_v34 = vld [vmem:[%s3382_s4 + $0x104] ss:$8 sps:$4 sm:$0xff]   ;;  %v2427_v36 = vld [vmem:[%s3382_s4 + $0x100] ss:$8 sps:$4 sm:$0xff]   ;;  %v2431_v38 = vld [vmem:[%s3383_s5 + $0x94] ss:$8 sps:$4 sm:$0xff]  }
  0x13   : > { %784 = vmatpush1.bf16.msra.mxu1 %v2398_v15  ;;  %v2430_v37 = vld [vmem:[%s3383_s5 + $0x80] ss:$8 sps:$4 sm:$0xff]   ;;  %v2435_v39 = vld [vmem:[%s3382_s4 + $0x114] ss:$8 sps:$4 sm:$0xff]   ;;  %v2436_v41 = vld [vmem:[%s3383_s5 + $0x90] ss:$8 sps:$4 sm:$0xff]  }
  0x14   : > { %827 = vmatpush1.bf16.msra.mxu0 %v2399_v16  ;;  %785 = vmatprep.subr.bf16.mxu1 %v2400_v17  ;;  %v2437_v42 = vld [vmem:[%s3383_s5 + $0xa4] ss:$8 sps:$4 sm:$0xff]   ;;  %v2439_v44 = vld [vmem:[%s3382_s4 + $0x120] ss:$8 sps:$4 sm:$0xff]   ;;  %v2443_v46 = vld [vmem:[%s3383_s5 + $0xb4] ss:$8 sps:$4 sm:$0xff]  }
  0x15   : > { %828 = vmatprep.subr.bf16.mxu0 %v2402_v18  ;;  %v2441_v43 = vld [vmem:[%s3382_s4 + $0x124] ss:$8 sps:$4 sm:$0xff]   ;;  %v2442_v45 = vld [vmem:[%s3383_s5 + $0xa0] ss:$8 sps:$4 sm:$0xff]   ;;  %v2447_v47 = vld [vmem:[%s3382_s4 + $0x134] ss:$8 sps:$4 sm:$0xff]  }
  0x16   : > { %v2445_v48 = vld [vmem:[%s3382_s4 + $0x130] ss:$8 sps:$4 sm:$0xff]   ;;  %v2449_v50 = vld [vmem:[%s3383_s5 + $0xc4] ss:$8 sps:$4 sm:$0xff]   ;;  %v2451_v53 = vld [vmem:[%s3382_s4 + $0x140] ss:$8 sps:$4 sm:$0xff]  }
  0x17   : > { %786 = vmatpush1.bf16.msra.mxu1 %v2404_v19  ;;  %v2448_v49 = vld [vmem:[%s3383_s5 + $0xb0] ss:$8 sps:$4 sm:$0xff]   ;;  %v2453_v52 = vld [vmem:[%s3382_s4 + $0x144] ss:$8 sps:$4 sm:$0xff]   ;;  %v2454_v54 = vld [vmem:[%s3383_s5 + $0xc0] ss:$8 sps:$4 sm:$0xff]  }
  0x18   : > { %829 = vmatpush1.bf16.msra.mxu0 %v2405_v20  ;;  %787 = vmatprep.subr.bf16.mxu1 %v2406_v21  ;;  %v2475_v51 = vld [vmem:[%s2835_s28 + $0x4] ss:$12 sps:$4 sm:$0xff]   ;;  %v2455_v55 = vld [vmem:[%s3383_s5 + $0xd4] ss:$8 sps:$4 sm:$0xff]   ;;  %v2463_v61 = vld [vmem:[%s3382_s4 + $0x160] ss:$8 sps:$4 sm:$0xff]  }
  0x19   : > { %830 = vmatprep.subr.bf16.mxu0 %v2408_v22  ;;  %809 = vmatprep.mubr.bf16.mxu1 %v2475_v51  ;;  %v2459_v56 = vld [vmem:[%s3382_s4 + $0x154] ss:$8 sps:$4 sm:$0xff]   ;;  %v2457_v57 = vld [vmem:[%s3382_s4 + $0x150] ss:$8 sps:$4 sm:$0xff]   ;;  %v2461_v59 = vld [vmem:[%s3383_s5 + $0xe4] ss:$8 sps:$4 sm:$0xff]  }
  0x1a   : > { %v2460_v58 = vld [vmem:[%s3383_s5 + $0xd0] ss:$8 sps:$4 sm:$0xff]   ;;  %v2465_v60 = vld [vmem:[%s3382_s4 + $0x164] ss:$8 sps:$4 sm:$0xff]   ;;  %v2466_v62 = vld [vmem:[%s3383_s5 + $0xe0] ss:$8 sps:$4 sm:$0xff]  }
  0x1b   : > { %788 = vmatpush1.bf16.msra.mxu1 %v2410_v23  ;;  %v2467_v63 = vld [vmem:[%s3383_s5 + $0xf4] ss:$8 sps:$4 sm:$0xff]   ;;  %v2469_v1 = vld [vmem:[%s3382_s4 + $0x170] ss:$8 sps:$4 sm:$0xff]   ;;  %v2478_v4 = vld [vmem:[%s3382_s4 + $0x4] ss:$8 sps:$4 sm:$0xff]  }
  0x1c   : > { %831 = vmatpush1.bf16.msra.mxu0 %v2411_v24  ;;  %789 = vmatprep.subr.bf16.mxu1 %v2412_v25  ;;  %v2471_v0 = vld [vmem:[%s3382_s4 + $0x174] ss:$8 sps:$4 sm:$0xff]   ;;  %v2472_v3 = vld [vmem:[%s3383_s5 + $0xf0] ss:$8 sps:$4 sm:$0xff]   ;;  %v2482_v5 = vld [vmem:[%s3384_s6 + $0x104] ss:$8 sps:$4 sm:$0xff]  }
  0x1d   : > { %832 = vmatprep.subr.bf16.mxu0 %v2414_v26  ;;  %v2473_v6 = vld [vmem:[%s2835_s28] ss:$12 sps:$4 sm:$0xff]   ;;  %v2479_v7 = vld [vmem:[%s2916_s27 + $0x8] ss:$12 sps:$4 sm:$0xff]   ;;  %v2483_v12 = vld [vmem:[%s3382_s4 + $0x10] ss:$8 sps:$4 sm:$0xff]  }
  0x1e   : > { %v2476_v8 = vld [vmem:[%s3382_s4] ss:$8 sps:$4 sm:$0xff]   ;;  %v2485_v10 = vld [vmem:[%s3382_s4 + $0x14] ss:$8 sps:$4 sm:$0xff]   ;;  %v2486_v13 = vld [vmem:[%s3384_s6 + $0x110] ss:$8 sps:$4 sm:$0xff]  }
  0x1f   : > { %790 = vmatpush1.bf16.msra.mxu1 %v2416_v27  ;;  %v2480_v9 = vld [vmem:[%s3384_s6 + $0x100] ss:$8 sps:$4 sm:$0xff]   ;;  %v2488_v11 = vld [vmem:[%s3384_s6 + $0x114] ss:$8 sps:$4 sm:$0xff]   ;;  %v2491_v14 = vld [vmem:[%s3382_s4 + $0x24] ss:$8 sps:$4 sm:$0xff]  }
  0x20   : > { %833 = vmatpush1.bf16.msra.mxu0 %v2417_v28  ;;  %791 = vmatprep.subr.bf16.mxu1 %v2418_v29  ;;  %v2494_v15 = vld [vmem:[%s3384_s6 + $0x124] ss:$8 sps:$4 sm:$0xff]   ;;  %v2489_v16 = vld [vmem:[%s3382_s4 + $0x20] ss:$8 sps:$4 sm:$0xff]   ;;  %v2497_v18 = vld [vmem:[%s3382_s4 + $0x34] ss:$8 sps:$4 sm:$0xff]  }
  0x21   : > { %834 = vmatprep.subr.bf16.mxu0 %v2420_v30  ;;  %v2492_v17 = vld [vmem:[%s3384_s6 + $0x120] ss:$8 sps:$4 sm:$0xff]   ;;  %v2500_v19 = vld [vmem:[%s3384_s6 + $0x134] ss:$8 sps:$4 sm:$0xff]   ;;  %v2495_v20 = vld [vmem:[%s3382_s4 + $0x30] ss:$8 sps:$4 sm:$0xff]  }
  0x22   : > { %v2498_v21 = vld [vmem:[%s3384_s6 + $0x130] ss:$8 sps:$4 sm:$0xff]   ;;  %v2503_v22 = vld [vmem:[%s3382_s4 + $0x44] ss:$8 sps:$4 sm:$0xff]   ;;  %v2501_v24 = vld [vmem:[%s3382_s4 + $0x40] ss:$8 sps:$4 sm:$0xff]  }
  0x23   : > { %792 = vmatpush1.bf16.msra.mxu1 %v2422_v31  ;;  %v2506_v23 = vld [vmem:[%s3384_s6 + $0x144] ss:$8 sps:$4 sm:$0xff]   ;;  %v2504_v25 = vld [vmem:[%s3384_s6 + $0x140] ss:$8 sps:$4 sm:$0xff]   ;;  %v2509_v26 = vld [vmem:[%s3382_s4 + $0x54] ss:$8 sps:$4 sm:$0xff]  }
  0x24   : > { %835 = vmatpush1.bf16.msra.mxu0 %v2423_v32  ;;  %793 = vmatprep.subr.bf16.mxu1 %v2424_v33  ;;  %v2512_v27 = vld [vmem:[%s3384_s6 + $0x154] ss:$8 sps:$4 sm:$0xff]   ;;  %v2507_v28 = vld [vmem:[%s3382_s4 + $0x50] ss:$8 sps:$4 sm:$0xff]   ;;  %v2515_v30 = vld [vmem:[%s3382_s4 + $0x64] ss:$8 sps:$4 sm:$0xff]  }
  0x25   : > { %1162 = vmatprep.subr.bf16.mxu0 %v2429_v34  ;;  %v2510_v29 = vld [vmem:[%s3384_s6 + $0x150] ss:$8 sps:$4 sm:$0xff]   ;;  %v2518_v31 = vld [vmem:[%s3384_s6 + $0x164] ss:$8 sps:$4 sm:$0xff]   ;;  %v2513_v32 = vld [vmem:[%s3382_s4 + $0x60] ss:$8 sps:$4 sm:$0xff]  }
  0x26   : > { %v2516_v33 = vld [vmem:[%s3384_s6 + $0x160] ss:$8 sps:$4 sm:$0xff]   ;;  %v2521_v34 = vld [vmem:[%s3382_s4 + $0x74] ss:$8 sps:$4 sm:$0xff]  }
  0x27   : > { %853 = vmatmul.mubr.bf16.vlgmr.msra.gmra.mrb[0].mxu0 %v2426_v35  ;;  %794 = vmatpush1.bf16.msra.mxu1 %v2430_v37  ;;  %v2524_v35 = vld [vmem:[%s3384_s6 + $0x174] ss:$8 sps:$4 sm:$0xff]   ;;  %v2519_v37 = vld [vmem:[%s3382_s4 + $0x70] ss:$8 sps:$4 sm:$0xff]   ;;  %v2541_v51 = vld [vmem:[%s3385_s7 + $0x20] ss:$8 sps:$4 sm:$0xff]  }
  0x28   : > { %1163 = vmatpush1.bf16.msra.mxu0 %v2427_v36  ;;  %795 = vmatprep.subr.bf16.mxu1 %v2431_v38  ;;  %v2576_v36 = vld [vmem:[%s2916_s27 + $0x4] ss:$12 sps:$4 sm:$0xff]  }
  0x29   : > { %1164 = vmatprep.subr.bf16.mxu0 %v2435_v39  ;;  %1194 = vmatprep.mubr.bf16.mxu0 %v2688_v2  ;;  %v2522_v38 = vld [vmem:[%s3384_s6 + $0x170] ss:$8 sps:$4 sm:$0xff]   ;;  %v2527_v39 = vld [vmem:[%s3382_s4 + $0x84] ss:$8 sps:$4 sm:$0xff]  }
  0x2b   : > { %796 = vmatpush1.bf16.msra.mxu1 %v2436_v41  ;;  %v2525_v41 = vld [vmem:[%s3382_s4 + $0x80] ss:$8 sps:$4 sm:$0xff]  }
  0x2c   : > { %1165 = vmatpush1.bf16.msra.mxu0 %v2433_v40  ;;  %797 = vmatprep.subr.bf16.mxu1 %v2437_v42  ;;  %v2530_v40 = vld [vmem:[%s3385_s7 + $0x4] ss:$8 sps:$4 sm:$0xff]   ;;  %v2531_v42 = vld [vmem:[%s2996_s12 + $0x8] ss:$12 sps:$4 sm:$0xff]  }
  0x2d   : > { %1166 = vmatprep.subr.bf16.mxu0 %v2441_v43  ;;  %v2528_v43 = vld [vmem:[%s3385_s7] ss:$8 sps:$4 sm:$0xff]  }
  0x2f   : > { %798 = vmatpush1.bf16.msra.mxu1 %v2442_v45  ;;  %v2537_v45 = vld [vmem:[%s3385_s7 + $0x14] ss:$8 sps:$4 sm:$0xff]  }
  0x30   : > { %1167 = vmatpush1.bf16.msra.mxu0 %v2439_v44  ;;  %799 = vmatprep.subr.bf16.mxu1 %v2443_v46  ;;  %v2534_v44 = vld [vmem:[%s3382_s4 + $0x94] ss:$8 sps:$4 sm:$0xff]   ;;  %v2532_v46 = vld [vmem:[%s3382_s4 + $0x90] ss:$8 sps:$4 sm:$0xff]  }
  0x31   : > { %1168 = vmatprep.subr.bf16.mxu0 %v2447_v47  ;;  %v2535_v47 = vld [vmem:[%s3385_s7 + $0x10] ss:$8 sps:$4 sm:$0xff]  }
  0x33   : > { %800 = vmatpush1.bf16.msra.mxu1 %v2448_v49  ;;  %v2543_v49 = vld [vmem:[%s3385_s7 + $0x24] ss:$8 sps:$4 sm:$0xff]  }
  0x34   : > { %1169 = vmatpush1.bf16.msra.mxu0 %v2445_v48  ;;  %801 = vmatprep.subr.bf16.mxu1 %v2449_v50  ;;  %v2540_v48 = vld [vmem:[%s3382_s4 + $0xa4] ss:$8 sps:$4 sm:$0xff]   ;;  %v2538_v50 = vld [vmem:[%s3382_s4 + $0xa0] ss:$8 sps:$4 sm:$0xff]  }
  0x35   : > { %1170 = vmatprep.subr.bf16.mxu0 %v2453_v52  ;;  %v2546_v52 = vld [vmem:[%s3382_s4 + $0xb4] ss:$8 sps:$4 sm:$0xff]  }
  0x37   : > { %802 = vmatpush1.bf16.msra.mxu1 %v2454_v54  ;;  %v2544_v54 = vld [vmem:[%s3382_s4 + $0xb0] ss:$8 sps:$4 sm:$0xff]  }
  0x38   : > { %1171 = vmatpush1.bf16.msra.mxu0 %v2451_v53  ;;  %803 = vmatprep.subr.bf16.mxu1 %v2455_v55  ;;  %v2549_v53 = vld [vmem:[%s3385_s7 + $0x34] ss:$8 sps:$4 sm:$0xff]   ;;  %v2547_v55 = vld [vmem:[%s3385_s7 + $0x30] ss:$8 sps:$4 sm:$0xff]  }
  0x39   : > { %1172 = vmatprep.subr.bf16.mxu0 %v2459_v56  ;;  %v2552_v56 = vld [vmem:[%s3382_s4 + $0xc4] ss:$8 sps:$4 sm:$0xff]  }
  0x3b   : > { %804 = vmatpush1.bf16.msra.mxu1 %v2460_v58  ;;  %v2550_v58 = vld [vmem:[%s3382_s4 + $0xc0] ss:$8 sps:$4 sm:$0xff]  }
  0x3c   : > { %1173 = vmatpush1.bf16.msra.mxu0 %v2457_v57  ;;  %805 = vmatprep.subr.bf16.mxu1 %v2461_v59  ;;  %v2555_v57 = vld [vmem:[%s3385_s7 + $0x44] ss:$8 sps:$4 sm:$0xff]   ;;  %v2553_v59 = vld [vmem:[%s3385_s7 + $0x40] ss:$8 sps:$4 sm:$0xff]  }
  0x3d   : > { %1174 = vmatprep.subr.bf16.mxu0 %v2465_v60  ;;  %v2558_v60 = vld [vmem:[%s3382_s4 + $0xd4] ss:$8 sps:$4 sm:$0xff]  }
  0x3f   : > { %806 = vmatpush1.bf16.msra.mxu1 %v2466_v62  ;;  %v2630_v62 = vld [vmem:[%s3128_s17 + $0x4] ss:$12 sps:$4 sm:$0xff]  }
  0x40   : > { %1175 = vmatpush1.bf16.msra.mxu0 %v2463_v61  ;;  %807 = vmatprep.subr.bf16.mxu1 %v2467_v63  ;;  %v2561_v61 = vld [vmem:[%s3385_s7 + $0x54] ss:$8 sps:$4 sm:$0xff]   ;;  %v2556_v63 = vld [vmem:[%s3382_s4 + $0xd0] ss:$8 sps:$4 sm:$0xff]  }
  0x41   : > { %1176 = vmatprep.subr.bf16.mxu0 %v2471_v0  ;;  %v2559_v0 = vld [vmem:[%s3385_s7 + $0x50] ss:$8 sps:$4 sm:$0xff]  }
  0x43   : > { %808 = vmatpush1.bf16.msra.mxu1 %v2472_v3  ;;  %v2567_v3 = vld [vmem:[%s3385_s7 + $0x64] ss:$8 sps:$4 sm:$0xff]  }
  0x44   : > { %1177 = vmatpush1.bf16.msra.mxu0 %v2469_v1  ;;  %1119 = vmatprep.subr.bf16.mxu1 %v2478_v4  ;;  %v2564_v1 = vld [vmem:[%s3382_s4 + $0xe4] ss:$8 sps:$4 sm:$0xff]   ;;  %v2562_v4 = vld [vmem:[%s3382_s4 + $0xe0] ss:$8 sps:$4 sm:$0xff]  }
  0x45   : > { %1556 = vmatprep.subr.bf16.mxu0 %v2482_v5  ;;  %v2565_v5 = vld [vmem:[%s3385_s7 + $0x60] ss:$8 sps:$4 sm:$0xff]  }
  0x46   : > { %810 = vmatmul.mubr.bf16.vlgmr.msra.gmra.mrb[0].mxu1 %v2473_v6  ;;  %v2570_v6 = vld [vmem:[%s3382_s4 + $0xf4] ss:$8 sps:$4 sm:$0xff]  }
  0x47   : > { %1195 = vmatmul.mubr.bf16.vlgmr.msra.gmra.mrb[4].mxu0 %v2479_v7  ;;  %1120 = vmatpush1.bf16.msra.mxu1 %v2476_v8  ;;  %v2573_v7 = vld [vmem:[%s3385_s7 + $0x74] ss:$8 sps:$4 sm:$0xff]   ;;  %v2568_v8 = vld [vmem:[%s3382_s4 + $0xf0] ss:$8 sps:$4 sm:$0xff]  }
  0x48   : > { %1557 = vmatpush1.bf16.msra.mxu0 %v2480_v9  ;;  %1121 = vmatprep.subr.bf16.mxu1 %v2485_v10  ;;  %v2571_v9 = vld [vmem:[%s3385_s7 + $0x70] ss:$8 sps:$4 sm:$0xff]   ;;  %v2579_v10 = vld [vmem:[%s3384_s6 + $0x4] ss:$8 sps:$4 sm:$0xff]  }
  0x49   : > { %1558 = vmatprep.subr.bf16.mxu0 %v2488_v11  ;;  %1588 = vmatprep.mubr.bf16.mxu0 %v2688_v2  ;;  %v2582_v11 = vld [vmem:[%s3385_s7 + $0x84] ss:$8 sps:$4 sm:$0xff]  }
  0x4a   : > { %1151 = vmatprep.mubr.bf16.mxu1 %v2576_v36  ;;  %v2615_v36 = vld [vmem:[%s3384_s6 + $0x64] ss:$8 sps:$4 sm:$0xff]  }
  0x4b   : > { %1122 = vmatpush1.bf16.msra.mxu1 %v2483_v12  ;;  %v2574_v12 = vld [vmem:[%s2916_s27] ss:$12 sps:$4 sm:$0xff]   ;;  %s414_s27 = scalar_lea.vmem %s3387_s9, %s2337_s20 }
  0x4c   : > { %1559 = vmatpush1.bf16.msra.mxu0 %v2486_v13  ;;  %1123 = vmatprep.subr.bf16.mxu1 %v2491_v14  ;;  %v2577_v13 = vld [vmem:[%s3384_s6] ss:$8 sps:$4 sm:$0xff]  }
  0x4d   : > { %1560 = vmatprep.subr.bf16.mxu0 %v2494_v15  ;;  %v2580_v14 = vld [vmem:[%s3385_s7 + $0x80] ss:$8 sps:$4 sm:$0xff]   ;;  %v2585_v15 = vld [vmem:[%s3384_s6 + $0x14] ss:$8 sps:$4 sm:$0xff]  }
  0x4f   : > { %1124 = vmatpush1.bf16.msra.mxu1 %v2489_v16  ;;  %v2588_v16 = vld [vmem:[%s3385_s7 + $0x94] ss:$8 sps:$4 sm:$0xff]  }
  0x50   : > { %1561 = vmatpush1.bf16.msra.mxu0 %v2492_v17  ;;  %1125 = vmatprep.subr.bf16.mxu1 %v2497_v18  ;;  %v2583_v17 = vld [vmem:[%s3384_s6 + $0x10] ss:$8 sps:$4 sm:$0xff]  }
  0x51   : > { %1562 = vmatprep.subr.bf16.mxu0 %v2500_v19  ;;  %v2586_v18 = vld [vmem:[%s3385_s7 + $0x90] ss:$8 sps:$4 sm:$0xff]   ;;  %v2591_v19 = vld [vmem:[%s3384_s6 + $0x24] ss:$8 sps:$4 sm:$0xff]  }
  0x53   : > { %1126 = vmatpush1.bf16.msra.mxu1 %v2495_v20  ;;  %v2594_v20 = vld [vmem:[%s3385_s7 + $0xa4] ss:$8 sps:$4 sm:$0xff]  }
  0x54   : > { %1563 = vmatpush1.bf16.msra.mxu0 %v2498_v21  ;;  %1127 = vmatprep.subr.bf16.mxu1 %v2503_v22  ;;  %v2589_v21 = vld [vmem:[%s3384_s6 + $0x20] ss:$8 sps:$4 sm:$0xff]  }
  0x55   : > { %1564 = vmatprep.subr.bf16.mxu0 %v2506_v23  ;;  %v2592_v22 = vld [vmem:[%s3385_s7 + $0xa0] ss:$8 sps:$4 sm:$0xff]   ;;  %v2678_v23 = vld [vmem:[%s2996_s12 + $0x4] ss:$12 sps:$4 sm:$0xff]  }
  0x57   : > { %1128 = vmatpush1.bf16.msra.mxu1 %v2501_v24  ;;  %v2597_v24 = vld [vmem:[%s3384_s6 + $0x34] ss:$8 sps:$4 sm:$0xff]  }
  0x58   : > { %1565 = vmatpush1.bf16.msra.mxu0 %v2504_v25  ;;  %1129 = vmatprep.subr.bf16.mxu1 %v2509_v26  ;;  %v2600_v25 = vld [vmem:[%s3385_s7 + $0xb4] ss:$8 sps:$4 sm:$0xff]   ;;  %v2595_v26 = vld [vmem:[%s3384_s6 + $0x30] ss:$8 sps:$4 sm:$0xff]  }
  0x59   : > { %1566 = vmatprep.subr.bf16.mxu0 %v2512_v27  ;;  %v2598_v27 = vld [vmem:[%s3385_s7 + $0xb0] ss:$8 sps:$4 sm:$0xff]  }
  0x5b   : > { %1130 = vmatpush1.bf16.msra.mxu1 %v2507_v28  ;;  %v2603_v28 = vld [vmem:[%s3384_s6 + $0x44] ss:$8 sps:$4 sm:$0xff]  }
  0x5c   : > { %1567 = vmatpush1.bf16.msra.mxu0 %v2510_v29  ;;  %1131 = vmatprep.subr.bf16.mxu1 %v2515_v30  ;;  %v2606_v29 = vld [vmem:[%s3385_s7 + $0xc4] ss:$8 sps:$4 sm:$0xff]   ;;  %v2601_v30 = vld [vmem:[%s3384_s6 + $0x40] ss:$8 sps:$4 sm:$0xff]  }
  0x5d   : > { %1568 = vmatprep.subr.bf16.mxu0 %v2518_v31  ;;  %v2604_v31 = vld [vmem:[%s3385_s7 + $0xc0] ss:$8 sps:$4 sm:$0xff]  }
  0x5f   : > { %1132 = vmatpush1.bf16.msra.mxu1 %v2513_v32  ;;  %v2609_v32 = vld [vmem:[%s3384_s6 + $0x54] ss:$8 sps:$4 sm:$0xff]  }
  0x60   : > { %1569 = vmatpush1.bf16.msra.mxu0 %v2516_v33  ;;  %1133 = vmatprep.subr.bf16.mxu1 %v2521_v34  ;;  %v2612_v33 = vld [vmem:[%s3385_s7 + $0xd4] ss:$8 sps:$4 sm:$0xff]   ;;  %v2607_v34 = vld [vmem:[%s3384_s6 + $0x50] ss:$8 sps:$4 sm:$0xff]  }
  0x61   : > { %1570 = vmatprep.subr.bf16.mxu0 %v2524_v35  ;;  %v2610_v35 = vld [vmem:[%s3385_s7 + $0xd0] ss:$8 sps:$4 sm:$0xff]  }
  0x63   : > { %1134 = vmatpush1.bf16.msra.mxu1 %v2519_v37  ;;  %v2618_v37 = vld [vmem:[%s3385_s7 + $0xe4] ss:$8 sps:$4 sm:$0xff]  }
  0x64   : > { %1571 = vmatpush1.bf16.msra.mxu0 %v2522_v38  ;;  %1135 = vmatprep.subr.bf16.mxu1 %v2527_v39  ;;  %v2613_v38 = vld [vmem:[%s3384_s6 + $0x60] ss:$8 sps:$4 sm:$0xff]  }
  0x65   : > { %1911 = vmatprep.subr.bf16.mxu0 %v2530_v40  ;;  %v2616_v39 = vld [vmem:[%s3385_s7 + $0xe0] ss:$8 sps:$4 sm:$0xff]   ;;  %v2621_v40 = vld [vmem:[%s3384_s6 + $0x74] ss:$8 sps:$4 sm:$0xff]  }
  0x67   : > { %1589 = vmatmul.mubr.bf16.vlgmr.msra.gmra.mrb[8].mxu0 %v2531_v42  ;;  %1136 = vmatpush1.bf16.msra.mxu1 %v2525_v41  ;;  %v2624_v41 = vld [vmem:[%s3385_s7 + $0xf4] ss:$8 sps:$4 sm:$0xff]   ;;  %v2619_v42 = vld [vmem:[%s3384_s6 + $0x70] ss:$8 sps:$4 sm:$0xff]  }
  0x68   : > { %1912 = vmatpush1.bf16.msra.mxu0 %v2528_v43  ;;  %1137 = vmatprep.subr.bf16.mxu1 %v2534_v44  ;;  %v2622_v43 = vld [vmem:[%s3385_s7 + $0xf0] ss:$8 sps:$4 sm:$0xff]   ;;  %v2627_v44 = vld [vmem:[%s3384_s6 + $0x84] ss:$8 sps:$4 sm:$0xff]  }
  0x69   : > { %1913 = vmatprep.subr.bf16.mxu0 %v2537_v45  ;;  %1943 = vmatprep.mubr.bf16.mxu0 %v2630_v62  ;;  %v2633_v45 = vld [vmem:[%s3385_s7 + $0x104] ss:$8 sps:$4 sm:$0xff]   ;;  %v2652_v62 = vld [vmem:[%s3384_s6 + $0xc0] ss:$8 sps:$4 sm:$0xff]  }
  0x6b   : > { %1138 = vmatpush1.bf16.msra.mxu1 %v2532_v46  ;;  %v2628_v46 = vld [vmem:[%s3128_s17] ss:$12 sps:$4 sm:$0xff]  }
  0x6c   : > { %1914 = vmatpush1.bf16.msra.mxu0 %v2535_v47  ;;  %1139 = vmatprep.subr.bf16.mxu1 %v2540_v48  ;;  %v2625_v47 = vld [vmem:[%s3384_s6 + $0x80] ss:$8 sps:$4 sm:$0xff]  }
  0x6d   : > { %1915 = vmatprep.subr.bf16.mxu0 %v2543_v49  ;;  %v2631_v48 = vld [vmem:[%s3385_s7 + $0x100] ss:$8 sps:$4 sm:$0xff]   ;;  %v2636_v49 = vld [vmem:[%s3384_s6 + $0x94] ss:$8 sps:$4 sm:$0xff]  }
  0x6f   : > { %1140 = vmatpush1.bf16.msra.mxu1 %v2538_v50  ;;  %v2639_v50 = vld [vmem:[%s3385_s7 + $0x114] ss:$8 sps:$4 sm:$0xff]  }
  0x70   : > { %1916 = vmatpush1.bf16.msra.mxu0 %v2541_v51  ;;  %1141 = vmatprep.subr.bf16.mxu1 %v2546_v52  ;;  %v2634_v51 = vld [vmem:[%s3384_s6 + $0x90] ss:$8 sps:$4 sm:$0xff]  }
  0x71   : > { %1917 = vmatprep.subr.bf16.mxu0 %v2549_v53  ;;  %v2637_v52 = vld [vmem:[%s3385_s7 + $0x110] ss:$8 sps:$4 sm:$0xff]   ;;  %v2642_v53 = vld [vmem:[%s3384_s6 + $0xa4] ss:$8 sps:$4 sm:$0xff]  }
  0x73   : > { %1142 = vmatpush1.bf16.msra.mxu1 %v2544_v54  ;;  %v2645_v54 = vld [vmem:[%s3385_s7 + $0x124] ss:$8 sps:$4 sm:$0xff]  }
  0x74   : > { %1918 = vmatpush1.bf16.msra.mxu0 %v2547_v55  ;;  %1143 = vmatprep.subr.bf16.mxu1 %v2552_v56  ;;  %v2640_v55 = vld [vmem:[%s3384_s6 + $0xa0] ss:$8 sps:$4 sm:$0xff]  }
  0x75   : > { %1919 = vmatprep.subr.bf16.mxu0 %v2555_v57  ;;  %v2643_v56 = vld [vmem:[%s3385_s7 + $0x120] ss:$8 sps:$4 sm:$0xff]   ;;  %v2648_v57 = vld [vmem:[%s3384_s6 + $0xb4] ss:$8 sps:$4 sm:$0xff]  }
  0x77   : > { %1144 = vmatpush1.bf16.msra.mxu1 %v2550_v58  ;;  %v2646_v58 = vld [vmem:[%s3384_s6 + $0xb0] ss:$8 sps:$4 sm:$0xff]  }
  0x78   : > { %1920 = vmatpush1.bf16.msra.mxu0 %v2553_v59  ;;  %1145 = vmatprep.subr.bf16.mxu1 %v2558_v60  ;;  %v2649_v59 = vld [vmem:[%s3385_s7 + $0x130] ss:$8 sps:$4 sm:$0xff]   ;;  %v2654_v60 = vld [vmem:[%s3384_s6 + $0xc4] ss:$8 sps:$4 sm:$0xff]  }
  0x79   : > { %1921 = vmatprep.subr.bf16.mxu0 %v2561_v61  ;;  %v2657_v61 = vld [vmem:[%s3385_s7 + $0x144] ss:$8 sps:$4 sm:$0xff]  }
  0x7b   : > { %1146 = vmatpush1.bf16.msra.mxu1 %v2556_v63  ;;  %v2655_v63 = vld [vmem:[%s3385_s7 + $0x140] ss:$8 sps:$4 sm:$0xff]  }
  0x7c   : > { %1922 = vmatpush1.bf16.msra.mxu0 %v2559_v0  ;;  %1147 = vmatprep.subr.bf16.mxu1 %v2564_v1  ;;  %v2660_v0 = vld [vmem:[%s3384_s6 + $0xd4] ss:$8 sps:$4 sm:$0xff]  }
  0x7d   : > { %1923 = vmatprep.subr.bf16.mxu0 %v2567_v3  ;;  %v2663_v1 = vld [vmem:[%s3385_s7 + $0x154] ss:$8 sps:$4 sm:$0xff]   ;;  %v2658_v3 = vld [vmem:[%s3384_s6 + $0xd0] ss:$8 sps:$4 sm:$0xff]  }
  0x7f   : > { %1148 = vmatpush1.bf16.msra.mxu1 %v2562_v4  ;;  %v2661_v4 = vld [vmem:[%s3385_s7 + $0x150] ss:$8 sps:$4 sm:$0xff]  }
  0x80   : > { %1924 = vmatpush1.bf16.msra.mxu0 %v2565_v5  ;;  %1149 = vmatprep.subr.bf16.mxu1 %v2570_v6  ;;  %v2666_v5 = vld [vmem:[%s3384_s6 + $0xe4] ss:$8 sps:$4 sm:$0xff]  }
  0x81   : > { %1925 = vmatprep.subr.bf16.mxu0 %v2573_v7  ;;  %v2669_v6 = vld [vmem:[%s3385_s7 + $0x164] ss:$8 sps:$4 sm:$0xff]   ;;  %v2664_v7 = vld [vmem:[%s3384_s6 + $0xe0] ss:$8 sps:$4 sm:$0xff]  }
  0x83   : > { %1150 = vmatpush1.bf16.msra.mxu1 %v2568_v8  ;;  %v2667_v8 = vld [vmem:[%s3385_s7 + $0x160] ss:$8 sps:$4 sm:$0xff]  }
  0x84   : > { %1926 = vmatpush1.bf16.msra.mxu0 %v2571_v9  ;;  %1513 = vmatprep.subr.bf16.mxu1 %v2579_v10  ;;  %v2672_v9 = vld [vmem:[%s3384_s6 + $0xf4] ss:$8 sps:$4 sm:$0xff]  }
  0x85   : > { %1927 = vmatprep.subr.bf16.mxu0 %v2582_v11  ;;  %v2675_v10 = vld [vmem:[%s3385_s7 + $0x174] ss:$8 sps:$4 sm:$0xff]   ;;  %v2670_v11 = vld [vmem:[%s3384_s6 + $0xf0] ss:$8 sps:$4 sm:$0xff]  }
  0x86   : > { %1152 = vmatmul.mubr.bf16.vlgmr.msra.gmra.mrb[4].mxu1 %v2574_v12  ;;  %v2673_v12 = vld [vmem:[%s3385_s7 + $0x170] ss:$8 sps:$4 sm:$0xff]  }
  0x87   : > { %1514 = vmatpush1.bf16.msra.mxu1 %v2577_v13  ;;  %1545 = vmatprep.mubr.bf16.mxu1 %v2678_v23  ;;  %v2676_v13 = vld [vmem:[%s2996_s12] ss:$12 sps:$4 sm:$0xff]  }
  0x88   : > { %1928 = vmatpush1.bf16.msra.mxu0 %v2580_v14  ;;  %1515 = vmatprep.subr.bf16.mxu1 %v2585_v15  ;;  %v2679_v14 = vld [vmem:[%s3128_s17 + $0x8] ss:$12 sps:$4 sm:$0xff]  }
  0x89   : > { %1929 = vmatprep.subr.bf16.mxu0 %v2588_v16 }
  0x8b   : > { %1516 = vmatpush1.bf16.msra.mxu1 %v2583_v17 }
  0x8c   : > { %1930 = vmatpush1.bf16.msra.mxu0 %v2586_v18  ;;  %1517 = vmatprep.subr.bf16.mxu1 %v2591_v19 }
  0x8d   : > { %1931 = vmatprep.subr.bf16.mxu0 %v2594_v20 }
  0x8f   : > { %1518 = vmatpush1.bf16.msra.mxu1 %v2589_v21 }
  0x90   : > { %1932 = vmatpush1.bf16.msra.mxu0 %v2592_v22  ;;  %1519 = vmatprep.subr.bf16.mxu1 %v2597_v24 }
  0x91   : > { %1933 = vmatprep.subr.bf16.mxu0 %v2600_v25 }
  0x93   : > { %1520 = vmatpush1.bf16.msra.mxu1 %v2595_v26 }
  0x94   : > { %1934 = vmatpush1.bf16.msra.mxu0 %v2598_v27  ;;  %1521 = vmatprep.subr.bf16.mxu1 %v2603_v28 }
  0x95   : > { %1935 = vmatprep.subr.bf16.mxu0 %v2606_v29 }
  0x97   : > { %1522 = vmatpush1.bf16.msra.mxu1 %v2601_v30 }
  0x98   : > { %1936 = vmatpush1.bf16.msra.mxu0 %v2604_v31  ;;  %1523 = vmatprep.subr.bf16.mxu1 %v2609_v32 }
  0x99   : > { %1937 = vmatprep.subr.bf16.mxu0 %v2612_v33 }
  0x9b   : > { %1524 = vmatpush1.bf16.msra.mxu1 %v2607_v34 }
  0x9c   : > { %1938 = vmatpush1.bf16.msra.mxu0 %v2610_v35  ;;  %1525 = vmatprep.subr.bf16.mxu1 %v2615_v36 }
  0x9d   : > { %1939 = vmatprep.subr.bf16.mxu0 %v2618_v37 }
  0x9f   : > { %1526 = vmatpush1.bf16.msra.mxu1 %v2613_v38 }
  0xa0   : > { %1940 = vmatpush1.bf16.msra.mxu0 %v2616_v39  ;;  %1527 = vmatprep.subr.bf16.mxu1 %v2621_v40 }
  0xa1   : > { %1941 = vmatprep.subr.bf16.mxu0 %v2624_v41 }
  0xa3   : > { %1528 = vmatpush1.bf16.msra.mxu1 %v2619_v42 }
  0xa4   : > { %1942 = vmatpush1.bf16.msra.mxu0 %v2622_v43  ;;  %1529 = vmatprep.subr.bf16.mxu1 %v2627_v44  ;;  %v2003_v43 = vlaneseq }
  0xa5   : > { %1954 = vmatprep.subr.bf16.mxu0 %v2633_v45 }
  0xa6   : > { %v2004_v44 = vshrl.u32 %v2003_v43, 7 }
  0xa7   : > { %1944 = vmatmul.mubr.bf16.vlgmr.msra.gmra.mrb[8].mxu0 %v2628_v46  ;;  %1530 = vmatpush1.bf16.msra.mxu1 %v2625_v47  ;;  %v2001_v46 = vld [vmem:[%s3386_s8] sm:$0x3] }
  0xa8   : > { %1955 = vmatpush1.bf16.msra.mxu0 %v2631_v48  ;;  %1531 = vmatprep.subr.bf16.mxu1 %v2636_v49  ;;  %v2005_v45 = vsub.s32 0, %v2004_v44  ;;  %v2009_v47 = vsub.s32 1, %v2004_v44 }
  0xa9   : > { %1956 = vmatprep.subr.bf16.mxu0 %v2639_v50  ;;  %1986 = vmatprep.mubr.bf16.mxu0 %v2688_v2  ;;  %v2651_v2 = vld [vmem:[%s3385_s7 + $0x134] ss:$8 sps:$4 sm:$0xff]  }
  0xab   : > { %1532 = vmatpush1.bf16.msra.mxu1 %v2634_v51  ;;  %v2006_v51 = vrot.slane %v2001_v46, %v2005_v45 }
  0xac   : > { %1957 = vmatpush1.bf16.msra.mxu0 %v2637_v52  ;;  %1533 = vmatprep.subr.bf16.mxu1 %v2642_v53 }
  0xad   : > { %1958 = vmatprep.subr.bf16.mxu0 %v2645_v54 }
  0xaf   : > { %1534 = vmatpush1.bf16.msra.mxu1 %v2640_v55  ;;  %v2010_v55 = vrot.slane %v2001_v46, %v2009_v47 }
  0xb0   : > { %1959 = vmatpush1.bf16.msra.mxu0 %v2643_v56  ;;  %1535 = vmatprep.subr.bf16.mxu1 %v2648_v57 }
  0xb1   : > { %1960 = vmatprep.subr.bf16.mxu0 %v2651_v2 }
  0xb3   : > { %1536 = vmatpush1.bf16.msra.mxu1 %v2646_v58 }
  0xb4   : > { %1961 = vmatpush1.bf16.msra.mxu0 %v2649_v59  ;;  %1537 = vmatprep.subr.bf16.mxu1 %v2654_v60 }
  0xb5   : > { %1962 = vmatprep.subr.bf16.mxu0 %v2657_v61 }
  0xb7   : > { %1538 = vmatpush1.bf16.msra.mxu1 %v2652_v62 }
  0xb8   : > { %1963 = vmatpush1.bf16.msra.mxu0 %v2655_v63  ;;  %1539 = vmatprep.subr.bf16.mxu1 %v2660_v0 }
  0xb9   : > { %1964 = vmatprep.subr.bf16.mxu0 %v2663_v1 }
  0xbb   : > { %1540 = vmatpush1.bf16.msra.mxu1 %v2658_v3 }
  0xbc   : > { %1965 = vmatpush1.bf16.msra.mxu0 %v2661_v4  ;;  %1541 = vmatprep.subr.bf16.mxu1 %v2666_v5 }
  0xbd   : > { %1966 = vmatprep.subr.bf16.mxu0 %v2669_v6 }
  0xbf   : > { %1542 = vmatpush1.bf16.msra.mxu1 %v2664_v7 }
  0xc0   : > { %1967 = vmatpush1.bf16.msra.mxu0 %v2667_v8  ;;  %1543 = vmatprep.subr.bf16.mxu1 %v2672_v9 }
  0xc1   : > { %1968 = vmatprep.subr.bf16.mxu0 %v2675_v10 }
  0xc3   : > { %1544 = vmatpush1.bf16.msra.mxu1 %v2670_v11 }
  0xc4   : > { %1969 = vmatpush1.bf16.msra.mxu0 %v2673_v12 }
  0xc6   : > { %1546 = vmatmul.mubr.bf16.vlgmr.msra.gmra.mrb[8].mxu1 %v2676_v13 }
  0xc7   : > { %1987 = vmatmul.mubr.bf16.vlgmr.msra.gmra.mrb[8].mxu0 %v2679_v14 }
  0xfa   : > { %v854_v15 = vpop.f32.mrb[0].mxu0 }
  0xfb   : > { %v856_v16 = vpop.f32.mrb[1].mxu0 }
  0xfc   : > { %v858_v17 = vpop.f32.mrb[2].mxu0 }
  0xfd   : > { %v860_v18 = vpop.f32.mrb[3].mxu0 }
 0x119   : > { %v811_v19 = vpop.f32.mrb[0].mxu1 }
 0x11a   : > { %v1196_v20 = vpop.f32.mrb[4].mxu0  ;;  %v855_v21 = vadd.f32 %v854_v15, %v811_v19  ;;  %v813_v22 = vpop.f32.mrb[1].mxu1 }
 0x11b   : > { %v1198_v23 = vpop.f32.mrb[5].mxu0  ;;  %v857_v24 = vadd.f32 %v856_v16, %v813_v22  ;;  %v815_v25 = vpop.f32.mrb[2].mxu1 }
 0x11c   : > { %v1200_v26 = vpop.f32.mrb[6].mxu0  ;;  %v859_v27 = vadd.f32 %v858_v17, %v815_v25  ;;  %v817_v28 = vpop.f32.mrb[3].mxu1 }
 0x11d   : > { %v1202_v29 = vpop.f32.mrb[7].mxu0  ;;  %v861_v30 = vadd.f32 %v860_v18, %v817_v28 }
 0x159   : > { %v1153_v31 = vpop.f32.mrb[4].mxu1 }
 0x15a   : > { %v1154_v32 = vadd.f32 %v1153_v31, %v855_v21  ;;  %v1155_v33 = vpop.f32.mrb[5].mxu1 }
 0x15b   : > { %v1156_v34 = vadd.f32 %v1155_v33, %v857_v24  ;;  %v1157_v35 = vpop.f32.mrb[6].mxu1 }
 0x15c   : > { %v1158_v36 = vadd.f32 %v1157_v35, %v859_v27  ;;  %v1159_v37 = vpop.f32.mrb[7].mxu1  ;;  %v1197_v38 = vadd.f32 %v1196_v20, %v1154_v32 }
 0x15d   : > { %v1160_v39 = vadd.f32 %v1159_v37, %v861_v30  ;;  %v1199_v40 = vadd.f32 %v1198_v23, %v1156_v34 }
 0x15e   : > { %v1201_v41 = vadd.f32 %v1200_v26, %v1158_v36 }
 0x15f   : > { %v1203_v42 = vadd.f32 %v1202_v29, %v1160_v39 }
 0x199   : > { %v1547_v48 = vpop.f32.mrb[8].mxu1 }
 0x19a   : > { %v1988_v49 = vpop.f32.mrb[8].mxu0  ;;  %v2341_v50 = vadd.f32 %v1547_v48, %v1197_v38  ;;  %v1549_v52 = vpop.f32.mrb[9].mxu1 }
 0x19b   : > { %v1990_v53 = vpop.f32.mrb[9].mxu0  ;;  %v2346_v54 = vadd.f32 %v1549_v52, %v1199_v40  ;;  %v1551_v56 = vpop.f32.mrb[10].mxu1 }
 0x19c   : > { %v1992_v57 = vpop.f32.mrb[10].mxu0  ;;  %v2342_v2 = vadd.f32 %v2341_v50, %v1988_v49  ;;  %v2351_v58 = vadd.f32 %v1551_v56, %v1201_v41  ;;  %v1553_v59 = vpop.f32.mrb[11].mxu1 }
 0x19d   : > { %v1994_v60 = vpop.f32.mrb[11].mxu0  ;;  %v2347_v61 = vadd.f32 %v2346_v54, %v1990_v53  ;;  %v2356_v62 = vadd.f32 %v1553_v59, %v1203_v42 }
 0x19e   : > { %v2013_v63 = vadd.f32 %v2342_v2, %v2006_v51  ;;  %v2352_v0 = vadd.f32 %v2351_v58, %v1992_v57 }
 0x19f   : > { %v2014_v1 = vadd.f32 %v2347_v61, %v2010_v55  ;;  %v2357_v3 = vadd.f32 %v2356_v62, %v1994_v60 }
 0x1a0   : > { %2017 = vst [vmem:[%s414_s27] sm:$0xff] %v2013_v63  ;;  %v2015_v4 = vadd.f32 %v2352_v0, %v2006_v51 }
 0x1a1   : > { %2018 = vst [vmem:[%s414_s27 + $0x8] sm:$0xff] %v2014_v1  ;;  %v2016_v5 = vadd.f32 %v2357_v3, %v2010_v55 }
 0x1a2   : > { %2019 = vst [vmem:[%s414_s27 + $0x10] sm:$0xff] %v2015_v4 }
 0x1a3   : > { %2020 = vst [vmem:[%s414_s27 + $0x18] sm:$0xff] %v2016_v5 }
 0x1a4 PF: > { %s19_s30 = sadd.s32 1, %s2686_s30  }
 0x1a5   : > { %p16_p4 = scmp.ge.s32.totalorder %s19_s30, 4  }
 0x1a7   :  { %18 = sbr.rel (!%p16_p4) target bundleno = 1 (0x1), region = 95 }

</bundles_post_ra>
